<compile_context>
chip_gen: v7x
topology: tpu7x:2x2x1
jax: 0.10.0
libtpu: 0.0.40
codegen_flags: <defaults>
</compile_context>

<pallas_src>
import numpy as np
import jax
import jax.numpy as jnp
from jax import lax
from jax.experimental import pallas as pl
from jax.experimental.pallas import tpu as pltpu


# ----------------------- padded-plane layout constants ----------------------
# Every spatial map is carried as one or more 4x4 tiles ("planes"), each stored
# row-major in a 6x6 zero-padded flat block of 36 rows; real value (i, j) sits
# at row 6*i + j + 7.  Pad rows/columns are kept at exact zero.
_W6 = 6                 # flat row width of a padded plane
_PLANE = 36             # rows per plane (6*6)
_K0 = _W6 + 1           # 7  : first interior row
_RLEN = 3 * _W6 + 4     # 22 : contiguous rows covering all 16 real positions


def _res(v, m):
    """v = m*q + r with r in [0, m); returns (r, q)."""
    r = v % m
    return r, (v - r) // m


# ------------------------------- the kernel ---------------------------------

def _inception2_kernel(pat_ref, m576_ref, m22_ref,
                       w1a_ref, b1a_ref, w2b_ref, b2b_ref, w2c_ref, b2c_ref,
                       w11_ref, wpool_ref, wb12_ref, wb22_ref, wb23_ref,
                       out_ref,
                       a1, a2, a3, a4, t_b1, t_b2, t_b2b, ob):
    """One grid step == one image; all activations stay in VMEM scratch."""

    def mm(x, w):                       # bf16 MXU matmul, f32 accumulation
        return jnp.dot(x.astype(jnp.bfloat16), w,
                       preferred_element_type=jnp.float32)

    def interior(ref, off=0):           # contiguous 22-row interior slice
        return ref[pl.ds(off + _K0, _RLEN), :]

    # Pad rows of the plane buffers must read as exact zeros.  Zero them every
    # step (~200 KB of VMEM stores, negligible) so correctness does not depend
    # on which TensorCore ran which grid step under megacore sharding.
    a2[...] = jnp.zeros_like(a2)
    a3[...] = jnp.zeros_like(a3)
    a4[...] = jnp.zeros_like(a4)
    t_b1[...] = jnp.zeros_like(t_b1)
    t_b2[...] = jnp.zeros_like(t_b2)
    t_b2b[...] = jnp.zeros_like(t_b2b)

    mask22 = m22_ref[...]

    # ---- Conv2d_1a_7x7 /2 (+folded BN, ReLU) -------------------------------
    # Patches arrive pre-ordered as 16 residue-(h%4, w%4) planes so the
    # stride-2 max-pool below becomes constant-offset slices.
    y1 = jnp.maximum(mm(pat_ref[...], w1a_ref[...]) + b1a_ref[...], 0.0)
    a1[...] = y1 * m576_ref[...]

    # ---- max_pool2d(3,2,1) fused with Conv2d_2b_1x1 (+BN, ReLU) ------------
    # Pooled 8x8 map is stored as 4 parity planes so the next stride-2 pool is
    # again offset-only.  Zero padding == -inf padding because values >= 0.
    for qh in range(2):
        for qw in range(2):
            m = None
            for da in (-1, 0, 1):
                for db in (-1, 0, 1):
                    rh, di = _res(2 * qh + da, 4)
                    rw, dj = _res(2 * qw + db, 4)
                    off = _PLANE * (4 * rh + rw) + _W6 * di + dj
                    sl = interior(a1, off)
                    m = sl if m is None else jnp.maximum(m, sl)
            y = jnp.maximum(mm(m, w2b_ref[...]) + b2b_ref[...], 0.0)
            a2[pl.ds(_PLANE * (2 * qh + qw) + _K0, _RLEN), :] = y * mask22

    # ---- Conv2d_2c_3x3 /1 (+BN, ReLU): parity planes in -> parity planes out
    for ph in range(2):
        for pw in range(2):
            acc = None
            for dy in range(3):
                for dx in range(3):
                    rh, di = _res(ph + dy - 1, 2)
                    rw, dj = _res(pw + dx - 1, 2)
                    off = _PLANE * (2 * rh + rw) + _W6 * di + dj
                    t = mm(interior(a2, off), w2c_ref[3 * dy + dx])
                    acc = t if acc is None else acc + t
            y = jnp.maximum(acc + b2c_ref[...], 0.0)
            a3[pl.ds(_PLANE * (2 * ph + pw) + _K0, _RLEN), :] = y * mask22

    # ---- max_pool2d(3,2,1) -> Mixed_3b input x (4x4x192) -------------------
    m = None
    for da in (-1, 0, 1):
        for db in (-1, 0, 1):
            rh, di = _res(da, 2)
            rw, dj = _res(db, 2)
            off = _PLANE * (2 * rh + rw) + _W6 * di + dj
            sl = interior(a3, off)
            m = sl if m is None else jnp.maximum(m, sl)
    x4 = m * mask22
    a4[pl.ds(_K0, _RLEN), :] = x4

    # ---- Mixed_3b ----------------------------------------------------------
    # branch0 / branch1_3x3_1 / branch2_3x3_1: three 1x1 convs as one matmul.
    r1 = jnp.maximum(mm(x4, w11_ref[...]), 0.0)
    ob[:, 0:64] = r1[:, 0:64]
    t_b1[pl.ds(_K0, _RLEN), :] = r1[:, 64:128] * mask22
    t_b2[pl.ds(_K0, _RLEN), :] = r1[:, 128:192] * mask22

    # branch_pool: avg_pool2d(3,1,1) (count_include_pad) + 1x1 conv + ReLU.
    s = None
    for dy in range(3):
        for dx in range(3):
            sl = interior(a4, _W6 * (dy - 1) + (dx - 1))
            s = sl if s is None else s + sl
    ob[:, 224:256] = jnp.maximum(mm(s * (1.0 / 9.0), wpool_ref[...]), 0.0)

    def conv3x3(src, w_ref):
        acc = None
        for dy in range(3):
            for dx in range(3):
                t = mm(interior(src, _W6 * (dy - 1) + (dx - 1)),
                       w_ref[3 * dy + dx])
                acc = t if acc is None else acc + t
        return acc

    # branch1: 3x3 64->64 + ReLU
    ob[:, 64:128] = jnp.maximum(conv3x3(t_b1, wb12_ref), 0.0)

    # branch2: 3x3 64->96 + ReLU, then 3x3 96->96 + ReLU
    t_b2b[pl.ds(_K0, _RLEN), :] = (jnp.maximum(conv3x3(t_b2, wb22_ref), 0.0)
                                   * mask22)
    ob[:, 128:224] = jnp.maximum(conv3x3(t_b2b, wb23_ref), 0.0)

    # ---- compact the 16 real rows into the dense (16, 256) output ----------
    for r in range(4):
        out_ref[pl.ds(4 * r, 4), :] = ob[pl.ds(_W6 * r, 4), :]


# ------------------------------ host-side glue ------------------------------

def _conv1a_row_maps():
    """For each of the 16*36 conv1a rows: its (h, w) in the 16x16 output grid
    and a validity flag (0 on the plane pad rows)."""
    g = np.arange(16 * _PLANE)
    plane, r = g // _PLANE, g % _PLANE
    i, j = r // _W6 - 1, r % _W6 - 1
    valid = (i >= 0) & (i < 4) & (j >= 0) & (j < 4)
    h = 4 * np.clip(i, 0, 3) + plane // 4
    w = 4 * np.clip(j, 0, 3) + plane % 4
    return h, w, valid


def _conv1a_patches(x_nchw):
    """7x7/s2/p3 im2col for Conv2d_1a only, rows ordered as 16 residue planes.
    One small XLA gather per call (~170 KB bf16 per image)."""
    B = x_nchw.shape[0]
    xh = jnp.transpose(x_nchw, (0, 2, 3, 1))                   # NHWC
    xp = jnp.pad(xh, ((0, 0), (3, 3), (3, 3), (0, 0)))
    h, w, _ = _conv1a_row_maps()
    hh = (2 * h)[:, None, None] + np.arange(7)[None, :, None]  # (576,7,1)
    ww = (2 * w)[:, None, None] + np.arange(7)[None, None, :]  # (576,1,7)
    pat = xp[:, hh, ww, :]                                     # (B,576,7,7,3)
    return pat.reshape(B, 16 * _PLANE, 147).astype(jnp.bfloat16)


def prepare_params(raw, eps=1e-5):
    """One-time weight prep: BN folding, layout flattening, bf16 cast, masks."""
    f32, bf16 = jnp.float32, jnp.bfloat16

    def fold_bn(w, bn):                     # w: (O,I,kh,kw) -> (kh,kw,I,O)
        gamma, beta, mean, var = bn
        scale = gamma / jnp.sqrt(var + eps)
        wf = jnp.transpose(w, (2, 3, 1, 0)) * scale
        return wf, (beta - mean * scale)[None, :]

    p = {}
    w, b = fold_bn(raw["conv1a_w"], raw["bn1a"])               # (7,7,3,64)
    p["w1a"], p["b1a"] = w.reshape(147, 64).astype(bf16), b.astype(f32)
    w, b = fold_bn(raw["conv2b_w"], raw["bn2b"])               # (1,1,64,64)
    p["w2b"], p["b2b"] = w.reshape(64, 64).astype(bf16), b.astype(f32)
    w, b = fold_bn(raw["conv2c_w"], raw["bn2c"])               # (3,3,64,192)
    p["w2c"], p["b2c"] = w.reshape(9, 64, 192).astype(bf16), b.astype(f32)

    def t1x1(w):                            # (O,I,1,1) -> (I,O)
        return jnp.transpose(w[:, :, 0, 0], (1, 0))

    def t3x3(w):                            # (O,I,3,3) -> (9,I,O)
        return jnp.transpose(w, (2, 3, 1, 0)).reshape(9, w.shape[1], w.shape[0])

    p["w11"] = jnp.concatenate([t1x1(raw["b0_w"]), t1x1(raw["b1_1_w"]),
                                t1x1(raw["b2_1_w"])], axis=1).astype(bf16)
    p["wpool"] = t1x1(raw["bp_w"]).astype(bf16)
    p["wb12"] = t3x3(raw["b1_2_w"]).astype(bf16)
    p["wb22"] = t3x3(raw["b2_2_w"]).astype(bf16)
    p["wb23"] = t3x3(raw["b2_3_w"]).astype(bf16)

    _, _, valid576 = _conv1a_row_maps()
    p["m576"] = jnp.asarray(valid576, f32)[:, None]            # (576,1)
    k = np.arange(_K0, _K0 + _RLEN)
    p["m22"] = jnp.asarray(((k % _W6) >= 1) & ((k % _W6) <= 4),
                           f32)[:, None]                       # (22,1)
    return p


def inception2_forward(x, p):
    """x: (B, 3, 32, 32) float32 NCHW -> (B, 256, 4, 4) float32 NCHW."""
    B, C, H, W = x.shape
    assert C == 3 and H == 32 and W == 32, "kernel is specialised to 3x32x32"

    pat = _conv1a_patches(x)                                   # (B,576,147) bf16

    def wspec(shape):                      # whole-array, grid-invariant block
        return pl.BlockSpec(shape, lambda b, _n=len(shape): (0,) * _n)

    out = pl.pallas_call(
        _inception2_kernel,
        out_shape=jax.ShapeDtypeStruct((B, 16, 256), jnp.float32),
        grid_spec=pltpu.PrefetchScalarGridSpec(
            num_scalar_prefetch=0,
            grid=(B,),
            in_specs=[
                pl.BlockSpec((None, 16 * _PLANE, 147), lambda b: (b, 0, 0)),
                wspec((16 * _PLANE, 1)), wspec((_RLEN, 1)),     # masks
                wspec((147, 64)), wspec((1, 64)),               # conv1a
                wspec((64, 64)), wspec((1, 64)),                # conv2b
                wspec((9, 64, 192)), wspec((1, 192)),           # conv2c
                wspec((192, 192)), wspec((192, 32)),            # mixed 1x1s
                wspec((9, 64, 64)), wspec((9, 64, 96)), wspec((9, 96, 96)),
            ],
            out_specs=pl.BlockSpec((None, 16, 256), lambda b: (b, 0, 0)),
            scratch_shapes=[
                pltpu.VMEM((16 * _PLANE, 64), jnp.float32),     # conv1a planes
                pltpu.VMEM((4 * _PLANE, 64), jnp.float32),      # pool1+conv2b
                pltpu.VMEM((4 * _PLANE, 192), jnp.float32),     # conv2c planes
                pltpu.VMEM((_PLANE, 192), jnp.float32),         # Mixed input
                pltpu.VMEM((_PLANE, 64), jnp.float32),          # branch1 1x1
                pltpu.VMEM((_PLANE, 64), jnp.float32),          # branch2 1x1
                pltpu.VMEM((_PLANE, 96), jnp.float32),          # branch2 3x3_2
                pltpu.VMEM((_RLEN, 256), jnp.float32),          # packed output
            ],
        ),
        compiler_params=pltpu.CompilerParams(
            dimension_semantics=("parallel",)),   # 2 steps -> megacore on v7x
    )(pat, p["m576"], p["m22"], p["w1a"], p["b1a"], p["w2b"], p["b2b"],
      p["w2c"], p["b2c"], p["w11"], p["wpool"], p["wb12"], p["wb22"], p["wb23"])

    return out.reshape(B, 4, 4, 256).transpose(0, 3, 1, 2)     # NCHW


# ------------------------- pure-JAX reference --------------------------------

def reference_forward(x, raw, eps=1e-5):
    dn = ("NCHW", "OIHW", "NCHW")
    hp = lax.Precision.HIGHEST

    def conv(x, w, stride=1, pad=0):
        return lax.conv_general_dilated(
            x, w, (stride, stride), [(pad, pad), (pad, pad)],
            dimension_numbers=dn, precision=hp)

    def bn(x, bnp):
        g, b, m, v = bnp
        inv = g / jnp.sqrt(v + eps)
        return x * inv[None, :, None, None] + (b - m * inv)[None, :, None, None]

    def maxpool(x, k, s, p):
        return lax.reduce_window(x, -jnp.inf, lax.max, (1, 1, k, k),
                                 (1, 1, s, s),
                                 [(0, 0), (0, 0), (p, p), (p, p)])

    def avgpool(x, k, s, p):
        return lax.reduce_window(x, 0.0, lax.add, (1, 1, k, k), (1, 1, s, s),
                                 [(0, 0), (0, 0), (p, p), (p, p)]) / float(k * k)

    relu = jax.nn.relu
    y = relu(bn(conv(x, raw["conv1a_w"], 2, 3), raw["bn1a"]))
    y = maxpool(y, 3, 2, 1)
    y = relu(bn(conv(y, raw["conv2b_w"], 1, 0), raw["bn2b"]))
    y = relu(bn(conv(y, raw["conv2c_w"], 1, 1), raw["bn2c"]))
    y = maxpool(y, 3, 2, 1)

    b0 = relu(conv(y, raw["b0_w"]))
    b1 = relu(conv(y, raw["b1_1_w"]))
    b1 = relu(conv(b1, raw["b1_2_w"], 1, 1))
    b2 = relu(conv(y, raw["b2_1_w"]))
    b2 = relu(conv(b2, raw["b2_2_w"], 1, 1))
    b2 = relu(conv(b2, raw["b2_3_w"], 1, 1))
    bp = relu(conv(avgpool(y, 3, 1, 1), raw["bp_w"]))
    return jnp.concatenate([b0, b1, b2, bp], axis=1)


# ---------------------------------- main -------------------------------------

if __name__ == "__main__":
    B, H, W = 2, 32, 32
    key = jax.random.PRNGKey(0)
    ks = jax.random.split(key, 16)

    def he(k, shape):
        fan_in = shape[1] * shape[2] * shape[3]
        return jax.random.normal(k, shape, jnp.float32) * (2.0 / fan_in) ** 0.5

    def bn_params(k, C):
        k1, k2, k3, k4 = jax.random.split(k, 4)
        gamma = 1.0 + 0.1 * jax.random.normal(k1, (C,), jnp.float32)
        beta = 0.1 * jax.random.normal(k2, (C,), jnp.float32)
        mean = 0.1 * jax.random.normal(k3, (C,), jnp.float32)
        var = 0.9 + 0.2 * jnp.abs(jax.random.normal(k4, (C,), jnp.float32))
        return gamma, beta, mean, var

    x = jax.random.normal(ks[0], (B, 3, H, W), jnp.float32)
    # BatchNorm uses (synthetic) running statistics, i.e. eval-mode inference
    # semantics, in both the kernel path and the reference.
    raw = {
        "conv1a_w": he(ks[1], (64, 3, 7, 7)),   "bn1a": bn_params(ks[2], 64),
        "conv2b_w": he(ks[3], (64, 64, 1, 1)),  "bn2b": bn_params(ks[4], 64),
        "conv2c_w": he(ks[5], (192, 64, 3, 3)), "bn2c": bn_params(ks[6], 192),
        "b0_w":   he(ks[7], (64, 192, 1, 1)),
        "b1_1_w": he(ks[8], (64, 192, 1, 1)),
        "b1_2_w": he(ks[9], (64, 64, 3, 3)),
        "b2_1_w": he(ks[10], (64, 192, 1, 1)),
        "b2_2_w": he(ks[11], (96, 64, 3, 3)),
        "b2_3_w": he(ks[12], (96, 96, 3, 3)),
        "bp_w":   he(ks[13], (32, 192, 1, 1)),
    }

    prepared = prepare_params(raw)          # one-time weight prep (outside jit)
    fwd = jax.jit(inception2_forward)
    out = jax.block_until_ready(fwd(x, prepared))

    ref = reference_forward(x, raw)
    assert out.shape == (B, 256, H // 8, W // 8), out.shape
    assert out.shape == ref.shape
    max_err = float(jnp.max(jnp.abs(out - ref)))
    # bf16 MXU operands across ~6 chained convs -> a few 1e-2 absolute error.
    assert jnp.allclose(out, ref, atol=5e-2, rtol=5e-2), max_err
    print("KERNEL_OK")
</pallas_src>

<mosaic_0001>
module attributes {stable_mosaic.version = 11 : i64} {
  func.func @_inception2_kernel(%arg0: i32, %arg1: memref<1x576x147xbf16, #tpu.memory_space<vmem>>, %arg2: memref<576x1xf32, #tpu.memory_space<vmem>>, %arg3: memref<22x1xf32, #tpu.memory_space<vmem>>, %arg4: memref<147x64xbf16, #tpu.memory_space<vmem>>, %arg5: memref<1x64xf32, #tpu.memory_space<vmem>>, %arg6: memref<64x64xbf16, #tpu.memory_space<vmem>>, %arg7: memref<1x64xf32, #tpu.memory_space<vmem>>, %arg8: memref<9x64x192xbf16, #tpu.memory_space<vmem>>, %arg9: memref<1x192xf32, #tpu.memory_space<vmem>>, %arg10: memref<192x192xbf16, #tpu.memory_space<vmem>>, %arg11: memref<192x32xbf16, #tpu.memory_space<vmem>>, %arg12: memref<9x64x64xbf16, #tpu.memory_space<vmem>>, %arg13: memref<9x64x96xbf16, #tpu.memory_space<vmem>>, %arg14: memref<9x96x96xbf16, #tpu.memory_space<vmem>>, %arg15: memref<1x16x256xf32, #tpu.memory_space<vmem>>, %arg16: memref<576x64xf32, #tpu.memory_space<vmem>>, %arg17: memref<144x64xf32, #tpu.memory_space<vmem>>, %arg18: memref<144x192xf32, #tpu.memory_space<vmem>>, %arg19: memref<36x192xf32, #tpu.memory_space<vmem>>, %arg20: memref<36x64xf32, #tpu.memory_space<vmem>>, %arg21: memref<36x64xf32, #tpu.memory_space<vmem>>, %arg22: memref<36x96xf32, #tpu.memory_space<vmem>>, %arg23: memref<22x256xf32, #tpu.memory_space<vmem>>) attributes {dimension_semantics = [#tpu.dimension_semantics<parallel>], iteration_bounds = array<i64: 2>, scalar_prefetch = 0 : i64, scratch_operands = 8 : i64, tpu.core_type = #tpu.core_type<tc>, window_params = [{transform_indices = @transform_0, window_bounds = array<i64: 1, 576, 147>}, {pipeline_mode = #tpu.pipeline_mode<synchronous>, transform_indices = @transform_1, window_bounds = array<i64: 576, 1>}, {pipeline_mode = #tpu.pipeline_mode<synchronous>, transform_indices = @transform_2, window_bounds = array<i64: 22, 1>}, {pipeline_mode = #tpu.pipeline_mode<synchronous>, transform_indices = @transform_3, window_bounds = array<i64: 147, 64>}, {pipeline_mode = #tpu.pipeline_mode<synchronous>, transform_indices = @transform_4, window_bounds = array<i64: 1, 64>}, {pipeline_mode = #tpu.pipeline_mode<synchronous>, transform_indices = @transform_5, window_bounds = array<i64: 64, 64>}, {pipeline_mode = #tpu.pipeline_mode<synchronous>, transform_indices = @transform_6, window_bounds = array<i64: 1, 64>}, {pipeline_mode = #tpu.pipeline_mode<synchronous>, transform_indices = @transform_7, window_bounds = array<i64: 9, 64, 192>}, {pipeline_mode = #tpu.pipeline_mode<synchronous>, transform_indices = @transform_8, window_bounds = array<i64: 1, 192>}, {pipeline_mode = #tpu.pipeline_mode<synchronous>, transform_indices = @transform_9, window_bounds = array<i64: 192, 192>}, {pipeline_mode = #tpu.pipeline_mode<synchronous>, transform_indices = @transform_10, window_bounds = array<i64: 192, 32>}, {pipeline_mode = #tpu.pipeline_mode<synchronous>, transform_indices = @transform_11, window_bounds = array<i64: 9, 64, 64>}, {pipeline_mode = #tpu.pipeline_mode<synchronous>, transform_indices = @transform_12, window_bounds = array<i64: 9, 64, 96>}, {pipeline_mode = #tpu.pipeline_mode<synchronous>, transform_indices = @transform_13, window_bounds = array<i64: 9, 96, 96>}, {transform_indices = @transform_14, window_bounds = array<i64: 1, 16, 256>}]} {
    %cst = arith.constant 0.000000e+00 : f32
    %0 = vector.broadcast %cst : f32 to vector<144x64xf32>
    %c0 = arith.constant 0 : index
    %c0_0 = arith.constant 0 : index
    %1 = vector.load %arg17[%c0, %c0_0] : memref<144x64xf32, #tpu.memory_space<vmem>>, vector<144x64xf32>
    tpu.vector_store %arg17[%c0, %c0_0], %0 {strides = array<i32>} : memref<144x64xf32, #tpu.memory_space<vmem>>, vector<144x64xf32>,
    %cst_1 = arith.constant 0.000000e+00 : f32
    %2 = vector.broadcast %cst_1 : f32 to vector<144x192xf32>
    %c0_2 = arith.constant 0 : index
    %c0_3 = arith.constant 0 : index
    %3 = vector.load %arg18[%c0_2, %c0_3] : memref<144x192xf32, #tpu.memory_space<vmem>>, vector<144x192xf32>
    tpu.vector_store %arg18[%c0_2, %c0_3], %2 {strides = array<i32>} : memref<144x192xf32, #tpu.memory_space<vmem>>, vector<144x192xf32>,
    %cst_4 = arith.constant 0.000000e+00 : f32
    %4 = vector.broadcast %cst_4 : f32 to vector<36x192xf32>
    %c0_5 = arith.constant 0 : index
    %c0_6 = arith.constant 0 : index
    %5 = vector.load %arg19[%c0_5, %c0_6] : memref<36x192xf32, #tpu.memory_space<vmem>>, vector<36x192xf32>
    tpu.vector_store %arg19[%c0_5, %c0_6], %4 {strides = array<i32>} : memref<36x192xf32, #tpu.memory_space<vmem>>, vector<36x192xf32>,
    %cst_7 = arith.constant 0.000000e+00 : f32
    %6 = vector.broadcast %cst_7 : f32 to vector<36x64xf32>
    %c0_8 = arith.constant 0 : index
    %c0_9 = arith.constant 0 : index
    %7 = vector.load %arg20[%c0_8, %c0_9] : memref<36x64xf32, #tpu.memory_space<vmem>>, vector<36x64xf32>
    tpu.vector_store %arg20[%c0_8, %c0_9], %6 {strides = array<i32>} : memref<36x64xf32, #tpu.memory_space<vmem>>, vector<36x64xf32>,
    %cst_10 = arith.constant 0.000000e+00 : f32
    %8 = vector.broadcast %cst_10 : f32 to vector<36x64xf32>
    %c0_11 = arith.constant 0 : index
    %c0_12 = arith.constant 0 : index
    %9 = vector.load %arg21[%c0_11, %c0_12] : memref<36x64xf32, #tpu.memory_space<vmem>>, vector<36x64xf32>
    tpu.vector_store %arg21[%c0_11, %c0_12], %8 {strides = array<i32>} : memref<36x64xf32, #tpu.memory_space<vmem>>, vector<36x64xf32>,
    %cst_13 = arith.constant 0.000000e+00 : f32
    %10 = vector.broadcast %cst_13 : f32 to vector<36x96xf32>
    %c0_14 = arith.constant 0 : index
    %c0_15 = arith.constant 0 : index
    %11 = vector.load %arg22[%c0_14, %c0_15] : memref<36x96xf32, #tpu.memory_space<vmem>>, vector<36x96xf32>
    tpu.vector_store %arg22[%c0_14, %c0_15], %10 {strides = array<i32>} : memref<36x96xf32, #tpu.memory_space<vmem>>, vector<36x96xf32>,
    %c0_16 = arith.constant 0 : index
    %c0_17 = arith.constant 0 : index
    %12 = vector.load %arg3[%c0_16, %c0_17] : memref<22x1xf32, #tpu.memory_space<vmem>>, vector<22x1xf32>
    %c0_18 = arith.constant 0 : index
    %c0_19 = arith.constant 0 : index
    %c0_20 = arith.constant 0 : index
    %13 = vector.load %arg1[%c0_18, %c0_19, %c0_20] : memref<1x576x147xbf16, #tpu.memory_space<vmem>>, vector<1x576x147xbf16>
    %14 = vector.shape_cast %13 : vector<1x576x147xbf16> to vector<576x147xbf16>
    %c0_21 = arith.constant 0 : index
    %c0_22 = arith.constant 0 : index
    %15 = vector.load %arg4[%c0_21, %c0_22] : memref<147x64xbf16, #tpu.memory_space<vmem>>, vector<147x64xbf16>
    %cst_23 = arith.constant dense<0.000000e+00> : vector<576x64xf32>
    %16 = tpu.matmul %14, %15, %cst_23 {dimension_numbers = #tpu.dot_dimension_numbers<[1], [0], [0], [1], [0, 0, 1, 1], [], []>} : vector<576x147xbf16>, vector<147x64xbf16>, vector<576x64xf32> -> vector<576x64xf32>
    %c0_24 = arith.constant 0 : index
    %c0_25 = arith.constant 0 : index
    %17 = vector.load %arg5[%c0_24, %c0_25] : memref<1x64xf32, #tpu.memory_space<vmem>>, vector<1x64xf32>
    %18 = vector.broadcast %17 : vector<1x64xf32> to vector<576x64xf32>
    %19 = arith.addf %16, %18 : vector<576x64xf32>
    %cst_26 = arith.constant 0.000000e+00 : f32
    %20 = vector.broadcast %cst_26 : f32 to vector<576x64xf32>
    %21 = arith.maximumf %19, %20 : vector<576x64xf32>
    %c0_27 = arith.constant 0 : index
    %c0_28 = arith.constant 0 : index
    %22 = vector.load %arg2[%c0_27, %c0_28] : memref<576x1xf32, #tpu.memory_space<vmem>>, vector<576x1xf32>
    %23 = vector.broadcast %22 : vector<576x1xf32> to vector<576x64xf32>
    %24 = arith.mulf %21, %23 : vector<576x64xf32>
    %c0_29 = arith.constant 0 : index
    %c0_30 = arith.constant 0 : index
    %25 = vector.load %arg16[%c0_29, %c0_30] : memref<576x64xf32, #tpu.memory_space<vmem>>, vector<576x64xf32>
    tpu.vector_store %arg16[%c0_29, %c0_30], %24 {strides = array<i32>} : memref<576x64xf32, #tpu.memory_space<vmem>>, vector<576x64xf32>,
    %c540 = arith.constant 540 : index
    %c0_31 = arith.constant 0 : index
    %26 = vector.load %arg16[%c540, %c0_31] : memref<576x64xf32, #tpu.memory_space<vmem>>, vector<22x64xf32>
    %c433 = arith.constant 433 : index
    %c0_32 = arith.constant 0 : index
    %27 = vector.load %arg16[%c433, %c0_32] : memref<576x64xf32, #tpu.memory_space<vmem>>, vector<22x64xf32>
    %28 = arith.maximumf %26, %27 : vector<22x64xf32>
    %c469 = arith.constant 469 : index
    %c0_33 = arith.constant 0 : index
    %29 = vector.load %arg16[%c469, %c0_33] : memref<576x64xf32, #tpu.memory_space<vmem>>, vector<22x64xf32>
    %30 = arith.maximumf %28, %29 : vector<22x64xf32>
    %c114 = arith.constant 114 : index
    %c0_34 = arith.constant 0 : index
    %31 = vector.load %arg16[%c114, %c0_34] : memref<576x64xf32, #tpu.memory_space<vmem>>, vector<22x64xf32>
    %32 = arith.maximumf %30, %31 : vector<22x64xf32>
    %c7 = arith.constant 7 : index
    %c0_35 = arith.constant 0 : index
    %33 = vector.load %arg16[%c7, %c0_35] : memref<576x64xf32, #tpu.memory_space<vmem>>, vector<22x64xf32>
    %34 = arith.maximumf %32, %33 : vector<22x64xf32>
    %c43 = arith.constant 43 : index
    %c0_36 = arith.constant 0 : index
    %35 = vector.load %arg16[%c43, %c0_36] : memref<576x64xf32, #tpu.memory_space<vmem>>, vector<22x64xf32>
    %36 = arith.maximumf %34, %35 : vector<22x64xf32>
    %c258 = arith.constant 258 : index
    %c0_37 = arith.constant 0 : index
    %37 = vector.load %arg16[%c258, %c0_37] : memref<576x64xf32, #tpu.memory_space<vmem>>, vector<22x64xf32>
    %38 = arith.maximumf %36, %37 : vector<22x64xf32>
    %c151 = arith.constant 151 : index
    %c0_38 = arith.constant 0 : index
    %39 = vector.load %arg16[%c151, %c0_38] : memref<576x64xf32, #tpu.memory_space<vmem>>, vector<22x64xf32>
    %40 = arith.maximumf %38, %39 : vector<22x64xf32>
    %c187 = arith.constant 187 : index
    %c0_39 = arith.constant 0 : index
    %41 = vector.load %arg16[%c187, %c0_39] : memref<576x64xf32, #tpu.memory_space<vmem>>, vector<22x64xf32>
    %42 = arith.maximumf %40, %41 : vector<22x64xf32>
    %c0_40 = arith.constant 0 : index
    %c0_41 = arith.constant 0 : index
    %43 = vector.load %arg6[%c0_40, %c0_41] : memref<64x64xbf16, #tpu.memory_space<vmem>>, vector<64x64xbf16>
    %44 = arith.truncf %42 : vector<22x64xf32> to vector<22x64xbf16>
    %cst_42 = arith.constant dense<0.000000e+00> : vector<22x64xf32>
    %45 = tpu.matmul %44, %43, %cst_42 {dimension_numbers = #tpu.dot_dimension_numbers<[1], [0], [0], [1], [0, 0, 1, 1], [], []>} : vector<22x64xbf16>, vector<64x64xbf16>, vector<22x64xf32> -> vector<22x64xf32>
    %c0_43 = arith.constant 0 : index
    %c0_44 = arith.constant 0 : index
    %46 = vector.load %arg7[%c0_43, %c0_44] : memref<1x64xf32, #tpu.memory_space<vmem>>, vector<1x64xf32>
    %47 = vector.broadcast %46 : vector<1x64xf32> to vector<22x64xf32>
    %48 = arith.addf %45, %47 : vector<22x64xf32>
    %cst_45 = arith.constant 0.000000e+00 : f32
    %49 = vector.broadcast %cst_45 : f32 to vector<22x64xf32>
    %50 = arith.maximumf %48, %49 : vector<22x64xf32>
    %51 = vector.broadcast %12 : vector<22x1xf32> to vector<22x64xf32>
    %52 = arith.mulf %50, %51 : vector<22x64xf32>
    %c7_46 = arith.constant 7 : index
    %c0_47 = arith.constant 0 : index
    %53 = vector.load %arg17[%c7_46, %c0_47] : memref<144x64xf32, #tpu.memory_space<vmem>>, vector<22x64xf32>
    tpu.vector_store %arg17[%c7_46, %c0_47], %52 {strides = array<i32>} : memref<144x64xf32, #tpu.memory_space<vmem>>, vector<22x64xf32>,
    %c469_48 = arith.constant 469 : index
    %c0_49 = arith.constant 0 : index
    %54 = vector.load %arg16[%c469_48, %c0_49] : memref<576x64xf32, #tpu.memory_space<vmem>>, vector<22x64xf32>
    %c505 = arith.constant 505 : index
    %c0_50 = arith.constant 0 : index
    %55 = vector.load %arg16[%c505, %c0_50] : memref<576x64xf32, #tpu.memory_space<vmem>>, vector<22x64xf32>
    %56 = arith.maximumf %54, %55 : vector<22x64xf32>
    %c541 = arith.constant 541 : index
    %c0_51 = arith.constant 0 : index
    %57 = vector.load %arg16[%c541, %c0_51] : memref<576x64xf32, #tpu.memory_space<vmem>>, vector<22x64xf32>
    %58 = arith.maximumf %56, %57 : vector<22x64xf32>
    %c43_52 = arith.constant 43 : index
    %c0_53 = arith.constant 0 : index
    %59 = vector.load %arg16[%c43_52, %c0_53] : memref<576x64xf32, #tpu.memory_space<vmem>>, vector<22x64xf32>
    %60 = arith.maximumf %58, %59 : vector<22x64xf32>
    %c79 = arith.constant 79 : index
    %c0_54 = arith.constant 0 : index
    %61 = vector.load %arg16[%c79, %c0_54] : memref<576x64xf32, #tpu.memory_space<vmem>>, vector<22x64xf32>
    %62 = arith.maximumf %60, %61 : vector<22x64xf32>
    %c115 = arith.constant 115 : index
    %c0_55 = arith.constant 0 : index
    %63 = vector.load %arg16[%c115, %c0_55] : memref<576x64xf32, #tpu.memory_space<vmem>>, vector<22x64xf32>
    %64 = arith.maximumf %62, %63 : vector<22x64xf32>
    %c187_56 = arith.constant 187 : index
    %c0_57 = arith.constant 0 : index
    %65 = vector.load %arg16[%c187_56, %c0_57] : memref<576x64xf32, #tpu.memory_space<vmem>>, vector<22x64xf32>
    %66 = arith.maximumf %64, %65 : vector<22x64xf32>
    %c223 = arith.constant 223 : index
    %c0_58 = arith.constant 0 : index
    %67 = vector.load %arg16[%c223, %c0_58] : memref<576x64xf32, #tpu.memory_space<vmem>>, vector<22x64xf32>
    %68 = arith.maximumf %66, %67 : vector<22x64xf32>
    %c259 = arith.constant 259 : index
    %c0_59 = arith.constant 0 : index
    %69 = vector.load %arg16[%c259, %c0_59] : memref<576x64xf32, #tpu.memory_space<vmem>>, vector<22x64xf32>
    %70 = arith.maximumf %68, %69 : vector<22x64xf32>
    %c0_60 = arith.constant 0 : index
    %c0_61 = arith.constant 0 : index
    %71 = vector.load %arg6[%c0_60, %c0_61] : memref<64x64xbf16, #tpu.memory_space<vmem>>, vector<64x64xbf16>
    %72 = arith.truncf %70 : vector<22x64xf32> to vector<22x64xbf16>
    %cst_62 = arith.constant dense<0.000000e+00> : vector<22x64xf32>
    %73 = tpu.matmul %72, %71, %cst_62 {dimension_numbers = #tpu.dot_dimension_numbers<[1], [0], [0], [1], [0, 0, 1, 1], [], []>} : vector<22x64xbf16>, vector<64x64xbf16>, vector<22x64xf32> -> vector<22x64xf32>
    %c0_63 = arith.constant 0 : index
    %c0_64 = arith.constant 0 : index
    %74 = vector.load %arg7[%c0_63, %c0_64] : memref<1x64xf32, #tpu.memory_space<vmem>>, vector<1x64xf32>
    %75 = vector.broadcast %74 : vector<1x64xf32> to vector<22x64xf32>
    %76 = arith.addf %73, %75 : vector<22x64xf32>
    %cst_65 = arith.constant 0.000000e+00 : f32
    %77 = vector.broadcast %cst_65 : f32 to vector<22x64xf32>
    %78 = arith.maximumf %76, %77 : vector<22x64xf32>
    %79 = vector.broadcast %12 : vector<22x1xf32> to vector<22x64xf32>
    %80 = arith.mulf %78, %79 : vector<22x64xf32>
    %c43_66 = arith.constant 43 : index
    %c0_67 = arith.constant 0 : index
    %81 = vector.load %arg17[%c43_66, %c0_67] : memref<144x64xf32, #tpu.memory_space<vmem>>, vector<22x64xf32>
    tpu.vector_store %arg17[%c43_66, %c0_67], %80 {strides = array<i32>} : memref<144x64xf32, #tpu.memory_space<vmem>>, vector<22x64xf32>,
    %c258_68 = arith.constant 258 : index
    %c0_69 = arith.constant 0 : index
    %82 = vector.load %arg16[%c258_68, %c0_69] : memref<576x64xf32, #tpu.memory_space<vmem>>, vector<22x64xf32>
    %c151_70 = arith.constant 151 : index
    %c0_71 = arith.constant 0 : index
    %83 = vector.load %arg16[%c151_70, %c0_71] : memref<576x64xf32, #tpu.memory_space<vmem>>, vector<22x64xf32>
    %84 = arith.maximumf %82, %83 : vector<22x64xf32>
    %c187_72 = arith.constant 187 : index
    %c0_73 = arith.constant 0 : index
    %85 = vector.load %arg16[%c187_72, %c0_73] : memref<576x64xf32, #tpu.memory_space<vmem>>, vector<22x64xf32>
    %86 = arith.maximumf %84, %85 : vector<22x64xf32>
    %c402 = arith.constant 402 : index
    %c0_74 = arith.constant 0 : index
    %87 = vector.load %arg16[%c402, %c0_74] : memref<576x64xf32, #tpu.memory_space<vmem>>, vector<22x64xf32>
    %88 = arith.maximumf %86, %87 : vector<22x64xf32>
    %c295 = arith.constant 295 : index
    %c0_75 = arith.constant 0 : index
    %89 = vector.load %arg16[%c295, %c0_75] : memref<576x64xf32, #tpu.memory_space<vmem>>, vector<22x64xf32>
    %90 = arith.maximumf %88, %89 : vector<22x64xf32>
    %c331 = arith.constant 331 : index
    %c0_76 = arith.constant 0 : index
    %91 = vector.load %arg16[%c331, %c0_76] : memref<576x64xf32, #tpu.memory_space<vmem>>, vector<22x64xf32>
    %92 = arith.maximumf %90, %91 : vector<22x64xf32>
    %c546 = arith.constant 546 : index
    %c0_77 = arith.constant 0 : index
    %93 = vector.load %arg16[%c546, %c0_77] : memref<576x64xf32, #tpu.memory_space<vmem>>, vector<22x64xf32>
    %94 = arith.maximumf %92, %93 : vector<22x64xf32>
    %c439 = arith.constant 439 : index
    %c0_78 = arith.constant 0 : index
    %95 = vector.load %arg16[%c439, %c0_78] : memref<576x64xf32, #tpu.memory_space<vmem>>, vector<22x64xf32>
    %96 = arith.maximumf %94, %95 : vector<22x64xf32>
    %c475 = arith.constant 475 : index
    %c0_79 = arith.constant 0 : index
    %97 = vector.load %arg16[%c475, %c0_79] : memref<576x64xf32, #tpu.memory_space<vmem>>, vector<22x64xf32>
    %98 = arith.maximumf %96, %97 : vector<22x64xf32>
    %c0_80 = arith.constant 0 : index
    %c0_81 = arith.constant 0 : index
    %99 = vector.load %arg6[%c0_80, %c0_81] : memref<64x64xbf16, #tpu.memory_space<vmem>>, vector<64x64xbf16>
    %100 = arith.truncf %98 : vector<22x64xf32> to vector<22x64xbf16>
    %cst_82 = arith.constant dense<0.000000e+00> : vector<22x64xf32>
    %101 = tpu.matmul %100, %99, %cst_82 {dimension_numbers = #tpu.dot_dimension_numbers<[1], [0], [0], [1], [0, 0, 1, 1], [], []>} : vector<22x64xbf16>, vector<64x64xbf16>, vector<22x64xf32> -> vector<22x64xf32>
    %c0_83 = arith.constant 0 : index
    %c0_84 = arith.constant 0 : index
    %102 = vector.load %arg7[%c0_83, %c0_84] : memref<1x64xf32, #tpu.memory_space<vmem>>, vector<1x64xf32>
    %103 = vector.broadcast %102 : vector<1x64xf32> to vector<22x64xf32>
    %104 = arith.addf %101, %103 : vector<22x64xf32>
    %cst_85 = arith.constant 0.000000e+00 : f32
    %105 = vector.broadcast %cst_85 : f32 to vector<22x64xf32>
    %106 = arith.maximumf %104, %105 : vector<22x64xf32>
    %107 = vector.broadcast %12 : vector<22x1xf32> to vector<22x64xf32>
    %108 = arith.mulf %106, %107 : vector<22x64xf32>
    %c79_86 = arith.constant 79 : index
    %c0_87 = arith.constant 0 : index
    %109 = vector.load %arg17[%c79_86, %c0_87] : memref<144x64xf32, #tpu.memory_space<vmem>>, vector<22x64xf32>
    tpu.vector_store %arg17[%c79_86, %c0_87], %108 {strides = array<i32>} : memref<144x64xf32, #tpu.memory_space<vmem>>, vector<22x64xf32>,
    %c187_88 = arith.constant 187 : index
    %c0_89 = arith.constant 0 : index
    %110 = vector.load %arg16[%c187_88, %c0_89] : memref<576x64xf32, #tpu.memory_space<vmem>>, vector<22x64xf32>
    %c223_90 = arith.constant 223 : index
    %c0_91 = arith.constant 0 : index
    %111 = vector.load %arg16[%c223_90, %c0_91] : memref<576x64xf32, #tpu.memory_space<vmem>>, vector<22x64xf32>
    %112 = arith.maximumf %110, %111 : vector<22x64xf32>
    %c259_92 = arith.constant 259 : index
    %c0_93 = arith.constant 0 : index
    %113 = vector.load %arg16[%c259_92, %c0_93] : memref<576x64xf32, #tpu.memory_space<vmem>>, vector<22x64xf32>
    %114 = arith.maximumf %112, %113 : vector<22x64xf32>
    %c331_94 = arith.constant 331 : index
    %c0_95 = arith.constant 0 : index
    %115 = vector.load %arg16[%c331_94, %c0_95] : memref<576x64xf32, #tpu.memory_space<vmem>>, vector<22x64xf32>
    %116 = arith.maximumf %114, %115 : vector<22x64xf32>
    %c367 = arith.constant 367 : index
    %c0_96 = arith.constant 0 : index
    %117 = vector.load %arg16[%c367, %c0_96] : memref<576x64xf32, #tpu.memory_space<vmem>>, vector<22x64xf32>
    %118 = arith.maximumf %116, %117 : vector<22x64xf32>
    %c403 = arith.constant 403 : index
    %c0_97 = arith.constant 0 : index
    %119 = vector.load %arg16[%c403, %c0_97] : memref<576x64xf32, #tpu.memory_space<vmem>>, vector<22x64xf32>
    %120 = arith.maximumf %118, %119 : vector<22x64xf32>
    %c475_98 = arith.constant 475 : index
    %c0_99 = arith.constant 0 : index
    %121 = vector.load %arg16[%c475_98, %c0_99] : memref<576x64xf32, #tpu.memory_space<vmem>>, vector<22x64xf32>
    %122 = arith.maximumf %120, %121 : vector<22x64xf32>
    %c511 = arith.constant 511 : index
    %c0_100 = arith.constant 0 : index
    %123 = vector.load %arg16[%c511, %c0_100] : memref<576x64xf32, #tpu.memory_space<vmem>>, vector<22x64xf32>
    %124 = arith.maximumf %122, %123 : vector<22x64xf32>
    %c547 = arith.constant 547 : index
    %c0_101 = arith.constant 0 : index
    %125 = vector.load %arg16[%c547, %c0_101] : memref<576x64xf32, #tpu.memory_space<vmem>>, vector<22x64xf32>
    %126 = arith.maximumf %124, %125 : vector<22x64xf32>
    %c0_102 = arith.constant 0 : index
    %c0_103 = arith.constant 0 : index
    %127 = vector.load %arg6[%c0_102, %c0_103] : memref<64x64xbf16, #tpu.memory_space<vmem>>, vector<64x64xbf16>
    %128 = arith.truncf %126 : vector<22x64xf32> to vector<22x64xbf16>
    %cst_104 = arith.constant dense<0.000000e+00> : vector<22x64xf32>
    %129 = tpu.matmul %128, %127, %cst_104 {dimension_numbers = #tpu.dot_dimension_numbers<[1], [0], [0], [1], [0, 0, 1, 1], [], []>} : vector<22x64xbf16>, vector<64x64xbf16>, vector<22x64xf32> -> vector<22x64xf32>
    %c0_105 = arith.constant 0 : index
    %c0_106 = arith.constant 0 : index
    %130 = vector.load %arg7[%c0_105, %c0_106] : memref<1x64xf32, #tpu.memory_space<vmem>>, vector<1x64xf32>
    %131 = vector.broadcast %130 : vector<1x64xf32> to vector<22x64xf32>
    %132 = arith.addf %129, %131 : vector<22x64xf32>
    %cst_107 = arith.constant 0.000000e+00 : f32
    %133 = vector.broadcast %cst_107 : f32 to vector<22x64xf32>
    %134 = arith.maximumf %132, %133 : vector<22x64xf32>
    %135 = vector.broadcast %12 : vector<22x1xf32> to vector<22x64xf32>
    %136 = arith.mulf %134, %135 : vector<22x64xf32>
    %c115_108 = arith.constant 115 : index
    %c0_109 = arith.constant 0 : index
    %137 = vector.load %arg17[%c115_108, %c0_109] : memref<144x64xf32, #tpu.memory_space<vmem>>, vector<22x64xf32>
    tpu.vector_store %arg17[%c115_108, %c0_109], %136 {strides = array<i32>} : memref<144x64xf32, #tpu.memory_space<vmem>>, vector<22x64xf32>,
    %c108 = arith.constant 108 : index
    %c0_110 = arith.constant 0 : index
    %138 = vector.load %arg17[%c108, %c0_110] : memref<144x64xf32, #tpu.memory_space<vmem>>, vector<22x64xf32>
    %c0_111 = arith.constant 0 : index
    %c0_112 = arith.constant 0 : index
    %c0_113 = arith.constant 0 : index
    %139 = vector.load %arg8[%c0_111, %c0_112, %c0_113] : memref<9x64x192xbf16, #tpu.memory_space<vmem>>, vector<1x64x192xbf16>
    %140 = vector.shape_cast %139 : vector<1x64x192xbf16> to vector<64x192xbf16>
    %141 = arith.truncf %138 : vector<22x64xf32> to vector<22x64xbf16>
    %cst_114 = arith.constant dense<0.000000e+00> : vector<22x192xf32>
    %142 = tpu.matmul %141, %140, %cst_114 {dimension_numbers = #tpu.dot_dimension_numbers<[1], [0], [0], [1], [0, 0, 1, 1], [], []>} : vector<22x64xbf16>, vector<64x192xbf16>, vector<22x192xf32> -> vector<22x192xf32>
    %c73 = arith.constant 73 : index
    %c0_115 = arith.constant 0 : index
    %143 = vector.load %arg17[%c73, %c0_115] : memref<144x64xf32, #tpu.memory_space<vmem>>, vector<22x64xf32>
    %c1 = arith.constant 1 : index
    %c0_116 = arith.constant 0 : index
    %c0_117 = arith.constant 0 : index
    %144 = vector.load %arg8[%c1, %c0_116, %c0_117] : memref<9x64x192xbf16, #tpu.memory_space<vmem>>, vector<1x64x192xbf16>
    %145 = vector.shape_cast %144 : vector<1x64x192xbf16> to vector<64x192xbf16>
    %146 = arith.truncf %143 : vector<22x64xf32> to vector<22x64xbf16>
    %cst_118 = arith.constant dense<0.000000e+00> : vector<22x192xf32>
    %147 = tpu.matmul %146, %145, %cst_118 {dimension_numbers = #tpu.dot_dimension_numbers<[1], [0], [0], [1], [0, 0, 1, 1], [], []>} : vector<22x64xbf16>, vector<64x192xbf16>, vector<22x192xf32> -> vector<22x192xf32>
    %148 = arith.addf %142, %147 : vector<22x192xf32>
    %c109 = arith.constant 109 : index
    %c0_119 = arith.constant 0 : index
    %149 = vector.load %arg17[%c109, %c0_119] : memref<144x64xf32, #tpu.memory_space<vmem>>, vector<22x64xf32>
    %c2 = arith.constant 2 : index
    %c0_120 = arith.constant 0 : index
    %c0_121 = arith.constant 0 : index
    %150 = vector.load %arg8[%c2, %c0_120, %c0_121] : memref<9x64x192xbf16, #tpu.memory_space<vmem>>, vector<1x64x192xbf16>
    %151 = vector.shape_cast %150 : vector<1x64x192xbf16> to vector<64x192xbf16>
    %152 = arith.truncf %149 : vector<22x64xf32> to vector<22x64xbf16>
    %cst_122 = arith.constant dense<0.000000e+00> : vector<22x192xf32>
    %153 = tpu.matmul %152, %151, %cst_122 {dimension_numbers = #tpu.dot_dimension_numbers<[1], [0], [0], [1], [0, 0, 1, 1], [], []>} : vector<22x64xbf16>, vector<64x192xbf16>, vector<22x192xf32> -> vector<22x192xf32>
    %154 = arith.addf %148, %153 : vector<22x192xf32>
    %c42 = arith.constant 42 : index
    %c0_123 = arith.constant 0 : index
    %155 = vector.load %arg17[%c42, %c0_123] : memref<144x64xf32, #tpu.memory_space<vmem>>, vector<22x64xf32>
    %c3 = arith.constant 3 : index
    %c0_124 = arith.constant 0 : index
    %c0_125 = arith.constant 0 : index
    %156 = vector.load %arg8[%c3, %c0_124, %c0_125] : memref<9x64x192xbf16, #tpu.memory_space<vmem>>, vector<1x64x192xbf16>
    %157 = vector.shape_cast %156 : vector<1x64x192xbf16> to vector<64x192xbf16>
    %158 = arith.truncf %155 : vector<22x64xf32> to vector<22x64xbf16>
    %cst_126 = arith.constant dense<0.000000e+00> : vector<22x192xf32>
    %159 = tpu.matmul %158, %157, %cst_126 {dimension_numbers = #tpu.dot_dimension_numbers<[1], [0], [0], [1], [0, 0, 1, 1], [], []>} : vector<22x64xbf16>, vector<64x192xbf16>, vector<22x192xf32> -> vector<22x192xf32>
    %160 = arith.addf %154, %159 : vector<22x192xf32>
    %c7_127 = arith.constant 7 : index
    %c0_128 = arith.constant 0 : index
    %161 = vector.load %arg17[%c7_127, %c0_128] : memref<144x64xf32, #tpu.memory_space<vmem>>, vector<22x64xf32>
    %c4 = arith.constant 4 : index
    %c0_129 = arith.constant 0 : index
    %c0_130 = arith.constant 0 : index
    %162 = vector.load %arg8[%c4, %c0_129, %c0_130] : memref<9x64x192xbf16, #tpu.memory_space<vmem>>, vector<1x64x192xbf16>
    %163 = vector.shape_cast %162 : vector<1x64x192xbf16> to vector<64x192xbf16>
    %164 = arith.truncf %161 : vector<22x64xf32> to vector<22x64xbf16>
    %cst_131 = arith.constant dense<0.000000e+00> : vector<22x192xf32>
    %165 = tpu.matmul %164, %163, %cst_131 {dimension_numbers = #tpu.dot_dimension_numbers<[1], [0], [0], [1], [0, 0, 1, 1], [], []>} : vector<22x64xbf16>, vector<64x192xbf16>, vector<22x192xf32> -> vector<22x192xf32>
    %166 = arith.addf %160, %165 : vector<22x192xf32>
    %c43_132 = arith.constant 43 : index
    %c0_133 = arith.constant 0 : index
    %167 = vector.load %arg17[%c43_132, %c0_133] : memref<144x64xf32, #tpu.memory_space<vmem>>, vector<22x64xf32>
    %c5 = arith.constant 5 : index
    %c0_134 = arith.constant 0 : index
    %c0_135 = arith.constant 0 : index
    %168 = vector.load %arg8[%c5, %c0_134, %c0_135] : memref<9x64x192xbf16, #tpu.memory_space<vmem>>, vector<1x64x192xbf16>
    %169 = vector.shape_cast %168 : vector<1x64x192xbf16> to vector<64x192xbf16>
    %170 = arith.truncf %167 : vector<22x64xf32> to vector<22x64xbf16>
    %cst_136 = arith.constant dense<0.000000e+00> : vector<22x192xf32>
    %171 = tpu.matmul %170, %169, %cst_136 {dimension_numbers = #tpu.dot_dimension_numbers<[1], [0], [0], [1], [0, 0, 1, 1], [], []>} : vector<22x64xbf16>, vector<64x192xbf16>, vector<22x192xf32> -> vector<22x192xf32>
    %172 = arith.addf %166, %171 : vector<22x192xf32>
    %c114_137 = arith.constant 114 : index
    %c0_138 = arith.constant 0 : index
    %173 = vector.load %arg17[%c114_137, %c0_138] : memref<144x64xf32, #tpu.memory_space<vmem>>, vector<22x64xf32>
    %c6 = arith.constant 6 : index
    %c0_139 = arith.constant 0 : index
    %c0_140 = arith.constant 0 : index
    %174 = vector.load %arg8[%c6, %c0_139, %c0_140] : memref<9x64x192xbf16, #tpu.memory_space<vmem>>, vector<1x64x192xbf16>
    %175 = vector.shape_cast %174 : vector<1x64x192xbf16> to vector<64x192xbf16>
    %176 = arith.truncf %173 : vector<22x64xf32> to vector<22x64xbf16>
    %cst_141 = arith.constant dense<0.000000e+00> : vector<22x192xf32>
    %177 = tpu.matmul %176, %175, %cst_141 {dimension_numbers = #tpu.dot_dimension_numbers<[1], [0], [0], [1], [0, 0, 1, 1], [], []>} : vector<22x64xbf16>, vector<64x192xbf16>, vector<22x192xf32> -> vector<22x192xf32>
    %178 = arith.addf %172, %177 : vector<22x192xf32>
    %c79_142 = arith.constant 79 : index
    %c0_143 = arith.constant 0 : index
    %179 = vector.load %arg17[%c79_142, %c0_143] : memref<144x64xf32, #tpu.memory_space<vmem>>, vector<22x64xf32>
    %c7_144 = arith.constant 7 : index
    %c0_145 = arith.constant 0 : index
    %c0_146 = arith.constant 0 : index
    %180 = vector.load %arg8[%c7_144, %c0_145, %c0_146] : memref<9x64x192xbf16, #tpu.memory_space<vmem>>, vector<1x64x192xbf16>
    %181 = vector.shape_cast %180 : vector<1x64x192xbf16> to vector<64x192xbf16>
    %182 = arith.truncf %179 : vector<22x64xf32> to vector<22x64xbf16>
    %cst_147 = arith.constant dense<0.000000e+00> : vector<22x192xf32>
    %183 = tpu.matmul %182, %181, %cst_147 {dimension_numbers = #tpu.dot_dimension_numbers<[1], [0], [0], [1], [0, 0, 1, 1], [], []>} : vector<22x64xbf16>, vector<64x192xbf16>, vector<22x192xf32> -> vector<22x192xf32>
    %184 = arith.addf %178, %183 : vector<22x192xf32>
    %c115_148 = arith.constant 115 : index
    %c0_149 = arith.constant 0 : index
    %185 = vector.load %arg17[%c115_148, %c0_149] : memref<144x64xf32, #tpu.memory_space<vmem>>, vector<22x64xf32>
    %c8 = arith.constant 8 : index
    %c0_150 = arith.constant 0 : index
    %c0_151 = arith.constant 0 : index
    %186 = vector.load %arg8[%c8, %c0_150, %c0_151] : memref<9x64x192xbf16, #tpu.memory_space<vmem>>, vector<1x64x192xbf16>
    %187 = vector.shape_cast %186 : vector<1x64x192xbf16> to vector<64x192xbf16>
    %188 = arith.truncf %185 : vector<22x64xf32> to vector<22x64xbf16>
    %cst_152 = arith.constant dense<0.000000e+00> : vector<22x192xf32>
    %189 = tpu.matmul %188, %187, %cst_152 {dimension_numbers = #tpu.dot_dimension_numbers<[1], [0], [0], [1], [0, 0, 1, 1], [], []>} : vector<22x64xbf16>, vector<64x192xbf16>, vector<22x192xf32> -> vector<22x192xf32>
    %190 = arith.addf %184, %189 : vector<22x192xf32>
    %c0_153 = arith.constant 0 : index
    %c0_154 = arith.constant 0 : index
    %191 = vector.load %arg9[%c0_153, %c0_154] : memref<1x192xf32, #tpu.memory_space<vmem>>, vector<1x192xf32>
    %192 = vector.broadcast %191 : vector<1x192xf32> to vector<22x192xf32>
    %193 = arith.addf %190, %192 : vector<22x192xf32>
    %cst_155 = arith.constant 0.000000e+00 : f32
    %194 = vector.broadcast %cst_155 : f32 to vector<22x192xf32>
    %195 = arith.maximumf %193, %194 : vector<22x192xf32>
    %196 = vector.broadcast %12 : vector<22x1xf32> to vector<22x192xf32>
    %197 = arith.mulf %195, %196 : vector<22x192xf32>
    %c7_156 = arith.constant 7 : index
    %c0_157 = arith.constant 0 : index
    %198 = vector.load %arg18[%c7_156, %c0_157] : memref<144x192xf32, #tpu.memory_space<vmem>>, vector<22x192xf32>
    tpu.vector_store %arg18[%c7_156, %c0_157], %197 {strides = array<i32>} : memref<144x192xf32, #tpu.memory_space<vmem>>, vector<22x192xf32>,
    %c73_158 = arith.constant 73 : index
    %c0_159 = arith.constant 0 : index
    %199 = vector.load %arg17[%c73_158, %c0_159] : memref<144x64xf32, #tpu.memory_space<vmem>>, vector<22x64xf32>
    %c0_160 = arith.constant 0 : index
    %c0_161 = arith.constant 0 : index
    %c0_162 = arith.constant 0 : index
    %200 = vector.load %arg8[%c0_160, %c0_161, %c0_162] : memref<9x64x192xbf16, #tpu.memory_space<vmem>>, vector<1x64x192xbf16>
    %201 = vector.shape_cast %200 : vector<1x64x192xbf16> to vector<64x192xbf16>
    %202 = arith.truncf %199 : vector<22x64xf32> to vector<22x64xbf16>
    %cst_163 = arith.constant dense<0.000000e+00> : vector<22x192xf32>
    %203 = tpu.matmul %202, %201, %cst_163 {dimension_numbers = #tpu.dot_dimension_numbers<[1], [0], [0], [1], [0, 0, 1, 1], [], []>} : vector<22x64xbf16>, vector<64x192xbf16>, vector<22x192xf32> -> vector<22x192xf32>
    %c109_164 = arith.constant 109 : index
    %c0_165 = arith.constant 0 : index
    %204 = vector.load %arg17[%c109_164, %c0_165] : memref<144x64xf32, #tpu.memory_space<vmem>>, vector<22x64xf32>
    %c1_166 = arith.constant 1 : index
    %c0_167 = arith.constant 0 : index
    %c0_168 = arith.constant 0 : index
    %205 = vector.load %arg8[%c1_166, %c0_167, %c0_168] : memref<9x64x192xbf16, #tpu.memory_space<vmem>>, vector<1x64x192xbf16>
    %206 = vector.shape_cast %205 : vector<1x64x192xbf16> to vector<64x192xbf16>
    %207 = arith.truncf %204 : vector<22x64xf32> to vector<22x64xbf16>
    %cst_169 = arith.constant dense<0.000000e+00> : vector<22x192xf32>
    %208 = tpu.matmul %207, %206, %cst_169 {dimension_numbers = #tpu.dot_dimension_numbers<[1], [0], [0], [1], [0, 0, 1, 1], [], []>} : vector<22x64xbf16>, vector<64x192xbf16>, vector<22x192xf32> -> vector<22x192xf32>
    %209 = arith.addf %203, %208 : vector<22x192xf32>
    %c74 = arith.constant 74 : index
    %c0_170 = arith.constant 0 : index
    %210 = vector.load %arg17[%c74, %c0_170] : memref<144x64xf32, #tpu.memory_space<vmem>>, vector<22x64xf32>
    %c2_171 = arith.constant 2 : index
    %c0_172 = arith.constant 0 : index
    %c0_173 = arith.constant 0 : index
    %211 = vector.load %arg8[%c2_171, %c0_172, %c0_173] : memref<9x64x192xbf16, #tpu.memory_space<vmem>>, vector<1x64x192xbf16>
    %212 = vector.shape_cast %211 : vector<1x64x192xbf16> to vector<64x192xbf16>
    %213 = arith.truncf %210 : vector<22x64xf32> to vector<22x64xbf16>
    %cst_174 = arith.constant dense<0.000000e+00> : vector<22x192xf32>
    %214 = tpu.matmul %213, %212, %cst_174 {dimension_numbers = #tpu.dot_dimension_numbers<[1], [0], [0], [1], [0, 0, 1, 1], [], []>} : vector<22x64xbf16>, vector<64x192xbf16>, vector<22x192xf32> -> vector<22x192xf32>
    %215 = arith.addf %209, %214 : vector<22x192xf32>
    %c7_175 = arith.constant 7 : index
    %c0_176 = arith.constant 0 : index
    %216 = vector.load %arg17[%c7_175, %c0_176] : memref<144x64xf32, #tpu.memory_space<vmem>>, vector<22x64xf32>
    %c3_177 = arith.constant 3 : index
    %c0_178 = arith.constant 0 : index
    %c0_179 = arith.constant 0 : index
    %217 = vector.load %arg8[%c3_177, %c0_178, %c0_179] : memref<9x64x192xbf16, #tpu.memory_space<vmem>>, vector<1x64x192xbf16>
    %218 = vector.shape_cast %217 : vector<1x64x192xbf16> to vector<64x192xbf16>
    %219 = arith.truncf %216 : vector<22x64xf32> to vector<22x64xbf16>
    %cst_180 = arith.constant dense<0.000000e+00> : vector<22x192xf32>
    %220 = tpu.matmul %219, %218, %cst_180 {dimension_numbers = #tpu.dot_dimension_numbers<[1], [0], [0], [1], [0, 0, 1, 1], [], []>} : vector<22x64xbf16>, vector<64x192xbf16>, vector<22x192xf32> -> vector<22x192xf32>
    %221 = arith.addf %215, %220 : vector<22x192xf32>
    %c43_181 = arith.constant 43 : index
    %c0_182 = arith.constant 0 : index
    %222 = vector.load %arg17[%c43_181, %c0_182] : memref<144x64xf32, #tpu.memory_space<vmem>>, vector<22x64xf32>
    %c4_183 = arith.constant 4 : index
    %c0_184 = arith.constant 0 : index
    %c0_185 = arith.constant 0 : index
    %223 = vector.load %arg8[%c4_183, %c0_184, %c0_185] : memref<9x64x192xbf16, #tpu.memory_space<vmem>>, vector<1x64x192xbf16>
    %224 = vector.shape_cast %223 : vector<1x64x192xbf16> to vector<64x192xbf16>
    %225 = arith.truncf %222 : vector<22x64xf32> to vector<22x64xbf16>
    %cst_186 = arith.constant dense<0.000000e+00> : vector<22x192xf32>
    %226 = tpu.matmul %225, %224, %cst_186 {dimension_numbers = #tpu.dot_dimension_numbers<[1], [0], [0], [1], [0, 0, 1, 1], [], []>} : vector<22x64xbf16>, vector<64x192xbf16>, vector<22x192xf32> -> vector<22x192xf32>
    %227 = arith.addf %221, %226 : vector<22x192xf32>
    %c8_187 = arith.constant 8 : index
    %c0_188 = arith.constant 0 : index
    %228 = vector.load %arg17[%c8_187, %c0_188] : memref<144x64xf32, #tpu.memory_space<vmem>>, vector<22x64xf32>
    %c5_189 = arith.constant 5 : index
    %c0_190 = arith.constant 0 : index
    %c0_191 = arith.constant 0 : index
    %229 = vector.load %arg8[%c5_189, %c0_190, %c0_191] : memref<9x64x192xbf16, #tpu.memory_space<vmem>>, vector<1x64x192xbf16>
    %230 = vector.shape_cast %229 : vector<1x64x192xbf16> to vector<64x192xbf16>
    %231 = arith.truncf %228 : vector<22x64xf32> to vector<22x64xbf16>
    %cst_192 = arith.constant dense<0.000000e+00> : vector<22x192xf32>
    %232 = tpu.matmul %231, %230, %cst_192 {dimension_numbers = #tpu.dot_dimension_numbers<[1], [0], [0], [1], [0, 0, 1, 1], [], []>} : vector<22x64xbf16>, vector<64x192xbf16>, vector<22x192xf32> -> vector<22x192xf32>
    %233 = arith.addf %227, %232 : vector<22x192xf32>
    %c79_193 = arith.constant 79 : index
    %c0_194 = arith.constant 0 : index
    %234 = vector.load %arg17[%c79_193, %c0_194] : memref<144x64xf32, #tpu.memory_space<vmem>>, vector<22x64xf32>
    %c6_195 = arith.constant 6 : index
    %c0_196 = arith.constant 0 : index
    %c0_197 = arith.constant 0 : index
    %235 = vector.load %arg8[%c6_195, %c0_196, %c0_197] : memref<9x64x192xbf16, #tpu.memory_space<vmem>>, vector<1x64x192xbf16>
    %236 = vector.shape_cast %235 : vector<1x64x192xbf16> to vector<64x192xbf16>
    %237 = arith.truncf %234 : vector<22x64xf32> to vector<22x64xbf16>
    %cst_198 = arith.constant dense<0.000000e+00> : vector<22x192xf32>
    %238 = tpu.matmul %237, %236, %cst_198 {dimension_numbers = #tpu.dot_dimension_numbers<[1], [0], [0], [1], [0, 0, 1, 1], [], []>} : vector<22x64xbf16>, vector<64x192xbf16>, vector<22x192xf32> -> vector<22x192xf32>
    %239 = arith.addf %233, %238 : vector<22x192xf32>
    %c115_199 = arith.constant 115 : index
    %c0_200 = arith.constant 0 : index
    %240 = vector.load %arg17[%c115_199, %c0_200] : memref<144x64xf32, #tpu.memory_space<vmem>>, vector<22x64xf32>
    %c7_201 = arith.constant 7 : index
    %c0_202 = arith.constant 0 : index
    %c0_203 = arith.constant 0 : index
    %241 = vector.load %arg8[%c7_201, %c0_202, %c0_203] : memref<9x64x192xbf16, #tpu.memory_space<vmem>>, vector<1x64x192xbf16>
    %242 = vector.shape_cast %241 : vector<1x64x192xbf16> to vector<64x192xbf16>
    %243 = arith.truncf %240 : vector<22x64xf32> to vector<22x64xbf16>
    %cst_204 = arith.constant dense<0.000000e+00> : vector<22x192xf32>
    %244 = tpu.matmul %243, %242, %cst_204 {dimension_numbers = #tpu.dot_dimension_numbers<[1], [0], [0], [1], [0, 0, 1, 1], [], []>} : vector<22x64xbf16>, vector<64x192xbf16>, vector<22x192xf32> -> vector<22x192xf32>
    %245 = arith.addf %239, %244 : vector<22x192xf32>
    %c80 = arith.constant 80 : index
    %c0_205 = arith.constant 0 : index
    %246 = vector.load %arg17[%c80, %c0_205] : memref<144x64xf32, #tpu.memory_space<vmem>>, vector<22x64xf32>
    %c8_206 = arith.constant 8 : index
    %c0_207 = arith.constant 0 : index
    %c0_208 = arith.constant 0 : index
    %247 = vector.load %arg8[%c8_206, %c0_207, %c0_208] : memref<9x64x192xbf16, #tpu.memory_space<vmem>>, vector<1x64x192xbf16>
    %248 = vector.shape_cast %247 : vector<1x64x192xbf16> to vector<64x192xbf16>
    %249 = arith.truncf %246 : vector<22x64xf32> to vector<22x64xbf16>
    %cst_209 = arith.constant dense<0.000000e+00> : vector<22x192xf32>
    %250 = tpu.matmul %249, %248, %cst_209 {dimension_numbers = #tpu.dot_dimension_numbers<[1], [0], [0], [1], [0, 0, 1, 1], [], []>} : vector<22x64xbf16>, vector<64x192xbf16>, vector<22x192xf32> -> vector<22x192xf32>
    %251 = arith.addf %245, %250 : vector<22x192xf32>
    %c0_210 = arith.constant 0 : index
    %c0_211 = arith.constant 0 : index
    %252 = vector.load %arg9[%c0_210, %c0_211] : memref<1x192xf32, #tpu.memory_space<vmem>>, vector<1x192xf32>
    %253 = vector.broadcast %252 : vector<1x192xf32> to vector<22x192xf32>
    %254 = arith.addf %251, %253 : vector<22x192xf32>
    %cst_212 = arith.constant 0.000000e+00 : f32
    %255 = vector.broadcast %cst_212 : f32 to vector<22x192xf32>
    %256 = arith.maximumf %254, %255 : vector<22x192xf32>
    %257 = vector.broadcast %12 : vector<22x1xf32> to vector<22x192xf32>
    %258 = arith.mulf %256, %257 : vector<22x192xf32>
    %c43_213 = arith.constant 43 : index
    %c0_214 = arith.constant 0 : index
    %259 = vector.load %arg18[%c43_213, %c0_214] : memref<144x192xf32, #tpu.memory_space<vmem>>, vector<22x192xf32>
    tpu.vector_store %arg18[%c43_213, %c0_214], %258 {strides = array<i32>} : memref<144x192xf32, #tpu.memory_space<vmem>>, vector<22x192xf32>,
    %c42_215 = arith.constant 42 : index
    %c0_216 = arith.constant 0 : index
    %260 = vector.load %arg17[%c42_215, %c0_216] : memref<144x64xf32, #tpu.memory_space<vmem>>, vector<22x64xf32>
    %c0_217 = arith.constant 0 : index
    %c0_218 = arith.constant 0 : index
    %c0_219 = arith.constant 0 : index
    %261 = vector.load %arg8[%c0_217, %c0_218, %c0_219] : memref<9x64x192xbf16, #tpu.memory_space<vmem>>, vector<1x64x192xbf16>
    %262 = vector.shape_cast %261 : vector<1x64x192xbf16> to vector<64x192xbf16>
    %263 = arith.truncf %260 : vector<22x64xf32> to vector<22x64xbf16>
    %cst_220 = arith.constant dense<0.000000e+00> : vector<22x192xf32>
    %264 = tpu.matmul %263, %262, %cst_220 {dimension_numbers = #tpu.dot_dimension_numbers<[1], [0], [0], [1], [0, 0, 1, 1], [], []>} : vector<22x64xbf16>, vector<64x192xbf16>, vector<22x192xf32> -> vector<22x192xf32>
    %c7_221 = arith.constant 7 : index
    %c0_222 = arith.constant 0 : index
    %265 = vector.load %arg17[%c7_221, %c0_222] : memref<144x64xf32, #tpu.memory_space<vmem>>, vector<22x64xf32>
    %c1_223 = arith.constant 1 : index
    %c0_224 = arith.constant 0 : index
    %c0_225 = arith.constant 0 : index
    %266 = vector.load %arg8[%c1_223, %c0_224, %c0_225] : memref<9x64x192xbf16, #tpu.memory_space<vmem>>, vector<1x64x192xbf16>
    %267 = vector.shape_cast %266 : vector<1x64x192xbf16> to vector<64x192xbf16>
    %268 = arith.truncf %265 : vector<22x64xf32> to vector<22x64xbf16>
    %cst_226 = arith.constant dense<0.000000e+00> : vector<22x192xf32>
    %269 = tpu.matmul %268, %267, %cst_226 {dimension_numbers = #tpu.dot_dimension_numbers<[1], [0], [0], [1], [0, 0, 1, 1], [], []>} : vector<22x64xbf16>, vector<64x192xbf16>, vector<22x192xf32> -> vector<22x192xf32>
    %270 = arith.addf %264, %269 : vector<22x192xf32>
    %c43_227 = arith.constant 43 : index
    %c0_228 = arith.constant 0 : index
    %271 = vector.load %arg17[%c43_227, %c0_228] : memref<144x64xf32, #tpu.memory_space<vmem>>, vector<22x64xf32>
    %c2_229 = arith.constant 2 : index
    %c0_230 = arith.constant 0 : index
    %c0_231 = arith.constant 0 : index
    %272 = vector.load %arg8[%c2_229, %c0_230, %c0_231] : memref<9x64x192xbf16, #tpu.memory_space<vmem>>, vector<1x64x192xbf16>
    %273 = vector.shape_cast %272 : vector<1x64x192xbf16> to vector<64x192xbf16>
    %274 = arith.truncf %271 : vector<22x64xf32> to vector<22x64xbf16>
    %cst_232 = arith.constant dense<0.000000e+00> : vector<22x192xf32>
    %275 = tpu.matmul %274, %273, %cst_232 {dimension_numbers = #tpu.dot_dimension_numbers<[1], [0], [0], [1], [0, 0, 1, 1], [], []>} : vector<22x64xbf16>, vector<64x192xbf16>, vector<22x192xf32> -> vector<22x192xf32>
    %276 = arith.addf %270, %275 : vector<22x192xf32>
    %c114_233 = arith.constant 114 : index
    %c0_234 = arith.constant 0 : index
    %277 = vector.load %arg17[%c114_233, %c0_234] : memref<144x64xf32, #tpu.memory_space<vmem>>, vector<22x64xf32>
    %c3_235 = arith.constant 3 : index
    %c0_236 = arith.constant 0 : index
    %c0_237 = arith.constant 0 : index
    %278 = vector.load %arg8[%c3_235, %c0_236, %c0_237] : memref<9x64x192xbf16, #tpu.memory_space<vmem>>, vector<1x64x192xbf16>
    %279 = vector.shape_cast %278 : vector<1x64x192xbf16> to vector<64x192xbf16>
    %280 = arith.truncf %277 : vector<22x64xf32> to vector<22x64xbf16>
    %cst_238 = arith.constant dense<0.000000e+00> : vector<22x192xf32>
    %281 = tpu.matmul %280, %279, %cst_238 {dimension_numbers = #tpu.dot_dimension_numbers<[1], [0], [0], [1], [0, 0, 1, 1], [], []>} : vector<22x64xbf16>, vector<64x192xbf16>, vector<22x192xf32> -> vector<22x192xf32>
    %282 = arith.addf %276, %281 : vector<22x192xf32>
    %c79_239 = arith.constant 79 : index
    %c0_240 = arith.constant 0 : index
    %283 = vector.load %arg17[%c79_239, %c0_240] : memref<144x64xf32, #tpu.memory_space<vmem>>, vector<22x64xf32>
    %c4_241 = arith.constant 4 : index
    %c0_242 = arith.constant 0 : index
    %c0_243 = arith.constant 0 : index
    %284 = vector.load %arg8[%c4_241, %c0_242, %c0_243] : memref<9x64x192xbf16, #tpu.memory_space<vmem>>, vector<1x64x192xbf16>
    %285 = vector.shape_cast %284 : vector<1x64x192xbf16> to vector<64x192xbf16>
    %286 = arith.truncf %283 : vector<22x64xf32> to vector<22x64xbf16>
    %cst_244 = arith.constant dense<0.000000e+00> : vector<22x192xf32>
    %287 = tpu.matmul %286, %285, %cst_244 {dimension_numbers = #tpu.dot_dimension_numbers<[1], [0], [0], [1], [0, 0, 1, 1], [], []>} : vector<22x64xbf16>, vector<64x192xbf16>, vector<22x192xf32> -> vector<22x192xf32>
    %288 = arith.addf %282, %287 : vector<22x192xf32>
    %c115_245 = arith.constant 115 : index
    %c0_246 = arith.constant 0 : index
    %289 = vector.load %arg17[%c115_245, %c0_246] : memref<144x64xf32, #tpu.memory_space<vmem>>, vector<22x64xf32>
    %c5_247 = arith.constant 5 : index
    %c0_248 = arith.constant 0 : index
    %c0_249 = arith.constant 0 : index
    %290 = vector.load %arg8[%c5_247, %c0_248, %c0_249] : memref<9x64x192xbf16, #tpu.memory_space<vmem>>, vector<1x64x192xbf16>
    %291 = vector.shape_cast %290 : vector<1x64x192xbf16> to vector<64x192xbf16>
    %292 = arith.truncf %289 : vector<22x64xf32> to vector<22x64xbf16>
    %cst_250 = arith.constant dense<0.000000e+00> : vector<22x192xf32>
    %293 = tpu.matmul %292, %291, %cst_250 {dimension_numbers = #tpu.dot_dimension_numbers<[1], [0], [0], [1], [0, 0, 1, 1], [], []>} : vector<22x64xbf16>, vector<64x192xbf16>, vector<22x192xf32> -> vector<22x192xf32>
    %294 = arith.addf %288, %293 : vector<22x192xf32>
    %c48 = arith.constant 48 : index
    %c0_251 = arith.constant 0 : index
    %295 = vector.load %arg17[%c48, %c0_251] : memref<144x64xf32, #tpu.memory_space<vmem>>, vector<22x64xf32>
    %c6_252 = arith.constant 6 : index
    %c0_253 = arith.constant 0 : index
    %c0_254 = arith.constant 0 : index
    %296 = vector.load %arg8[%c6_252, %c0_253, %c0_254] : memref<9x64x192xbf16, #tpu.memory_space<vmem>>, vector<1x64x192xbf16>
    %297 = vector.shape_cast %296 : vector<1x64x192xbf16> to vector<64x192xbf16>
    %298 = arith.truncf %295 : vector<22x64xf32> to vector<22x64xbf16>
    %cst_255 = arith.constant dense<0.000000e+00> : vector<22x192xf32>
    %299 = tpu.matmul %298, %297, %cst_255 {dimension_numbers = #tpu.dot_dimension_numbers<[1], [0], [0], [1], [0, 0, 1, 1], [], []>} : vector<22x64xbf16>, vector<64x192xbf16>, vector<22x192xf32> -> vector<22x192xf32>
    %300 = arith.addf %294, %299 : vector<22x192xf32>
    %c13 = arith.constant 13 : index
    %c0_256 = arith.constant 0 : index
    %301 = vector.load %arg17[%c13, %c0_256] : memref<144x64xf32, #tpu.memory_space<vmem>>, vector<22x64xf32>
    %c7_257 = arith.constant 7 : index
    %c0_258 = arith.constant 0 : index
    %c0_259 = arith.constant 0 : index
    %302 = vector.load %arg8[%c7_257, %c0_258, %c0_259] : memref<9x64x192xbf16, #tpu.memory_space<vmem>>, vector<1x64x192xbf16>
    %303 = vector.shape_cast %302 : vector<1x64x192xbf16> to vector<64x192xbf16>
    %304 = arith.truncf %301 : vector<22x64xf32> to vector<22x64xbf16>
    %cst_260 = arith.constant dense<0.000000e+00> : vector<22x192xf32>
    %305 = tpu.matmul %304, %303, %cst_260 {dimension_numbers = #tpu.dot_dimension_numbers<[1], [0], [0], [1], [0, 0, 1, 1], [], []>} : vector<22x64xbf16>, vector<64x192xbf16>, vector<22x192xf32> -> vector<22x192xf32>
    %306 = arith.addf %300, %305 : vector<22x192xf32>
    %c49 = arith.constant 49 : index
    %c0_261 = arith.constant 0 : index
    %307 = vector.load %arg17[%c49, %c0_261] : memref<144x64xf32, #tpu.memory_space<vmem>>, vector<22x64xf32>
    %c8_262 = arith.constant 8 : index
    %c0_263 = arith.constant 0 : index
    %c0_264 = arith.constant 0 : index
    %308 = vector.load %arg8[%c8_262, %c0_263, %c0_264] : memref<9x64x192xbf16, #tpu.memory_space<vmem>>, vector<1x64x192xbf16>
    %309 = vector.shape_cast %308 : vector<1x64x192xbf16> to vector<64x192xbf16>
    %310 = arith.truncf %307 : vector<22x64xf32> to vector<22x64xbf16>
    %cst_265 = arith.constant dense<0.000000e+00> : vector<22x192xf32>
    %311 = tpu.matmul %310, %309, %cst_265 {dimension_numbers = #tpu.dot_dimension_numbers<[1], [0], [0], [1], [0, 0, 1, 1], [], []>} : vector<22x64xbf16>, vector<64x192xbf16>, vector<22x192xf32> -> vector<22x192xf32>
    %312 = arith.addf %306, %311 : vector<22x192xf32>
    %c0_266 = arith.constant 0 : index
    %c0_267 = arith.constant 0 : index
    %313 = vector.load %arg9[%c0_266, %c0_267] : memref<1x192xf32, #tpu.memory_space<vmem>>, vector<1x192xf32>
    %314 = vector.broadcast %313 : vector<1x192xf32> to vector<22x192xf32>
    %315 = arith.addf %312, %314 : vector<22x192xf32>
    %cst_268 = arith.constant 0.000000e+00 : f32
    %316 = vector.broadcast %cst_268 : f32 to vector<22x192xf32>
    %317 = arith.maximumf %315, %316 : vector<22x192xf32>
    %318 = vector.broadcast %12 : vector<22x1xf32> to vector<22x192xf32>
    %319 = arith.mulf %317, %318 : vector<22x192xf32>
    %c79_269 = arith.constant 79 : index
    %c0_270 = arith.constant 0 : index
    %320 = vector.load %arg18[%c79_269, %c0_270] : memref<144x192xf32, #tpu.memory_space<vmem>>, vector<22x192xf32>
    tpu.vector_store %arg18[%c79_269, %c0_270], %319 {strides = array<i32>} : memref<144x192xf32, #tpu.memory_space<vmem>>, vector<22x192xf32>,
    %c7_271 = arith.constant 7 : index
    %c0_272 = arith.constant 0 : index
    %321 = vector.load %arg17[%c7_271, %c0_272] : memref<144x64xf32, #tpu.memory_space<vmem>>, vector<22x64xf32>
    %c0_273 = arith.constant 0 : index
    %c0_274 = arith.constant 0 : index
    %c0_275 = arith.constant 0 : index
    %322 = vector.load %arg8[%c0_273, %c0_274, %c0_275] : memref<9x64x192xbf16, #tpu.memory_space<vmem>>, vector<1x64x192xbf16>
    %323 = vector.shape_cast %322 : vector<1x64x192xbf16> to vector<64x192xbf16>
    %324 = arith.truncf %321 : vector<22x64xf32> to vector<22x64xbf16>
    %cst_276 = arith.constant dense<0.000000e+00> : vector<22x192xf32>
    %325 = tpu.matmul %324, %323, %cst_276 {dimension_numbers = #tpu.dot_dimension_numbers<[1], [0], [0], [1], [0, 0, 1, 1], [], []>} : vector<22x64xbf16>, vector<64x192xbf16>, vector<22x192xf32> -> vector<22x192xf32>
    %c43_277 = arith.constant 43 : index
    %c0_278 = arith.constant 0 : index
    %326 = vector.load %arg17[%c43_277, %c0_278] : memref<144x64xf32, #tpu.memory_space<vmem>>, vector<22x64xf32>
    %c1_279 = arith.constant 1 : index
    %c0_280 = arith.constant 0 : index
    %c0_281 = arith.constant 0 : index
    %327 = vector.load %arg8[%c1_279, %c0_280, %c0_281] : memref<9x64x192xbf16, #tpu.memory_space<vmem>>, vector<1x64x192xbf16>
    %328 = vector.shape_cast %327 : vector<1x64x192xbf16> to vector<64x192xbf16>
    %329 = arith.truncf %326 : vector<22x64xf32> to vector<22x64xbf16>
    %cst_282 = arith.constant dense<0.000000e+00> : vector<22x192xf32>
    %330 = tpu.matmul %329, %328, %cst_282 {dimension_numbers = #tpu.dot_dimension_numbers<[1], [0], [0], [1], [0, 0, 1, 1], [], []>} : vector<22x64xbf16>, vector<64x192xbf16>, vector<22x192xf32> -> vector<22x192xf32>
    %331 = arith.addf %325, %330 : vector<22x192xf32>
    %c8_283 = arith.constant 8 : index
    %c0_284 = arith.constant 0 : index
    %332 = vector.load %arg17[%c8_283, %c0_284] : memref<144x64xf32, #tpu.memory_space<vmem>>, vector<22x64xf32>
    %c2_285 = arith.constant 2 : index
    %c0_286 = arith.constant 0 : index
    %c0_287 = arith.constant 0 : index
    %333 = vector.load %arg8[%c2_285, %c0_286, %c0_287] : memref<9x64x192xbf16, #tpu.memory_space<vmem>>, vector<1x64x192xbf16>
    %334 = vector.shape_cast %333 : vector<1x64x192xbf16> to vector<64x192xbf16>
    %335 = arith.truncf %332 : vector<22x64xf32> to vector<22x64xbf16>
    %cst_288 = arith.constant dense<0.000000e+00> : vector<22x192xf32>
    %336 = tpu.matmul %335, %334, %cst_288 {dimension_numbers = #tpu.dot_dimension_numbers<[1], [0], [0], [1], [0, 0, 1, 1], [], []>} : vector<22x64xbf16>, vector<64x192xbf16>, vector<22x192xf32> -> vector<22x192xf32>
    %337 = arith.addf %331, %336 : vector<22x192xf32>
    %c79_289 = arith.constant 79 : index
    %c0_290 = arith.constant 0 : index
    %338 = vector.load %arg17[%c79_289, %c0_290] : memref<144x64xf32, #tpu.memory_space<vmem>>, vector<22x64xf32>
    %c3_291 = arith.constant 3 : index
    %c0_292 = arith.constant 0 : index
    %c0_293 = arith.constant 0 : index
    %339 = vector.load %arg8[%c3_291, %c0_292, %c0_293] : memref<9x64x192xbf16, #tpu.memory_space<vmem>>, vector<1x64x192xbf16>
    %340 = vector.shape_cast %339 : vector<1x64x192xbf16> to vector<64x192xbf16>
    %341 = arith.truncf %338 : vector<22x64xf32> to vector<22x64xbf16>
    %cst_294 = arith.constant dense<0.000000e+00> : vector<22x192xf32>
    %342 = tpu.matmul %341, %340, %cst_294 {dimension_numbers = #tpu.dot_dimension_numbers<[1], [0], [0], [1], [0, 0, 1, 1], [], []>} : vector<22x64xbf16>, vector<64x192xbf16>, vector<22x192xf32> -> vector<22x192xf32>
    %343 = arith.addf %337, %342 : vector<22x192xf32>
    %c115_295 = arith.constant 115 : index
    %c0_296 = arith.constant 0 : index
    %344 = vector.load %arg17[%c115_295, %c0_296] : memref<144x64xf32, #tpu.memory_space<vmem>>, vector<22x64xf32>
    %c4_297 = arith.constant 4 : index
    %c0_298 = arith.constant 0 : index
    %c0_299 = arith.constant 0 : index
    %345 = vector.load %arg8[%c4_297, %c0_298, %c0_299] : memref<9x64x192xbf16, #tpu.memory_space<vmem>>, vector<1x64x192xbf16>
    %346 = vector.shape_cast %345 : vector<1x64x192xbf16> to vector<64x192xbf16>
    %347 = arith.truncf %344 : vector<22x64xf32> to vector<22x64xbf16>
    %cst_300 = arith.constant dense<0.000000e+00> : vector<22x192xf32>
    %348 = tpu.matmul %347, %346, %cst_300 {dimension_numbers = #tpu.dot_dimension_numbers<[1], [0], [0], [1], [0, 0, 1, 1], [], []>} : vector<22x64xbf16>, vector<64x192xbf16>, vector<22x192xf32> -> vector<22x192xf32>
    %349 = arith.addf %343, %348 : vector<22x192xf32>
    %c80_301 = arith.constant 80 : index
    %c0_302 = arith.constant 0 : index
    %350 = vector.load %arg17[%c80_301, %c0_302] : memref<144x64xf32, #tpu.memory_space<vmem>>, vector<22x64xf32>
    %c5_303 = arith.constant 5 : index
    %c0_304 = arith.constant 0 : index
    %c0_305 = arith.constant 0 : index
    %351 = vector.load %arg8[%c5_303, %c0_304, %c0_305] : memref<9x64x192xbf16, #tpu.memory_space<vmem>>, vector<1x64x192xbf16>
    %352 = vector.shape_cast %351 : vector<1x64x192xbf16> to vector<64x192xbf16>
    %353 = arith.truncf %350 : vector<22x64xf32> to vector<22x64xbf16>
    %cst_306 = arith.constant dense<0.000000e+00> : vector<22x192xf32>
    %354 = tpu.matmul %353, %352, %cst_306 {dimension_numbers = #tpu.dot_dimension_numbers<[1], [0], [0], [1], [0, 0, 1, 1], [], []>} : vector<22x64xbf16>, vector<64x192xbf16>, vector<22x192xf32> -> vector<22x192xf32>
    %355 = arith.addf %349, %354 : vector<22x192xf32>
    %c13_307 = arith.constant 13 : index
    %c0_308 = arith.constant 0 : index
    %356 = vector.load %arg17[%c13_307, %c0_308] : memref<144x64xf32, #tpu.memory_space<vmem>>, vector<22x64xf32>
    %c6_309 = arith.constant 6 : index
    %c0_310 = arith.constant 0 : index
    %c0_311 = arith.constant 0 : index
    %357 = vector.load %arg8[%c6_309, %c0_310, %c0_311] : memref<9x64x192xbf16, #tpu.memory_space<vmem>>, vector<1x64x192xbf16>
    %358 = vector.shape_cast %357 : vector<1x64x192xbf16> to vector<64x192xbf16>
    %359 = arith.truncf %356 : vector<22x64xf32> to vector<22x64xbf16>
    %cst_312 = arith.constant dense<0.000000e+00> : vector<22x192xf32>
    %360 = tpu.matmul %359, %358, %cst_312 {dimension_numbers = #tpu.dot_dimension_numbers<[1], [0], [0], [1], [0, 0, 1, 1], [], []>} : vector<22x64xbf16>, vector<64x192xbf16>, vector<22x192xf32> -> vector<22x192xf32>
    %361 = arith.addf %355, %360 : vector<22x192xf32>
    %c49_313 = arith.constant 49 : index
    %c0_314 = arith.constant 0 : index
    %362 = vector.load %arg17[%c49_313, %c0_314] : memref<144x64xf32, #tpu.memory_space<vmem>>, vector<22x64xf32>
    %c7_315 = arith.constant 7 : index
    %c0_316 = arith.constant 0 : index
    %c0_317 = arith.constant 0 : index
    %363 = vector.load %arg8[%c7_315, %c0_316, %c0_317] : memref<9x64x192xbf16, #tpu.memory_space<vmem>>, vector<1x64x192xbf16>
    %364 = vector.shape_cast %363 : vector<1x64x192xbf16> to vector<64x192xbf16>
    %365 = arith.truncf %362 : vector<22x64xf32> to vector<22x64xbf16>
    %cst_318 = arith.constant dense<0.000000e+00> : vector<22x192xf32>
    %366 = tpu.matmul %365, %364, %cst_318 {dimension_numbers = #tpu.dot_dimension_numbers<[1], [0], [0], [1], [0, 0, 1, 1], [], []>} : vector<22x64xbf16>, vector<64x192xbf16>, vector<22x192xf32> -> vector<22x192xf32>
    %367 = arith.addf %361, %366 : vector<22x192xf32>
    %c14 = arith.constant 14 : index
    %c0_319 = arith.constant 0 : index
    %368 = vector.load %arg17[%c14, %c0_319] : memref<144x64xf32, #tpu.memory_space<vmem>>, vector<22x64xf32>
    %c8_320 = arith.constant 8 : index
    %c0_321 = arith.constant 0 : index
    %c0_322 = arith.constant 0 : index
    %369 = vector.load %arg8[%c8_320, %c0_321, %c0_322] : memref<9x64x192xbf16, #tpu.memory_space<vmem>>, vector<1x64x192xbf16>
    %370 = vector.shape_cast %369 : vector<1x64x192xbf16> to vector<64x192xbf16>
    %371 = arith.truncf %368 : vector<22x64xf32> to vector<22x64xbf16>
    %cst_323 = arith.constant dense<0.000000e+00> : vector<22x192xf32>
    %372 = tpu.matmul %371, %370, %cst_323 {dimension_numbers = #tpu.dot_dimension_numbers<[1], [0], [0], [1], [0, 0, 1, 1], [], []>} : vector<22x64xbf16>, vector<64x192xbf16>, vector<22x192xf32> -> vector<22x192xf32>
    %373 = arith.addf %367, %372 : vector<22x192xf32>
    %c0_324 = arith.constant 0 : index
    %c0_325 = arith.constant 0 : index
    %374 = vector.load %arg9[%c0_324, %c0_325] : memref<1x192xf32, #tpu.memory_space<vmem>>, vector<1x192xf32>
    %375 = vector.broadcast %374 : vector<1x192xf32> to vector<22x192xf32>
    %376 = arith.addf %373, %375 : vector<22x192xf32>
    %cst_326 = arith.constant 0.000000e+00 : f32
    %377 = vector.broadcast %cst_326 : f32 to vector<22x192xf32>
    %378 = arith.maximumf %376, %377 : vector<22x192xf32>
    %379 = vector.broadcast %12 : vector<22x1xf32> to vector<22x192xf32>
    %380 = arith.mulf %378, %379 : vector<22x192xf32>
    %c115_327 = arith.constant 115 : index
    %c0_328 = arith.constant 0 : index
    %381 = vector.load %arg18[%c115_327, %c0_328] : memref<144x192xf32, #tpu.memory_space<vmem>>, vector<22x192xf32>
    tpu.vector_store %arg18[%c115_327, %c0_328], %380 {strides = array<i32>} : memref<144x192xf32, #tpu.memory_space<vmem>>, vector<22x192xf32>,
    %c108_329 = arith.constant 108 : index
    %c0_330 = arith.constant 0 : index
    %382 = vector.load %arg18[%c108_329, %c0_330] : memref<144x192xf32, #tpu.memory_space<vmem>>, vector<22x192xf32>
    %c73_331 = arith.constant 73 : index
    %c0_332 = arith.constant 0 : index
    %383 = vector.load %arg18[%c73_331, %c0_332] : memref<144x192xf32, #tpu.memory_space<vmem>>, vector<22x192xf32>
    %384 = arith.maximumf %382, %383 : vector<22x192xf32>
    %c109_333 = arith.constant 109 : index
    %c0_334 = arith.constant 0 : index
    %385 = vector.load %arg18[%c109_333, %c0_334] : memref<144x192xf32, #tpu.memory_space<vmem>>, vector<22x192xf32>
    %386 = arith.maximumf %384, %385 : vector<22x192xf32>
    %c42_335 = arith.constant 42 : index
    %c0_336 = arith.constant 0 : index
    %387 = vector.load %arg18[%c42_335, %c0_336] : memref<144x192xf32, #tpu.memory_space<vmem>>, vector<22x192xf32>
    %388 = arith.maximumf %386, %387 : vector<22x192xf32>
    %c7_337 = arith.constant 7 : index
    %c0_338 = arith.constant 0 : index
    %389 = vector.load %arg18[%c7_337, %c0_338] : memref<144x192xf32, #tpu.memory_space<vmem>>, vector<22x192xf32>
    %390 = arith.maximumf %388, %389 : vector<22x192xf32>
    %c43_339 = arith.constant 43 : index
    %c0_340 = arith.constant 0 : index
    %391 = vector.load %arg18[%c43_339, %c0_340] : memref<144x192xf32, #tpu.memory_space<vmem>>, vector<22x192xf32>
    %392 = arith.maximumf %390, %391 : vector<22x192xf32>
    %c114_341 = arith.constant 114 : index
    %c0_342 = arith.constant 0 : index
    %393 = vector.load %arg18[%c114_341, %c0_342] : memref<144x192xf32, #tpu.memory_space<vmem>>, vector<22x192xf32>
    %394 = arith.maximumf %392, %393 : vector<22x192xf32>
    %c79_343 = arith.constant 79 : index
    %c0_344 = arith.constant 0 : index
    %395 = vector.load %arg18[%c79_343, %c0_344] : memref<144x192xf32, #tpu.memory_space<vmem>>, vector<22x192xf32>
    %396 = arith.maximumf %394, %395 : vector<22x192xf32>
    %c115_345 = arith.constant 115 : index
    %c0_346 = arith.constant 0 : index
    %397 = vector.load %arg18[%c115_345, %c0_346] : memref<144x192xf32, #tpu.memory_space<vmem>>, vector<22x192xf32>
    %398 = arith.maximumf %396, %397 : vector<22x192xf32>
    %399 = vector.broadcast %12 : vector<22x1xf32> to vector<22x192xf32>
    %400 = arith.mulf %398, %399 : vector<22x192xf32>
    %c7_347 = arith.constant 7 : index
    %c0_348 = arith.constant 0 : index
    %401 = vector.load %arg19[%c7_347, %c0_348] : memref<36x192xf32, #tpu.memory_space<vmem>>, vector<22x192xf32>
    tpu.vector_store %arg19[%c7_347, %c0_348], %400 {strides = array<i32>} : memref<36x192xf32, #tpu.memory_space<vmem>>, vector<22x192xf32>,
    %c0_349 = arith.constant 0 : index
    %c0_350 = arith.constant 0 : index
    %402 = vector.load %arg10[%c0_349, %c0_350] : memref<192x192xbf16, #tpu.memory_space<vmem>>, vector<192x192xbf16>
    %403 = arith.truncf %400 : vector<22x192xf32> to vector<22x192xbf16>
    %cst_351 = arith.constant dense<0.000000e+00> : vector<22x192xf32>
    %404 = tpu.matmul %403, %402, %cst_351 {dimension_numbers = #tpu.dot_dimension_numbers<[1], [0], [0], [1], [0, 0, 1, 1], [], []>} : vector<22x192xbf16>, vector<192x192xbf16>, vector<22x192xf32> -> vector<22x192xf32>
    %cst_352 = arith.constant 0.000000e+00 : f32
    %405 = vector.broadcast %cst_352 : f32 to vector<22x192xf32>
    %406 = arith.maximumf %404, %405 : vector<22x192xf32>
    %407 = vector.extract_strided_slice %406 {offsets = [0, 0], sizes = [22, 64], strides = [1, 1]} : vector<22x192xf32> to vector<22x64xf32>
    %c0_353 = arith.constant 0 : index
    %c0_354 = arith.constant 0 : index
    %408 = vector.load %arg23[%c0_353, %c0_354] : memref<22x256xf32, #tpu.memory_space<vmem>>, vector<22x64xf32>
    tpu.vector_store %arg23[%c0_353, %c0_354], %407 {strides = array<i32>} : memref<22x256xf32, #tpu.memory_space<vmem>>, vector<22x64xf32>,
    %409 = vector.extract_strided_slice %406 {offsets = [0, 64], sizes = [22, 64], strides = [1, 1]} : vector<22x192xf32> to vector<22x64xf32>
    %410 = vector.broadcast %12 : vector<22x1xf32> to vector<22x64xf32>
    %411 = arith.mulf %409, %410 : vector<22x64xf32>
    %c7_355 = arith.constant 7 : index
    %c0_356 = arith.constant 0 : index
    %412 = vector.load %arg20[%c7_355, %c0_356] : memref<36x64xf32, #tpu.memory_space<vmem>>, vector<22x64xf32>
    tpu.vector_store %arg20[%c7_355, %c0_356], %411 {strides = array<i32>} : memref<36x64xf32, #tpu.memory_space<vmem>>, vector<22x64xf32>,
    %413 = vector.extract_strided_slice %406 {offsets = [0, 128], sizes = [22, 64], strides = [1, 1]} : vector<22x192xf32> to vector<22x64xf32>
    %414 = vector.broadcast %12 : vector<22x1xf32> to vector<22x64xf32>
    %415 = arith.mulf %413, %414 : vector<22x64xf32>
    %c7_357 = arith.constant 7 : index
    %c0_358 = arith.constant 0 : index
    %416 = vector.load %arg21[%c7_357, %c0_358] : memref<36x64xf32, #tpu.memory_space<vmem>>, vector<22x64xf32>
    tpu.vector_store %arg21[%c7_357, %c0_358], %415 {strides = array<i32>} : memref<36x64xf32, #tpu.memory_space<vmem>>, vector<22x64xf32>,
    %c0_359 = arith.constant 0 : index
    %c0_360 = arith.constant 0 : index
    %417 = vector.load %arg19[%c0_359, %c0_360] : memref<36x192xf32, #tpu.memory_space<vmem>>, vector<22x192xf32>
    %c1_361 = arith.constant 1 : index
    %c0_362 = arith.constant 0 : index
    %418 = vector.load %arg19[%c1_361, %c0_362] : memref<36x192xf32, #tpu.memory_space<vmem>>, vector<22x192xf32>
    %419 = arith.addf %417, %418 : vector<22x192xf32>
    %c2_363 = arith.constant 2 : index
    %c0_364 = arith.constant 0 : index
    %420 = vector.load %arg19[%c2_363, %c0_364] : memref<36x192xf32, #tpu.memory_space<vmem>>, vector<22x192xf32>
    %421 = arith.addf %419, %420 : vector<22x192xf32>
    %c6_365 = arith.constant 6 : index
    %c0_366 = arith.constant 0 : index
    %422 = vector.load %arg19[%c6_365, %c0_366] : memref<36x192xf32, #tpu.memory_space<vmem>>, vector<22x192xf32>
    %423 = arith.addf %421, %422 : vector<22x192xf32>
    %c7_367 = arith.constant 7 : index
    %c0_368 = arith.constant 0 : index
    %424 = vector.load %arg19[%c7_367, %c0_368] : memref<36x192xf32, #tpu.memory_space<vmem>>, vector<22x192xf32>
    %425 = arith.addf %423, %424 : vector<22x192xf32>
    %c8_369 = arith.constant 8 : index
    %c0_370 = arith.constant 0 : index
    %426 = vector.load %arg19[%c8_369, %c0_370] : memref<36x192xf32, #tpu.memory_space<vmem>>, vector<22x192xf32>
    %427 = arith.addf %425, %426 : vector<22x192xf32>
    %c12 = arith.constant 12 : index
    %c0_371 = arith.constant 0 : index
    %428 = vector.load %arg19[%c12, %c0_371] : memref<36x192xf32, #tpu.memory_space<vmem>>, vector<22x192xf32>
    %429 = arith.addf %427, %428 : vector<22x192xf32>
    %c13_372 = arith.constant 13 : index
    %c0_373 = arith.constant 0 : index
    %430 = vector.load %arg19[%c13_372, %c0_373] : memref<36x192xf32, #tpu.memory_space<vmem>>, vector<22x192xf32>
    %431 = arith.addf %429, %430 : vector<22x192xf32>
    %c14_374 = arith.constant 14 : index
    %c0_375 = arith.constant 0 : index
    %432 = vector.load %arg19[%c14_374, %c0_375] : memref<36x192xf32, #tpu.memory_space<vmem>>, vector<22x192xf32>
    %433 = arith.addf %431, %432 : vector<22x192xf32>
    %cst_376 = arith.constant 0.111111112 : f32
    %434 = vector.broadcast %cst_376 : f32 to vector<22x192xf32>
    %435 = arith.mulf %433, %434 : vector<22x192xf32>
    %c0_377 = arith.constant 0 : index
    %c0_378 = arith.constant 0 : index
    %436 = vector.load %arg11[%c0_377, %c0_378] : memref<192x32xbf16, #tpu.memory_space<vmem>>, vector<192x32xbf16>
    %437 = arith.truncf %435 : vector<22x192xf32> to vector<22x192xbf16>
    %cst_379 = arith.constant dense<0.000000e+00> : vector<22x32xf32>
    %438 = tpu.matmul %437, %436, %cst_379 {dimension_numbers = #tpu.dot_dimension_numbers<[1], [0], [0], [1], [0, 0, 1, 1], [], []>} : vector<22x192xbf16>, vector<192x32xbf16>, vector<22x32xf32> -> vector<22x32xf32>
    %cst_380 = arith.constant 0.000000e+00 : f32
    %439 = vector.broadcast %cst_380 : f32 to vector<22x32xf32>
    %440 = arith.maximumf %438, %439 : vector<22x32xf32>
    %c0_381 = arith.constant 0 : index
    %c224 = arith.constant 224 : index
    %441 = vector.load %arg23[%c0_381, %c224] : memref<22x256xf32, #tpu.memory_space<vmem>>, vector<22x32xf32>
    tpu.vector_store %arg23[%c0_381, %c224], %440 {strides = array<i32>} : memref<22x256xf32, #tpu.memory_space<vmem>>, vector<22x32xf32>,
    %c0_382 = arith.constant 0 : index
    %c0_383 = arith.constant 0 : index
    %442 = vector.load %arg20[%c0_382, %c0_383] : memref<36x64xf32, #tpu.memory_space<vmem>>, vector<22x64xf32>
    %c0_384 = arith.constant 0 : index
    %c0_385 = arith.constant 0 : index
    %c0_386 = arith.constant 0 : index
    %443 = vector.load %arg12[%c0_384, %c0_385, %c0_386] : memref<9x64x64xbf16, #tpu.memory_space<vmem>>, vector<1x64x64xbf16>
    %444 = vector.shape_cast %443 : vector<1x64x64xbf16> to vector<64x64xbf16>
    %445 = arith.truncf %442 : vector<22x64xf32> to vector<22x64xbf16>
    %cst_387 = arith.constant dense<0.000000e+00> : vector<22x64xf32>
    %446 = tpu.matmul %445, %444, %cst_387 {dimension_numbers = #tpu.dot_dimension_numbers<[1], [0], [0], [1], [0, 0, 1, 1], [], []>} : vector<22x64xbf16>, vector<64x64xbf16>, vector<22x64xf32> -> vector<22x64xf32>
    %c1_388 = arith.constant 1 : index
    %c0_389 = arith.constant 0 : index
    %447 = vector.load %arg20[%c1_388, %c0_389] : memref<36x64xf32, #tpu.memory_space<vmem>>, vector<22x64xf32>
    %c1_390 = arith.constant 1 : index
    %c0_391 = arith.constant 0 : index
    %c0_392 = arith.constant 0 : index
    %448 = vector.load %arg12[%c1_390, %c0_391, %c0_392] : memref<9x64x64xbf16, #tpu.memory_space<vmem>>, vector<1x64x64xbf16>
    %449 = vector.shape_cast %448 : vector<1x64x64xbf16> to vector<64x64xbf16>
    %450 = arith.truncf %447 : vector<22x64xf32> to vector<22x64xbf16>
    %cst_393 = arith.constant dense<0.000000e+00> : vector<22x64xf32>
    %451 = tpu.matmul %450, %449, %cst_393 {dimension_numbers = #tpu.dot_dimension_numbers<[1], [0], [0], [1], [0, 0, 1, 1], [], []>} : vector<22x64xbf16>, vector<64x64xbf16>, vector<22x64xf32> -> vector<22x64xf32>
    %452 = arith.addf %446, %451 : vector<22x64xf32>
    %c2_394 = arith.constant 2 : index
    %c0_395 = arith.constant 0 : index
    %453 = vector.load %arg20[%c2_394, %c0_395] : memref<36x64xf32, #tpu.memory_space<vmem>>, vector<22x64xf32>
    %c2_396 = arith.constant 2 : index
    %c0_397 = arith.constant 0 : index
    %c0_398 = arith.constant 0 : index
    %454 = vector.load %arg12[%c2_396, %c0_397, %c0_398] : memref<9x64x64xbf16, #tpu.memory_space<vmem>>, vector<1x64x64xbf16>
    %455 = vector.shape_cast %454 : vector<1x64x64xbf16> to vector<64x64xbf16>
    %456 = arith.truncf %453 : vector<22x64xf32> to vector<22x64xbf16>
    %cst_399 = arith.constant dense<0.000000e+00> : vector<22x64xf32>
    %457 = tpu.matmul %456, %455, %cst_399 {dimension_numbers = #tpu.dot_dimension_numbers<[1], [0], [0], [1], [0, 0, 1, 1], [], []>} : vector<22x64xbf16>, vector<64x64xbf16>, vector<22x64xf32> -> vector<22x64xf32>
    %458 = arith.addf %452, %457 : vector<22x64xf32>
    %c6_400 = arith.constant 6 : index
    %c0_401 = arith.constant 0 : index
    %459 = vector.load %arg20[%c6_400, %c0_401] : memref<36x64xf32, #tpu.memory_space<vmem>>, vector<22x64xf32>
    %c3_402 = arith.constant 3 : index
    %c0_403 = arith.constant 0 : index
    %c0_404 = arith.constant 0 : index
    %460 = vector.load %arg12[%c3_402, %c0_403, %c0_404] : memref<9x64x64xbf16, #tpu.memory_space<vmem>>, vector<1x64x64xbf16>
    %461 = vector.shape_cast %460 : vector<1x64x64xbf16> to vector<64x64xbf16>
    %462 = arith.truncf %459 : vector<22x64xf32> to vector<22x64xbf16>
    %cst_405 = arith.constant dense<0.000000e+00> : vector<22x64xf32>
    %463 = tpu.matmul %462, %461, %cst_405 {dimension_numbers = #tpu.dot_dimension_numbers<[1], [0], [0], [1], [0, 0, 1, 1], [], []>} : vector<22x64xbf16>, vector<64x64xbf16>, vector<22x64xf32> -> vector<22x64xf32>
    %464 = arith.addf %458, %463 : vector<22x64xf32>
    %c7_406 = arith.constant 7 : index
    %c0_407 = arith.constant 0 : index
    %465 = vector.load %arg20[%c7_406, %c0_407] : memref<36x64xf32, #tpu.memory_space<vmem>>, vector<22x64xf32>
    %c4_408 = arith.constant 4 : index
    %c0_409 = arith.constant 0 : index
    %c0_410 = arith.constant 0 : index
    %466 = vector.load %arg12[%c4_408, %c0_409, %c0_410] : memref<9x64x64xbf16, #tpu.memory_space<vmem>>, vector<1x64x64xbf16>
    %467 = vector.shape_cast %466 : vector<1x64x64xbf16> to vector<64x64xbf16>
    %468 = arith.truncf %465 : vector<22x64xf32> to vector<22x64xbf16>
    %cst_411 = arith.constant dense<0.000000e+00> : vector<22x64xf32>
    %469 = tpu.matmul %468, %467, %cst_411 {dimension_numbers = #tpu.dot_dimension_numbers<[1], [0], [0], [1], [0, 0, 1, 1], [], []>} : vector<22x64xbf16>, vector<64x64xbf16>, vector<22x64xf32> -> vector<22x64xf32>
    %470 = arith.addf %464, %469 : vector<22x64xf32>
    %c8_412 = arith.constant 8 : index
    %c0_413 = arith.constant 0 : index
    %471 = vector.load %arg20[%c8_412, %c0_413] : memref<36x64xf32, #tpu.memory_space<vmem>>, vector<22x64xf32>
    %c5_414 = arith.constant 5 : index
    %c0_415 = arith.constant 0 : index
    %c0_416 = arith.constant 0 : index
    %472 = vector.load %arg12[%c5_414, %c0_415, %c0_416] : memref<9x64x64xbf16, #tpu.memory_space<vmem>>, vector<1x64x64xbf16>
    %473 = vector.shape_cast %472 : vector<1x64x64xbf16> to vector<64x64xbf16>
    %474 = arith.truncf %471 : vector<22x64xf32> to vector<22x64xbf16>
    %cst_417 = arith.constant dense<0.000000e+00> : vector<22x64xf32>
    %475 = tpu.matmul %474, %473, %cst_417 {dimension_numbers = #tpu.dot_dimension_numbers<[1], [0], [0], [1], [0, 0, 1, 1], [], []>} : vector<22x64xbf16>, vector<64x64xbf16>, vector<22x64xf32> -> vector<22x64xf32>
    %476 = arith.addf %470, %475 : vector<22x64xf32>
    %c12_418 = arith.constant 12 : index
    %c0_419 = arith.constant 0 : index
    %477 = vector.load %arg20[%c12_418, %c0_419] : memref<36x64xf32, #tpu.memory_space<vmem>>, vector<22x64xf32>
    %c6_420 = arith.constant 6 : index
    %c0_421 = arith.constant 0 : index
    %c0_422 = arith.constant 0 : index
    %478 = vector.load %arg12[%c6_420, %c0_421, %c0_422] : memref<9x64x64xbf16, #tpu.memory_space<vmem>>, vector<1x64x64xbf16>
    %479 = vector.shape_cast %478 : vector<1x64x64xbf16> to vector<64x64xbf16>
    %480 = arith.truncf %477 : vector<22x64xf32> to vector<22x64xbf16>
    %cst_423 = arith.constant dense<0.000000e+00> : vector<22x64xf32>
    %481 = tpu.matmul %480, %479, %cst_423 {dimension_numbers = #tpu.dot_dimension_numbers<[1], [0], [0], [1], [0, 0, 1, 1], [], []>} : vector<22x64xbf16>, vector<64x64xbf16>, vector<22x64xf32> -> vector<22x64xf32>
    %482 = arith.addf %476, %481 : vector<22x64xf32>
    %c13_424 = arith.constant 13 : index
    %c0_425 = arith.constant 0 : index
    %483 = vector.load %arg20[%c13_424, %c0_425] : memref<36x64xf32, #tpu.memory_space<vmem>>, vector<22x64xf32>
    %c7_426 = arith.constant 7 : index
    %c0_427 = arith.constant 0 : index
    %c0_428 = arith.constant 0 : index
    %484 = vector.load %arg12[%c7_426, %c0_427, %c0_428] : memref<9x64x64xbf16, #tpu.memory_space<vmem>>, vector<1x64x64xbf16>
    %485 = vector.shape_cast %484 : vector<1x64x64xbf16> to vector<64x64xbf16>
    %486 = arith.truncf %483 : vector<22x64xf32> to vector<22x64xbf16>
    %cst_429 = arith.constant dense<0.000000e+00> : vector<22x64xf32>
    %487 = tpu.matmul %486, %485, %cst_429 {dimension_numbers = #tpu.dot_dimension_numbers<[1], [0], [0], [1], [0, 0, 1, 1], [], []>} : vector<22x64xbf16>, vector<64x64xbf16>, vector<22x64xf32> -> vector<22x64xf32>
    %488 = arith.addf %482, %487 : vector<22x64xf32>
    %c14_430 = arith.constant 14 : index
    %c0_431 = arith.constant 0 : index
    %489 = vector.load %arg20[%c14_430, %c0_431] : memref<36x64xf32, #tpu.memory_space<vmem>>, vector<22x64xf32>
    %c8_432 = arith.constant 8 : index
    %c0_433 = arith.constant 0 : index
    %c0_434 = arith.constant 0 : index
    %490 = vector.load %arg12[%c8_432, %c0_433, %c0_434] : memref<9x64x64xbf16, #tpu.memory_space<vmem>>, vector<1x64x64xbf16>
    %491 = vector.shape_cast %490 : vector<1x64x64xbf16> to vector<64x64xbf16>
    %492 = arith.truncf %489 : vector<22x64xf32> to vector<22x64xbf16>
    %cst_435 = arith.constant dense<0.000000e+00> : vector<22x64xf32>
    %493 = tpu.matmul %492, %491, %cst_435 {dimension_numbers = #tpu.dot_dimension_numbers<[1], [0], [0], [1], [0, 0, 1, 1], [], []>} : vector<22x64xbf16>, vector<64x64xbf16>, vector<22x64xf32> -> vector<22x64xf32>
    %494 = arith.addf %488, %493 : vector<22x64xf32>
    %cst_436 = arith.constant 0.000000e+00 : f32
    %495 = vector.broadcast %cst_436 : f32 to vector<22x64xf32>
    %496 = arith.maximumf %494, %495 : vector<22x64xf32>
    %c0_437 = arith.constant 0 : index
    %c64 = arith.constant 64 : index
    %497 = vector.load %arg23[%c0_437, %c64] : memref<22x256xf32, #tpu.memory_space<vmem>>, vector<22x64xf32>
    tpu.vector_store %arg23[%c0_437, %c64], %496 {strides = array<i32>} : memref<22x256xf32, #tpu.memory_space<vmem>>, vector<22x64xf32>,
    %c0_438 = arith.constant 0 : index
    %c0_439 = arith.constant 0 : index
    %498 = vector.load %arg21[%c0_438, %c0_439] : memref<36x64xf32, #tpu.memory_space<vmem>>, vector<22x64xf32>
    %c0_440 = arith.constant 0 : index
    %c0_441 = arith.constant 0 : index
    %c0_442 = arith.constant 0 : index
    %499 = vector.load %arg13[%c0_440, %c0_441, %c0_442] : memref<9x64x96xbf16, #tpu.memory_space<vmem>>, vector<1x64x96xbf16>
    %500 = vector.shape_cast %499 : vector<1x64x96xbf16> to vector<64x96xbf16>
    %501 = arith.truncf %498 : vector<22x64xf32> to vector<22x64xbf16>
    %cst_443 = arith.constant dense<0.000000e+00> : vector<22x96xf32>
    %502 = tpu.matmul %501, %500, %cst_443 {dimension_numbers = #tpu.dot_dimension_numbers<[1], [0], [0], [1], [0, 0, 1, 1], [], []>} : vector<22x64xbf16>, vector<64x96xbf16>, vector<22x96xf32> -> vector<22x96xf32>
    %c1_444 = arith.constant 1 : index
    %c0_445 = arith.constant 0 : index
    %503 = vector.load %arg21[%c1_444, %c0_445] : memref<36x64xf32, #tpu.memory_space<vmem>>, vector<22x64xf32>
    %c1_446 = arith.constant 1 : index
    %c0_447 = arith.constant 0 : index
    %c0_448 = arith.constant 0 : index
    %504 = vector.load %arg13[%c1_446, %c0_447, %c0_448] : memref<9x64x96xbf16, #tpu.memory_space<vmem>>, vector<1x64x96xbf16>
    %505 = vector.shape_cast %504 : vector<1x64x96xbf16> to vector<64x96xbf16>
    %506 = arith.truncf %503 : vector<22x64xf32> to vector<22x64xbf16>
    %cst_449 = arith.constant dense<0.000000e+00> : vector<22x96xf32>
    %507 = tpu.matmul %506, %505, %cst_449 {dimension_numbers = #tpu.dot_dimension_numbers<[1], [0], [0], [1], [0, 0, 1, 1], [], []>} : vector<22x64xbf16>, vector<64x96xbf16>, vector<22x96xf32> -> vector<22x96xf32>
    %508 = arith.addf %502, %507 : vector<22x96xf32>
    %c2_450 = arith.constant 2 : index
    %c0_451 = arith.constant 0 : index
    %509 = vector.load %arg21[%c2_450, %c0_451] : memref<36x64xf32, #tpu.memory_space<vmem>>, vector<22x64xf32>
    %c2_452 = arith.constant 2 : index
    %c0_453 = arith.constant 0 : index
    %c0_454 = arith.constant 0 : index
    %510 = vector.load %arg13[%c2_452, %c0_453, %c0_454] : memref<9x64x96xbf16, #tpu.memory_space<vmem>>, vector<1x64x96xbf16>
    %511 = vector.shape_cast %510 : vector<1x64x96xbf16> to vector<64x96xbf16>
    %512 = arith.truncf %509 : vector<22x64xf32> to vector<22x64xbf16>
    %cst_455 = arith.constant dense<0.000000e+00> : vector<22x96xf32>
    %513 = tpu.matmul %512, %511, %cst_455 {dimension_numbers = #tpu.dot_dimension_numbers<[1], [0], [0], [1], [0, 0, 1, 1], [], []>} : vector<22x64xbf16>, vector<64x96xbf16>, vector<22x96xf32> -> vector<22x96xf32>
    %514 = arith.addf %508, %513 : vector<22x96xf32>
    %c6_456 = arith.constant 6 : index
    %c0_457 = arith.constant 0 : index
    %515 = vector.load %arg21[%c6_456, %c0_457] : memref<36x64xf32, #tpu.memory_space<vmem>>, vector<22x64xf32>
    %c3_458 = arith.constant 3 : index
    %c0_459 = arith.constant 0 : index
    %c0_460 = arith.constant 0 : index
    %516 = vector.load %arg13[%c3_458, %c0_459, %c0_460] : memref<9x64x96xbf16, #tpu.memory_space<vmem>>, vector<1x64x96xbf16>
    %517 = vector.shape_cast %516 : vector<1x64x96xbf16> to vector<64x96xbf16>
    %518 = arith.truncf %515 : vector<22x64xf32> to vector<22x64xbf16>
    %cst_461 = arith.constant dense<0.000000e+00> : vector<22x96xf32>
    %519 = tpu.matmul %518, %517, %cst_461 {dimension_numbers = #tpu.dot_dimension_numbers<[1], [0], [0], [1], [0, 0, 1, 1], [], []>} : vector<22x64xbf16>, vector<64x96xbf16>, vector<22x96xf32> -> vector<22x96xf32>
    %520 = arith.addf %514, %519 : vector<22x96xf32>
    %c7_462 = arith.constant 7 : index
    %c0_463 = arith.constant 0 : index
    %521 = vector.load %arg21[%c7_462, %c0_463] : memref<36x64xf32, #tpu.memory_space<vmem>>, vector<22x64xf32>
    %c4_464 = arith.constant 4 : index
    %c0_465 = arith.constant 0 : index
    %c0_466 = arith.constant 0 : index
    %522 = vector.load %arg13[%c4_464, %c0_465, %c0_466] : memref<9x64x96xbf16, #tpu.memory_space<vmem>>, vector<1x64x96xbf16>
    %523 = vector.shape_cast %522 : vector<1x64x96xbf16> to vector<64x96xbf16>
    %524 = arith.truncf %521 : vector<22x64xf32> to vector<22x64xbf16>
    %cst_467 = arith.constant dense<0.000000e+00> : vector<22x96xf32>
    %525 = tpu.matmul %524, %523, %cst_467 {dimension_numbers = #tpu.dot_dimension_numbers<[1], [0], [0], [1], [0, 0, 1, 1], [], []>} : vector<22x64xbf16>, vector<64x96xbf16>, vector<22x96xf32> -> vector<22x96xf32>
    %526 = arith.addf %520, %525 : vector<22x96xf32>
    %c8_468 = arith.constant 8 : index
    %c0_469 = arith.constant 0 : index
    %527 = vector.load %arg21[%c8_468, %c0_469] : memref<36x64xf32, #tpu.memory_space<vmem>>, vector<22x64xf32>
    %c5_470 = arith.constant 5 : index
    %c0_471 = arith.constant 0 : index
    %c0_472 = arith.constant 0 : index
    %528 = vector.load %arg13[%c5_470, %c0_471, %c0_472] : memref<9x64x96xbf16, #tpu.memory_space<vmem>>, vector<1x64x96xbf16>
    %529 = vector.shape_cast %528 : vector<1x64x96xbf16> to vector<64x96xbf16>
    %530 = arith.truncf %527 : vector<22x64xf32> to vector<22x64xbf16>
    %cst_473 = arith.constant dense<0.000000e+00> : vector<22x96xf32>
    %531 = tpu.matmul %530, %529, %cst_473 {dimension_numbers = #tpu.dot_dimension_numbers<[1], [0], [0], [1], [0, 0, 1, 1], [], []>} : vector<22x64xbf16>, vector<64x96xbf16>, vector<22x96xf32> -> vector<22x96xf32>
    %532 = arith.addf %526, %531 : vector<22x96xf32>
    %c12_474 = arith.constant 12 : index
    %c0_475 = arith.constant 0 : index
    %533 = vector.load %arg21[%c12_474, %c0_475] : memref<36x64xf32, #tpu.memory_space<vmem>>, vector<22x64xf32>
    %c6_476 = arith.constant 6 : index
    %c0_477 = arith.constant 0 : index
    %c0_478 = arith.constant 0 : index
    %534 = vector.load %arg13[%c6_476, %c0_477, %c0_478] : memref<9x64x96xbf16, #tpu.memory_space<vmem>>, vector<1x64x96xbf16>
    %535 = vector.shape_cast %534 : vector<1x64x96xbf16> to vector<64x96xbf16>
    %536 = arith.truncf %533 : vector<22x64xf32> to vector<22x64xbf16>
    %cst_479 = arith.constant dense<0.000000e+00> : vector<22x96xf32>
    %537 = tpu.matmul %536, %535, %cst_479 {dimension_numbers = #tpu.dot_dimension_numbers<[1], [0], [0], [1], [0, 0, 1, 1], [], []>} : vector<22x64xbf16>, vector<64x96xbf16>, vector<22x96xf32> -> vector<22x96xf32>
    %538 = arith.addf %532, %537 : vector<22x96xf32>
    %c13_480 = arith.constant 13 : index
    %c0_481 = arith.constant 0 : index
    %539 = vector.load %arg21[%c13_480, %c0_481] : memref<36x64xf32, #tpu.memory_space<vmem>>, vector<22x64xf32>
    %c7_482 = arith.constant 7 : index
    %c0_483 = arith.constant 0 : index
    %c0_484 = arith.constant 0 : index
    %540 = vector.load %arg13[%c7_482, %c0_483, %c0_484] : memref<9x64x96xbf16, #tpu.memory_space<vmem>>, vector<1x64x96xbf16>
    %541 = vector.shape_cast %540 : vector<1x64x96xbf16> to vector<64x96xbf16>
    %542 = arith.truncf %539 : vector<22x64xf32> to vector<22x64xbf16>
    %cst_485 = arith.constant dense<0.000000e+00> : vector<22x96xf32>
    %543 = tpu.matmul %542, %541, %cst_485 {dimension_numbers = #tpu.dot_dimension_numbers<[1], [0], [0], [1], [0, 0, 1, 1], [], []>} : vector<22x64xbf16>, vector<64x96xbf16>, vector<22x96xf32> -> vector<22x96xf32>
    %544 = arith.addf %538, %543 : vector<22x96xf32>
    %c14_486 = arith.constant 14 : index
    %c0_487 = arith.constant 0 : index
    %545 = vector.load %arg21[%c14_486, %c0_487] : memref<36x64xf32, #tpu.memory_space<vmem>>, vector<22x64xf32>
    %c8_488 = arith.constant 8 : index
    %c0_489 = arith.constant 0 : index
    %c0_490 = arith.constant 0 : index
    %546 = vector.load %arg13[%c8_488, %c0_489, %c0_490] : memref<9x64x96xbf16, #tpu.memory_space<vmem>>, vector<1x64x96xbf16>
    %547 = vector.shape_cast %546 : vector<1x64x96xbf16> to vector<64x96xbf16>
    %548 = arith.truncf %545 : vector<22x64xf32> to vector<22x64xbf16>
    %cst_491 = arith.constant dense<0.000000e+00> : vector<22x96xf32>
    %549 = tpu.matmul %548, %547, %cst_491 {dimension_numbers = #tpu.dot_dimension_numbers<[1], [0], [0], [1], [0, 0, 1, 1], [], []>} : vector<22x64xbf16>, vector<64x96xbf16>, vector<22x96xf32> -> vector<22x96xf32>
    %550 = arith.addf %544, %549 : vector<22x96xf32>
    %cst_492 = arith.constant 0.000000e+00 : f32
    %551 = vector.broadcast %cst_492 : f32 to vector<22x96xf32>
    %552 = arith.maximumf %550, %551 : vector<22x96xf32>
    %553 = vector.broadcast %12 : vector<22x1xf32> to vector<22x96xf32>
    %554 = arith.mulf %552, %553 : vector<22x96xf32>
    %c7_493 = arith.constant 7 : index
    %c0_494 = arith.constant 0 : index
    %555 = vector.load %arg22[%c7_493, %c0_494] : memref<36x96xf32, #tpu.memory_space<vmem>>, vector<22x96xf32>
    tpu.vector_store %arg22[%c7_493, %c0_494], %554 {strides = array<i32>} : memref<36x96xf32, #tpu.memory_space<vmem>>, vector<22x96xf32>,
    %c0_495 = arith.constant 0 : index
    %c0_496 = arith.constant 0 : index
    %556 = vector.load %arg22[%c0_495, %c0_496] : memref<36x96xf32, #tpu.memory_space<vmem>>, vector<22x96xf32>
    %c0_497 = arith.constant 0 : index
    %c0_498 = arith.constant 0 : index
    %c0_499 = arith.constant 0 : index
    %557 = vector.load %arg14[%c0_497, %c0_498, %c0_499] : memref<9x96x96xbf16, #tpu.memory_space<vmem>>, vector<1x96x96xbf16>
    %558 = vector.shape_cast %557 : vector<1x96x96xbf16> to vector<96x96xbf16>
    %559 = arith.truncf %556 : vector<22x96xf32> to vector<22x96xbf16>
    %cst_500 = arith.constant dense<0.000000e+00> : vector<22x96xf32>
    %560 = tpu.matmul %559, %558, %cst_500 {dimension_numbers = #tpu.dot_dimension_numbers<[1], [0], [0], [1], [0, 0, 1, 1], [], []>} : vector<22x96xbf16>, vector<96x96xbf16>, vector<22x96xf32> -> vector<22x96xf32>
    %c1_501 = arith.constant 1 : index
    %c0_502 = arith.constant 0 : index
    %561 = vector.load %arg22[%c1_501, %c0_502] : memref<36x96xf32, #tpu.memory_space<vmem>>, vector<22x96xf32>
    %c1_503 = arith.constant 1 : index
    %c0_504 = arith.constant 0 : index
    %c0_505 = arith.constant 0 : index
    %562 = vector.load %arg14[%c1_503, %c0_504, %c0_505] : memref<9x96x96xbf16, #tpu.memory_space<vmem>>, vector<1x96x96xbf16>
    %563 = vector.shape_cast %562 : vector<1x96x96xbf16> to vector<96x96xbf16>
    %564 = arith.truncf %561 : vector<22x96xf32> to vector<22x96xbf16>
    %cst_506 = arith.constant dense<0.000000e+00> : vector<22x96xf32>
    %565 = tpu.matmul %564, %563, %cst_506 {dimension_numbers = #tpu.dot_dimension_numbers<[1], [0], [0], [1], [0, 0, 1, 1], [], []>} : vector<22x96xbf16>, vector<96x96xbf16>, vector<22x96xf32> -> vector<22x96xf32>
    %566 = arith.addf %560, %565 : vector<22x96xf32>
    %c2_507 = arith.constant 2 : index
    %c0_508 = arith.constant 0 : index
    %567 = vector.load %arg22[%c2_507, %c0_508] : memref<36x96xf32, #tpu.memory_space<vmem>>, vector<22x96xf32>
    %c2_509 = arith.constant 2 : index
    %c0_510 = arith.constant 0 : index
    %c0_511 = arith.constant 0 : index
    %568 = vector.load %arg14[%c2_509, %c0_510, %c0_511] : memref<9x96x96xbf16, #tpu.memory_space<vmem>>, vector<1x96x96xbf16>
    %569 = vector.shape_cast %568 : vector<1x96x96xbf16> to vector<96x96xbf16>
    %570 = arith.truncf %567 : vector<22x96xf32> to vector<22x96xbf16>
    %cst_512 = arith.constant dense<0.000000e+00> : vector<22x96xf32>
    %571 = tpu.matmul %570, %569, %cst_512 {dimension_numbers = #tpu.dot_dimension_numbers<[1], [0], [0], [1], [0, 0, 1, 1], [], []>} : vector<22x96xbf16>, vector<96x96xbf16>, vector<22x96xf32> -> vector<22x96xf32>
    %572 = arith.addf %566, %571 : vector<22x96xf32>
    %c6_513 = arith.constant 6 : index
    %c0_514 = arith.constant 0 : index
    %573 = vector.load %arg22[%c6_513, %c0_514] : memref<36x96xf32, #tpu.memory_space<vmem>>, vector<22x96xf32>
    %c3_515 = arith.constant 3 : index
    %c0_516 = arith.constant 0 : index
    %c0_517 = arith.constant 0 : index
    %574 = vector.load %arg14[%c3_515, %c0_516, %c0_517] : memref<9x96x96xbf16, #tpu.memory_space<vmem>>, vector<1x96x96xbf16>
    %575 = vector.shape_cast %574 : vector<1x96x96xbf16> to vector<96x96xbf16>
    %576 = arith.truncf %573 : vector<22x96xf32> to vector<22x96xbf16>
    %cst_518 = arith.constant dense<0.000000e+00> : vector<22x96xf32>
    %577 = tpu.matmul %576, %575, %cst_518 {dimension_numbers = #tpu.dot_dimension_numbers<[1], [0], [0], [1], [0, 0, 1, 1], [], []>} : vector<22x96xbf16>, vector<96x96xbf16>, vector<22x96xf32> -> vector<22x96xf32>
    %578 = arith.addf %572, %577 : vector<22x96xf32>
    %c7_519 = arith.constant 7 : index
    %c0_520 = arith.constant 0 : index
    %579 = vector.load %arg22[%c7_519, %c0_520] : memref<36x96xf32, #tpu.memory_space<vmem>>, vector<22x96xf32>
    %c4_521 = arith.constant 4 : index
    %c0_522 = arith.constant 0 : index
    %c0_523 = arith.constant 0 : index
    %580 = vector.load %arg14[%c4_521, %c0_522, %c0_523] : memref<9x96x96xbf16, #tpu.memory_space<vmem>>, vector<1x96x96xbf16>
    %581 = vector.shape_cast %580 : vector<1x96x96xbf16> to vector<96x96xbf16>
    %582 = arith.truncf %579 : vector<22x96xf32> to vector<22x96xbf16>
    %cst_524 = arith.constant dense<0.000000e+00> : vector<22x96xf32>
    %583 = tpu.matmul %582, %581, %cst_524 {dimension_numbers = #tpu.dot_dimension_numbers<[1], [0], [0], [1], [0, 0, 1, 1], [], []>} : vector<22x96xbf16>, vector<96x96xbf16>, vector<22x96xf32> -> vector<22x96xf32>
    %584 = arith.addf %578, %583 : vector<22x96xf32>
    %c8_525 = arith.constant 8 : index
    %c0_526 = arith.constant 0 : index
    %585 = vector.load %arg22[%c8_525, %c0_526] : memref<36x96xf32, #tpu.memory_space<vmem>>, vector<22x96xf32>
    %c5_527 = arith.constant 5 : index
    %c0_528 = arith.constant 0 : index
    %c0_529 = arith.constant 0 : index
    %586 = vector.load %arg14[%c5_527, %c0_528, %c0_529] : memref<9x96x96xbf16, #tpu.memory_space<vmem>>, vector<1x96x96xbf16>
    %587 = vector.shape_cast %586 : vector<1x96x96xbf16> to vector<96x96xbf16>
    %588 = arith.truncf %585 : vector<22x96xf32> to vector<22x96xbf16>
    %cst_530 = arith.constant dense<0.000000e+00> : vector<22x96xf32>
    %589 = tpu.matmul %588, %587, %cst_530 {dimension_numbers = #tpu.dot_dimension_numbers<[1], [0], [0], [1], [0, 0, 1, 1], [], []>} : vector<22x96xbf16>, vector<96x96xbf16>, vector<22x96xf32> -> vector<22x96xf32>
    %590 = arith.addf %584, %589 : vector<22x96xf32>
    %c12_531 = arith.constant 12 : index
    %c0_532 = arith.constant 0 : index
    %591 = vector.load %arg22[%c12_531, %c0_532] : memref<36x96xf32, #tpu.memory_space<vmem>>, vector<22x96xf32>
    %c6_533 = arith.constant 6 : index
    %c0_534 = arith.constant 0 : index
    %c0_535 = arith.constant 0 : index
    %592 = vector.load %arg14[%c6_533, %c0_534, %c0_535] : memref<9x96x96xbf16, #tpu.memory_space<vmem>>, vector<1x96x96xbf16>
    %593 = vector.shape_cast %592 : vector<1x96x96xbf16> to vector<96x96xbf16>
    %594 = arith.truncf %591 : vector<22x96xf32> to vector<22x96xbf16>
    %cst_536 = arith.constant dense<0.000000e+00> : vector<22x96xf32>
    %595 = tpu.matmul %594, %593, %cst_536 {dimension_numbers = #tpu.dot_dimension_numbers<[1], [0], [0], [1], [0, 0, 1, 1], [], []>} : vector<22x96xbf16>, vector<96x96xbf16>, vector<22x96xf32> -> vector<22x96xf32>
    %596 = arith.addf %590, %595 : vector<22x96xf32>
    %c13_537 = arith.constant 13 : index
    %c0_538 = arith.constant 0 : index
    %597 = vector.load %arg22[%c13_537, %c0_538] : memref<36x96xf32, #tpu.memory_space<vmem>>, vector<22x96xf32>
    %c7_539 = arith.constant 7 : index
    %c0_540 = arith.constant 0 : index
    %c0_541 = arith.constant 0 : index
    %598 = vector.load %arg14[%c7_539, %c0_540, %c0_541] : memref<9x96x96xbf16, #tpu.memory_space<vmem>>, vector<1x96x96xbf16>
    %599 = vector.shape_cast %598 : vector<1x96x96xbf16> to vector<96x96xbf16>
    %600 = arith.truncf %597 : vector<22x96xf32> to vector<22x96xbf16>
    %cst_542 = arith.constant dense<0.000000e+00> : vector<22x96xf32>
    %601 = tpu.matmul %600, %599, %cst_542 {dimension_numbers = #tpu.dot_dimension_numbers<[1], [0], [0], [1], [0, 0, 1, 1], [], []>} : vector<22x96xbf16>, vector<96x96xbf16>, vector<22x96xf32> -> vector<22x96xf32>
    %602 = arith.addf %596, %601 : vector<22x96xf32>
    %c14_543 = arith.constant 14 : index
    %c0_544 = arith.constant 0 : index
    %603 = vector.load %arg22[%c14_543, %c0_544] : memref<36x96xf32, #tpu.memory_space<vmem>>, vector<22x96xf32>
    %c8_545 = arith.constant 8 : index
    %c0_546 = arith.constant 0 : index
    %c0_547 = arith.constant 0 : index
    %604 = vector.load %arg14[%c8_545, %c0_546, %c0_547] : memref<9x96x96xbf16, #tpu.memory_space<vmem>>, vector<1x96x96xbf16>
    %605 = vector.shape_cast %604 : vector<1x96x96xbf16> to vector<96x96xbf16>
    %606 = arith.truncf %603 : vector<22x96xf32> to vector<22x96xbf16>
    %cst_548 = arith.constant dense<0.000000e+00> : vector<22x96xf32>
    %607 = tpu.matmul %606, %605, %cst_548 {dimension_numbers = #tpu.dot_dimension_numbers<[1], [0], [0], [1], [0, 0, 1, 1], [], []>} : vector<22x96xbf16>, vector<96x96xbf16>, vector<22x96xf32> -> vector<22x96xf32>
    %608 = arith.addf %602, %607 : vector<22x96xf32>
    %cst_549 = arith.constant 0.000000e+00 : f32
    %609 = vector.broadcast %cst_549 : f32 to vector<22x96xf32>
    %610 = arith.maximumf %608, %609 : vector<22x96xf32>
    %c0_550 = arith.constant 0 : index
    %c128 = arith.constant 128 : index
    %611 = vector.load %arg23[%c0_550, %c128] : memref<22x256xf32, #tpu.memory_space<vmem>>, vector<22x96xf32>
    tpu.vector_store %arg23[%c0_550, %c128], %610 {strides = array<i32>} : memref<22x256xf32, #tpu.memory_space<vmem>>, vector<22x96xf32>,
    %c0_551 = arith.constant 0 : index
    %c0_552 = arith.constant 0 : index
    %612 = vector.load %arg23[%c0_551, %c0_552] : memref<22x256xf32, #tpu.memory_space<vmem>>, vector<4x256xf32>
    %c0_553 = arith.constant 0 : index
    %c0_554 = arith.constant 0 : index
    %c0_555 = arith.constant 0 : index
    %613 = vector.load %arg15[%c0_553, %c0_554, %c0_555] : memref<1x16x256xf32, #tpu.memory_space<vmem>>, vector<1x4x256xf32>
    %614 = vector.shape_cast %613 : vector<1x4x256xf32> to vector<4x256xf32>
    %615 = vector.shape_cast %612 : vector<4x256xf32> to vector<1x4x256xf32>
    tpu.vector_store %arg15[%c0_553, %c0_554, %c0_555], %615 {strides = array<i32>} : memref<1x16x256xf32, #tpu.memory_space<vmem>>, vector<1x4x256xf32>,
    %c6_556 = arith.constant 6 : index
    %c0_557 = arith.constant 0 : index
    %616 = vector.load %arg23[%c6_556, %c0_557] : memref<22x256xf32, #tpu.memory_space<vmem>>, vector<4x256xf32>
    %c0_558 = arith.constant 0 : index
    %c4_559 = arith.constant 4 : index
    %c0_560 = arith.constant 0 : index
    %617 = vector.load %arg15[%c0_558, %c4_559, %c0_560] : memref<1x16x256xf32, #tpu.memory_space<vmem>>, vector<1x4x256xf32>
    %618 = vector.shape_cast %617 : vector<1x4x256xf32> to vector<4x256xf32>
    %619 = vector.shape_cast %616 : vector<4x256xf32> to vector<1x4x256xf32>
    tpu.vector_store %arg15[%c0_558, %c4_559, %c0_560], %619 {strides = array<i32>} : memref<1x16x256xf32, #tpu.memory_space<vmem>>, vector<1x4x256xf32>,
    %c12_561 = arith.constant 12 : index
    %c0_562 = arith.constant 0 : index
    %620 = vector.load %arg23[%c12_561, %c0_562] : memref<22x256xf32, #tpu.memory_space<vmem>>, vector<4x256xf32>
    %c0_563 = arith.constant 0 : index
    %c8_564 = arith.constant 8 : index
    %c0_565 = arith.constant 0 : index
    %621 = vector.load %arg15[%c0_563, %c8_564, %c0_565] : memref<1x16x256xf32, #tpu.memory_space<vmem>>, vector<1x4x256xf32>
    %622 = vector.shape_cast %621 : vector<1x4x256xf32> to vector<4x256xf32>
    %623 = vector.shape_cast %620 : vector<4x256xf32> to vector<1x4x256xf32>
    tpu.vector_store %arg15[%c0_563, %c8_564, %c0_565], %623 {strides = array<i32>} : memref<1x16x256xf32, #tpu.memory_space<vmem>>, vector<1x4x256xf32>,
    %c18 = arith.constant 18 : index
    %c0_566 = arith.constant 0 : index
    %624 = vector.load %arg23[%c18, %c0_566] : memref<22x256xf32, #tpu.memory_space<vmem>>, vector<4x256xf32>
    %c0_567 = arith.constant 0 : index
    %c12_568 = arith.constant 12 : index
    %c0_569 = arith.constant 0 : index
    %625 = vector.load %arg15[%c0_567, %c12_568, %c0_569] : memref<1x16x256xf32, #tpu.memory_space<vmem>>, vector<1x4x256xf32>
    %626 = vector.shape_cast %625 : vector<1x4x256xf32> to vector<4x256xf32>
    %627 = vector.shape_cast %624 : vector<4x256xf32> to vector<1x4x256xf32>
    tpu.vector_store %arg15[%c0_567, %c12_568, %c0_569], %627 {strides = array<i32>} : memref<1x16x256xf32, #tpu.memory_space<vmem>>, vector<1x4x256xf32>,
    return
  }
  func.func @transform_0(%arg0: i32) -> (i32, i32, i32) {
    %c0_i32 = arith.constant 0 : i32
    %c0_i32_0 = arith.constant 0 : i32
    %c0_i32_1 = arith.constant 0 : i32
    return %arg0, %c0_i32, %c0_i32_0 : i32, i32, i32
  }
  func.func @transform_1(%arg0: i32) -> (i32, i32) {
    %c0_i32 = arith.constant 0 : i32
    %c0_i32_0 = arith.constant 0 : i32
    %c0_i32_1 = arith.constant 0 : i32
    return %c0_i32, %c0_i32_0 : i32, i32
  }
  func.func @transform_2(%arg0: i32) -> (i32, i32) {
    %c0_i32 = arith.constant 0 : i32
    %c0_i32_0 = arith.constant 0 : i32
    %c0_i32_1 = arith.constant 0 : i32
    return %c0_i32, %c0_i32_0 : i32, i32
  }
  func.func @transform_3(%arg0: i32) -> (i32, i32) {
    %c0_i32 = arith.constant 0 : i32
    %c0_i32_0 = arith.constant 0 : i32
    %c0_i32_1 = arith.constant 0 : i32
    return %c0_i32, %c0_i32_0 : i32, i32
  }
  func.func @transform_4(%arg0: i32) -> (i32, i32) {
    %c0_i32 = arith.constant 0 : i32
    %c0_i32_0 = arith.constant 0 : i32
    %c0_i32_1 = arith.constant 0 : i32
    return %c0_i32, %c0_i32_0 : i32, i32
  }
  func.func @transform_5(%arg0: i32) -> (i32, i32) {
    %c0_i32 = arith.constant 0 : i32
    %c0_i32_0 = arith.constant 0 : i32
    %c0_i32_1 = arith.constant 0 : i32
    return %c0_i32, %c0_i32_0 : i32, i32
  }
  func.func @transform_6(%arg0: i32) -> (i32, i32) {
    %c0_i32 = arith.constant 0 : i32
    %c0_i32_0 = arith.constant 0 : i32
    %c0_i32_1 = arith.constant 0 : i32
    return %c0_i32, %c0_i32_0 : i32, i32
  }
  func.func @transform_7(%arg0: i32) -> (i32, i32, i32) {
    %c0_i32 = arith.constant 0 : i32
    %c0_i32_0 = arith.constant 0 : i32
    %c0_i32_1 = arith.constant 0 : i32
    %c0_i32_2 = arith.constant 0 : i32
    return %c0_i32, %c0_i32_0, %c0_i32_1 : i32, i32, i32
  }
  func.func @transform_8(%arg0: i32) -> (i32, i32) {
    %c0_i32 = arith.constant 0 : i32
    %c0_i32_0 = arith.constant 0 : i32
    %c0_i32_1 = arith.constant 0 : i32
    return %c0_i32, %c0_i32_0 : i32, i32
  }
  func.func @transform_9(%arg0: i32) -> (i32, i32) {
    %c0_i32 = arith.constant 0 : i32
    %c0_i32_0 = arith.constant 0 : i32
    %c0_i32_1 = arith.constant 0 : i32
    return %c0_i32, %c0_i32_0 : i32, i32
  }
  func.func @transform_10(%arg0: i32) -> (i32, i32) {
    %c0_i32 = arith.constant 0 : i32
    %c0_i32_0 = arith.constant 0 : i32
    %c0_i32_1 = arith.constant 0 : i32
    return %c0_i32, %c0_i32_0 : i32, i32
  }
  func.func @transform_11(%arg0: i32) -> (i32, i32, i32) {
    %c0_i32 = arith.constant 0 : i32
    %c0_i32_0 = arith.constant 0 : i32
    %c0_i32_1 = arith.constant 0 : i32
    %c0_i32_2 = arith.constant 0 : i32
    return %c0_i32, %c0_i32_0, %c0_i32_1 : i32, i32, i32
  }
  func.func @transform_12(%arg0: i32) -> (i32, i32, i32) {
    %c0_i32 = arith.constant 0 : i32
    %c0_i32_0 = arith.constant 0 : i32
    %c0_i32_1 = arith.constant 0 : i32
    %c0_i32_2 = arith.constant 0 : i32
    return %c0_i32, %c0_i32_0, %c0_i32_1 : i32, i32, i32
  }
  func.func @transform_13(%arg0: i32) -> (i32, i32, i32) {
    %c0_i32 = arith.constant 0 : i32
    %c0_i32_0 = arith.constant 0 : i32
    %c0_i32_1 = arith.constant 0 : i32
    %c0_i32_2 = arith.constant 0 : i32
    return %c0_i32, %c0_i32_0, %c0_i32_1 : i32, i32, i32
  }
  func.func @transform_14(%arg0: i32) -> (i32, i32, i32) {
    %c0_i32 = arith.constant 0 : i32
    %c0_i32_0 = arith.constant 0 : i32
    %c0_i32_1 = arith.constant 0 : i32
    return %arg0, %c0_i32, %c0_i32_0 : i32, i32, i32
  }
}

</mosaic_0001>

<bundles_post_ra>
// kernel: inception2_forward.1
= control target key start
LH: loop header
LB: loop body
LE: loop exit
PB: predicated region body
PF: predicated region fallthrough
CT: control target
= control target key end

     0   :  { %s13733_s29 = smov 0   ;;  %s16964_s0 = inlined_call_operand.vmem [shape: bf16[2,576,147], index: 0, kind: input, shape index: {}]   ;;  %s16965_s1 = inlined_call_operand.vmem [shape: f32[576,1], index: 1, kind: input, shape index: {}]   ;;  %s16966_s2 = inlined_call_operand.vmem [shape: f32[22,1], index: 2, kind: input, shape index: {}]   ;;  %s16967_s3 = inlined_call_operand.vmem [shape: bf16[147,64], index: 3, kind: input, shape index: {}]   ;;  %s16968_s4 = inlined_call_operand.vmem [shape: f32[1,64], index: 4, kind: input, shape index: {}]   ;;  %s16969_s5 = inlined_call_operand.vmem [shape: bf16[64,64], index: 5, kind: input, shape index: {}]   ;;  %s16970_s6 = inlined_call_operand.vmem [shape: f32[1,64], index: 6, kind: input, shape index: {}]   ;;  %s16971_s7 = inlined_call_operand.vmem [shape: bf16[9,64,192], index: 7, kind: input, shape index: {}]   ;;  %s16972_s8 = inlined_call_operand.vmem [shape: f32[1,192], index: 8, kind: input, shape index: {}]   ;;  %s16973_s9 = inlined_call_operand.vmem [shape: bf16[192,192], index: 9, kind: input, shape index: {}]   ;;  %s16974_s10 = inlined_call_operand.vmem [shape: bf16[192,32], index: 10, kind: input, shape index: {}]   ;;  %s16975_s11 = inlined_call_operand.vmem [shape: bf16[9,64,64], index: 11, kind: input, shape index: {}]   ;;  %s16976_s12 = inlined_call_operand.vmem [shape: bf16[9,64,96], index: 12, kind: input, shape index: {}]   ;;  %s16977_s13 = inlined_call_operand.vmem [shape: bf16[9,96,96], index: 13, kind: input, shape index: {}]   ;;  %s16978_s14 = inlined_call_operand.vmem [shape: f32[2,16,256], index: 14, kind: output, shape index: {}]  }
   0x1 LB: > { %s11027_s30 = sadd.s32 4294967295, %s13651_s29   ;;  %p11031_p0 = scmp.ge.s32.totalorder %s13651_s29, 1  ;;  %s13651_s29 = sphi %s13733_s29, %s24_s29  }
   0x2   : > { %p412_p1 = scmp.lt.s32.totalorder %s13651_s29, 3 }
   0x4   : > { %p413_p2 = pnand %p11031_p0, %p412_p1 }
   0x6   : > { %416 = sbr.rel (%p413_p2) target bundleno = 2431 (0x97f), region = 76 }
   0xd   : > { %v13117_v0 = vld [vmem:[%s16967_s3] sm:$0xff]   ;;  %v16979_v1 = vmov 0   ;;  %v13118_v2 = vld [vmem:[%s16967_s3 + $0x8] sm:$0xff]   ;;  %v13119_v3 = vld [vmem:[%s16967_s3 + $0x10] sm:$0xff]   ;;  %p458_p3 = scmp.lt.s32.totalorder %s11027_s30, 1  ;;  %vm1034_vm0 = vcmask 154624  }
   0xe   : > { %1150 = vmatprep.subr.bf16.mxu0 %v16979_v1  ;;  %12857 = vmatprep.subr.bf16.mxu1 %v16979_v1  ;;  %v1597_v4 = vld [vmem:[%s16965_s1 + $0x1b0] sm:$0xff]  ;;  %v13120_v5 = vld [vmem:[%s16967_s3 + $0x18] sm:$0xff]   ;;  %v1599_v6 = vld [vmem:[%s16965_s1 + $0x1c0] sm:$0xff]  ;;  %vm1143_vm1 = vcmask 1040384   ;;  %vm1144_vm2 = vcmask 1041408   ;;  %v13654_v21 = vmov 65535  }
   0xf   : > { %1151 = vmatpush1.bf16.msra.mxu0 %v13117_v0  ;;  %12867 = vmatpush1.bf16.msra.mxu1 %v13117_v0  ;;  %s17107_s30 = smov (!%p458_p3, %s11027_s30), 1  ;;  %v13121_v7 = vld [vmem:[%s16967_s3 + $0x20] sm:$0xff]   ;;  %v1598_v8 = vld [vmem:[%s16965_s1 + $0x1b8] sm:$0xff]  ;;  %v13122_v12 = vld [vmem:[%s16967_s3 + $0x28] sm:$0xff]   ;;  %v1145_v22 = vsel %vm1143_vm1, 4294967295, %v13654_v21  ;;  %vm469_vm3 = vcmask 523264  }
  0x10   : > { %1152 = vmatprep.subr.bf16.mxu0 %v16979_v1  ;;  %12858 = vmatprep.subr.bf16.mxu1 %v16979_v1  ;;  %s13101_s25 = smul.u32 576, %s17107_s30  ;;  %v1610_v9 = vld [vmem:[%s16965_s1 + $0x218] sm:$0xff]  ;;  %v1611_v13 = vld [vmem:[%s16965_s1 + $0x220] sm:$0xff]  ;;  %v1612_v14 = vld [vmem:[%s16965_s1 + $0x228] sm:$0xff]  ;;  %v1146_v25 = vsel %vm1144_vm2, %v1145_v22, 0  ;;  %vm2288_vm4 = vcmask 521216  }
  0x11   : > { %13115 = vset.pattern.permute.xlu0 %v16979_v1  ;;  %13116 = vset.pattern.permute.xlu1 %v16979_v1  ;;  %v13123_v15 = vld [vmem:[%s16967_s3 + $0x30] sm:$0xff]   ;;  %v1602_v18 = vld [vmem:[%s16965_s1 + $0x1d8] sm:$0xff]  ;;  %v13125_v20 = vld [vmem:[%s16967_s3 + $0x40] sm:$0xff]   ;;  %vm3851_vm5 = vcmask 523271   ;;  %vm3831_vm6 = vcmask 1046528   ;;  %vm3858_vm7 = vcmask 520192  }
  0x12   : > { %s13778_s18 = scalar_lea.vmem %s16964_s0, %s13101_s25  ;;  %1887 = vperm.xlu0 %13115, %v1597_v4   ;;  %1897 = vperm.xlu1 %13116, %v1599_v6   ;;  %v1613_v16 = vld [vmem:[%s16965_s1 + $0x230] sm:$0xff]  ;;  %v13124_v19 = vld [vmem:[%s16967_s3 + $0x38] sm:$0xff]   ;;  %v1604_v23 = vld [vmem:[%s16965_s1 + $0x1e8] sm:$0xff]  ;;  %vm4948_vm8 = vcmask 523267   ;;  %vm4928_vm9 = vcmask 1042432   ;;  %vm4955_vm10 = vcmask 516096  }
  0x13   : > { %1153 = vmatpush1.bf16.msra.mxu0 %v13118_v2  ;;  %12868 = vmatpush1.bf16.msra.mxu1 %v13118_v2  ;;  %v13129_v10 = vld [vmem:[%s13778_s18 + $0x4] ss:$8 sps:$4 sm:$0xff]   ;;  %v13132_v11 = vld [vmem:[%s13778_s18 + $0x1b4] ss:$8 sps:$4 sm:$0xff]   ;;  %v13127_v27 = vld [vmem:[%s13778_s18] ss:$8 sps:$4 sm:$0xff]  }
  0x14   : > { %1154 = vmatprep.subr.bf16.mxu0 %v16979_v1  ;;  %12859 = vmatprep.subr.bf16.mxu1 %v16979_v1  ;;  %v1601_v17 = vld [vmem:[%s16965_s1 + $0x1d0] sm:$0xff]  ;;  %v13126_v24 = vld [vmem:[%s16967_s3 + $0x48] ss:$0 sps:$4 sm:$0x33]   ;;  %v13135_v30 = vld [vmem:[%s13778_s18 + $0x1c4] ss:$8 sps:$4 sm:$0xff]  }
  0x15   : > { %11118 = vmatprep.mubr.msk.bf16.mxu0 %vm1034_vm0, %v13129_v10  ;;  %11145 = vmatprep.mubr.msk.bf16.mxu1 %vm1034_vm0, %v13132_v11  ;;  %v1148_v26 = vand.u32 %v13126_v24, %v1146_v25  ;;  %v13130_v28 = vld [vmem:[%s13778_s18 + $0x1b0] ss:$8 sps:$4 sm:$0xff]   ;;  %v13133_v29 = vld [vmem:[%s13778_s18 + $0x14] ss:$8 sps:$4 sm:$0xff]   ;;  %v1603_v31 = vld [vmem:[%s16965_s1 + $0x1e0] sm:$0xff]  ;;  %vm533_vm11 = vcmask 519168  }
  0x16   : > { %1892 = vperm.xlu0 %13115, %v1598_v8   ;;  %1952 = vperm.xlu1 %13116, %v1610_v9   ;;  %v1558_v32 = vld [vmem:[%s16965_s1 + $0x78] sm:$0xff]  ;;  %v1557_v33 = vld [vmem:[%s16965_s1 + $0x70] sm:$0xff]  ;;  %v1543_v34 = vld [vmem:[%s16965_s1] sm:$0xff]  ;;  %vm7470_vm12 = vcmask 1043456   ;;  %vm7287_vm13 = vcmask 1044480   ;;  %vm7558_vm14 = vcmask 1045504  }
  0x17   : > { %1155 = vmatpush1.bf16.msra.mxu0 %v13119_v3  ;;  %12869 = vmatpush1.bf16.msra.mxu1 %v13119_v3  ;;  %v13137_v35 = vld [vmem:[%s13778_s18 + $0x10] ss:$8 sps:$4 sm:$0xff]   ;;  %v1559_v36 = vld [vmem:[%s16965_s1 + $0x80] sm:$0xff]  ;;  %v13141_v40 = vld [vmem:[%s13778_s18 + $0x1d4] ss:$8 sps:$4 sm:$0xff]   ;;  %s13656_s23 = smov 64  }
  0x18   : > { %1156 = vmatprep.subr.bf16.mxu0 %v16979_v1  ;;  %12860 = vmatprep.subr.bf16.mxu1 %v16979_v1  ;;  %v1545_v37 = vld [vmem:[%s16965_s1 + $0x10] sm:$0xff]  ;;  %v13138_v38 = vld [vmem:[%s13778_s18 + $0x1c0] ss:$8 sps:$4 sm:$0xff]   ;;  %v13139_v39 = vld [vmem:[%s13778_s18 + $0x24] ss:$8 sps:$4 sm:$0xff]   ;;  %s13657_s17 = smov 96  }
  0x19   : > { %v1544_v41 = vld [vmem:[%s16965_s1 + $0x8] sm:$0xff]  ;;  %v1546_v44 = vld [vmem:[%s16965_s1 + $0x18] sm:$0xff]  ;;  %v1549_v49 = vld [vmem:[%s16965_s1 + $0x30] sm:$0xff]  ;;  %vm545_vm15 = vcmask 785408   ;;  %s12244_s21 = sshll.u32 %s17107_s30, 5 }
  0x1a   : > { %1957 = vperm.xlu0 %13115, %v1611_v13   ;;  %1962 = vperm.xlu1 %13116, %v1612_v14   ;;  %v1548_v42 = vld [vmem:[%s16965_s1 + $0x28] sm:$0xff]  ;;  %v1550_v45 = vld [vmem:[%s16965_s1 + $0x38] sm:$0xff]  ;;  %v1575_v50 = vld [vmem:[%s16965_s1 + $0x100] sm:$0xff]  ;;  %s16946_s24 = scalar_lea.vmem %s16978_s14, %s12244_s21 }
  0x1b   : > { %1157 = vmatpush1.bf16.msra.mxu0 %v13120_v5  ;;  %12870 = vmatpush1.bf16.msra.mxu1 %v13120_v5  ;;  %v13143_v43 = vld [vmem:[%s13778_s18 + $0x20] ss:$8 sps:$4 sm:$0xff]   ;;  %v13144_v46 = vld [vmem:[%s13778_s18 + $0x1d0] ss:$8 sps:$4 sm:$0xff]   ;;  %v13145_v47 = vld [vmem:[%s13778_s18 + $0x34] ss:$8 sps:$4 sm:$0xff]  }
  0x1c   : > { %1158 = vmatprep.subr.bf16.mxu0 %v16979_v1  ;;  %12861 = vmatprep.subr.bf16.mxu1 %v16979_v1  ;;  %v13147_v48 = vld [vmem:[%s13778_s18 + $0x1e4] ss:$8 sps:$4 sm:$0xff]   ;;  %v1577_v52 = vld [vmem:[%s16965_s1 + $0x110] sm:$0xff]  ;;  %v13150_v54 = vld [vmem:[%s13778_s18 + $0x1e0] ss:$8 sps:$4 sm:$0xff]  }
  0x1d   : > { %v1551_v51 = vld [vmem:[%s16965_s1 + $0x40] sm:$0xff]  ;;  %v13149_v53 = vld [vmem:[%s13778_s18 + $0x30] ss:$8 sps:$4 sm:$0xff]   ;;  %v13153_v56 = vld [vmem:[%s13778_s18 + $0x1f4] ss:$8 sps:$4 sm:$0xff]  }
  0x1e   : > { %1967 = vperm.xlu0 %13115, %v1613_v16   ;;  %1907 = vperm.xlu1 %13116, %v1601_v17   ;;  %v13151_v55 = vld [vmem:[%s13778_s18 + $0x44] ss:$8 sps:$4 sm:$0xff]   ;;  %v1562_v58 = vld [vmem:[%s16965_s1 + $0x98] sm:$0xff]  ;;  %v1561_v59 = vld [vmem:[%s16965_s1 + $0x90] sm:$0xff] }
  0x1f   : > { %1159 = vmatpush1.bf16.msra.mxu0 %v13121_v7  ;;  %12871 = vmatpush1.bf16.msra.mxu1 %v13121_v7  ;;  %v1576_v57 = vld [vmem:[%s16965_s1 + $0x108] sm:$0xff]  ;;  %v13156_v61 = vld [vmem:[%s13778_s18 + $0x1f0] ss:$8 sps:$4 sm:$0xff]   ;;  %v13157_v63 = vld [vmem:[%s13778_s18 + $0x54] ss:$8 sps:$4 sm:$0xff]  }
  0x20   : > { %1160 = vmatprep.subr.bf16.mxu0 %v16979_v1  ;;  %12862 = vmatprep.subr.bf16.mxu1 %v16979_v1  ;;  %v13155_v60 = vld [vmem:[%s13778_s18 + $0x40] ss:$8 sps:$4 sm:$0xff]   ;;  %v13159_v0 = vld [vmem:[%s13778_s18 + $0x204] ss:$8 sps:$4 sm:$0xff]   ;;  %v1566_v4 = vld [vmem:[%s16965_s1 + $0xb8] sm:$0xff] }
  0x21   : > { %v1564_v62 = vld [vmem:[%s16965_s1 + $0xa8] sm:$0xff]  ;;  %v1563_v2 = vld [vmem:[%s16965_s1 + $0xa0] sm:$0xff]  ;;  %v1569_v5 = vld [vmem:[%s16965_s1 + $0xd0] sm:$0xff] }
  0x22   : > { %1912 = vperm.xlu0 %13115, %v1602_v18   ;;  %1917 = vperm.xlu1 %13116, %v1603_v31   ;;  %v1567_v3 = vld [vmem:[%s16965_s1 + $0xc0] sm:$0xff]  ;;  %v13161_v6 = vld [vmem:[%s13778_s18 + $0x50] ss:$8 sps:$4 sm:$0xff]   ;;  %v13165_v9 = vld [vmem:[%s13778_s18 + $0x214] ss:$8 sps:$4 sm:$0xff]  }
  0x23   : > { %1161 = vmatpush1.bf16.msra.mxu0 %v13122_v12  ;;  %12872 = vmatpush1.bf16.msra.mxu1 %v13122_v12  ;;  %v13162_v7 = vld [vmem:[%s13778_s18 + $0x200] ss:$8 sps:$4 sm:$0xff]   ;;  %v13163_v8 = vld [vmem:[%s13778_s18 + $0x64] ss:$8 sps:$4 sm:$0xff]   ;;  %v1606_v12 = vld [vmem:[%s16965_s1 + $0x1f8] sm:$0xff] }
  0x24   : > { %1162 = vmatprep.subr.bf16.mxu0 %v16979_v1  ;;  %12863 = vmatprep.subr.bf16.mxu1 %v16979_v1  ;;  %v1568_v10 = vld [vmem:[%s16965_s1 + $0xc8] sm:$0xff]  ;;  %v1607_v11 = vld [vmem:[%s16965_s1 + $0x200] sm:$0xff]  ;;  %v13169_v16 = vld [vmem:[%s13778_s18 + $0x74] ss:$8 sps:$4 sm:$0xff]  }
  0x25   : > { %v1552_v13 = vld [vmem:[%s16965_s1 + $0x48] sm:$0xff]  ;;  %v13173_v22 = vld [vmem:[%s13778_s18 + $0x70] ss:$8 sps:$4 sm:$0xff]   ;;  %v13177_v25 = vld [vmem:[%s13778_s18 + $0x234] ss:$8 sps:$4 sm:$0xff]  }
  0x26   : > { %1922 = vperm.xlu0 %13115, %v1604_v23   ;;  %1687 = vperm.xlu1 %13116, %v1557_v33   ;;  %v13167_v14 = vld [vmem:[%s13778_s18 + $0x60] ss:$8 sps:$4 sm:$0xff]   ;;  %v13171_v17 = vld [vmem:[%s13778_s18 + $0x224] ss:$8 sps:$4 sm:$0xff]   ;;  %v13180_v31 = vld [vmem:[%s13778_s18 + $0x230] ss:$8 sps:$4 sm:$0xff]  }
  0x27   : > { %1163 = vmatpush1.bf16.msra.mxu0 %v13123_v15  ;;  %12873 = vmatpush1.bf16.msra.mxu1 %v13123_v15  ;;  %v13168_v15 = vld [vmem:[%s13778_s18 + $0x210] ss:$8 sps:$4 sm:$0xff]   ;;  %v1608_v18 = vld [vmem:[%s16965_s1 + $0x208] sm:$0xff] }
  0x28   : > { %1164 = vmatprep.subr.bf16.mxu0 %v16979_v1  ;;  %12864 = vmatprep.subr.bf16.mxu1 %v16979_v1  ;;  %v1560_v21 = vld [vmem:[%s16965_s1 + $0x88] sm:$0xff] }
  0x29   : > { %v13174_v23 = vld [vmem:[%s13778_s18 + $0x220] ss:$8 sps:$4 sm:$0xff]   ;;  %v13175_v24 = vld [vmem:[%s13778_s18 + $0x84] ss:$8 sps:$4 sm:$0xff]  }
  0x2a   : > { %1692 = vperm.xlu0 %13115, %v1558_v32   ;;  %1697 = vperm.xlu1 %13116, %v1559_v36   ;;  %v13181_v32 = vld [vmem:[%s13778_s18 + $0x94] ss:$8 sps:$4 sm:$0xff]   ;;  %v1572_v33 = vld [vmem:[%s16965_s1 + $0xe8] sm:$0xff]  ;;  %v1595_v36 = vld [vmem:[%s16965_s1 + $0x1a0] sm:$0xff] }
  0x2b   : > { %1165 = vmatpush1.bf16.msra.mxu0 %v13124_v19  ;;  %12874 = vmatpush1.bf16.msra.mxu1 %v13124_v19  ;;  %v1554_v19 = vld [vmem:[%s16965_s1 + $0x58] sm:$0xff] }
  0x2c   : > { %1166 = vmatprep.subr.bf16.mxu0 %v16979_v1  ;;  %12865 = vmatprep.subr.bf16.mxu1 %v16979_v1 }
  0x2e   : > { %1617 = vperm.xlu0 %13115, %v1543_v34   ;;  %1622 = vperm.xlu1 %13116, %v1544_v41   ;;  %v1593_v34 = vld [vmem:[%s16965_s1 + $0x190] sm:$0xff]  ;;  %v1579_v41 = vld [vmem:[%s16965_s1 + $0x120] sm:$0xff] }
  0x2f   : > { %1167 = vmatpush1.bf16.msra.mxu0 %v13125_v20  ;;  %12875 = vmatpush1.bf16.msra.mxu1 %v13125_v20  ;;  %v1553_v20 = vld [vmem:[%s16965_s1 + $0x50] sm:$0xff] }
  0x30   : > { %1168 = vmatprep.subr.bf16.mxu0 %v16979_v1  ;;  %12866 = vmatprep.subr.bf16.mxu1 %v16979_v1 }
  0x32   : > { %1627 = vperm.xlu0 %13115, %v1545_v37   ;;  %1632 = vperm.xlu1 %13116, %v1546_v44   ;;  %v13183_v37 = vld [vmem:[%s13778_s18 + $0x90] ss:$8 sps:$4 sm:$0xff]   ;;  %v13187_v44 = vld [vmem:[%s13778_s18 + $0xb4] ss:$8 sps:$4 sm:$0xff]  }
  0x33   : > { %1169 = vmatpush1.bf16.msra.mxu0 %v1148_v26  ;;  %12876 = vmatpush1.bf16.msra.mxu1 %v1148_v26  ;;  %v1555_v26 = vld [vmem:[%s16965_s1 + $0x60] sm:$0xff] }
  0x36   : > { %1183 = vmatmul.mubr.bf16.vlgmr.msra.gmra.mrb[0].mxu0 %v13127_v27  ;;  %1399 = vmatmul.mubr.bf16.vlgmr.msra.gmra.mrb[0].mxu1 %v13130_v28  ;;  %v1571_v27 = vld [vmem:[%s16965_s1 + $0xe0] sm:$0xff]  ;;  %v1570_v28 = vld [vmem:[%s16965_s1 + $0xd8] sm:$0xff] }
  0x37   : > { %11119 = vmatprep.mubr.msk.bf16.mxu0 %vm1034_vm0, %v13133_v29  ;;  %11146 = vmatprep.mubr.msk.bf16.mxu1 %vm1034_vm0, %v13135_v30  ;;  %v1573_v29 = vld [vmem:[%s16965_s1 + $0xf0] sm:$0xff]  ;;  %v13179_v30 = vld [vmem:[%s13778_s18 + $0x80] ss:$8 sps:$4 sm:$0xff]  }
  0x38   : > { %1642 = vperm.xlu0 %13115, %v1548_v42   ;;  %1647 = vperm.xlu1 %13116, %v1549_v49   ;;  %v1582_v42 = vld [vmem:[%s16965_s1 + $0x138] sm:$0xff] }
  0x39   : > { %v13189_v49 = vld [vmem:[%s13778_s18 + $0xb0] ss:$8 sps:$4 sm:$0xff]  }
  0x3c   : > { %1652 = vperm.xlu0 %13115, %v1550_v45   ;;  %1657 = vperm.xlu1 %13116, %v1551_v51   ;;  %v1581_v45 = vld [vmem:[%s16965_s1 + $0x130] sm:$0xff]  ;;  %v1586_v51 = vld [vmem:[%s16965_s1 + $0x158] sm:$0xff] }
  0x3e   : > { %1191 = vmatmul.mubr.bf16.gmra.mrb[4].mxu0 %v13137_v35  ;;  %1407 = vmatmul.mubr.bf16.gmra.mrb[4].mxu1 %v13138_v38  ;;  %v1578_v35 = vld [vmem:[%s16965_s1 + $0x118] sm:$0xff]  ;;  %v13184_v38 = vld [vmem:[%s13778_s18 + $0xa4] ss:$8 sps:$4 sm:$0xff]  }
  0x3f   : > { %11120 = vmatprep.mubr.msk.bf16.mxu0 %vm1034_vm0, %v13139_v39  ;;  %11147 = vmatprep.mubr.msk.bf16.mxu1 %vm1034_vm0, %v13141_v40  ;;  %v1594_v39 = vld [vmem:[%s16965_s1 + $0x198] sm:$0xff]  ;;  %v1580_v40 = vld [vmem:[%s16965_s1 + $0x128] sm:$0xff] }
  0x40   : > { %1777 = vperm.xlu0 %13115, %v1575_v50   ;;  %1782 = vperm.xlu1 %13116, %v1576_v57   ;;  %v13190_v50 = vld [vmem:[%s13778_s18 + $0xc4] ss:$8 sps:$4 sm:$0xff]  }
  0x41   : > { %v1588_v57 = vld [vmem:[%s16965_s1 + $0x168] sm:$0xff] }
  0x44   : > { %1787 = vperm.xlu0 %13115, %v1577_v52   ;;  %1707 = vperm.xlu1 %13116, %v1561_v59   ;;  %v1605_v52 = vld [vmem:[%s16965_s1 + $0x1f0] sm:$0xff]  ;;  %v1590_v59 = vld [vmem:[%s16965_s1 + $0x178] sm:$0xff] }
  0x46   : > { %1199 = vmatmul.mubr.bf16.gmra.mrb[8].mxu0 %v13143_v43  ;;  %1415 = vmatmul.mubr.bf16.gmra.mrb[8].mxu1 %v13144_v46  ;;  %v13186_v43 = vld [vmem:[%s13778_s18 + $0xa0] ss:$8 sps:$4 sm:$0xff]   ;;  %v1585_v46 = vld [vmem:[%s16965_s1 + $0x150] sm:$0xff] }
  0x47   : > { %11121 = vmatprep.mubr.msk.bf16.mxu0 %vm1034_vm0, %v13145_v47  ;;  %11148 = vmatprep.mubr.msk.bf16.mxu1 %vm1034_vm0, %v13147_v48  ;;  %v1584_v47 = vld [vmem:[%s16965_s1 + $0x148] sm:$0xff]  ;;  %v1587_v48 = vld [vmem:[%s16965_s1 + $0x160] sm:$0xff] }
  0x48   : > { %1712 = vperm.xlu0 %13115, %v1562_v58   ;;  %1717 = vperm.xlu1 %13116, %v1563_v2   ;;  %v1591_v58 = vld [vmem:[%s16965_s1 + $0x180] sm:$0xff] }
  0x4c   : > { %1722 = vperm.xlu0 %13115, %v1564_v62   ;;  %1732 = vperm.xlu1 %13116, %v1566_v4  }
  0x4e   : > { %1207 = vmatmul.mubr.bf16.gmra.mrb[12].mxu0 %v13149_v53  ;;  %1423 = vmatmul.mubr.bf16.gmra.mrb[12].mxu1 %v13150_v54  ;;  %v1600_v53 = vld [vmem:[%s16965_s1 + $0x1c8] sm:$0xff]  ;;  %v1589_v54 = vld [vmem:[%s16965_s1 + $0x170] sm:$0xff] }
  0x4f   : > { %11122 = vmatprep.mubr.msk.bf16.mxu0 %vm1034_vm0, %v13151_v55  ;;  %11149 = vmatprep.mubr.msk.bf16.mxu1 %vm1034_vm0, %v13153_v56  ;;  %v13192_v55 = vld [vmem:[%s13778_s18 + $0xc0] ss:$8 sps:$4 sm:$0xff]   ;;  %v13193_v56 = vld [vmem:[%s13778_s18 + $0xd4] ss:$8 sps:$4 sm:$0xff]  }
  0x50   : > { %1737 = vperm.xlu0 %13115, %v1567_v3   ;;  %1742 = vperm.xlu1 %13116, %v1568_v10   ;;  %v552_v3 = vld [vmem:[%s16966_s2] sm:$0xff] }
  0x54   : > { %1747 = vperm.xlu0 %13115, %v1569_v5   ;;  %1932 = vperm.xlu1 %13116, %v1606_v12   ;;  %v1614_v5 = vld [vmem:[%s16965_s1 + $0x238] sm:$0xff] }
  0x56   : > { %1215 = vmatmul.mubr.bf16.gmra.mrb[16].mxu0 %v13155_v60  ;;  %1431 = vmatmul.mubr.bf16.gmra.mrb[16].mxu1 %v13156_v61  ;;  %v1609_v60 = vld [vmem:[%s16965_s1 + $0x210] sm:$0xff] }
  0x57   : > { %11123 = vmatprep.mubr.msk.bf16.mxu0 %vm1034_vm0, %v13157_v63  ;;  %11150 = vmatprep.mubr.msk.bf16.mxu1 %vm1034_vm0, %v13159_v0  ;;  %v13195_v61 = vld [vmem:[%s13778_s18 + $0xd0] ss:$8 sps:$4 sm:$0xff]   ;;  %v13196_v63 = vld [vmem:[%s13778_s18 + $0xe4] ss:$8 sps:$4 sm:$0xff]  }
  0x58   : > { %1937 = vperm.xlu0 %13115, %v1607_v11   ;;  %1942 = vperm.xlu1 %13116, %v1608_v18   ;;  %v1596_v0 = vld [vmem:[%s16965_s1 + $0x1a8] sm:$0xff] }
  0x59   : > { %v553_v11 = vld [vmem:[%s16966_s2 + $0x8] sm:$0xff] }
  0x5c   : > { %1662 = vperm.xlu0 %13115, %v1552_v13   ;;  %1667 = vperm.xlu1 %13116, %v1553_v20   ;;  %v13205_v20 = vld [vmem:[%s13778_s18 + $0x114] ss:$8 sps:$4 sm:$0xff]  }
  0x5e   : > { %1223 = vmatmul.mubr.bf16.gmra.mrb[20].mxu0 %v13161_v6  ;;  %1439 = vmatmul.mubr.bf16.gmra.mrb[20].mxu1 %v13162_v7  ;;  %v554_v6 = vld [vmem:[%s16966_s2 + $0x10] sm:$0x3f]  ;;  %v13198_v7 = vld [vmem:[%s13778_s18 + $0xe0] ss:$8 sps:$4 sm:$0xff]  }
  0x5f   : > { %11124 = vmatprep.mubr.msk.bf16.mxu0 %vm1034_vm0, %v13163_v8  ;;  %11151 = vmatprep.mubr.msk.bf16.mxu1 %vm1034_vm0, %v13165_v9  ;;  %v13199_v9 = vld [vmem:[%s13778_s18 + $0xf4] ss:$8 sps:$4 sm:$0xff]  }
  0x60   : > { %1672 = vperm.xlu0 %13115, %v1554_v19   ;;  %1677 = vperm.xlu1 %13116, %v1555_v26   ;;  %v13204_v19 = vld [vmem:[%s13778_s18 + $0x100] ss:$8 sps:$4 sm:$0xff]   ;;  %v13208_v26 = vld [vmem:[%s13778_s18 + $0x124] ss:$8 sps:$4 sm:$0xff]  }
  0x64   : > { %1702 = vperm.xlu0 %13115, %v1560_v21   ;;  %1752 = vperm.xlu1 %13116, %v1570_v28  }
  0x66   : > { %1231 = vmatmul.mubr.bf16.gmra.mrb[24].mxu0 %v13167_v14  ;;  %1447 = vmatmul.mubr.bf16.gmra.mrb[24].mxu1 %v13168_v15  ;;  %v13201_v14 = vld [vmem:[%s13778_s18 + $0xf0] ss:$8 sps:$4 sm:$0xff]  }
  0x67   : > { %11125 = vmatprep.mubr.msk.bf16.mxu0 %vm1034_vm0, %v13169_v16  ;;  %11152 = vmatprep.mubr.msk.bf16.mxu1 %vm1034_vm0, %v13171_v17  ;;  %v13202_v16 = vld [vmem:[%s13778_s18 + $0x104] ss:$8 sps:$4 sm:$0xff]  }
  0x68   : > { %1757 = vperm.xlu0 %13115, %v1571_v27   ;;  %1762 = vperm.xlu1 %13116, %v1572_v33  }
  0x6c   : > { %1767 = vperm.xlu0 %13115, %v1573_v29   ;;  %1792 = vperm.xlu1 %13116, %v1578_v35  }
  0x6e   : > { %1239 = vmatmul.mubr.bf16.gmra.mrb[28].mxu0 %v13173_v22  ;;  %1455 = vmatmul.mubr.bf16.gmra.mrb[28].mxu1 %v13174_v23 }
  0x6f   : > { %11126 = vmatprep.mubr.msk.bf16.mxu0 %vm1034_vm0, %v13175_v24  ;;  %11153 = vmatprep.mubr.msk.bf16.mxu1 %vm1034_vm0, %v13177_v25  ;;  %v13207_v25 = vld [vmem:[%s13778_s18 + $0x110] ss:$8 sps:$4 sm:$0xff]  }
  0x70   : > { %1867 = vperm.xlu0 %13115, %v1593_v34   ;;  %1872 = vperm.xlu1 %13116, %v1594_v39  }
  0x74   : > { %1877 = vperm.xlu0 %13115, %v1595_v36   ;;  %1797 = vperm.xlu1 %13116, %v1579_v41  }
  0x76   : > { %1247 = vmatmul.mubr.bf16.gmra.mrb[32].mxu0 %v13179_v30  ;;  %1463 = vmatmul.mubr.bf16.gmra.mrb[32].mxu1 %v13180_v31  ;;  %v13210_v31 = vld [vmem:[%s13778_s18 + $0x120] ss:$8 sps:$4 sm:$0xff]  }
  0x77   : > { %11127 = vmatprep.mubr.msk.bf16.mxu0 %vm1034_vm0, %v13181_v32  ;;  %v13211_v32 = vld [vmem:[%s13778_s18 + $0x134] ss:$8 sps:$4 sm:$0xff]  }
  0x78   : > { %1802 = vperm.xlu0 %13115, %v1580_v40   ;;  %1807 = vperm.xlu1 %13116, %v1581_v45  }
  0x7c   : > { %1812 = vperm.xlu0 %13115, %v1582_v42   ;;  %1822 = vperm.xlu1 %13116, %v1584_v47  }
  0x7e   : > { %1255 = vmatmul.mubr.bf16.gmra.mrb[36].mxu0 %v13183_v37  ;;  %v13213_v37 = vld [vmem:[%s13778_s18 + $0x130] ss:$8 sps:$4 sm:$0xff]  }
  0x7f   : > { %11128 = vmatprep.mubr.msk.bf16.mxu0 %vm1034_vm0, %v13184_v38  ;;  %v13214_v38 = vld [vmem:[%s13778_s18 + $0x144] ss:$8 sps:$4 sm:$0xff]  }
  0x80   : > { %1827 = vperm.xlu0 %13115, %v1585_v46   ;;  %1832 = vperm.xlu1 %13116, %v1586_v51  }
  0x84   : > { %1837 = vperm.xlu0 %13115, %v1587_v48   ;;  %1902 = vperm.xlu1 %13116, %v1600_v53  }
  0x86   : > { %1263 = vmatmul.mubr.bf16.gmra.mrb[40].mxu0 %v13186_v43  ;;  %v13216_v43 = vld [vmem:[%s13778_s18 + $0x140] ss:$8 sps:$4 sm:$0xff]  }
  0x87   : > { %11129 = vmatprep.mubr.msk.bf16.mxu0 %vm1034_vm0, %v13187_v44  ;;  %v13217_v44 = vld [vmem:[%s13778_s18 + $0x154] ss:$8 sps:$4 sm:$0xff]  }
  0x88   : > { %1927 = vperm.xlu0 %13115, %v1605_v52   ;;  %1842 = vperm.xlu1 %13116, %v1588_v57  }
  0x8c   : > { %1847 = vperm.xlu0 %13115, %v1589_v54   ;;  %1852 = vperm.xlu1 %13116, %v1590_v59  }
  0x8e   : > { %1271 = vmatmul.mubr.bf16.gmra.mrb[44].mxu0 %v13189_v49  ;;  %v13219_v49 = vld [vmem:[%s13778_s18 + $0x150] ss:$8 sps:$4 sm:$0xff]  }
  0x8f   : > { %11130 = vmatprep.mubr.msk.bf16.mxu0 %vm1034_vm0, %v13190_v50  ;;  %v13220_v50 = vld [vmem:[%s13778_s18 + $0x164] ss:$8 sps:$4 sm:$0xff]  }
  0x90   : > { %1857 = vperm.xlu0 %13115, %v1591_v58   ;;  %1882 = vperm.xlu1 %13116, %v1596_v0  }
  0x91   : > { %v14064_v62 = vpop.permute.xlu0 %1887  ;;  %v14070_v2 = vpop.permute.xlu1 %1897 }
  0x94   : > { %1947 = vperm.xlu0 %13115, %v1609_v60   ;;  %1972 = vperm.xlu1 %13116, %v1614_v5  }
  0x95   : > { %v14075_v4 = vpop.permute.xlu0 %1892  ;;  %v14088_v10 = vpop.permute.xlu1 %1952 }
  0x96   : > { %1279 = vmatmul.mubr.bf16.gmra.mrb[48].mxu0 %v13192_v55  ;;  %v13222_v55 = vld [vmem:[%s13778_s18 + $0x160] ss:$8 sps:$4 sm:$0xff]  }
  0x97   : > { %11131 = vmatprep.mubr.msk.bf16.mxu0 %vm1034_vm0, %v13193_v56  ;;  %v13223_v56 = vld [vmem:[%s13778_s18 + $0x174] ss:$8 sps:$4 sm:$0xff]  }
  0x98   : > { %2270 = vperm.xlu0 %13115, %v552_v3   ;;  %2275 = vperm.xlu1 %13116, %v553_v11  }
  0x99   : > { %v14085_v8 = vpop.permute.xlu0 %1957  ;;  %v14096_v13 = vpop.permute.xlu1 %1962 }
  0x9c   : > { %2280 = vperm.xlu0 %13115, %v554_v6   ;;  %v13228_v6 = vld [vmem:[%s13778_s18 + $0x180] ss:$8 sps:$4 sm:$0xff]  }
  0x9d   : > { %v14093_v12 = vpop.permute.xlu0 %1967  ;;  %v14102_v17 = vpop.permute.xlu1 %1907 }
  0x9e   : > { %1287 = vmatmul.mubr.bf16.gmra.mrb[52].mxu0 %v13195_v61  ;;  %v13225_v61 = vld [vmem:[%s13778_s18 + $0x170] ss:$8 sps:$4 sm:$0xff]  }
  0x9f   : > { %11132 = vmatprep.mubr.msk.bf16.mxu0 %vm1034_vm0, %v13196_v63  ;;  %v13226_v63 = vld [vmem:[%s13778_s18 + $0x184] ss:$8 sps:$4 sm:$0xff]  }
  0xa1   : > { %v14099_v15 = vpop.permute.xlu0 %1912  ;;  %v14109_v21 = vpop.permute.xlu1 %1917 }
  0xa5   : > { %v14104_v18 = vpop.permute.xlu0 %1922  ;;  %v14114_v23 = vpop.permute.xlu1 %1687 }
  0xa6   : > { %1295 = vmatmul.mubr.bf16.gmra.mrb[56].mxu0 %v13198_v7 }
  0xa7   : > { %11133 = vmatprep.mubr.msk.bf16.mxu0 %vm1034_vm0, %v13199_v9  ;;  %v13229_v9 = vld [vmem:[%s13778_s18 + $0x194] ss:$8 sps:$4 sm:$0xff]  }
  0xa9   : > { %v14111_v22 = vpop.permute.xlu0 %1692  ;;  %v14120_v27 = vpop.permute.xlu1 %1697 }
  0xad   : > { %v14116_v24 = vpop.permute.xlu0 %1617  ;;  %v14125_v29 = vpop.permute.xlu1 %1622 }
  0xae   : > { %1303 = vmatmul.mubr.bf16.gmra.mrb[60].mxu0 %v13201_v14 }
  0xaf   : > { %11134 = vmatprep.mubr.msk.bf16.mxu0 %vm1034_vm0, %v13202_v16 }
  0xb1   : > { %v14122_v28 = vpop.permute.xlu0 %1627  ;;  %v14131_v33 = vpop.permute.xlu1 %1632 }
  0xb6   : > { %1311 = vmatmul.mubr.bf16.gmra.mrb[64].mxu0 %v13204_v19  ;;  %v13231_v19 = vld [vmem:[%s13778_s18 + $0x190] ss:$8 sps:$4 sm:$0xff]  }
  0xb7   : > { %11135 = vmatprep.mubr.msk.bf16.mxu0 %vm1034_vm0, %v13205_v20  ;;  %v14127_v30 = vpop.permute.xlu0 %1642  ;;  %v14136_v35 = vpop.permute.xlu1 %1647  ;;  %v13232_v20 = vld [vmem:[%s13778_s18 + $0x1a4] ss:$8 sps:$4 sm:$0xff]  }
  0xbb   : > { %v14133_v34 = vpop.permute.xlu0 %1652  ;;  %v14142_v39 = vpop.permute.xlu1 %1657 }
  0xbe   : > { %1319 = vmatmul.mubr.bf16.gmra.mrb[68].mxu0 %v13207_v25 }
  0xbf   : > { %11136 = vmatprep.mubr.msk.bf16.mxu0 %vm1034_vm0, %v13208_v26  ;;  %v14138_v36 = vpop.permute.xlu0 %1777  ;;  %v14147_v41 = vpop.permute.xlu1 %1782 }
  0xc3   : > { %v14144_v40 = vpop.permute.xlu0 %1787  ;;  %v14153_v45 = vpop.permute.xlu1 %1707 }
  0xc6   : > { %1327 = vmatmul.mubr.bf16.gmra.mrb[72].mxu0 %v13210_v31 }
  0xc7   : > { %11137 = vmatprep.mubr.msk.bf16.mxu0 %vm1034_vm0, %v13211_v32  ;;  %v14149_v42 = vpop.permute.xlu0 %1712  ;;  %v14158_v47 = vpop.permute.xlu1 %1717  ;;  %v13234_v32 = vld [vmem:[%s13778_s18 + $0x1a0] ss:$8 sps:$4 sm:$0xff]  }
  0xcb   : > { %v14155_v46 = vpop.permute.xlu0 %1722  ;;  %v14164_v51 = vpop.permute.xlu1 %1732 }
  0xce   : > { %1335 = vmatmul.mubr.bf16.gmra.mrb[76].mxu0 %v13213_v37 }
  0xcf   : > { %11138 = vmatprep.mubr.msk.bf16.mxu0 %vm1034_vm0, %v13214_v38  ;;  %v14160_v48 = vpop.permute.xlu0 %1737  ;;  %v14169_v53 = vpop.permute.xlu1 %1742 }
  0xd3   : > { %v14166_v52 = vpop.permute.xlu0 %1747  ;;  %v14175_v57 = vpop.permute.xlu1 %1932 }
  0xd6   : > { %1343 = vmatmul.mubr.bf16.gmra.mrb[80].mxu0 %v13216_v43  ;;  %v14221_v43 = vld [vmem:[%s16968_s4] ss:$0 sm:$0xff] }
  0xd7   : > { %11139 = vmatprep.mubr.msk.bf16.mxu0 %vm1034_vm0, %v13217_v44  ;;  %v14171_v54 = vpop.permute.xlu0 %1937  ;;  %v14180_v59 = vpop.permute.xlu1 %1942 }
  0xdb   : > { %v14177_v58 = vpop.permute.xlu0 %1662  ;;  %v14186_v0 = vpop.permute.xlu1 %1667 }
  0xde   : > { %1351 = vmatmul.mubr.bf16.gmra.mrb[84].mxu0 %v13219_v49 }
  0xdf   : > { %11140 = vmatprep.mubr.msk.bf16.mxu0 %vm1034_vm0, %v13220_v50  ;;  %v14182_v60 = vpop.permute.xlu0 %1672  ;;  %v14191_v5 = vpop.permute.xlu1 %1677 }
  0xe3   : > { %v14188_v3 = vpop.permute.xlu0 %1702  ;;  %v14197_v11 = vpop.permute.xlu1 %1752 }
  0xe6   : > { %1359 = vmatmul.mubr.bf16.gmra.mrb[88].mxu0 %v13222_v55 }
  0xe7   : > { %11141 = vmatprep.mubr.msk.bf16.mxu0 %vm1034_vm0, %v13223_v56  ;;  %v14194_v7 = vpop.permute.xlu0 %1757  ;;  %v14202_v16 = vpop.permute.xlu1 %1762 }
  0xeb   : > { %v14199_v14 = vpop.permute.xlu0 %1767  ;;  %v14206_v25 = vpop.permute.xlu1 %1792 }
  0xee   : > { %1367 = vmatmul.mubr.bf16.gmra.mrb[92].mxu0 %v13225_v61 }
  0xef   : > { %11142 = vmatprep.mubr.msk.bf16.mxu0 %vm1034_vm0, %v13226_v63  ;;  %v14208_v26 = vpop.permute.xlu0 %1867  ;;  %v14211_v31 = vpop.permute.xlu1 %1872 }
  0xf0   : > { %17026 = vst [vmem:[#allocation10_spill] sm:$0xff] %v14208_v26  ;;  %17027 = vst [vmem:[#allocation11_spill] sm:$0xff] %v14211_v31 }
  0xf3   : > { %v14214_v37 = vpop.permute.xlu0 %1877  ;;  %v14216_v38 = vpop.permute.xlu1 %1797 }
  0xf4   : > { %17028 = vst [vmem:[#allocation12_spill] sm:$0xff] %v14214_v37 }
  0xf6   : > { %1375 = vmatmul.mubr.bf16.gmra.mrb[96].mxu0 %v13228_v6 }
  0xf7   : > { %11143 = vmatprep.mubr.msk.bf16.mxu0 %vm1034_vm0, %v13229_v9  ;;  %v14224_v44 = vpop.permute.xlu0 %1802  ;;  %v14226_v49 = vpop.permute.xlu1 %1807 }
  0xf8   : > { %17029 = vst [vmem:[#allocation13_spill] sm:$0xff] %v14224_v44  ;;  %17030 = vst [vmem:[#allocation14_spill] sm:$0xff] %v14226_v49 }
  0xfe   : > { %1383 = vmatmul.mubr.bf16.gmra.mrb[100].mxu0 %v13231_v19 }
  0xff   : > { %11144 = vmatprep.mubr.msk.bf16.mxu0 %vm1034_vm0, %v13232_v20  ;;  %vm8201_vm0 = vcmask 1048320  }
 0x106   : > { %1391 = vmatmul.mubr.bf16.gmra.mrb[104].mxu0 %v13234_v32 }
 0x107   : > { %5061 = vmatprep.mubr.bf16.mxu0 %v16979_v1 }
 0x109   : > { %v1184_v50 = vpop.f32.mrb[0].mxu0  ;;  %v1400_v55 = vpop.f32.mrb[0].mxu1 }
 0x10a   : > { %v1185_v56 = vadd.f32 %v14221_v43, %v1184_v50  ;;  %v1186_v61 = vpop.f32.mrb[1].mxu0  ;;  %v1401_v63 = vadd.f32 %v14221_v43, %v1400_v55  ;;  %v1402_v6 = vpop.f32.mrb[1].mxu1 }
 0x10b   : > { %v1187_v9 = vpop.f32.mrb[2].mxu0  ;;  %v1403_v19 = vpop.f32.mrb[2].mxu1 }
 0x10c   : > { %v1471_v20 = vmax.f32 %v1185_v56, 0.0  ;;  %v1188_v32 = vadd.f32 %v14221_v43, %v1187_v9  ;;  %v1189_v37 = vpop.f32.mrb[3].mxu0  ;;  %v1525_v31 = vmax.f32 %v1401_v63, 0.0  ;;  %v1404_v1 = vadd.f32 %v14221_v43, %v1403_v19  ;;  %v1405_v26 = vpop.f32.mrb[3].mxu1 }
 0x10d   : > { %v14238_v37 = vpop.permute.xlu0 %1812  ;;  %v14240_v63 = vpop.permute.xlu1 %1822 }
 0x10e   : > { %v1975_v49 = vmul.f32 %v14116_v24, %v1471_v20  ;;  %v1472_v44 = vmax.f32 %v1188_v32, 0.0  ;;  %v2029_v50 = vmul.f32 %v14064_v62, %v1525_v31  ;;  %v1526_v61 = vmax.f32 %v1404_v1, 0.0 }
 0x110   : > { %2047 = vst.msk [vmem:[#allocation2] sm:$0xff] %vm469_vm3, %v1975_v49  ;;  %v1976_v55 = vmul.f32 %v14125_v29, %v1472_v44  ;;  %2101 = vst.msk [vmem:[#allocation2 + $0x1b0] sm:$0xff] %vm469_vm3, %v2029_v50  ;;  %v2030_v56 = vmul.f32 %v14075_v4, %v1526_v61  ;;  %v13235_v4 = vld [vmem:[%s16969_s5] sm:$0xff]  }
 0x111   : > { %v1192_v26 = vpop.f32.mrb[4].mxu0  ;;  %v1408_v6 = vpop.f32.mrb[4].mxu1  ;;  %12449 = vmatprep.subr.bf16.mxu1 %v13235_v4 }
 0x112   : > { %2048 = vst.msk [vmem:[#allocation2 + $0x8] sm:$0xff] %vm469_vm3, %v1976_v55  ;;  %v1193_v24 = vadd.f32 %v14221_v43, %v1192_v26  ;;  %v1194_v62 = vpop.f32.mrb[5].mxu0  ;;  %2102 = vst.msk [vmem:[#allocation2 + $0x1b8] sm:$0xff] %vm469_vm3, %v2030_v56  ;;  %v1409_v1 = vadd.f32 %v14221_v43, %v1408_v6  ;;  %v1410_v29 = vpop.f32.mrb[5].mxu1  ;;  %12450 = vmatpush3.bf16.msra.mxu1 %v13235_v4 }
 0x113   : > { %v1195_v31 = vpop.f32.mrb[6].mxu0  ;;  %v1411_v44 = vpop.f32.mrb[6].mxu1 }
 0x114   : > { %v1473_v49 = vmax.f32 %v1193_v24, 0.0  ;;  %v1196_v9 = vadd.f32 %v14221_v43, %v1195_v31  ;;  %v1197_v19 = vpop.f32.mrb[7].mxu0  ;;  %v1527_v20 = vmax.f32 %v1409_v1, 0.0  ;;  %v1413_v32 = vpop.f32.mrb[7].mxu1  ;;  %v1412_v56 = vadd.f32 %v14221_v43, %v1411_v44  ;;  %v13236_v31 = vld [vmem:[%s16969_s5 + $0x8] sm:$0xff]  }
 0x115   : > { %v14253_v26 = vpop.permute.xlu1 %1832  ;;  %v14258_v24 = vpop.permute.xlu0 %1827  ;;  %12451 = vmatprep.subr.bf16.mxu1 %v13236_v31 }
 0x116   : > { %v1977_v50 = vmul.f32 %v14122_v28, %v1473_v49  ;;  %v1474_v61 = vmax.f32 %v1196_v9, 0.0  ;;  %v2031_v55 = vmul.f32 %v14070_v2, %v1527_v20  ;;  %v1528_v29 = vmax.f32 %v1412_v56, 0.0  ;;  %12452 = vmatpush3.bf16.msra.mxu1 %v13236_v31 }
 0x118   : > { %2049 = vst.msk [vmem:[#allocation2 + $0x10] sm:$0xff] %vm469_vm3, %v1977_v50  ;;  %v1978_v6 = vmul.f32 %v14131_v33, %v1474_v61  ;;  %2103 = vst.msk [vmem:[#allocation2 + $0x1c0] sm:$0xff] %vm469_vm3, %v2031_v55 }
 0x119   : > { %v1200_v62 = vpop.f32.mrb[8].mxu0  ;;  %v1416_v1 = vpop.f32.mrb[8].mxu1 }
 0x11a   : > { %2050 = vst.msk [vmem:[#allocation2 + $0x18] sm:$0xff] %vm469_vm3, %v1978_v6  ;;  %v1202_v28 = vpop.f32.mrb[9].mxu0  ;;  %v1417_v2 = vadd.f32 %v14221_v43, %v1416_v1  ;;  %v1418_v4 = vpop.f32.mrb[9].mxu1  ;;  %v13237_v62 = vld [vmem:[%s16969_s5 + $0x10] sm:$0xff]  }
 0x11b   : > { %v1203_v44 = vpop.f32.mrb[10].mxu0  ;;  %v1419_v49 = vpop.f32.mrb[10].mxu1  ;;  %12453 = vmatprep.subr.bf16.mxu1 %v13237_v62 }
 0x11c   : > { %v1204_v33 = vadd.f32 %v14221_v43, %v1203_v44  ;;  %v1205_v9 = vpop.f32.mrb[11].mxu0  ;;  %v1529_v19 = vmax.f32 %v1417_v2, 0.0  ;;  %v1420_v20 = vadd.f32 %v14221_v43, %v1419_v49  ;;  %v1421_v32 = vpop.f32.mrb[11].mxu1  ;;  %12454 = vmatpush3.bf16.msra.mxu1 %v13237_v62 }
 0x11d   : > { %v1903_v50 = vpop.permute.xlu1 %1902  ;;  %v14274_v2 = vpop.permute.xlu0 %1837 }
 0x11e   : > { %v1476_v61 = vmax.f32 %v1204_v33, 0.0  ;;  %v2033_v55 = vmul.f32 %v14102_v17, %v1529_v19  ;;  %v1530_v56 = vmax.f32 %v1420_v20, 0.0  ;;  %v2032_v6 = vmul.f32 %v1903_v50, %v1528_v29 }
 0x120   : > { %v1980_v1 = vmul.f32 %v14127_v30, %v1476_v61  ;;  %2105 = vst.msk [vmem:[#allocation2 + $0x1d0] sm:$0xff] %vm469_vm3, %v2033_v55  ;;  %v2034_v28 = vmul.f32 %v14099_v15, %v1530_v56  ;;  %2104 = vst.msk [vmem:[#allocation2 + $0x1c8] sm:$0xff] %vm469_vm3, %v2032_v6  ;;  %v13238_v15 = vld [vmem:[%s16969_s5 + $0x18] sm:$0xff]  }
 0x121   : > { %v1208_v4 = vpop.f32.mrb[12].mxu0  ;;  %v1424_v31 = vpop.f32.mrb[12].mxu1  ;;  %12455 = vmatprep.subr.bf16.mxu1 %v13238_v15 }
 0x122   : > { %2052 = vst.msk [vmem:[#allocation2 + $0x28] sm:$0xff] %vm469_vm3, %v1980_v1  ;;  %v1209_v17 = vadd.f32 %v14221_v43, %v1208_v4  ;;  %v1210_v29 = vpop.f32.mrb[13].mxu0  ;;  %2106 = vst.msk [vmem:[#allocation2 + $0x1d8] sm:$0xff] %vm469_vm3, %v2034_v28  ;;  %v1425_v30 = vadd.f32 %v14221_v43, %v1424_v31  ;;  %v1426_v44 = vpop.f32.mrb[13].mxu1  ;;  %12456 = vmatpush3.bf16.msra.mxu1 %v13238_v15  ;;  %v14291_v1 = vld [vmem:[%s16969_s5] sm:$0xff]  }
 0x123   : > { %v1211_v49 = vpop.f32.mrb[14].mxu0  ;;  %v1427_v33 = vpop.f32.mrb[14].mxu1  ;;  %12461 = vmatprep.subr.bf16.mxu1 %v14291_v1 }
 0x124   : > { %v1477_v9 = vmax.f32 %v1209_v17, 0.0  ;;  %v1212_v19 = vadd.f32 %v14221_v43, %v1211_v49  ;;  %v1213_v20 = vpop.f32.mrb[15].mxu0  ;;  %v1531_v32 = vmax.f32 %v1425_v30, 0.0  ;;  %v1428_v50 = vadd.f32 %v14221_v43, %v1427_v33  ;;  %v1429_v61 = vpop.f32.mrb[15].mxu1 }
 0x125   : > { %v1928_v31 = vpop.permute.xlu0 %1927 }
 0x126   : > { %v1981_v55 = vmul.f32 %v14136_v35, %v1477_v9  ;;  %v1478_v56 = vmax.f32 %v1212_v19, 0.0  ;;  %v2035_v6 = vmul.f32 %v14109_v21, %v1531_v32  ;;  %v1532_v62 = vmax.f32 %v1428_v50, 0.0 }
 0x128   : > { %2053 = vst.msk [vmem:[#allocation2 + $0x30] sm:$0xff] %vm469_vm3, %v1981_v55  ;;  %v1982_v28 = vmul.f32 %v14133_v34, %v1478_v56  ;;  %2107 = vst.msk [vmem:[#allocation2 + $0x1e0] sm:$0xff] %vm469_vm3, %v2035_v6  ;;  %v2036_v4 = vmul.f32 %v14104_v18, %v1532_v62 }
 0x129   : > { %v1216_v35 = vpop.f32.mrb[16].mxu0  ;;  %v1432_v17 = vpop.f32.mrb[16].mxu1 }
 0x12a   : > { %2054 = vst.msk [vmem:[#allocation2 + $0x38] sm:$0xff] %vm469_vm3, %v1982_v28  ;;  %v1217_v21 = vadd.f32 %v14221_v43, %v1216_v35  ;;  %v1218_v29 = vpop.f32.mrb[17].mxu0  ;;  %2108 = vst.msk [vmem:[#allocation2 + $0x1e8] sm:$0xff] %vm469_vm3, %v2036_v4  ;;  %v1433_v30 = vadd.f32 %v14221_v43, %v1432_v17  ;;  %v1434_v44 = vpop.f32.mrb[17].mxu1 }
 0x12b   : > { %v1219_v34 = vpop.f32.mrb[18].mxu0  ;;  %v1435_v15 = vpop.f32.mrb[18].mxu1 }
 0x12c   : > { %v1479_v49 = vmax.f32 %v1217_v21, 0.0  ;;  %v1220_v18 = vadd.f32 %v14221_v43, %v1219_v34  ;;  %v1221_v33 = vpop.f32.mrb[19].mxu0  ;;  %v1533_v9 = vmax.f32 %v1433_v30, 0.0  ;;  %v1436_v19 = vadd.f32 %v14221_v43, %v1435_v15  ;;  %v1437_v20 = vpop.f32.mrb[19].mxu1 }
 0x12d   : > { %v14309_v62 = vpop.permute.xlu0 %1847 }
 0x12e   : > { %v1983_v32 = vmul.f32 %v14142_v39, %v1479_v49  ;;  %v1480_v50 = vmax.f32 %v1220_v18, 0.0  ;;  %v1534_v61 = vmax.f32 %v1436_v19, 0.0  ;;  %v2037_v55 = vmul.f32 %v1928_v31, %v1533_v9 }
 0x130   : > { %2055 = vst.msk [vmem:[#allocation2 + $0x40] sm:$0xff] %vm469_vm3, %v1983_v32  ;;  %v1984_v56 = vmul.f32 %v14177_v58, %v1480_v50  ;;  %v2038_v6 = vmul.f32 %v14175_v57, %v1534_v61  ;;  %2109 = vst.msk [vmem:[#allocation2 + $0x1f0] sm:$0xff] %vm469_vm3, %v2037_v55  ;;  %v14325_v50 = vpop.permute.xlu1 %1842 }
 0x131   : > { %v1224_v28 = vpop.f32.mrb[20].mxu0  ;;  %v1440_v4 = vpop.f32.mrb[20].mxu1 }
 0x132   : > { %2056 = vst.msk [vmem:[#allocation2 + $0x48] sm:$0xff] %vm469_vm3, %v1984_v56  ;;  %v1225_v35 = vadd.f32 %v14221_v43, %v1224_v28  ;;  %v1226_v39 = vpop.f32.mrb[21].mxu0  ;;  %2110 = vst.msk [vmem:[#allocation2 + $0x1f8] sm:$0xff] %vm469_vm3, %v2038_v6  ;;  %v1441_v31 = vadd.f32 %v14221_v43, %v1440_v4  ;;  %v1442_v17 = vpop.f32.mrb[21].mxu1 }
 0x133   : > { %v1227_v21 = vpop.f32.mrb[22].mxu0  ;;  %v1443_v58 = vpop.f32.mrb[22].mxu1 }
 0x134   : > { %v1481_v29 = vmax.f32 %v1225_v35, 0.0  ;;  %v1228_v57 = vadd.f32 %v14221_v43, %v1227_v21  ;;  %v1229_v30 = vpop.f32.mrb[23].mxu0  ;;  %v1535_v44 = vmax.f32 %v1441_v31, 0.0  ;;  %v1444_v34 = vadd.f32 %v14221_v43, %v1443_v58  ;;  %v1445_v15 = vpop.f32.mrb[23].mxu1 }
 0x135   : > { %v14319_v19 = vpop.permute.xlu0 %1857  ;;  %v14335_v30 = vpop.permute.xlu1 %1852 }
 0x136   : > { %v1482_v49 = vmax.f32 %v1228_v57, 0.0  ;;  %v1985_v18 = vmul.f32 %v14186_v0, %v1481_v29  ;;  %v2039_v33 = vmul.f32 %v14171_v54, %v1535_v44  ;;  %v1536_v9 = vmax.f32 %v1444_v34, 0.0 }
 0x138   : > { %2057 = vst.msk [vmem:[#allocation2 + $0x50] sm:$0xff] %vm469_vm3, %v1985_v18  ;;  %v1986_v20 = vmul.f32 %v14182_v60, %v1482_v49  ;;  %2111 = vst.msk [vmem:[#allocation2 + $0x200] sm:$0xff] %vm469_vm3, %v2039_v33  ;;  %v2040_v32 = vmul.f32 %v14180_v59, %v1536_v9 }
 0x139   : > { %v1232_v61 = vpop.f32.mrb[24].mxu0  ;;  %v1448_v55 = vpop.f32.mrb[24].mxu1 }
 0x13a   : > { %2058 = vst.msk [vmem:[#allocation2 + $0x58] sm:$0xff] %vm469_vm3, %v1986_v20  ;;  %v1233_v0 = vadd.f32 %v14221_v43, %v1232_v61  ;;  %v1234_v54 = vpop.f32.mrb[25].mxu0  ;;  %2112 = vst.msk [vmem:[#allocation2 + $0x208] sm:$0xff] %vm469_vm3, %v2040_v32  ;;  %v1449_v56 = vadd.f32 %v14221_v43, %v1448_v55  ;;  %v1450_v6 = vpop.f32.mrb[25].mxu1 }
 0x13b   : > { %v1235_v28 = vpop.f32.mrb[26].mxu0  ;;  %v1451_v60 = vpop.f32.mrb[26].mxu1 }
 0x13c   : > { %v1483_v4 = vmax.f32 %v1233_v0, 0.0  ;;  %v1237_v35 = vpop.f32.mrb[27].mxu0  ;;  %v1537_v39 = vmax.f32 %v1449_v56, 0.0  ;;  %v1452_v59 = vadd.f32 %v14221_v43, %v1451_v60  ;;  %v1453_v31 = vpop.f32.mrb[27].mxu1 }
 0x13d   : > { %v1948_v17 = vpop.permute.xlu0 %1947  ;;  %v14349_v35 = vpop.permute.xlu1 %1882 }
 0x13e   : > { %v1987_v21 = vmul.f32 %v14191_v5, %v1483_v4  ;;  %v1538_v58 = vmax.f32 %v1452_v59, 0.0  ;;  %v2041_v29 = vmul.f32 %v1948_v17, %v1537_v39 }
 0x140   : > { %2059 = vst.msk [vmem:[#allocation2 + $0x60] sm:$0xff] %vm469_vm3, %v1987_v21  ;;  %v2042_v57 = vmul.f32 %v14088_v10, %v1538_v58  ;;  %2113 = vst.msk [vmem:[#allocation2 + $0x210] sm:$0xff] %vm469_vm3, %v2041_v29 }
 0x141   : > { %v1240_v44 = vpop.f32.mrb[28].mxu0  ;;  %v1456_v34 = vpop.f32.mrb[28].mxu1 }
 0x142   : > { %2114 = vst.msk [vmem:[#allocation2 + $0x218] sm:$0xff] %vm469_vm3, %v2042_v57  ;;  %v1241_v15 = vadd.f32 %v14221_v43, %v1240_v44  ;;  %v1457_v49 = vadd.f32 %v14221_v43, %v1456_v34  ;;  %v1242_v18 = vpop.f32.mrb[29].mxu0  ;;  %v1458_v5 = vpop.f32.mrb[29].mxu1 }
 0x143   : > { %v1243_v33 = vpop.f32.mrb[30].mxu0  ;;  %v1459_v9 = vpop.f32.mrb[30].mxu1 }
 0x144   : > { %v1485_v20 = vmax.f32 %v1241_v15, 0.0  ;;  %v1539_v32 = vmax.f32 %v1457_v49, 0.0  ;;  %v1244_v10 = vadd.f32 %v14221_v43, %v1243_v33  ;;  %v1460_v61 = vadd.f32 %v14221_v43, %v1459_v9  ;;  %v1245_v55 = vpop.f32.mrb[31].mxu0  ;;  %v1461_v0 = vpop.f32.mrb[31].mxu1 }
 0x145   : > { %v1973_v33 = vpop.permute.xlu1 %1972 }
 0x146   : > { %v1989_v54 = vmul.f32 %v14114_v23, %v1485_v20  ;;  %v2043_v56 = vmul.f32 %v14085_v8, %v1539_v32  ;;  %v1486_v6 = vmax.f32 %v1244_v10, 0.0  ;;  %v1540_v28 = vmax.f32 %v1460_v61, 0.0 }
 0x148   : > { %2061 = vst.msk [vmem:[#allocation2 + $0x70] sm:$0xff] %vm469_vm3, %v1989_v54  ;;  %2115 = vst.msk [vmem:[#allocation2 + $0x220] sm:$0xff] %vm469_vm3, %v2043_v56  ;;  %v1990_v60 = vmul.f32 %v14111_v22, %v1486_v6  ;;  %v2044_v4 = vmul.f32 %v14096_v13, %v1540_v28 }
 0x149   : > { %v1248_v39 = vpop.f32.mrb[32].mxu0  ;;  %v1464_v59 = vpop.f32.mrb[32].mxu1 }
 0x14a   : > { %2062 = vst.msk [vmem:[#allocation2 + $0x78] sm:$0xff] %vm469_vm3, %v1990_v60  ;;  %2116 = vst.msk [vmem:[#allocation2 + $0x228] sm:$0xff] %vm469_vm3, %v2044_v4  ;;  %v1249_v8 = vadd.f32 %v14221_v43, %v1248_v39  ;;  %v1465_v23 = vadd.f32 %v14221_v43, %v1464_v59  ;;  %v1250_v31 = vpop.f32.mrb[33].mxu0  ;;  %v1466_v17 = vpop.f32.mrb[33].mxu1 }
 0x14b   : > { %v1251_v21 = vpop.f32.mrb[34].mxu0  ;;  %v1467_v58 = vpop.f32.mrb[34].mxu1 }
 0x14c   : > { %v1487_v29 = vmax.f32 %v1249_v8, 0.0  ;;  %v1541_v22 = vmax.f32 %v1465_v23, 0.0  ;;  %v1252_v13 = vadd.f32 %v14221_v43, %v1251_v21  ;;  %v1253_v57 = vpop.f32.mrb[35].mxu0  ;;  %v1468_v44 = vadd.f32 %v14221_v43, %v1467_v58  ;;  %v1469_v34 = vpop.f32.mrb[35].mxu1 }
 0x14e   : > { %v1991_v15 = vmul.f32 %v14120_v27, %v1487_v29  ;;  %v2045_v49 = vmul.f32 %v14093_v12, %v1541_v22  ;;  %v1488_v18 = vmax.f32 %v1252_v13, 0.0  ;;  %v1542_v5 = vmax.f32 %v1468_v44, 0.0 }
 0x150   : > { %2063 = vst.msk [vmem:[#allocation2 + $0x80] sm:$0xff] %vm469_vm3, %v1991_v15  ;;  %2117 = vst.msk [vmem:[#allocation2 + $0x230] sm:$0xff] %vm469_vm3, %v2045_v49  ;;  %v1992_v9 = vmul.f32 %v14188_v3, %v1488_v18  ;;  %v2046_v20 = vmul.f32 %v1973_v33, %v1542_v5 }
 0x151   : > { %v1256_v32 = vpop.f32.mrb[36].mxu0 }
 0x152   : > { %2064 = vst.msk [vmem:[#allocation2 + $0x88] sm:$0xff] %vm469_vm3, %v1992_v9  ;;  %v1257_v10 = vadd.f32 %v14221_v43, %v1256_v32  ;;  %v1258_v61 = vpop.f32.mrb[37].mxu0  ;;  %2118 = vst.msk [vmem:[#allocation2 + $0x238] sm:$0xff] %vm469_vm3, %v2046_v20 }
 0x153   : > { %v1259_v27 = vpop.f32.mrb[38].mxu0 }
 0x154   : > { %v1489_v12 = vmax.f32 %v1257_v10, 0.0  ;;  %v1260_v55 = vadd.f32 %v14221_v43, %v1259_v27  ;;  %v1261_v0 = vpop.f32.mrb[39].mxu0 }
 0x156   : > { %v1993_v54 = vmul.f32 %v14153_v45, %v1489_v12  ;;  %v1490_v56 = vmax.f32 %v1260_v55, 0.0 }
 0x158   : > { %2065 = vst.msk [vmem:[#allocation2 + $0x90] sm:$0xff] %vm469_vm3, %v1993_v54  ;;  %v1994_v3 = vmul.f32 %v14149_v42, %v1490_v56 }
 0x159   : > { %v1264_v6 = vpop.f32.mrb[40].mxu0 }
 0x15a   : > { %2066 = vst.msk [vmem:[#allocation2 + $0x98] sm:$0xff] %vm469_vm3, %v1994_v3  ;;  %v1265_v28 = vadd.f32 %v14221_v43, %v1264_v6  ;;  %v1266_v60 = vpop.f32.mrb[41].mxu0 }
 0x15b   : > { %v1267_v4 = vpop.f32.mrb[42].mxu0 }
 0x15c   : > { %v1491_v39 = vmax.f32 %v1265_v28, 0.0  ;;  %v1268_v59 = vadd.f32 %v14221_v43, %v1267_v4  ;;  %v1269_v8 = vpop.f32.mrb[43].mxu0 }
 0x15e   : > { %v1995_v23 = vmul.f32 %v14158_v47, %v1491_v39  ;;  %v1492_v31 = vmax.f32 %v1268_v59, 0.0 }
 0x160   : > { %2067 = vst.msk [vmem:[#allocation2 + $0xa0] sm:$0xff] %vm469_vm3, %v1995_v23  ;;  %v1996_v45 = vmul.f32 %v14155_v46, %v1492_v31 }
 0x161   : > { %v1272_v17 = vpop.f32.mrb[44].mxu0 }
 0x162   : > { %2068 = vst.msk [vmem:[#allocation2 + $0xa8] sm:$0xff] %vm469_vm3, %v1996_v45  ;;  %v1274_v42 = vpop.f32.mrb[45].mxu0  ;;  %v14399_v17 = vld [vmem:[#allocation2 + $0x21c] sm:$0xff] }
 0x163   : > { %v1275_v21 = vpop.f32.mrb[46].mxu0  ;;  %v14401_v42 = vld [vmem:[#allocation2 + $0x1b1] sm:$0xff] }
 0x164   : > { %v1276_v58 = vadd.f32 %v14221_v43, %v1275_v21  ;;  %v1277_v29 = vpop.f32.mrb[47].mxu0 }
 0x165   : > { %v2125_v29 = vmax.f32 %v14399_v17, %v14401_v42 }
 0x166   : > { %v1494_v22 = vmax.f32 %v1276_v58, 0.0  ;;  %v13655_v58 = vmov 0.0  }
 0x167   : > { %472 = vst.msk [vmem:[#allocation3 + $0x10] sm:$0xff] %vm469_vm3, %v13655_v58  ;;  %473 = vst.msk [vmem:[#allocation3 + $0x18] sm:$0xff] %vm469_vm3, %v13655_v58 }
 0x168   : > { %v1998_v13 = vmul.f32 %v14164_v51, %v1494_v22  ;;  %496 = vst [vmem:[#allocation4 + $0x40] sm:$0xff] %v13655_v58  ;;  %470 = vst.msk [vmem:[#allocation3] sm:$0xff] %vm469_vm3, %v13655_v58 }
 0x169   : > { %v1280_v57 = vpop.f32.mrb[48].mxu0  ;;  %471 = vst.msk [vmem:[#allocation3 + $0x8] sm:$0xff] %vm469_vm3, %v13655_v58  ;;  %474 = vst.msk [vmem:[#allocation3 + $0x20] sm:$0xff] %vm469_vm3, %v13655_v58 }
 0x16a   : > { %2070 = vst.msk [vmem:[#allocation2 + $0xb8] sm:$0xff] %vm469_vm3, %v1998_v13  ;;  %v1281_v47 = vadd.f32 %v14221_v43, %v1280_v57  ;;  %v1282_v44 = vpop.f32.mrb[49].mxu0  ;;  %475 = vst.msk [vmem:[#allocation3 + $0x28] sm:$0xff] %vm469_vm3, %v13655_v58 }
 0x16b   : > { %v1283_v34 = vpop.f32.mrb[50].mxu0  ;;  %476 = vst.msk [vmem:[#allocation3 + $0x30] sm:$0xff] %vm469_vm3, %v13655_v58  ;;  %477 = vst.msk [vmem:[#allocation3 + $0x38] sm:$0xff] %vm469_vm3, %v13655_v58  ;;  %v2123_v44 = vld [vmem:[#allocation2 + $0x1b9] sm:$0xff] }
 0x16c   : > { %v1495_v15 = vmax.f32 %v1281_v47, 0.0  ;;  %v1284_v46 = vadd.f32 %v14221_v43, %v1283_v34  ;;  %v1285_v49 = vpop.f32.mrb[51].mxu0  ;;  %478 = vst.msk [vmem:[#allocation3 + $0x40] sm:$0xff] %vm469_vm3, %v13655_v58  ;;  %479 = vst.msk [vmem:[#allocation3 + $0x48] sm:$0xff] %vm469_vm3, %v13655_v58  ;;  %v2129_v34 = vld [vmem:[#allocation2 + $0x1dd] sm:$0xff] }
 0x16d   : > { %480 = vst.msk [vmem:[#allocation3 + $0x50] sm:$0xff] %vm469_vm3, %v13655_v58  ;;  %481 = vst.msk [vmem:[#allocation3 + $0x58] sm:$0xff] %vm469_vm3, %v13655_v58 }
 0x16e   : > { %v1999_v18 = vmul.f32 %v14160_v48, %v1495_v15  ;;  %v1496_v5 = vmax.f32 %v1284_v46, 0.0  ;;  %482 = vst.msk [vmem:[#allocation3 + $0x60] sm:$0xff] %vm469_vm3, %v13655_v58  ;;  %483 = vst.msk [vmem:[#allocation3 + $0x68] sm:$0xff] %vm469_vm3, %v13655_v58  ;;  %v2294_v15 = vld [vmem:[#allocation2 + $0x201] sm:$0xff] }
 0x16f   : > { %484 = vst.msk [vmem:[#allocation3 + $0x70] sm:$0xff] %vm469_vm3, %v13655_v58  ;;  %485 = vst.msk [vmem:[#allocation3 + $0x78] sm:$0xff] %vm469_vm3, %v13655_v58 }
 0x170   : > { %2071 = vst.msk [vmem:[#allocation2 + $0xc0] sm:$0xff] %vm469_vm3, %v1999_v18  ;;  %v2000_v33 = vmul.f32 %v14169_v53, %v1496_v5  ;;  %486 = vst.msk [vmem:[#allocation3 + $0x80] sm:$0xff] %vm469_vm3, %v13655_v58  ;;  %v2120_v18 = vld [vmem:[#allocation2 + $0x224] sm:$0xff]  ;;  %v2121_v5 = vld [vmem:[#allocation2 + $0x22c] sm:$0x3f] }
 0x171   : > { %v1288_v9 = vpop.f32.mrb[52].mxu0  ;;  %487 = vst.msk [vmem:[#allocation3 + $0x88] sm:$0xff] %vm469_vm3, %v13655_v58  ;;  %488 = vst [vmem:[#allocation4] sm:$0xff] %v13655_v58 }
 0x172   : > { %2072 = vst.msk [vmem:[#allocation2 + $0xc8] sm:$0xff] %vm469_vm3, %v2000_v33  ;;  %v1289_v51 = vadd.f32 %v14221_v43, %v1288_v9  ;;  %v1290_v20 = vpop.f32.mrb[53].mxu0  ;;  %489 = vst.msk [vmem:[#allocation4 + $0x8] sm:$0xff] %vm469_vm3, %v13655_v58  ;;  %v2124_v33 = vld [vmem:[#allocation2 + $0x1c1] sm:$0x3f] }
 0x173   : > { %v1291_v32 = vpop.f32.mrb[54].mxu0  ;;  %491 = vst.msk [vmem:[#allocation4 + $0x18] sm:$0xff] %vm469_vm3, %v13655_v58  ;;  %493 = vst.msk [vmem:[#allocation4 + $0x28] sm:$0xff] %vm469_vm3, %v13655_v58 }
 0x174   : > { %v1497_v10 = vmax.f32 %v1289_v51, 0.0  ;;  %v1292_v61 = vadd.f32 %v14221_v43, %v1291_v32  ;;  %v1293_v27 = vpop.f32.mrb[55].mxu0  ;;  %494 = vst [vmem:[#allocation4 + $0x30] sm:$0xff] %v13655_v58  ;;  %495 = vst.msk [vmem:[#allocation4 + $0x38] sm:$0xff] %vm469_vm3, %v13655_v58  ;;  %v2128_v32 = vld [vmem:[#allocation2 + $0x1d5] sm:$0xff] }
 0x175   : > { %498 = vst [vmem:[#allocation4 + $0x50] sm:$0xff] %v13655_v58  ;;  %499 = vst.msk [vmem:[#allocation4 + $0x58] sm:$0xff] %vm469_vm3, %v13655_v58  ;;  %v2297_v27 = vmax.f32 %v2129_v34, %v2294_v15 }
 0x176   : > { %v2001_v12 = vmul.f32 %v14166_v52, %v1497_v10  ;;  %v1498_v55 = vmax.f32 %v1292_v61, 0.0  ;;  %501 = vst.msk [vmem:[#allocation4 + $0x68] sm:$0xff] %vm469_vm3, %v13655_v58  ;;  %503 = vst.msk [vmem:[#allocation4 + $0x78] sm:$0xff] %vm469_vm3, %v13655_v58  ;;  %v2293_v10 = vld [vmem:[#allocation2 + $0x1f9] sm:$0xff]  ;;  %v2131_v61 = vmax.f32 %v2125_v29, %v2128_v32  ;;  %v2136_v29 = vld [vmem:[#allocation2 + $0x82] sm:$0x3f] }
 0x177   : > { %504 = vst [vmem:[#allocation4 + $0x80] sm:$0xff] %v13655_v58  ;;  %505 = vst.msk [vmem:[#allocation4 + $0x88] sm:$0xff] %vm469_vm3, %v13655_v58 }
 0x178   : > { %2073 = vst.msk [vmem:[#allocation2 + $0xd0] sm:$0xff] %vm469_vm3, %v2001_v12  ;;  %v2002_v48 = vmul.f32 %v14197_v11, %v1498_v55  ;;  %506 = vst [vmem:[#allocation4 + $0x90] sm:$0xff] %v13655_v58 }
 0x179   : > { %v1296_v0 = vpop.f32.mrb[56].mxu0  ;;  %507 = vst.msk [vmem:[#allocation4 + $0x98] sm:$0xff] %vm469_vm3, %v13655_v58  ;;  %509 = vst.msk [vmem:[#allocation4 + $0xa8] sm:$0xff] %vm469_vm3, %v13655_v58  ;;  %v14459_v22 = vld [vmem:[#allocation2 + $0xc3] sm:$0xff] }
 0x17a   : > { %2074 = vst.msk [vmem:[#allocation2 + $0xd8] sm:$0xff] %vm469_vm3, %v2002_v48  ;;  %v1297_v53 = vadd.f32 %v14221_v43, %v1296_v0  ;;  %v1298_v54 = vpop.f32.mrb[57].mxu0  ;;  %511 = vst.msk [vmem:[#allocation4 + $0xb8] sm:$0xff] %vm469_vm3, %v13655_v58  ;;  %v2126_v48 = vmax.f32 %v2120_v18, %v2123_v44  ;;  %v2127_v0 = vmax.f32 %v2121_v5, %v2124_v33  ;;  %v2142_v5 = vld [vmem:[#allocation2 + $0x17] sm:$0x3f] }
 0x17b   : > { %v1299_v56 = vpop.f32.mrb[58].mxu0  ;;  %512 = vst [vmem:[#allocation4 + $0xc0] sm:$0xff] %v13655_v58  ;;  %513 = vst.msk [vmem:[#allocation4 + $0xc8] sm:$0xff] %vm469_vm3, %v13655_v58  ;;  %v2130_v54 = vld [vmem:[#allocation2 + $0x1e5] sm:$0x3f] }
 0x17c   : > { %v1499_v3 = vmax.f32 %v1297_v53, 0.0  ;;  %v1300_v6 = vadd.f32 %v14221_v43, %v1299_v56  ;;  %v1301_v28 = vpop.f32.mrb[59].mxu0  ;;  %514 = vst [vmem:[#allocation4 + $0xd0] sm:$0xff] %v13655_v58  ;;  %515 = vst.msk [vmem:[#allocation4 + $0xd8] sm:$0xff] %vm469_vm3, %v13655_v58  ;;  %v2300_v53 = vld [vmem:[#allocation2 + $0x225] sm:$0xff]  ;;  %v2296_v56 = vmax.f32 %v2128_v32, %v2293_v10 }
 0x17d   : > { %516 = vst [vmem:[#allocation4 + $0xe0] sm:$0xff] %v13655_v58  ;;  %517 = vst.msk [vmem:[#allocation4 + $0xe8] sm:$0xff] %vm469_vm3, %v13655_v58  ;;  %v2299_v28 = vld [vmem:[#allocation2 + $0x21d] sm:$0xff]  ;;  %v2295_v32 = vld [vmem:[#allocation2 + $0x209] sm:$0x3f] }
 0x17e   : > { %v2003_v60 = vmul.f32 %v14194_v7, %v1499_v3  ;;  %v1500_v4 = vmax.f32 %v1300_v6, 0.0  ;;  %v14403_v7 = vld [vmem:[#allocation2 + $0xbb] sm:$0xff]  ;;  %519 = vst.msk [vmem:[#allocation4 + $0xf8] sm:$0xff] %vm469_vm3, %v13655_v58  ;;  %521 = vst.msk [vmem:[#allocation4 + $0x108] sm:$0xff] %vm469_vm3, %v13655_v58  ;;  %v2134_v6 = vld [vmem:[#allocation2 + $0x72] sm:$0xff] }
 0x17f   : > { %522 = vst [vmem:[#allocation4 + $0x110] sm:$0xff] %v13655_v58  ;;  %523 = vst.msk [vmem:[#allocation4 + $0x118] sm:$0xff] %vm469_vm3, %v13655_v58 }
 0x180   : > { %2075 = vst.msk [vmem:[#allocation2 + $0xe0] sm:$0xff] %vm469_vm3, %v2003_v60  ;;  %v2004_v52 = vmul.f32 %v14202_v16, %v1500_v4  ;;  %524 = vst [vmem:[#allocation5] sm:$0xff] %v13655_v58  ;;  %v2137_v4 = vmax.f32 %v2131_v61, %v2134_v6 }
 0x181   : > { %v1304_v39 = vpop.f32.mrb[60].mxu0  ;;  %525 = vst.msk [vmem:[#allocation5 + $0x8] sm:$0xff] %vm469_vm3, %v13655_v58  ;;  %527 = vst.msk [vmem:[#allocation5 + $0x18] sm:$0xff] %vm469_vm3, %v13655_v58 }
 0x182   : > { %2076 = vst.msk [vmem:[#allocation2 + $0xe8] sm:$0xff] %vm469_vm3, %v2004_v52  ;;  %v1305_v11 = vadd.f32 %v14221_v43, %v1304_v39  ;;  %v1306_v59 = vpop.f32.mrb[61].mxu0  ;;  %529 = vst.msk [vmem:[#allocation5 + $0x28] sm:$0xff] %vm469_vm3, %v13655_v58  ;;  %v2303_v52 = vmax.f32 %v2297_v27, %v2300_v53 }
 0x183   : > { %v1307_v8 = vpop.f32.mrb[62].mxu0  ;;  %530 = vst [vmem:[#allocation5 + $0x30] sm:$0xff] %v13655_v58  ;;  %531 = vst.msk [vmem:[#allocation5 + $0x38] sm:$0xff] %vm469_vm3, %v13655_v58  ;;  %v2133_v59 = vmax.f32 %v2127_v0, %v2130_v54 }
 0x184   : > { %v1501_v23 = vmax.f32 %v1305_v11, 0.0  ;;  %v1309_v31 = vpop.f32.mrb[63].mxu0  ;;  %532 = vst [vmem:[#allocation5 + $0x40] sm:$0xf] %v13655_v58  ;;  %535 = vst.msk [vmem:[#allocation6] sm:$0xff] %vm469_vm3, %v13655_v58  ;;  %v2132_v11 = vmax.f32 %v2126_v48, %v2129_v34  ;;  %v2141_v34 = vld [vmem:[#allocation2 + $0xf] sm:$0xff] }
 0x185   : > { %536 = vst.msk [vmem:[#allocation6 + $0x8] sm:$0xff] %vm469_vm3, %v13655_v58  ;;  %537 = vst.msk [vmem:[#allocation6 + $0x10] sm:$0xff] %vm469_vm3, %v13655_v58  ;;  %v2302_v31 = vmax.f32 %v2296_v56, %v2299_v28  ;;  %v2139_v18 = vmax.f32 %v2133_v59, %v2136_v29  ;;  %v2311_v56 = vld [vmem:[#allocation2 + $0x4f] sm:$0xff] }
 0x186   : > { %v2005_v45 = vmul.f32 %v14199_v14, %v1501_v23  ;;  %538 = vst.msk [vmem:[#allocation6 + $0x18] sm:$0xff] %vm469_vm3, %v13655_v58  ;;  %540 = vst.msk [vmem:[#allocation7] sm:$0xff] %vm469_vm3, %v13655_v58  ;;  %v2135_v23 = vld [vmem:[#allocation2 + $0x7a] sm:$0xff] }
 0x187   : > { %v14405_v21 = vld [vmem:[#allocation2 + $0xdf] sm:$0xff]  ;;  %541 = vst.msk [vmem:[#allocation7 + $0x8] sm:$0xff] %vm469_vm3, %v13655_v58  ;;  %542 = vst.msk [vmem:[#allocation7 + $0x10] sm:$0xff] %vm469_vm3, %v13655_v58  ;;  %v2138_v15 = vmax.f32 %v2132_v11, %v2135_v23  ;;  %v2145_v54 = vmax.f32 %v2139_v18, %v2142_v5 }
 0x188   : > { %2077 = vst.msk [vmem:[#allocation2 + $0xf0] sm:$0xff] %vm469_vm3, %v2005_v45  ;;  %v2606_v16 = vmax.f32 %v14403_v7, %v14405_v21  ;;  %543 = vst.msk [vmem:[#allocation7 + $0x18] sm:$0xff] %vm469_vm3, %v13655_v58  ;;  %v2147_v58 = vld [vmem:[#allocation2 + $0x33] sm:$0xff]  ;;  %v2159_v5 = vld [vmem:[#allocation2 + $0x9f] sm:$0xff] }
 0x189   : > { %v1312_v14 = vpop.f32.mrb[64].mxu0  ;;  %v14461_v13 = vld [vmem:[#allocation2 + $0xe7] sm:$0xff]  ;;  %v2144_v53 = vmax.f32 %v2138_v15, %v2141_v34 }
 0x18a   : > { %v1313_v57 = vadd.f32 %v14221_v43, %v1312_v14  ;;  %v1314_v47 = vpop.f32.mrb[65].mxu0  ;;  %v2607_v46 = vmax.f32 %v14459_v22, %v14461_v13 }
 0x18b   : > { %v1315_v49 = vpop.f32.mrb[66].mxu0 }
 0x18c   : > { %v1503_v9 = vmax.f32 %v1313_v57, 0.0  ;;  %v1316_v51 = vadd.f32 %v14221_v43, %v1315_v49  ;;  %v1317_v20 = vpop.f32.mrb[67].mxu0  ;;  %v2309_v57 = vmax.f32 %v2303_v52, %v2147_v58  ;;  %v2146_v49 = vld [vmem:[#allocation2 + $0x2b] sm:$0xff] }
 0x18d   : > { %v2308_v33 = vmax.f32 %v2302_v31, %v2146_v49  ;;  %v2292_v20 = vld [vmem:[#allocation2 + $0x1e5] sm:$0x3f]  ;;  %v2301_v31 = vld [vmem:[#allocation2 + $0x22d] sm:$0x3f] }
 0x18e   : > { %v2007_v12 = vmul.f32 %v14138_v36, %v1503_v9  ;;  %v1504_v55 = vmax.f32 %v1316_v51, 0.0  ;;  %v2312_v51 = vld [vmem:[#allocation2 + $0x57] sm:$0xff]  ;;  %v2298_v11 = vmax.f32 %v2292_v20, %v2295_v32 }
 0x190   : > { %2079 = vst.msk [vmem:[#allocation2 + $0x100] sm:$0xff] %vm469_vm3, %v2007_v12  ;;  %v2008_v3 = vmul.f32 %v14147_v41, %v1504_v55  ;;  %v2140_v41 = vld [vmem:[#allocation2 + $0x7] sm:$0xff]  ;;  %v2158_v12 = vld [vmem:[#allocation2 + $0x97] sm:$0xff]  ;;  %v2315_v55 = vmax.f32 %v2309_v57, %v2312_v51 }
 0x191   : > { %v1320_v60 = vpop.f32.mrb[68].mxu0  ;;  %v2143_v14 = vmax.f32 %v2137_v4, %v2140_v41  ;;  %v2160_v51 = vld [vmem:[#allocation2 + $0xa7] sm:$0x3f] }
 0x192   : > { %2080 = vst.msk [vmem:[#allocation2 + $0x108] sm:$0xff] %vm469_vm3, %v2008_v3  ;;  %v1321_v39 = vadd.f32 %v14221_v43, %v1320_v60  ;;  %v1322_v36 = vpop.f32.mrb[69].mxu0  ;;  %v2318_v3 = vld [vmem:[#allocation2 + $0x7b] sm:$0xff]  ;;  %v2314_v60 = vmax.f32 %v2308_v33, %v2311_v56 }
 0x193   : > { %v1323_v8 = vpop.f32.mrb[70].mxu0  ;;  %v2149_v61 = vmax.f32 %v2143_v14, %v2146_v49  ;;  %v2321_v23 = vmax.f32 %v2315_v55, %v2318_v3  ;;  %v2317_v14 = vld [vmem:[#allocation2 + $0x73] sm:$0xff]  ;;  %v17031_v49 = vld [vmem:[#allocation13_spill] sm:$0xff] }
 0x194   : > { %v1505_v45 = vmax.f32 %v1321_v39, 0.0  ;;  %v1324_v17 = vadd.f32 %v14221_v43, %v1323_v8  ;;  %v1325_v42 = vpop.f32.mrb[71].mxu0  ;;  %v2148_v8 = vld [vmem:[#allocation2 + $0x3b] sm:$0x3f] }
 0x195   : > { %v2150_v42 = vmax.f32 %v2144_v53, %v2147_v58  ;;  %v2151_v41 = vmax.f32 %v2145_v54, %v2148_v8  ;;  %v2166_v53 = vld [vmem:[#allocation2 + $0xcb] sm:$0x3f] }
 0x196   : > { %v2009_v47 = vmul.f32 %v14144_v40, %v1505_v45  ;;  %v1506_v44 = vmax.f32 %v1324_v17, 0.0 }
 0x198   : > { %2081 = vst.msk [vmem:[#allocation2 + $0x110] sm:$0xff] %vm469_vm3, %v2009_v47  ;;  %v2010_v9 = vmul.f32 %v14206_v25, %v1506_v44  ;;  %v2320_v47 = vmax.f32 %v2314_v60, %v2317_v14  ;;  %v2327_v44 = vmax.f32 %v2321_v23, %v14459_v22  ;;  %v2307_v60 = vld [vmem:[#allocation2 + $0x3b] sm:$0x3f] }
 0x199   : > { %v1328_v10 = vpop.f32.mrb[72].mxu0  ;;  %v2152_v27 = vld [vmem:[#allocation2 + $0x102] sm:$0xff] }
 0x19a   : > { %v2335_v40 = vld [vmem:[#allocation2 + $0x103] sm:$0xff]  ;;  %2082 = vst.msk [vmem:[#allocation2 + $0x118] sm:$0xff] %vm469_vm3, %v2010_v9  ;;  %v1329_v48 = vadd.f32 %v14221_v43, %v1328_v10  ;;  %v1330_v0 = vpop.f32.mrb[73].mxu0  ;;  %v2451_v6 = vmax.f32 %v2152_v27, %v2158_v12  ;;  %v2155_v28 = vmax.f32 %v2149_v61, %v2152_v27  ;;  %v2304_v9 = vmax.f32 %v2298_v11, %v2301_v31 }
 0x19b   : > { %v1331_v25 = vpop.f32.mrb[74].mxu0  ;;  %v14481_v4 = vmax.f32 %v2606_v16, %v2335_v40  ;;  %v2326_v58 = vmax.f32 %v2320_v47, %v14403_v7  ;;  %v2333_v20 = vmax.f32 %v2327_v44, %v14461_v13  ;;  %v2313_v31 = vld [vmem:[#allocation2 + $0x5f] sm:$0x3f]  ;;  %v2331_v44 = vld [vmem:[#allocation2 + $0xef] sm:$0x3f] }
 0x19c   : > { %v1507_v52 = vmax.f32 %v1329_v48, 0.0  ;;  %v1332_v39 = vadd.f32 %v14221_v43, %v1331_v25  ;;  %v1333_v36 = vpop.f32.mrb[75].mxu0  ;;  %v14485_v59 = vmax.f32 %v2451_v6, %v14403_v7  ;;  %v2161_v16 = vmax.f32 %v2155_v28, %v2158_v12 }
 0x19d   : > { %v2332_v54 = vmax.f32 %v2326_v58, %v14405_v21  ;;  %v17032_v36 = vld [vmem:[#allocation14_spill] sm:$0xff] }
 0x19e   : > { %v2011_v45 = vmul.f32 %v14216_v38, %v1507_v52  ;;  %v1508_v17 = vmax.f32 %v1332_v39, 0.0  ;;  %v2167_v0 = vmax.f32 %v2161_v16, %v14403_v7  ;;  %v2310_v39 = vmax.f32 %v2304_v9, %v2307_v60  ;;  %v13240_v21 = vld [vmem:[%s16969_s5 + $0x8] sm:$0xff]   ;;  %v13246_v60 = vld [vmem:[%s16969_s5 + $0x18] sm:$0xff]  }
 0x19f   : > { %v2153_v29 = vld [vmem:[#allocation2 + $0x10a] sm:$0xff]  ;;  %v2154_v57 = vld [vmem:[#allocation2 + $0x112] sm:$0x3f]  ;;  %v2338_v52 = vmax.f32 %v2332_v54, %v2335_v40  ;;  %v2319_v16 = vld [vmem:[#allocation2 + $0x83] sm:$0x3f] }
 0x1a0   : > { %v2336_v15 = vld [vmem:[#allocation2 + $0x10b] sm:$0xff]  ;;  %2083 = vst.msk [vmem:[#allocation2 + $0x120] sm:$0xff] %vm469_vm3, %v2011_v45  ;;  %v2012_v18 = vmul.f32 %v17031_v49, %v1508_v17  ;;  %v2156_v34 = vmax.f32 %v2150_v42, %v2153_v29  ;;  %v2157_v33 = vmax.f32 %v2151_v41, %v2154_v57  ;;  %v2452_v32 = vmax.f32 %v2153_v29, %v2159_v5  ;;  %v14524_v41 = vld [vmem:[%s16968_s4] ss:$0 sm:$0xff] }
 0x1a1   : > { %v1336_v38 = vpop.f32.mrb[76].mxu0  ;;  %v14496_v10 = vmax.f32 %v2607_v46, %v2336_v15  ;;  %v2339_v56 = vmax.f32 %v2333_v20, %v2336_v15  ;;  %v2316_v40 = vmax.f32 %v2310_v39, %v2313_v31  ;;  %v2325_v57 = vld [vmem:[#allocation2 + $0xcb] sm:$0x3f]  ;;  %v13242_v15 = vld [vmem:[%s16969_s5 + $0x18] sm:$0xff]   ;;  %v13243_v20 = vld [vmem:[%s16969_s5] sm:$0xff]  }
 0x1a2   : > { %2084 = vst.msk [vmem:[#allocation2 + $0x128] sm:$0xff] %vm469_vm3, %v2012_v18  ;;  %v1337_v61 = vadd.f32 %v14221_v43, %v1336_v38  ;;  %v1338_v27 = vpop.f32.mrb[77].mxu0  ;;  %v2162_v12 = vmax.f32 %v2156_v34, %v2159_v5  ;;  %v2163_v55 = vmax.f32 %v2157_v33, %v2160_v51  ;;  %v14503_v3 = vmax.f32 %v2452_v32, %v14459_v22  ;;  %v2337_v34 = vld [vmem:[#allocation2 + $0x113] sm:$0x3f] }
 0x1a3   : > { %v1339_v48 = vpop.f32.mrb[78].mxu0 }
 0x1a4   : > { %v1509_v13 = vmax.f32 %v1337_v61, 0.0  ;;  %v1340_v46 = vadd.f32 %v14221_v43, %v1339_v48  ;;  %v1341_v6 = vpop.f32.mrb[79].mxu0  ;;  %v2168_v25 = vmax.f32 %v2162_v12, %v14459_v22  ;;  %v2169_v28 = vmax.f32 %v2163_v55, %v2166_v53  ;;  %v13244_v48 = vld [vmem:[%s16969_s5 + $0x8] sm:$0xff]  }
 0x1a5   : > { %v2349_v22 = vpack.c.bf16 %v2339_v56, %v2338_v52 }
 0x1a6   : > { %v2013_v11 = vmul.f32 %v17032_v36, %v1509_v13  ;;  %v1510_v7 = vmax.f32 %v1340_v46, 0.0  ;;  %v2178_v8 = vpack.c.bf16 %v2168_v25, %v2167_v0  ;;  %v2179_v23 = vpack.c.bf16 %v2169_v28, %v2169_v28  ;;  %v13245_v13 = vld [vmem:[%s16969_s5 + $0x10] sm:$0xff]  }
 0x1a8   : > { %2085 = vst.msk [vmem:[#allocation2 + $0x130] sm:$0xff] %vm469_vm3, %v2013_v11  ;;  %v2014_v43 = vmul.f32 %v14238_v37, %v1510_v7  ;;  %12457 = vmatprep.mubr.msk.bf16.mxu1 %vm469_vm3, %v2178_v8  ;;  %v13241_v37 = vld [vmem:[%s16969_s5 + $0x10] sm:$0xff]  }
 0x1a9   : > { %v1344_v45 = vpop.f32.mrb[80].mxu0  ;;  %12458 = vmatmul.mubr.msk.bf16.vlgmr.msra.gmra.mrb[36].mxu1 %vm469_vm3, %v2179_v23 }
 0x1aa   : > { %2086 = vst.msk [vmem:[#allocation2 + $0x138] sm:$0xff] %vm469_vm3, %v2014_v43  ;;  %12462 = vmatpush3.bf16.msra.mxu1 %v14291_v1  ;;  %v1346_v17 = vpop.f32.mrb[81].mxu0  ;;  %12469 = vmatprep.mubr.msk.bf16.mxu1 %vm469_vm3, %v2349_v22  ;;  %v2322_v1 = vmax.f32 %v2316_v40, %v2319_v16 }
 0x1ab   : > { %v1347_v42 = vpop.f32.mrb[82].mxu0  ;;  %12463 = vmatprep.subr.bf16.mxu1 %v13240_v21 }
 0x1ac   : > { %v1348_v14 = vadd.f32 %v14524_v41, %v1347_v42  ;;  %v1349_v29 = vpop.f32.mrb[83].mxu0  ;;  %v2328_v49 = vmax.f32 %v2322_v1, %v2325_v57 }
 0x1ae   : > { %v1512_v47 = vmax.f32 %v1348_v14, 0.0  ;;  %12464 = vmatpush3.bf16.msra.mxu1 %v13240_v21  ;;  %v2334_v33 = vmax.f32 %v2328_v49, %v2331_v44  ;;  %v17033_v44 = vld [vmem:[#allocation10_spill] sm:$0xff] }
 0x1af   : > { %12465 = vmatprep.subr.bf16.mxu1 %v13241_v37 }
 0x1b0   : > { %v2016_v18 = vmul.f32 %v14240_v63, %v1512_v47  ;;  %v2340_v58 = vmax.f32 %v2334_v33, %v2337_v34 }
 0x1b1   : > { %v1352_v5 = vpop.f32.mrb[84].mxu0 }
 0x1b2   : > { %2088 = vst.msk [vmem:[#allocation2 + $0x148] sm:$0xff] %vm469_vm3, %v2016_v18  ;;  %v1353_v9 = vadd.f32 %v14524_v41, %v1352_v5  ;;  %12466 = vmatpush3.bf16.msra.mxu1 %v13241_v37  ;;  %v1354_v38 = vpop.f32.mrb[85].mxu0  ;;  %v2350_v55 = vpack.c.bf16 %v2340_v58, %v2340_v58  ;;  %v17034_v18 = vld [vmem:[#allocation11_spill] sm:$0xff] }
 0x1b3   : > { %v1355_v51 = vpop.f32.mrb[86].mxu0  ;;  %12467 = vmatprep.subr.bf16.mxu1 %v13242_v15 }
 0x1b4   : > { %v1513_v32 = vmax.f32 %v1353_v9, 0.0  ;;  %v1356_v61 = vadd.f32 %v14524_v41, %v1355_v51  ;;  %v1357_v63 = vpop.f32.mrb[87].mxu0 }
 0x1b6   : > { %v2017_v27 = vmul.f32 %v14258_v24, %v1513_v32  ;;  %v1514_v12 = vmax.f32 %v1356_v61, 0.0  ;;  %12468 = vmatpush3.bf16.msra.mxu1 %v13242_v15  ;;  %v17035_v61 = vld [vmem:[#allocation12_spill] sm:$0xff] }
 0x1b7   : > { %12473 = vmatprep.subr.bf16.mxu1 %v13243_v20 }
 0x1b8   : > { %2089 = vst.msk [vmem:[#allocation2 + $0x150] sm:$0xff] %vm469_vm3, %v2017_v27  ;;  %v2018_v0 = vmul.f32 %v14253_v26, %v1514_v12 }
 0x1b9   : > { %12470 = vmatmul.mubr.msk.bf16.vlgmr.msra.gmra.mrb[40].mxu1 %vm469_vm3, %v2350_v55  ;;  %v1360_v53 = vpop.f32.mrb[88].mxu0  ;;  %v2447_v55 = vld [vmem:[#allocation2 + $0x112] sm:$0x3f] }
 0x1ba   : > { %2090 = vst.msk [vmem:[#allocation2 + $0x158] sm:$0xff] %vm469_vm3, %v2018_v0  ;;  %v1361_v54 = vadd.f32 %v14524_v41, %v1360_v53  ;;  %v1362_v24 = vpop.f32.mrb[89].mxu0  ;;  %12474 = vmatpush3.bf16.msra.mxu1 %v13243_v20  ;;  %v2450_v0 = vld [vmem:[#allocation2 + $0xa7] sm:$0x3f] }
 0x1bb   : > { %v1363_v56 = vpop.f32.mrb[90].mxu0  ;;  %12475 = vmatprep.subr.bf16.mxu1 %v13244_v48 }
 0x1bc   : > { %v1515_v46 = vmax.f32 %v1361_v54, 0.0  ;;  %v1364_v6 = vadd.f32 %v14524_v41, %v1363_v56  ;;  %v1365_v25 = vpop.f32.mrb[91].mxu0 }
 0x1be   : > { %v2019_v26 = vmul.f32 %v14274_v2, %v1515_v46  ;;  %v1516_v28 = vmax.f32 %v1364_v6, 0.0  ;;  %12476 = vmatpush3.bf16.msra.mxu1 %v13244_v48  ;;  %v14561_v2 = vld [vmem:[%s16969_s5] sm:$0xff]  }
 0x1bf   : > { %12477 = vmatprep.subr.bf16.mxu1 %v13245_v13  ;;  %v2472_v38 = vld [vmem:[#allocation2 + $0x14b] sm:$0xff] }
 0x1c0   : > { %2091 = vst.msk [vmem:[#allocation2 + $0x160] sm:$0xff] %vm469_vm3, %v2019_v26  ;;  %v2020_v52 = vmul.f32 %v14325_v50, %v1516_v28  ;;  %v2618_v12 = vmax.f32 %v14481_v4, %v2472_v38  ;;  %v2466_v6 = vld [vmem:[#allocation2 + $0x127] sm:$0xff]  ;;  %v2490_v4 = vld [vmem:[#allocation2 + $0x1db] sm:$0xff] }
 0x1c1   : > { %v1368_v39 = vpop.f32.mrb[92].mxu0  ;;  %v2473_v24 = vld [vmem:[#allocation2 + $0x153] sm:$0xff] }
 0x1c2   : > { %2092 = vst.msk [vmem:[#allocation2 + $0x168] sm:$0xff] %vm469_vm3, %v2020_v52  ;;  %v1369_v36 = vadd.f32 %v14524_v41, %v1368_v39  ;;  %v1370_v11 = vpop.f32.mrb[93].mxu0  ;;  %12478 = vmatpush3.bf16.msra.mxu1 %v13245_v13  ;;  %v2453_v13 = vmax.f32 %v2447_v55, %v2450_v0  ;;  %v2619_v28 = vmax.f32 %v14496_v10, %v2473_v24  ;;  %v2492_v55 = vld [vmem:[#allocation2 + $0x1eb] sm:$0x3f] }
 0x1c3   : > { %v1371_v7 = vpop.f32.mrb[94].mxu0  ;;  %12479 = vmatprep.subr.bf16.mxu1 %v13246_v60 }
 0x1c4   : > { %v1517_v8 = vmax.f32 %v1369_v36, 0.0  ;;  %v1372_v23 = vadd.f32 %v14524_v41, %v1371_v7  ;;  %v1373_v21 = vpop.f32.mrb[95].mxu0 }
 0x1c5   : > { %v2491_v21 = vld [vmem:[#allocation2 + $0x1e3] sm:$0xff] }
 0x1c6   : > { %v2021_v50 = vmul.f32 %v14309_v62, %v1517_v8  ;;  %v1518_v43 = vmax.f32 %v1372_v23, 0.0  ;;  %12480 = vmatpush3.bf16.msra.mxu1 %v13246_v60  ;;  %v2456_v60 = vld [vmem:[#allocation2 + $0xcb] sm:$0x3f] }
 0x1c7   : > { %12485 = vmatprep.subr.bf16.mxu1 %v14561_v2  ;;  %v2459_v39 = vmax.f32 %v2453_v13, %v2456_v60  ;;  %v13250_v60 = vld [vmem:[%s16969_s5 + $0x18] sm:$0xff]  }
 0x1c8   : > { %2093 = vst.msk [vmem:[#allocation2 + $0x170] sm:$0xff] %vm469_vm3, %v2021_v50  ;;  %v2022_v22 = vmul.f32 %v14335_v30, %v1518_v43  ;;  %v2639_v43 = vld [vmem:[#allocation2 + $0x1ff] sm:$0xff] }
 0x1c9   : > { %v1376_v31 = vpop.f32.mrb[96].mxu0 }
 0x1ca   : > { %2094 = vst.msk [vmem:[#allocation2 + $0x178] sm:$0xff] %vm469_vm3, %v2022_v22  ;;  %v1377_v45 = vadd.f32 %v14524_v41, %v1376_v31  ;;  %v1378_v40 = vpop.f32.mrb[97].mxu0  ;;  %v2467_v22 = vld [vmem:[#allocation2 + $0x12f] sm:$0xff]  ;;  %v2478_v31 = vld [vmem:[#allocation2 + $0x222] sm:$0xff] }
 0x1cb   : > { %v1379_v17 = vpop.f32.mrb[98].mxu0 }
 0x1cc   : > { %v1519_v42 = vmax.f32 %v1377_v45, 0.0  ;;  %v1381_v37 = vpop.f32.mrb[99].mxu0  ;;  %v2468_v45 = vld [vmem:[#allocation2 + $0x137] sm:$0x3f] }
 0x1ce   : > { %v2023_v14 = vmul.f32 %v14319_v19, %v1519_v42 }
 0x1cf   : > { %v2621_v32 = vld [vmem:[#allocation2 + $0x16f] sm:$0xff] }
 0x1d0   : > { %2095 = vst.msk [vmem:[#allocation2 + $0x180] sm:$0xff] %vm469_vm3, %v2023_v14  ;;  %v2624_v53 = vmax.f32 %v2618_v12, %v2621_v32  ;;  %v2605_v14 = vld [vmem:[#allocation2 + $0xef] sm:$0x3f] }
 0x1d1   : > { %v1384_v62 = vpop.f32.mrb[100].mxu0  ;;  %v2622_v25 = vld [vmem:[#allocation2 + $0x177] sm:$0xff] }
 0x1d2   : > { %v1385_v29 = vadd.f32 %v14524_v41, %v1384_v62  ;;  %v1386_v16 = vpop.f32.mrb[101].mxu0  ;;  %v2625_v36 = vmax.f32 %v2619_v28, %v2622_v25  ;;  %v2484_v62 = vld [vmem:[#allocation2 + $0x1b7] sm:$0xff]  ;;  %v2635_v25 = vld [vmem:[#allocation2 + $0x1eb] sm:$0x3f] }
 0x1d3   : > { %v1387_v57 = vpop.f32.mrb[102].mxu0  ;;  %v2640_v16 = vld [vmem:[#allocation2 + $0x207] sm:$0xff]  ;;  %v2641_v28 = vld [vmem:[#allocation2 + $0x20f] sm:$0x3f] }
 0x1d4   : > { %v1521_v1 = vmax.f32 %v1385_v29, 0.0  ;;  %v1388_v30 = vadd.f32 %v14524_v41, %v1387_v57  ;;  %v1389_v47 = vpop.f32.mrb[103].mxu0  ;;  %v2474_v29 = vld [vmem:[#allocation2 + $0x15b] sm:$0x3f] }
 0x1d5   : > { %v2602_v47 = vld [vmem:[#allocation2 + $0xcb] sm:$0x3f] }
 0x1d6   : > { %v2025_v15 = vmul.f32 %v17033_v44, %v1521_v1  ;;  %v1522_v49 = vmax.f32 %v1388_v30, 0.0  ;;  %v2611_v44 = vld [vmem:[#allocation2 + $0x113] sm:$0x3f] }
 0x1d7   : > { %v2623_v12 = vld [vmem:[#allocation2 + $0x17f] sm:$0x3f] }
 0x1d8   : > { %2097 = vst.msk [vmem:[#allocation2 + $0x190] sm:$0xff] %vm469_vm3, %v2025_v15  ;;  %v2026_v34 = vmul.f32 %v17034_v18, %v1522_v49  ;;  %v2479_v15 = vld [vmem:[#allocation2 + $0x22a] sm:$0xff]  ;;  %v2480_v49 = vld [vmem:[#allocation2 + $0x232] sm:$0x3f] }
 0x1d9   : > { %v1392_v5 = vpop.f32.mrb[104].mxu0  ;;  %v2646_v18 = vld [vmem:[#allocation2 + $0x22b] sm:$0xff] }
 0x1da   : > { %2098 = vst.msk [vmem:[#allocation2 + $0x198] sm:$0xff] %vm469_vm3, %v2026_v34  ;;  %v1393_v19 = vadd.f32 %v14524_v41, %v1392_v5  ;;  %v1394_v33 = vpop.f32.mrb[105].mxu0  ;;  %v2608_v5 = vmax.f32 %v2602_v47, %v2605_v14  ;;  %v14644_v47 = vpop.permute.xlu1 %2275 }
 0x1db   : > { %v1395_v9 = vpop.f32.mrb[106].mxu0  ;;  %17039 = vst [vmem:[#allocation10_spill] sm:$0xff] %v14644_v47 }
 0x1dc   : > { %v1523_v51 = vmax.f32 %v1393_v19, 0.0  ;;  %v1396_v58 = vadd.f32 %v14524_v41, %v1395_v9  ;;  %v1397_v20 = vpop.f32.mrb[107].mxu0  ;;  %v2614_v32 = vmax.f32 %v2608_v5, %v2611_v44 }
 0x1dd   : > { %v2486_v20 = vld [vmem:[#allocation2 + $0x1c7] sm:$0x3f] }
 0x1de   : > { %v2027_v63 = vmul.f32 %v17035_v61, %v1523_v51  ;;  %v1524_v27 = vmax.f32 %v1396_v58, 0.0  ;;  %v2617_v51 = vld [vmem:[#allocation2 + $0x15b] sm:$0x3f] }
 0x1df   : > { %v2485_v58 = vld [vmem:[#allocation2 + $0x1bf] sm:$0xff] }
 0x1e0   : > { %2099 = vst.msk [vmem:[#allocation2 + $0x1a0] sm:$0xff] %vm469_vm3, %v2027_v63  ;;  %v2028_v48 = vmul.f32 %v14349_v35, %v1524_v27 }
 0x1e1   : > { %v2460_v54 = vld [vmem:[#allocation2 + $0x192] sm:$0xff] }
 0x1e2   : > { %v2627_v56 = vld [vmem:[#allocation2 + $0x193] sm:$0xff]  ;;  %2100 = vst.msk [vmem:[#allocation2 + $0x1a8] sm:$0xff] %vm469_vm3, %v2028_v48  ;;  %v2463_v41 = vmax.f32 %v14485_v59, %v2460_v54  ;;  %v2620_v48 = vmax.f32 %v2614_v32, %v2617_v51 }
 0x1e3   : > { %v2630_v46 = vmax.f32 %v2624_v53, %v2627_v56  ;;  %v14662_v51 = vld [vmem:[%s16971_s7 + $0x14] ss:$8 sps:$4 sm:$0xff]  }
 0x1e4   : > { %v2469_v26 = vmax.f32 %v2463_v41, %v2466_v6  ;;  %v2626_v56 = vmax.f32 %v2620_v48, %v2623_v12  ;;  %v14680_v48 = vld [vmem:[%s16971_s7 + $0x24] ss:$8 sps:$4 sm:$0xff]  }
 0x1e5   : > { %v2636_v52 = vmax.f32 %v2630_v46, %v2490_v4  ;;  %v13248_v46 = vld [vmem:[%s16969_s5 + $0x8] sm:$0xff]  }
 0x1e6   : > { %v2475_v35 = vmax.f32 %v2469_v26, %v2472_v38  ;;  %v13249_v26 = vld [vmem:[%s16969_s5 + $0x10] sm:$0xff]  }
 0x1e7   : > { %v2461_v11 = vld [vmem:[#allocation2 + $0x19a] sm:$0xff]  ;;  %v2462_v7 = vld [vmem:[#allocation2 + $0x1a2] sm:$0x3f]  ;;  %v2642_v40 = vmax.f32 %v2636_v52, %v2639_v43 }
 0x1e8   : > { %v2628_v8 = vld [vmem:[#allocation2 + $0x19b] sm:$0xff]  ;;  %v2464_v23 = vmax.f32 %v14503_v3, %v2461_v11  ;;  %v2465_v59 = vmax.f32 %v2459_v39, %v2462_v7  ;;  %v2481_v10 = vmax.f32 %v2475_v35, %v2478_v31  ;;  %v2645_v3 = vld [vmem:[#allocation2 + $0x223] sm:$0xff]  ;;  %v2647_v35 = vld [vmem:[#allocation2 + $0x233] sm:$0x3f]  ;;  %v14630_v31 = vpop.permute.xlu0 %2270 }
 0x1e9   : > { %v2631_v50 = vmax.f32 %v2625_v36, %v2628_v8  ;;  %v2648_v34 = vmax.f32 %v2642_v40, %v2645_v3  ;;  %v13251_v39 = vld [vmem:[%s16971_s7 + $0x40] ss:$8 sps:$4 sm:$0xff]   ;;  %v13256_v11 = vld [vmem:[%s16971_s7 + $0x54] ss:$8 sps:$4 sm:$0xff]   ;;  %v13254_v7 = vld [vmem:[%s16971_s7 + $0x50] ss:$8 sps:$4 sm:$0xff]  }
 0x1ea   : > { %v2470_v17 = vmax.f32 %v2464_v23, %v2467_v22  ;;  %v2471_v42 = vmax.f32 %v2465_v59, %v2468_v45  ;;  %v2487_v33 = vmax.f32 %v2481_v10, %v2484_v62  ;;  %v13257_v23 = vld [vmem:[%s16971_s7 + $0x60] ss:$8 sps:$4 sm:$0xff]   ;;  %v17036_v59 = vmov 0   ;;  %v13260_v43 = vld [vmem:[%s16971_s7 + $0x70] ss:$8 sps:$4 sm:$0xff]   ;;  %17037 = vst [vmem:[#allocation13_spill] sm:$0xff] %v14630_v31 }
 0x1eb   : > { %v2637_v37 = vmax.f32 %v2631_v50, %v2491_v21  ;;  %v13262_v50 = vld [vmem:[%s16971_s7 + $0x74] ss:$8 sps:$4 sm:$0xff]   ;;  %v13265_v22 = vld [vmem:[%s16971_s7 + $0x4] ss:$8 sps:$4 sm:$0xff]   ;;  %v14635_v45 = vld [vmem:[%s16970_s6] ss:$0 sm:$0xff] }
 0x1ec   : > { %v2476_v57 = vmax.f32 %v2470_v17, %v2473_v24  ;;  %v2477_v1 = vmax.f32 %v2471_v42, %v2474_v29  ;;  %v2493_v0 = vmax.f32 %v2487_v33, %v2490_v4  ;;  %v2629_v24 = vld [vmem:[#allocation2 + $0x1a3] sm:$0x3f]  ;;  %v14639_v29 = vpop.permute.xlu0 %2280 }
 0x1ed   : > { %v2643_v30 = vmax.f32 %v2637_v37, %v2640_v16  ;;  %v2632_v6 = vmax.f32 %v2626_v56, %v2629_v24  ;;  %17038 = vst [vmem:[#allocation14_spill] sm:$0xff] %v14639_v29  ;;  %v14696_v56 = vld [vmem:[%s16971_s7 + $0x34] ss:$8 sps:$4 sm:$0xff]  }
 0x1ee   : > { %v2482_v19 = vmax.f32 %v2476_v57, %v2479_v15  ;;  %v2483_v9 = vmax.f32 %v2477_v1, %v2480_v49 }
 0x1ef   : > { %v2649_v38 = vmax.f32 %v2643_v30, %v2646_v18  ;;  %v2638_v4 = vmax.f32 %v2632_v6, %v2635_v25  ;;  %v14716_v25 = vld [vmem:[%s16971_s7 + $0x80] ss:$8 sps:$4 sm:$0xff]  }
 0x1f0   : > { %v2488_v61 = vmax.f32 %v2482_v19, %v2485_v58  ;;  %v2489_v63 = vmax.f32 %v2483_v9, %v2486_v20  ;;  %v14654_v19 = vld [vmem:[%s16971_s7] ss:$8 sps:$4 sm:$0xff]  }
 0x1f1   : > { %v2659_v27 = vpack.c.bf16 %v2649_v38, %v2648_v34  ;;  %v2644_v52 = vmax.f32 %v2638_v4, %v2641_v28  ;;  %v14724_v4 = vld [vmem:[%s16971_s7 + $0x94] ss:$8 sps:$4 sm:$0xff]   ;;  %v14732_v28 = vld [vmem:[%s16971_s7 + $0x90] ss:$8 sps:$4 sm:$0xff]  }
 0x1f2   : > { %v2494_v53 = vmax.f32 %v2488_v61, %v2491_v21  ;;  %v2495_v54 = vmax.f32 %v2489_v63, %v2492_v55  ;;  %v13259_v21 = vld [vmem:[%s16971_s7 + $0x64] ss:$8 sps:$4 sm:$0xff]  }
 0x1f3   : > { %v2650_v36 = vmax.f32 %v2644_v52, %v2647_v35 }
 0x1f4   : > { %v2504_v41 = vpack.c.bf16 %v2494_v53, %v2493_v0  ;;  %v2505_v13 = vpack.c.bf16 %v2495_v54, %v2495_v54  ;;  %v14689_v54 = vld [vmem:[%s16971_s7 + $0x20] ss:$8 sps:$4 sm:$0xff]  }
 0x1f5   : > { %v2660_v8 = vpack.c.bf16 %v2650_v36, %v2650_v36  ;;  %v14758_v36 = vld [vmem:[%s16971_s7 + $0xb0] ss:$8 sps:$4 sm:$0xff]  }
 0x1f6   : > { %12481 = vmatprep.mubr.msk.bf16.mxu1 %vm469_vm3, %v2504_v41  ;;  %v14703_v41 = vld [vmem:[%s16971_s7 + $0x30] ss:$8 sps:$4 sm:$0xff]  }
 0x1f7   : > { %12482 = vmatmul.mubr.msk.bf16.vlgmr.msra.gmra.mrb[44].mxu1 %vm469_vm3, %v2505_v13  ;;  %v14710_v13 = vld [vmem:[%s16971_s7 + $0x84] ss:$8 sps:$4 sm:$0xff]  }
 0x1f8   : > { %12486 = vmatpush3.bf16.msra.mxu1 %v14561_v2  ;;  %12493 = vmatprep.mubr.msk.bf16.mxu1 %vm469_vm3, %v2659_v27  ;;  %v13253_v2 = vld [vmem:[%s16971_s7 + $0x44] ss:$8 sps:$4 sm:$0xff]   ;;  %v14672_v27 = vld [vmem:[%s16971_s7 + $0x10] ss:$8 sps:$4 sm:$0xff]  }
 0x1f9   : > { %12487 = vmatprep.subr.bf16.mxu1 %v13248_v46  ;;  %5029 = vmatprep.subr.bf16.mxu0 %v13253_v2 }
 0x1fa   : > { %5030 = vmatpush1.bf16.msra.mxu0 %v13251_v39 }
 0x1fb   : > { %5031 = vmatprep.subr.bf16.mxu0 %v13256_v11 }
 0x1fc   : > { %12488 = vmatpush3.bf16.msra.mxu1 %v13248_v46 }
 0x1fd   : > { %12489 = vmatprep.subr.bf16.mxu1 %v13249_v26 }
 0x1fe   : > { %5032 = vmatpush1.bf16.msra.mxu0 %v13254_v7 }
 0x1ff   : > { %5033 = vmatprep.subr.bf16.mxu0 %v13259_v21 }
 0x200   : > { %12490 = vmatpush3.bf16.msra.mxu1 %v13249_v26 }
 0x201   : > { %12491 = vmatprep.subr.bf16.mxu1 %v13250_v60 }
 0x202   : > { %5034 = vmatpush1.bf16.msra.mxu0 %v13257_v23 }
 0x203   : > { %5035 = vmatprep.subr.bf16.mxu0 %v13262_v50 }
 0x204   : > { %12492 = vmatpush3.bf16.msra.mxu1 %v13250_v60  ;;  %v14739_v60 = vld [vmem:[%s16971_s7 + $0xa4] ss:$8 sps:$4 sm:$0xff]  }
 0x205   : > { %2828 = vmatprep.subr.bf16.mxu1 %v13253_v2  ;;  %v14745_v2 = vld [vmem:[%s16971_s7 + $0xa0] ss:$8 sps:$4 sm:$0xff]  }
 0x206   : > { %5036 = vmatpush1.bf16.msra.mxu0 %v13260_v43 }
 0x207   : > { %12494 = vmatmul.mubr.msk.bf16.vlgmr.msra.gmra.mrb[48].mxu1 %vm469_vm3, %v2660_v8  ;;  %5126 = vmatprep.subr.bf16.mxu0 %v13265_v22 }
 0x208   : > { %2829 = vmatpush1.bf16.msra.mxu1 %v13251_v39  ;;  %2860 = vmatprep.mubr.bf16.mxu1 %v17036_v59  ;;  %v14751_v39 = vld [vmem:[%s16971_s7 + $0xb4] ss:$8 sps:$4 sm:$0xff]  }
 0x209   : > { %2830 = vmatprep.subr.bf16.mxu1 %v13256_v11  ;;  %v14765_v11 = vld [vmem:[%s16971_s7 + $0xc4] ss:$8 sps:$4 sm:$0xff]  }
 0x20c   : > { %2831 = vmatpush1.bf16.msra.mxu1 %v13254_v7 }
 0x20d   : > { %2832 = vmatprep.subr.bf16.mxu1 %v13259_v21 }
 0x210   : > { %2833 = vmatpush1.bf16.msra.mxu1 %v13257_v23  ;;  %v14771_v23 = vld [vmem:[%s16971_s7 + $0xc0] ss:$8 sps:$4 sm:$0xff]  }
 0x211   : > { %2834 = vmatprep.subr.bf16.mxu1 %v13262_v50  ;;  %v14779_v50 = vld [vmem:[%s16971_s7 + $0xd4] ss:$8 sps:$4 sm:$0xff]  }
 0x214   : > { %2835 = vmatpush1.bf16.msra.mxu1 %v13260_v43  ;;  %v14788_v43 = vld [vmem:[%s16971_s7 + $0xd0] ss:$8 sps:$4 sm:$0xff]  }
 0x215   : > { %2925 = vmatprep.subr.bf16.mxu1 %v13265_v22  ;;  %v14794_v22 = vld [vmem:[%s16971_s7 + $0xe4] ss:$8 sps:$4 sm:$0xff]  }
 0x27c   : > { %v12459_v40 = vpop.f32.mrb[36].mxu1 }
 0x27d   : > { %v2260_v17 = vadd.f32 %v12459_v40, %v14635_v45  ;;  %v2251_v10 = vpop.f32.mrb[37].mxu1 }
 0x27e   : > { %v2252_v42 = vadd.f32 %v14635_v45, %v2251_v10  ;;  %v12460_v37 = vpop.f32.mrb[38].mxu1 }
 0x27f   : > { %v2267_v14 = vmax.f32 %v2260_v17, 0.0  ;;  %v2254_v62 = vpop.f32.mrb[39].mxu1  ;;  %v14800_v17 = vld [vmem:[%s16971_s7 + $0xe0] ss:$8 sps:$4 sm:$0xff]   ;;  %v14813_v37 = vld [vmem:[%s16971_s7 + $0xf0] ss:$8 sps:$4 sm:$0xff]  }
 0x280   : > { %v2265_v16 = vmax.f32 %v2252_v42, 0.0  ;;  %v2255_v57 = vadd.f32 %v14635_v45, %v2254_v62  ;;  %v14806_v42 = vld [vmem:[%s16971_s7 + $0xf4] ss:$8 sps:$4 sm:$0xff]  }
 0x281   : > { %v2285_v1 = vmul.f32 %v14639_v29, %v2267_v14  ;;  %v14820_v14 = vld [vmem:[%s16971_s7 + $0x104] ss:$8 sps:$4 sm:$0xff]  }
 0x282   : > { %v2283_v30 = vmul.f32 %v14630_v31, %v2265_v16  ;;  %v2266_v3 = vmax.f32 %v2255_v57, 0.0 }
 0x283   : > { %2289 = vst.msk [vmem:[#allocation3 + $0x17] sm:$0x3f] %vm2288_vm4, %v2285_v1 }
 0x284   : > { %2286 = vst.msk [vmem:[#allocation3 + $0x7] sm:$0xff] %vm469_vm3, %v2283_v30  ;;  %v2284_v44 = vmul.f32 %v14644_v47, %v2266_v3 }
 0x286   : > { %2287 = vst.msk [vmem:[#allocation3 + $0xf] sm:$0xff] %vm469_vm3, %v2284_v44 }
 0x28a   : > { %v4972_v0 = vld [vmem:[#allocation3 + $0x17] sm:$0x3f] }
 0x28b   : > { %v4970_v34 = vld [vmem:[#allocation3 + $0x7] sm:$0xff]  ;;  %v4982_v24 = vpack.c.bf16 %v4972_v0, %v4972_v0 }
 0x28c   : > { %v12471_v15 = vpop.f32.mrb[40].mxu1 }
 0x28d   : > { %v2431_v49 = vadd.f32 %v12471_v15, %v14635_v45  ;;  %v2422_v18 = vpop.f32.mrb[41].mxu1  ;;  %v4971_v5 = vld [vmem:[#allocation3 + $0xf] sm:$0xff] }
 0x28e   : > { %v2423_v33 = vadd.f32 %v14635_v45, %v2422_v18  ;;  %v12472_v9 = vpop.f32.mrb[42].mxu1  ;;  %v14657_v38 = vpack.c.bf16 %v4971_v5, %v4970_v34 }
 0x28f   : > { %v2438_v58 = vmax.f32 %v2431_v49, 0.0  ;;  %v2425_v20 = vpop.f32.mrb[43].mxu1 }
 0x290   : > { %v2436_v32 = vmax.f32 %v2423_v33, 0.0  ;;  %v2426_v61 = vadd.f32 %v14635_v45, %v2425_v20  ;;  %11506 = vmatmul.mubr.msk.bf16.vlgmr.msra.gmra.mrb[108].mxu0 %vm469_vm3, %v14657_v38 }
 0x291   : > { %v2441_v63 = vmul.f32 %v2438_v58, %v14639_v29  ;;  %5127 = vmatpush1.bf16.msra.mxu0 %v14654_v19  ;;  %5071 = vmatprep.mubr.bf16.mxu0 %v17036_v59 }
 0x292   : > { %v2439_v12 = vmul.f32 %v2436_v32, %v14630_v31  ;;  %v2437_v55 = vmax.f32 %v2426_v61, 0.0  ;;  %5128 = vmatprep.subr.bf16.mxu0 %v14662_v51 }
 0x293   : > { %2444 = vst.msk [vmem:[#allocation3 + $0x3b] sm:$0x3f] %vm2288_vm4, %v2441_v63 }
 0x294   : > { %2442 = vst.msk [vmem:[#allocation3 + $0x2b] sm:$0xff] %vm469_vm3, %v2439_v12  ;;  %v2440_v53 = vmul.f32 %v2437_v55, %v14644_v47 }
 0x295   : > { %5129 = vmatpush1.bf16.msra.mxu0 %v14672_v27 }
 0x296   : > { %2443 = vst.msk [vmem:[#allocation3 + $0x33] sm:$0xff] %vm469_vm3, %v2440_v53  ;;  %5130 = vmatprep.subr.bf16.mxu0 %v14680_v48 }
 0x298   : > { %11507 = vmatmul.mubr.msk.bf16.gmra.mrb[112].mxu0 %vm469_vm3, %v4982_v24 }
 0x299   : > { %5131 = vmatpush1.bf16.msra.mxu0 %v14689_v54  ;;  %5158 = vmatprep.mubr.bf16.mxu0 %v17036_v59 }
 0x29a   : > { %5132 = vmatprep.subr.bf16.mxu0 %v14696_v56  ;;  %v5179_v40 = vld [vmem:[#allocation3 + $0x3b] sm:$0x3f] }
 0x29b   : > { %v4957_v46 = vld [vmem:[#allocation3 + $0x2a] sm:$0xff]  ;;  %v5189_v10 = vpack.c.bf16 %v5179_v40, %v5179_v40 }
 0x29c   : > { %v5177_v8 = vld [vmem:[#allocation3 + $0x2b] sm:$0xff] }
 0x29d   : > { %5133 = vmatpush1.bf16.msra.mxu0 %v14703_v41  ;;  %v4958_v6 = vld [vmem:[#allocation3 + $0x32] sm:$0xff]  ;;  %v4959_v52 = vld [vmem:[#allocation3 + $0x3a] sm:$0x3f] }
 0x29e   : > { %v14718_v26 = vpack.c.bf16 %v4958_v6, %v4957_v46  ;;  %5236 = vmatprep.subr.bf16.mxu0 %v14710_v13  ;;  %v4969_v35 = vpack.c.bf16 %v4959_v52, %v4959_v52  ;;  %v5178_v7 = vld [vmem:[#allocation3 + $0x33] sm:$0xff] }
 0x29f   : > { %v14773_v21 = vpack.c.bf16 %v5178_v7, %v5177_v8  ;;  %v14855_v8 = vld [vmem:[%s16971_s7 + $0x100] ss:$8 sps:$4 sm:$0xff]  }
 0x2a0   : > { %11516 = vmatmul.mubr.msk.bf16.vlgmr.msra.gmra.mrb[108].mxu0 %vm469_vm3, %v14718_v26 }
 0x2a1   : > { %5237 = vmatpush1.bf16.msra.mxu0 %v14716_v25  ;;  %5168 = vmatprep.mubr.bf16.mxu0 %v17036_v59 }
 0x2a2   : > { %5238 = vmatprep.subr.bf16.mxu0 %v14724_v4 }
 0x2a5   : > { %5239 = vmatpush1.bf16.msra.mxu0 %v14732_v28 }
 0x2a6   : > { %5240 = vmatprep.subr.bf16.mxu0 %v14739_v60 }
 0x2a8   : > { %11517 = vmatmul.mubr.msk.bf16.gmra.mrb[116].mxu0 %vm469_vm3, %v4969_v35 }
 0x2a9   : > { %5241 = vmatpush1.bf16.msra.mxu0 %v14745_v2  ;;  %5268 = vmatprep.mubr.bf16.mxu0 %v17036_v59 }
 0x2aa   : > { %5242 = vmatprep.subr.bf16.mxu0 %v14751_v39 }
 0x2ad   : > { %5243 = vmatpush1.bf16.msra.mxu0 %v14758_v36 }
 0x2ae   : > { %5352 = vmatprep.subr.bf16.mxu0 %v14765_v11 }
 0x2b0   : > { %11534 = vmatmul.mubr.msk.bf16.vlgmr.msra.gmra.mrb[108].mxu0 %vm469_vm3, %v14773_v21 }
 0x2b1   : > { %5278 = vmatprep.mubr.bf16.mxu0 %v17036_v59  ;;  %5353 = vmatpush1.bf16.msra.mxu0 %v14771_v23 }
 0x2b2   : > { %5354 = vmatprep.subr.bf16.mxu0 %v14779_v50 }
 0x2b5   : > { %5355 = vmatpush1.bf16.msra.mxu0 %v14788_v43 }
 0x2b6   : > { %5356 = vmatprep.subr.bf16.mxu0 %v14794_v22 }
 0x2b8   : > { %11535 = vmatmul.mubr.msk.bf16.gmra.mrb[120].mxu0 %vm469_vm3, %v5189_v10 }
 0x2b9   : > { %5357 = vmatpush1.bf16.msra.mxu0 %v14800_v17  ;;  %5384 = vmatprep.mubr.bf16.mxu0 %v17036_v59 }
 0x2ba   : > { %5358 = vmatprep.subr.bf16.mxu0 %v14806_v42 }
 0x2bd   : > { %5359 = vmatpush1.bf16.msra.mxu0 %v14813_v37 }
 0x2be   : > { %5468 = vmatprep.subr.bf16.mxu0 %v14820_v14 }
 0x2ca   : > { %v12483_v62 = vpop.f32.mrb[44].mxu1 }
 0x2cb   : > { %v2586_v16 = vadd.f32 %v12483_v62, %v14635_v45  ;;  %v2577_v57 = vpop.f32.mrb[45].mxu1 }
 0x2cc   : > { %v2578_v1 = vadd.f32 %v14635_v45, %v2577_v57  ;;  %v12484_v30 = vpop.f32.mrb[46].mxu1 }
 0x2cd   : > { %v2593_v3 = vmax.f32 %v2586_v16, 0.0  ;;  %v2580_v44 = vpop.f32.mrb[47].mxu1 }
 0x2ce   : > { %v2591_v15 = vmax.f32 %v2578_v1, 0.0  ;;  %v2581_v49 = vadd.f32 %v14635_v45, %v2580_v44  ;;  %v14897_v1 = vld [vmem:[%s16971_s7 + $0x134] ss:$8 sps:$4 sm:$0xff]  }
 0x2cf   : > { %v2596_v18 = vmul.f32 %v2593_v3, %v14639_v29 }
 0x2d0   : > { %v2594_v34 = vmul.f32 %v2591_v15, %v14630_v31  ;;  %v2592_v5 = vmax.f32 %v2581_v49, 0.0 }
 0x2d1   : > { %2599 = vst.msk [vmem:[#allocation3 + $0x5f] sm:$0x3f] %vm2288_vm4, %v2596_v18  ;;  %v14951_v18 = vld [vmem:[%s16971_s7 + $0x164] ss:$8 sps:$4 sm:$0xff]  }
 0x2d2   : > { %2597 = vst.msk [vmem:[#allocation3 + $0x4f] sm:$0xff] %vm469_vm3, %v2594_v34  ;;  %v2595_v33 = vmul.f32 %v2592_v5, %v14644_v47 }
 0x2d4   : > { %2598 = vst.msk [vmem:[#allocation3 + $0x57] sm:$0xff] %vm469_vm3, %v2595_v33 }
 0x2d9   : > { %v2768_v32 = vld [vmem:[#allocation3 + $0x49] sm:$0xff] }
 0x2da   : > { %v12495_v9 = vpop.f32.mrb[48].mxu1  ;;  %v5409_v3 = vld [vmem:[#allocation3 + $0x4f] sm:$0xff] }
 0x2db   : > { %v2741_v58 = vadd.f32 %v12495_v9, %v14635_v45  ;;  %v2732_v20 = vpop.f32.mrb[49].mxu1  ;;  %v2769_v61 = vld [vmem:[#allocation3 + $0x51] sm:$0xff]  ;;  %v2770_v7 = vld [vmem:[#allocation3 + $0x59] sm:$0x3f] }
 0x2dc   : > { %v2733_v63 = vadd.f32 %v14635_v45, %v2732_v20  ;;  %v12496_v12 = vpop.f32.mrb[50].mxu1  ;;  %v2780_v55 = vpack.c.bf16 %v2769_v61, %v2768_v32  ;;  %v14967_v9 = vld [vmem:[%s16971_s7 + $0x174] ss:$8 sps:$4 sm:$0xff]  }
 0x2dd   : > { %v2748_v0 = vmax.f32 %v2741_v58, 0.0  ;;  %v2735_v53 = vpop.f32.mrb[51].mxu1  ;;  %v15001_v32 = vld [vmem:[%s16971_s7 + $0x194] ss:$8 sps:$4 sm:$0xff]  }
 0x2de   : > { %v2746_v24 = vmax.f32 %v2733_v63, 0.0  ;;  %v2736_v46 = vadd.f32 %v14635_v45, %v2735_v53  ;;  %11198 = vmatmul.mubr.msk.bf16.vlgmr.msra.gmra.mrb[52].mxu1 %vm469_vm3, %v2780_v55  ;;  %v3095_v61 = vld [vmem:[#allocation3 + $0x3a] sm:$0x3f]  ;;  %v15028_v63 = vld [vmem:[%s16971_s7 + $0x1a0] ss:$8 sps:$4 sm:$0xff]  }
 0x2df   : > { %v2751_v6 = vmul.f32 %v2748_v0, %v14639_v29  ;;  %2926 = vmatpush1.bf16.msra.mxu1 %v14654_v19  ;;  %2870 = vmatprep.mubr.bf16.mxu1 %v17036_v59  ;;  %v2781_v19 = vpack.c.bf16 %v2770_v7, %v2770_v7  ;;  %v3106_v55 = vpack.c.bf16 %v3095_v61, %v3095_v61  ;;  %v15035_v0 = vld [vmem:[%s16971_s7 + $0x1b4] ss:$8 sps:$4 sm:$0xff]   ;;  %v15044_v53 = vld [vmem:[%s16971_s7 + $0x1b0] ss:$8 sps:$4 sm:$0xff]  }
 0x2e0   : > { %v2749_v52 = vmul.f32 %v2746_v24, %v14630_v31  ;;  %v2747_v35 = vmax.f32 %v2736_v46, 0.0  ;;  %2927 = vmatprep.subr.bf16.mxu1 %v14662_v51  ;;  %v15051_v24 = vld [vmem:[%s16971_s7 + $0x1c4] ss:$8 sps:$4 sm:$0xff]   ;;  %v5641_v46 = vld [vmem:[#allocation3 + $0x30] sm:$0xff] }
 0x2e1   : > { %2754 = vst.msk [vmem:[#allocation3 + $0x83] sm:$0x3f] %vm2288_vm4, %v2751_v6  ;;  %v5642_v6 = vld [vmem:[#allocation3 + $0x38] sm:$0xff] }
 0x2e2   : > { %2752 = vst.msk [vmem:[#allocation3 + $0x73] sm:$0xff] %vm469_vm3, %v2749_v52  ;;  %v2750_v45 = vmul.f32 %v2747_v35, %v14644_v47  ;;  %v15060_v52 = vld [vmem:[%s16971_s7 + $0x1c0] ss:$8 sps:$4 sm:$0xff]   ;;  %v5652_v35 = vpack.c.bf16 %v5642_v6, %v5641_v46  ;;  %v15067_v7 = vld [vmem:[%s16971_s7 + $0x1d4] ss:$8 sps:$4 sm:$0xff]  }
 0x2e3   : > { %2928 = vmatpush1.bf16.msra.mxu1 %v14672_v27  ;;  %v15233_v46 = vld [vmem:[%s16971_s7 + $0x50] ss:$8 sps:$4 sm:$0xff]   ;;  %v15240_v6 = vld [vmem:[%s16971_s7 + $0x64] ss:$8 sps:$4 sm:$0xff]  }
 0x2e4   : > { %2753 = vst.msk [vmem:[#allocation3 + $0x7b] sm:$0xff] %vm469_vm3, %v2750_v45  ;;  %2929 = vmatprep.subr.bf16.mxu1 %v14680_v48  ;;  %v15077_v45 = vld [vmem:[%s16971_s7 + $0x1d0] ss:$8 sps:$4 sm:$0xff]  }
 0x2e6   : > { %11199 = vmatmul.mubr.msk.bf16.gmra.mrb[56].mxu1 %vm469_vm3, %v2781_v19  ;;  %v15084_v19 = vld [vmem:[%s16971_s7 + $0x1e4] ss:$8 sps:$4 sm:$0xff]  }
 0x2e7   : > { %2930 = vmatpush1.bf16.msra.mxu1 %v14689_v54  ;;  %2957 = vmatprep.mubr.bf16.mxu1 %v17036_v59 }
 0x2e8   : > { %2931 = vmatprep.subr.bf16.mxu1 %v14696_v56  ;;  %v14864_v56 = vld [vmem:[%s16971_s7 + $0x114] ss:$8 sps:$4 sm:$0xff]  }
 0x2e9   : > { %v5293_v51 = vld [vmem:[#allocation3 + $0x72] sm:$0xff] }
 0x2ea   : > { %v2755_v40 = vld [vmem:[#allocation3 + $0x6c] sm:$0xff] }
 0x2eb   : > { %2932 = vmatpush1.bf16.msra.mxu1 %v14703_v41  ;;  %v5294_v27 = vld [vmem:[#allocation3 + $0x7a] sm:$0xff]  ;;  %v2976_v44 = vld [vmem:[#allocation3 + $0x6d] sm:$0xff] }
 0x2ec   : > { %v2756_v48 = vld [vmem:[#allocation3 + $0x74] sm:$0xff]  ;;  %3036 = vmatprep.subr.bf16.mxu1 %v14710_v13  ;;  %v14859_v10 = vpack.c.bf16 %v5294_v27, %v5293_v51  ;;  %v14881_v13 = vld [vmem:[%s16971_s7 + $0x124] ss:$8 sps:$4 sm:$0xff]   ;;  %v2757_v62 = vld [vmem:[#allocation3 + $0x7c] sm:$0x3f] }
 0x2ed   : > { %v2766_v54 = vpack.c.bf16 %v2756_v48, %v2755_v40  ;;  %v14874_v41 = vld [vmem:[%s16971_s7 + $0x110] ss:$8 sps:$4 sm:$0xff]   ;;  %v2767_v57 = vpack.c.bf16 %v2757_v62, %v2757_v62  ;;  %v2978_v34 = vld [vmem:[#allocation3 + $0x7d] sm:$0x3f] }
 0x2ee   : > { %11552 = vmatmul.mubr.msk.bf16.vlgmr.msra.gmra.mrb[108].mxu0 %vm469_vm3, %v14859_v10  ;;  %v2977_v30 = vld [vmem:[#allocation3 + $0x75] sm:$0xff]  ;;  %v2989_v33 = vpack.c.bf16 %v2978_v34, %v2978_v34 }
 0x2ef   : > { %11208 = vmatmul.mubr.msk.bf16.vlgmr.msra.gmra.mrb[52].mxu1 %vm469_vm3, %v2766_v54  ;;  %5469 = vmatpush1.bf16.msra.mxu0 %v14855_v8  ;;  %v14928_v49 = vpack.c.bf16 %v2977_v30, %v2976_v44  ;;  %v5525_v58 = vld [vmem:[#allocation3 + $0x73] sm:$0xff] }
 0x2f0   : > { %3037 = vmatpush1.bf16.msra.mxu1 %v14716_v25  ;;  %5470 = vmatprep.subr.bf16.mxu0 %v14864_v56  ;;  %v5295_v25 = vld [vmem:[#allocation3 + $0x82] sm:$0x3f]  ;;  %v3212_v51 = vld [vmem:[#allocation3 + $0x17] sm:$0x3f] }
 0x2f1   : > { %3038 = vmatprep.subr.bf16.mxu1 %v14724_v4  ;;  %5394 = vmatprep.mubr.bf16.mxu0 %v17036_v59  ;;  %v14890_v4 = vld [vmem:[%s16971_s7 + $0x120] ss:$8 sps:$4 sm:$0xff]   ;;  %v5305_v16 = vpack.c.bf16 %v5295_v25, %v5295_v25  ;;  %v3223_v40 = vpack.c.bf16 %v3212_v51, %v3212_v51  ;;  %v15100_v48 = vld [vmem:[%s16971_s7 + $0x1f4] ss:$8 sps:$4 sm:$0xff]   ;;  %v15109_v54 = vld [vmem:[%s16971_s7 + $0x1f0] ss:$8 sps:$4 sm:$0xff]  }
 0x2f2   : > { %2967 = vmatprep.mubr.bf16.mxu1 %v17036_v59  ;;  %v15125_v25 = vld [vmem:[%s16971_s7 + $0x200] ss:$8 sps:$4 sm:$0xff]   ;;  %v15174_v44 = vld [vmem:[%s16971_s7 + $0x230] ss:$8 sps:$4 sm:$0xff]   ;;  %v15252_v51 = vld [vmem:[%s16971_s7 + $0x74] ss:$8 sps:$4 sm:$0xff]  }
 0x2f3   : > { %5471 = vmatpush1.bf16.msra.mxu0 %v14874_v41  ;;  %v5874_v34 = vld [vmem:[#allocation3 + $0x39] sm:$0xff] }
 0x2f4   : > { %3039 = vmatpush1.bf16.msra.mxu1 %v14732_v28  ;;  %5472 = vmatprep.subr.bf16.mxu0 %v14881_v13  ;;  %v14906_v28 = vld [vmem:[%s16971_s7 + $0x130] ss:$8 sps:$4 sm:$0xff]  }
 0x2f5   : > { %3040 = vmatprep.subr.bf16.mxu1 %v14739_v60  ;;  %v14913_v60 = vld [vmem:[%s16971_s7 + $0x144] ss:$8 sps:$4 sm:$0xff]  }
 0x2f6   : > { %11553 = vmatmul.mubr.msk.bf16.gmra.mrb[124].mxu0 %vm469_vm3, %v5305_v16  ;;  %v15142_v16 = vld [vmem:[%s16971_s7 + $0x210] ss:$8 sps:$4 sm:$0xff]  }
 0x2f7   : > { %11209 = vmatmul.mubr.msk.bf16.gmra.mrb[60].mxu1 %vm469_vm3, %v2767_v57  ;;  %5473 = vmatpush1.bf16.msra.mxu0 %v14890_v4  ;;  %v5759_v57 = vld [vmem:[#allocation3 + $0x1d] sm:$0x3f] }
 0x2f8   : > { %3041 = vmatpush1.bf16.msra.mxu1 %v14745_v2  ;;  %5474 = vmatprep.subr.bf16.mxu0 %v14897_v1  ;;  %v5410_v2 = vld [vmem:[#allocation3 + $0x57] sm:$0xff] }
 0x2f9   : > { %3042 = vmatprep.subr.bf16.mxu1 %v14751_v39  ;;  %5500 = vmatprep.mubr.bf16.mxu0 %v17036_v59  ;;  %v14922_v39 = vld [vmem:[%s16971_s7 + $0x140] ss:$8 sps:$4 sm:$0xff]   ;;  %v14925_v15 = vpack.c.bf16 %v5410_v2, %v5409_v3  ;;  %v15165_v3 = vld [vmem:[%s16971_s7 + $0x234] ss:$8 sps:$4 sm:$0xff]  }
 0x2fa   : > { %3068 = vmatprep.mubr.bf16.mxu1 %v17036_v59  ;;  %v15158_v2 = vld [vmem:[%s16971_s7 + $0x220] ss:$8 sps:$4 sm:$0xff]  }
 0x2fb   : > { %5475 = vmatpush1.bf16.msra.mxu0 %v14906_v28 }
 0x2fc   : > { %3043 = vmatpush1.bf16.msra.mxu1 %v14758_v36  ;;  %5584 = vmatprep.subr.bf16.mxu0 %v14913_v60  ;;  %v14933_v36 = vld [vmem:[%s16971_s7 + $0x154] ss:$8 sps:$4 sm:$0xff]  }
 0x2fd   : > { %3153 = vmatprep.subr.bf16.mxu1 %v14765_v11  ;;  %v14944_v11 = vld [vmem:[%s16971_s7 + $0x150] ss:$8 sps:$4 sm:$0xff]  }
 0x2fe   : > { %11570 = vmatmul.mubr.msk.bf16.vlgmr.msra.gmra.mrb[108].mxu0 %vm469_vm3, %v14925_v15 }
 0x2ff   : > { %11226 = vmatmul.mubr.msk.bf16.vlgmr.msra.gmra.mrb[52].mxu1 %vm469_vm3, %v14928_v49  ;;  %5585 = vmatpush1.bf16.msra.mxu0 %v14922_v39 }
 0x300   : > { %3154 = vmatpush1.bf16.msra.mxu1 %v14771_v23  ;;  %5586 = vmatprep.subr.bf16.mxu0 %v14933_v36  ;;  %v5411_v23 = vld [vmem:[#allocation3 + $0x5f] sm:$0x3f] }
 0x301   : > { %3155 = vmatprep.subr.bf16.mxu1 %v14779_v50  ;;  %5510 = vmatprep.mubr.bf16.mxu0 %v17036_v59  ;;  %v14960_v50 = vld [vmem:[%s16971_s7 + $0x160] ss:$8 sps:$4 sm:$0xff]   ;;  %v5421_v5 = vpack.c.bf16 %v5411_v23, %v5411_v23  ;;  %v5873_v23 = vld [vmem:[#allocation3 + $0x31] sm:$0xff] }
 0x302   : > { %3078 = vmatprep.mubr.bf16.mxu1 %v17036_v59 }
 0x303   : > { %5587 = vmatpush1.bf16.msra.mxu0 %v14944_v11 }
 0x304   : > { %3156 = vmatpush1.bf16.msra.mxu1 %v14788_v43  ;;  %5588 = vmatprep.subr.bf16.mxu0 %v14951_v18  ;;  %v14976_v43 = vld [vmem:[%s16971_s7 + $0x170] ss:$8 sps:$4 sm:$0xff]  }
 0x305   : > { %3157 = vmatprep.subr.bf16.mxu1 %v14794_v22  ;;  %v14983_v22 = vld [vmem:[%s16971_s7 + $0x184] ss:$8 sps:$4 sm:$0xff]  }
 0x306   : > { %11571 = vmatmul.mubr.msk.bf16.gmra.mrb[128].mxu0 %vm469_vm3, %v5421_v5  ;;  %v5884_v5 = vpack.c.bf16 %v5874_v34, %v5873_v23  ;;  %v15293_v23 = vld [vmem:[%s16971_s7 + $0x24] ss:$8 sps:$4 sm:$0xff]   ;;  %v3875_v34 = vld [vmem:[#allocation3 + $0x7d] sm:$0x3f] }
 0x307   : > { %11227 = vmatmul.mubr.msk.bf16.gmra.mrb[64].mxu1 %vm469_vm3, %v2989_v33  ;;  %5589 = vmatpush1.bf16.msra.mxu0 %v14960_v50  ;;  %v5875_v33 = vld [vmem:[#allocation3 + $0x41] sm:$0x3f] }
 0x308   : > { %3158 = vmatpush1.bf16.msra.mxu1 %v14800_v17  ;;  %5590 = vmatprep.subr.bf16.mxu0 %v14967_v9  ;;  %v5526_v17 = vld [vmem:[#allocation3 + $0x7b] sm:$0xff] }
 0x309   : > { %3159 = vmatprep.subr.bf16.mxu1 %v14806_v42  ;;  %5616 = vmatprep.mubr.bf16.mxu0 %v17036_v59  ;;  %v14992_v42 = vld [vmem:[%s16971_s7 + $0x180] ss:$8 sps:$4 sm:$0xff]   ;;  %v14995_v20 = vpack.c.bf16 %v5526_v17, %v5525_v58  ;;  %v5885_v58 = vpack.c.bf16 %v5875_v33, %v5875_v33  ;;  %v15305_v33 = vld [vmem:[%s16971_s7 + $0x34] ss:$8 sps:$4 sm:$0xff]  }
 0x30a   : > { %3185 = vmatprep.mubr.bf16.mxu1 %v17036_v59  ;;  %v3446_v17 = vld [vmem:[#allocation3 + $0x82] sm:$0x3f] }
 0x30b   : > { %5591 = vmatpush1.bf16.msra.mxu0 %v14976_v43 }
 0x30c   : > { %3160 = vmatpush1.bf16.msra.mxu1 %v14813_v37  ;;  %5700 = vmatprep.subr.bf16.mxu0 %v14983_v22  ;;  %v15012_v37 = vld [vmem:[%s16971_s7 + $0x190] ss:$8 sps:$4 sm:$0xff]  }
 0x30d   : > { %3270 = vmatprep.subr.bf16.mxu1 %v14820_v14  ;;  %v15019_v14 = vld [vmem:[%s16971_s7 + $0x1a4] ss:$8 sps:$4 sm:$0xff]  }
 0x30e   : > { %11588 = vmatmul.mubr.msk.bf16.vlgmr.msra.gmra.mrb[108].mxu0 %vm469_vm3, %v14995_v20 }
 0x30f   : > { %11244 = vmatmul.mubr.msk.bf16.vlgmr.msra.gmra.mrb[52].mxu1 %vm469_vm3, %v14718_v26  ;;  %5701 = vmatpush1.bf16.msra.mxu0 %v14992_v42  ;;  %v5527_v26 = vld [vmem:[#allocation3 + $0x83] sm:$0x3f] }
 0x310   : > { %3271 = vmatpush1.bf16.msra.mxu1 %v14855_v8  ;;  %5702 = vmatprep.subr.bf16.mxu0 %v15001_v32  ;;  %v5537_v12 = vpack.c.bf16 %v5527_v26, %v5527_v26  ;;  %v15093_v8 = vld [vmem:[%s16971_s7 + $0x1e0] ss:$8 sps:$4 sm:$0xff]   ;;  %v3457_v26 = vpack.c.bf16 %v3446_v17, %v3446_v17  ;;  %v15312_v17 = vld [vmem:[%s16971_s7 + $0x30] ss:$8 sps:$4 sm:$0xff]  }
 0x311   : > { %3272 = vmatprep.subr.bf16.mxu1 %v14864_v56  ;;  %5626 = vmatprep.mubr.bf16.mxu0 %v17036_v59  ;;  %v15116_v56 = vld [vmem:[%s16971_s7 + $0x204] ss:$8 sps:$4 sm:$0xff]  }
 0x312   : > { %3195 = vmatprep.mubr.bf16.mxu1 %v17036_v59 }
 0x313   : > { %5703 = vmatpush1.bf16.msra.mxu0 %v15012_v37 }
 0x314   : > { %3273 = vmatpush1.bf16.msra.mxu1 %v14874_v41  ;;  %5704 = vmatprep.subr.bf16.mxu0 %v15019_v14  ;;  %v5757_v41 = vld [vmem:[#allocation3 + $0xd] sm:$0xff] }
 0x315   : > { %3274 = vmatprep.subr.bf16.mxu1 %v14881_v13  ;;  %v5758_v13 = vld [vmem:[#allocation3 + $0x15] sm:$0xff] }
 0x316   : > { %11589 = vmatmul.mubr.msk.bf16.gmra.mrb[132].mxu0 %vm469_vm3, %v5537_v12  ;;  %v5768_v62 = vpack.c.bf16 %v5758_v13, %v5757_v41  ;;  %v15219_v12 = vld [vmem:[%s16971_s7 + $0x40] ss:$8 sps:$4 sm:$0xff]  }
 0x317   : > { %11245 = vmatmul.mubr.msk.bf16.gmra.mrb[68].mxu1 %vm469_vm3, %v3106_v55  ;;  %5705 = vmatpush1.bf16.msra.mxu0 %v15028_v63  ;;  %v15225_v55 = vld [vmem:[%s16971_s7 + $0x54] ss:$8 sps:$4 sm:$0xff]   ;;  %v15272_v13 = vld [vmem:[%s16971_s7] ss:$8 sps:$4 sm:$0xff]  }
 0x318   : > { %3275 = vmatpush1.bf16.msra.mxu1 %v14890_v4  ;;  %5706 = vmatprep.subr.bf16.mxu0 %v15035_v0  ;;  %v15132_v4 = vld [vmem:[%s16971_s7 + $0x214] ss:$8 sps:$4 sm:$0xff]  }
 0x319   : > { %3276 = vmatprep.subr.bf16.mxu1 %v14897_v1  ;;  %5732 = vmatprep.mubr.bf16.mxu0 %v17036_v59  ;;  %v15149_v1 = vld [vmem:[%s16971_s7 + $0x224] ss:$8 sps:$4 sm:$0xff]  }
 0x31a   : > { %3302 = vmatprep.mubr.bf16.mxu1 %v17036_v59 }
 0x31b   : > { %5707 = vmatpush1.bf16.msra.mxu0 %v15044_v53 }
 0x31c   : > { %3277 = vmatpush1.bf16.msra.mxu1 %v14906_v28  ;;  %5816 = vmatprep.subr.bf16.mxu0 %v15051_v24  ;;  %v5769_v28 = vpack.c.bf16 %v5759_v57, %v5759_v57  ;;  %v15278_v57 = vld [vmem:[%s16971_s7 + $0x14] ss:$8 sps:$4 sm:$0xff]  }
 0x31d   : > { %3387 = vmatprep.subr.bf16.mxu1 %v14913_v60 }
 0x31e   : > { %11606 = vmatmul.mubr.msk.bf16.vlgmr.msra.gmra.mrb[108].mxu0 %vm469_vm3, %v5652_v35  ;;  %v3680_v35 = vld [vmem:[#allocation3 + $0x83] sm:$0x3f] }
 0x31f   : > { %11262 = vmatmul.mubr.msk.bf16.vlgmr.msra.gmra.mrb[52].mxu1 %vm469_vm3, %v14657_v38  ;;  %5817 = vmatpush1.bf16.msra.mxu0 %v15060_v52  ;;  %v5643_v38 = vld [vmem:[#allocation3 + $0x40] sm:$0x3f] }
 0x320   : > { %3388 = vmatpush1.bf16.msra.mxu1 %v14922_v39  ;;  %5818 = vmatprep.subr.bf16.mxu0 %v15067_v7  ;;  %v5653_v27 = vpack.c.bf16 %v5643_v38, %v5643_v38  ;;  %v3691_v38 = vpack.c.bf16 %v3680_v35, %v3680_v35  ;;  %v3860_v35 = vld [vmem:[#allocation3 + $0x49] sm:$0xff] }
 0x321   : > { %3389 = vmatprep.subr.bf16.mxu1 %v14933_v36  ;;  %5742 = vmatprep.mubr.bf16.mxu0 %v17036_v59 }
 0x322   : > { %3312 = vmatprep.mubr.bf16.mxu1 %v17036_v59 }
 0x323   : > { %5819 = vmatpush1.bf16.msra.mxu0 %v15077_v45 }
 0x324   : > { %3390 = vmatpush1.bf16.msra.mxu1 %v14944_v11  ;;  %5820 = vmatprep.subr.bf16.mxu0 %v15084_v19 }
 0x325   : > { %3391 = vmatprep.subr.bf16.mxu1 %v14951_v18 }
 0x326   : > { %11607 = vmatmul.mubr.msk.bf16.gmra.mrb[136].mxu0 %vm469_vm3, %v5653_v27  ;;  %v15259_v27 = vld [vmem:[%s16971_s7 + $0x70] ss:$8 sps:$4 sm:$0xff]  }
 0x327   : > { %11263 = vmatmul.mubr.msk.bf16.gmra.mrb[72].mxu1 %vm469_vm3, %v3223_v40  ;;  %5821 = vmatpush1.bf16.msra.mxu0 %v15093_v8  ;;  %v15266_v40 = vld [vmem:[%s16971_s7 + $0x4] ss:$8 sps:$4 sm:$0xff]  }
 0x328   : > { %3392 = vmatpush1.bf16.msra.mxu1 %v14960_v50  ;;  %5822 = vmatprep.subr.bf16.mxu0 %v15100_v48 }
 0x329   : > { %3393 = vmatprep.subr.bf16.mxu1 %v14967_v9  ;;  %5848 = vmatprep.mubr.bf16.mxu0 %v17036_v59 }
 0x32a   : > { %3419 = vmatprep.mubr.bf16.mxu1 %v17036_v59 }
 0x32b   : > { %5823 = vmatpush1.bf16.msra.mxu0 %v15109_v54 }
 0x32c   : > { %3394 = vmatpush1.bf16.msra.mxu1 %v14976_v43  ;;  %5932 = vmatprep.subr.bf16.mxu0 %v15116_v56 }
 0x32d   : > { %3504 = vmatprep.subr.bf16.mxu1 %v14983_v22 }
 0x32e   : > { %11624 = vmatmul.mubr.msk.bf16.vlgmr.msra.gmra.mrb[108].mxu0 %vm469_vm3, %v5768_v62 }
 0x32f   : > { %11280 = vmatmul.mubr.msk.bf16.vlgmr.msra.gmra.mrb[52].mxu1 %vm469_vm3, %v14773_v21  ;;  %5933 = vmatpush1.bf16.msra.mxu0 %v15125_v25  ;;  %v3329_v21 = vld [vmem:[#allocation3 + $0x3b] sm:$0x3f] }
 0x330   : > { %3505 = vmatpush1.bf16.msra.mxu1 %v14992_v42  ;;  %5934 = vmatprep.subr.bf16.mxu0 %v15132_v4  ;;  %v3340_v30 = vpack.c.bf16 %v3329_v21, %v3329_v21 }
 0x331   : > { %3506 = vmatprep.subr.bf16.mxu1 %v15001_v32  ;;  %5858 = vmatprep.mubr.bf16.mxu0 %v17036_v59 }
 0x332   : > { %3429 = vmatprep.mubr.bf16.mxu1 %v17036_v59 }
 0x333   : > { %5935 = vmatpush1.bf16.msra.mxu0 %v15142_v16 }
 0x334   : > { %3507 = vmatpush1.bf16.msra.mxu1 %v15012_v37  ;;  %5936 = vmatprep.subr.bf16.mxu0 %v15149_v1 }
 0x335   : > { %3508 = vmatprep.subr.bf16.mxu1 %v15019_v14 }
 0x336   : > { %11625 = vmatmul.mubr.msk.bf16.gmra.mrb[140].mxu0 %vm469_vm3, %v5769_v28 }
 0x337   : > { %11281 = vmatmul.mubr.msk.bf16.gmra.mrb[76].mxu1 %vm469_vm3, %v3340_v30  ;;  %5937 = vmatpush1.bf16.msra.mxu0 %v15158_v2  ;;  %v15286_v30 = vld [vmem:[%s16971_s7 + $0x10] ss:$8 sps:$4 sm:$0xff]  }
 0x338   : > { %3509 = vmatpush1.bf16.msra.mxu1 %v15028_v63  ;;  %5938 = vmatprep.subr.bf16.mxu0 %v15165_v3 }
 0x339   : > { %3510 = vmatprep.subr.bf16.mxu1 %v15035_v0  ;;  %5964 = vmatprep.mubr.bf16.mxu0 %v17036_v59 }
 0x33a   : > { %3536 = vmatprep.mubr.bf16.mxu1 %v17036_v59 }
 0x33b   : > { %5939 = vmatpush1.bf16.msra.mxu0 %v15174_v44 }
 0x33c   : > { %3511 = vmatpush1.bf16.msra.mxu1 %v15044_v53 }
 0x33d   : > { %3621 = vmatprep.subr.bf16.mxu1 %v15051_v24 }
 0x33e   : > { %11642 = vmatmul.mubr.msk.bf16.vlgmr.msra.gmra.mrb[108].mxu0 %vm469_vm3, %v5884_v5  ;;  %v3885_v5 = vpack.c.bf16 %v3875_v34, %v3875_v34  ;;  %v15331_v34 = vld [vmem:[%s16971_s7 + $0x94] ss:$8 sps:$4 sm:$0xff]  }
 0x33f   : > { %11298 = vmatmul.mubr.msk.bf16.vlgmr.msra.gmra.mrb[52].mxu1 %vm469_vm3, %v14859_v10  ;;  %5974 = vmatprep.mubr.bf16.mxu0 %v17036_v59  ;;  %v3563_v10 = vld [vmem:[#allocation3 + $0x5f] sm:$0x3f]  ;;  %17041 = vst [vmem:[#allocation12_spill] sm:$0xff] %v15331_v34 }
 0x340   : > { %3622 = vmatpush1.bf16.msra.mxu1 %v15060_v52  ;;  %3546 = vmatprep.mubr.bf16.mxu1 %v17036_v59  ;;  %v3574_v61 = vpack.c.bf16 %v3563_v10, %v3563_v10 }
 0x341   : > { %3623 = vmatprep.subr.bf16.mxu1 %v15067_v7 }
 0x344   : > { %3624 = vmatpush1.bf16.msra.mxu1 %v15077_v45 }
 0x345   : > { %3625 = vmatprep.subr.bf16.mxu1 %v15084_v19 }
 0x346   : > { %11643 = vmatmul.mubr.msk.bf16.gmra.mrb[144].mxu0 %vm469_vm3, %v5885_v58  ;;  %v15319_v58 = vld [vmem:[%s16971_s7 + $0x84] ss:$8 sps:$4 sm:$0xff]  }
 0x347   : > { %11299 = vmatmul.mubr.msk.bf16.gmra.mrb[80].mxu1 %vm469_vm3, %v3457_v26  ;;  %v3861_v26 = vld [vmem:[#allocation3 + $0x51] sm:$0xff] }
 0x348   : > { %3626 = vmatpush1.bf16.msra.mxu1 %v15093_v8  ;;  %3653 = vmatprep.mubr.bf16.mxu1 %v17036_v59 }
 0x349   : > { %3627 = vmatprep.subr.bf16.mxu1 %v15100_v48 }
 0x34c   : > { %3628 = vmatpush1.bf16.msra.mxu1 %v15109_v54 }
 0x34d   : > { %3738 = vmatprep.subr.bf16.mxu1 %v15116_v56 }
 0x34f   : > { %11316 = vmatmul.mubr.msk.bf16.vlgmr.msra.gmra.mrb[52].mxu1 %vm469_vm3, %v14925_v15  ;;  %v15213_v15 = vld [vmem:[%s16971_s7 + $0x44] ss:$8 sps:$4 sm:$0xff]  }
 0x350   : > { %3739 = vmatpush1.bf16.msra.mxu1 %v15125_v25  ;;  %3663 = vmatprep.mubr.bf16.mxu1 %v17036_v59 }
 0x351   : > { %3740 = vmatprep.subr.bf16.mxu1 %v15132_v4 }
 0x354   : > { %3741 = vmatpush1.bf16.msra.mxu1 %v15142_v16 }
 0x355   : > { %3742 = vmatprep.subr.bf16.mxu1 %v15149_v1 }
 0x357   : > { %11317 = vmatmul.mubr.msk.bf16.gmra.mrb[84].mxu1 %vm469_vm3, %v3574_v61  ;;  %v15325_v61 = vld [vmem:[%s16971_s7 + $0x80] ss:$8 sps:$4 sm:$0xff]  }
 0x358   : > { %3743 = vmatpush1.bf16.msra.mxu1 %v15158_v2  ;;  %3770 = vmatprep.mubr.bf16.mxu1 %v17036_v59  ;;  %17040 = vst [vmem:[#allocation11_spill] sm:$0xff] %v15325_v61 }
 0x359   : > { %3744 = vmatprep.subr.bf16.mxu1 %v15165_v3 }
 0x35c   : > { %3745 = vmatpush1.bf16.msra.mxu1 %v15174_v44 }
 0x35d   : > { %3932 = vmatprep.subr.bf16.mxu1 %v15213_v15 }
 0x35f   : > { %11334 = vmatmul.mubr.msk.bf16.vlgmr.msra.gmra.mrb[52].mxu1 %vm469_vm3, %v14995_v20  ;;  %v15246_v20 = vld [vmem:[%s16971_s7 + $0x60] ss:$8 sps:$4 sm:$0xff]  }
 0x360   : > { %3933 = vmatpush1.bf16.msra.mxu1 %v15219_v12  ;;  %3780 = vmatprep.mubr.bf16.mxu1 %v17036_v59 }
 0x361   : > { %3934 = vmatprep.subr.bf16.mxu1 %v15225_v55 }
 0x364   : > { %3935 = vmatpush1.bf16.msra.mxu1 %v15233_v46 }
 0x365   : > { %3936 = vmatprep.subr.bf16.mxu1 %v15240_v6 }
 0x367   : > { %11335 = vmatmul.mubr.msk.bf16.gmra.mrb[88].mxu1 %vm469_vm3, %v3691_v38 }
 0x368   : > { %3937 = vmatpush1.bf16.msra.mxu1 %v15246_v20  ;;  %3964 = vmatprep.mubr.bf16.mxu1 %v17036_v59 }
 0x369   : > { %3938 = vmatprep.subr.bf16.mxu1 %v15252_v51 }
 0x36b   : > { %v5073_v41 = vpop.f32.mrb[112].mxu0 }
 0x36c   : > { %3939 = vmatpush1.bf16.msra.mxu1 %v15259_v27  ;;  %v5075_v62 = vpop.f32.mrb[113].mxu0 }
 0x36d   : > { %4029 = vmatprep.subr.bf16.mxu1 %v15266_v40  ;;  %v5077_v21 = vpop.f32.mrb[114].mxu0 }
 0x36e   : > { %v5078_v28 = vpop.f32.mrb[115].mxu0 }
 0x36f   : > { %11352 = vmatmul.mubr.msk.bf16.vlgmr.msra.gmra.mrb[92].mxu1 %vm469_vm3, %v14928_v49  ;;  %v15299_v49 = vld [vmem:[%s16971_s7 + $0x20] ss:$8 sps:$4 sm:$0xff]   ;;  %v3871_v28 = vpack.c.bf16 %v3861_v26, %v3860_v35  ;;  %v15345_v26 = vld [vmem:[%s16971_s7 + $0xa4] ss:$8 sps:$4 sm:$0xff]   ;;  %v15364_v35 = vld [vmem:[%s16971_s7 + $0xb0] ss:$8 sps:$4 sm:$0xff]  }
 0x370   : > { %4030 = vmatpush1.bf16.msra.mxu1 %v15272_v13  ;;  %3974 = vmatprep.mubr.bf16.mxu1 %v17036_v59  ;;  %17043 = vst [vmem:[#allocation16_spill] sm:$0xff] %v15345_v26  ;;  %17046 = vst [vmem:[#allocation19_spill] sm:$0xff] %v15364_v35 }
 0x371   : > { %4031 = vmatprep.subr.bf16.mxu1 %v15278_v57 }
 0x374   : > { %4032 = vmatpush1.bf16.msra.mxu1 %v15286_v30 }
 0x375   : > { %4033 = vmatprep.subr.bf16.mxu1 %v15293_v23 }
 0x377   : > { %11353 = vmatmul.mubr.msk.bf16.gmra.mrb[96].mxu1 %vm469_vm3, %v3885_v5 }
 0x378   : > { %4034 = vmatpush1.bf16.msra.mxu1 %v15299_v49  ;;  %4061 = vmatprep.mubr.bf16.mxu1 %v17036_v59 }
 0x379   : > { %4035 = vmatprep.subr.bf16.mxu1 %v15305_v33 }
 0x37b   : > { %v5170_v10 = vpop.f32.mrb[116].mxu0 }
 0x37c   : > { %4036 = vmatpush1.bf16.msra.mxu1 %v15312_v17  ;;  %v5171_v38 = vadd.f32 %v5170_v10, %v5073_v41  ;;  %v5172_v21 = vpop.f32.mrb[117].mxu0  ;;  %v15338_v41 = vld [vmem:[%s16971_s7 + $0x90] ss:$8 sps:$4 sm:$0xff]   ;;  %v15357_v10 = vld [vmem:[%s16971_s7 + $0xb4] ss:$8 sps:$4 sm:$0xff]  }
 0x37d   : > { %4139 = vmatprep.subr.bf16.mxu1 %v15319_v58  ;;  %v5173_v5 = vadd.f32 %v5172_v21, %v5075_v62  ;;  %v5174_v29 = vpop.f32.mrb[118].mxu0  ;;  %17042 = vst [vmem:[#allocation15_spill] sm:$0xff] %v15338_v41  ;;  %17045 = vst [vmem:[#allocation18_spill] sm:$0xff] %v15357_v10  ;;  %v15371_v21 = vld [vmem:[%s16971_s7 + $0xc4] ss:$8 sps:$4 sm:$0xff]  }
 0x37e   : > { %v5175_v47 = vpop.f32.mrb[119].mxu0  ;;  %v3862_v29 = vld [vmem:[#allocation3 + $0x59] sm:$0x3f] }
 0x37f   : > { %11362 = vmatmul.mubr.msk.bf16.vlgmr.msra.gmra.mrb[92].mxu1 %vm469_vm3, %v3871_v28  ;;  %v15351_v47 = vld [vmem:[%s16971_s7 + $0xa0] ss:$8 sps:$4 sm:$0xff]   ;;  %v3872_v62 = vpack.c.bf16 %v3862_v29, %v3862_v29  ;;  %v4081_v28 = vld [vmem:[#allocation3 + $0x52] sm:$0xff] }
 0x380   : > { %4140 = vmatpush1.bf16.msra.mxu1 %v15325_v61  ;;  %4071 = vmatprep.mubr.bf16.mxu1 %v17036_v59  ;;  %17044 = vst [vmem:[#allocation17_spill] sm:$0xff] %v15351_v47 }
 0x381   : > { %4141 = vmatprep.subr.bf16.mxu1 %v15331_v34 }
 0x384   : > { %4142 = vmatpush1.bf16.msra.mxu1 %v15338_v41  ;;  %v15385_v41 = vld [vmem:[%s16971_s7 + $0xd4] ss:$8 sps:$4 sm:$0xff]  }
 0x385   : > { %4143 = vmatprep.subr.bf16.mxu1 %v15345_v26 }
 0x387   : > { %11363 = vmatmul.mubr.msk.bf16.gmra.mrb[100].mxu1 %vm469_vm3, %v3872_v62  ;;  %v15377_v62 = vld [vmem:[%s16971_s7 + $0xc0] ss:$8 sps:$4 sm:$0xff]  }
 0x388   : > { %4144 = vmatpush1.bf16.msra.mxu1 %v15351_v47  ;;  %4171 = vmatprep.mubr.bf16.mxu1 %v17036_v59  ;;  %v4080_v47 = vld [vmem:[#allocation3 + $0x4a] sm:$0xff] }
 0x389   : > { %4145 = vmatprep.subr.bf16.mxu1 %v15357_v10  ;;  %v4091_v10 = vpack.c.bf16 %v4081_v28, %v4080_v47  ;;  %v15427_v28 = vld [vmem:[%s16971_s7 + $0x104] ss:$8 sps:$4 sm:$0xff]  }
 0x38a   : > { %17051 = vst [vmem:[#allocation24_spill] sm:$0xff] %v15427_v28 }
 0x38b   : > { %v5280_v29 = vpop.f32.mrb[120].mxu0 }
 0x38c   : > { %4146 = vmatpush1.bf16.msra.mxu1 %v15364_v35  ;;  %v15379_v31 = vadd.f32 %v5280_v29, %v5171_v38  ;;  %v5282_v26 = vpop.f32.mrb[121].mxu0  ;;  %v15394_v38 = vld [vmem:[%s16971_s7 + $0xd0] ss:$8 sps:$4 sm:$0xff]  }
 0x38d   : > { %4255 = vmatprep.subr.bf16.mxu1 %v15371_v21  ;;  %v15387_v34 = vadd.f32 %v5282_v26, %v5173_v5  ;;  %v5284_v35 = vpop.f32.mrb[122].mxu0  ;;  %v15401_v5 = vld [vmem:[%s16971_s7 + $0xe4] ss:$8 sps:$4 sm:$0xff]   ;;  %v4082_v26 = vld [vmem:[#allocation3 + $0x5a] sm:$0x3f] }
 0x38e   : > { %v5285_v61 = vpop.f32.mrb[123].mxu0  ;;  %17047 = vst [vmem:[#allocation20_spill] sm:$0xff] %v15401_v5  ;;  %v4092_v47 = vpack.c.bf16 %v4082_v26, %v4082_v26  ;;  %v15420_v35 = vld [vmem:[%s16971_s7 + $0xf0] ss:$8 sps:$4 sm:$0xff]   ;;  %v15433_v26 = vld [vmem:[%s16971_s7 + $0x100] ss:$8 sps:$4 sm:$0xff]  }
 0x38f   : > { %11380 = vmatmul.mubr.msk.bf16.vlgmr.msra.gmra.mrb[92].mxu1 %vm469_vm3, %v4091_v10  ;;  %v15407_v61 = vld [vmem:[%s16971_s7 + $0xe0] ss:$8 sps:$4 sm:$0xff]   ;;  %v15413_v10 = vld [vmem:[%s16971_s7 + $0xf4] ss:$8 sps:$4 sm:$0xff]   ;;  %17050 = vst [vmem:[#allocation23_spill] sm:$0xff] %v15420_v35  ;;  %17052 = vst [vmem:[#allocation25_spill] sm:$0xff] %v15433_v26 }
 0x390   : > { %4256 = vmatpush1.bf16.msra.mxu1 %v15377_v62  ;;  %4181 = vmatprep.mubr.bf16.mxu1 %v17036_v59  ;;  %17048 = vst [vmem:[#allocation21_spill] sm:$0xff] %v15407_v61  ;;  %17049 = vst [vmem:[#allocation22_spill] sm:$0xff] %v15413_v10  ;;  %v4197_v29 = vld [vmem:[#allocation3 + $0xf] sm:$0xff] }
 0x391   : > { %4257 = vmatprep.subr.bf16.mxu1 %v15385_v41 }
 0x394   : > { %4258 = vmatpush1.bf16.msra.mxu1 %v15394_v38 }
 0x395   : > { %4259 = vmatprep.subr.bf16.mxu1 %v15401_v5 }
 0x397   : > { %11381 = vmatmul.mubr.msk.bf16.gmra.mrb[104].mxu1 %vm469_vm3, %v4092_v47  ;;  %v4196_v47 = vld [vmem:[#allocation3 + $0x7] sm:$0xff] }
 0x398   : > { %4260 = vmatpush1.bf16.msra.mxu1 %v15407_v61  ;;  %4287 = vmatprep.mubr.bf16.mxu1 %v17036_v59  ;;  %v15436_v61 = vpack.c.bf16 %v4197_v29, %v4196_v47  ;;  %v15456_v29 = vld [vmem:[%s16971_s7 + $0x124] ss:$8 sps:$4 sm:$0xff]   ;;  %v4198_v47 = vld [vmem:[#allocation3 + $0x17] sm:$0x3f] }
 0x399   : > { %4261 = vmatprep.subr.bf16.mxu1 %v15413_v10  ;;  %v15441_v10 = vld [vmem:[%s16971_s7 + $0x114] ss:$8 sps:$4 sm:$0xff]   ;;  %17055 = vst [vmem:[#allocation28_spill] sm:$0xff] %v15456_v29 }
 0x39a   : > { %17053 = vst [vmem:[#allocation26_spill] sm:$0xff] %v15441_v10 }
 0x39c   : > { %4262 = vmatpush1.bf16.msra.mxu1 %v15420_v35  ;;  %v15449_v35 = vld [vmem:[%s16971_s7 + $0x110] ss:$8 sps:$4 sm:$0xff]  }
 0x39d   : > { %4371 = vmatprep.subr.bf16.mxu1 %v15427_v28  ;;  %17054 = vst [vmem:[#allocation27_spill] sm:$0xff] %v15449_v35  ;;  %v4208_v28 = vpack.c.bf16 %v4198_v47, %v4198_v47  ;;  %v4312_v47 = vld [vmem:[#allocation3 + $0x2b] sm:$0xff] }
 0x39f   : > { %11398 = vmatmul.mubr.msk.bf16.vlgmr.msra.gmra.mrb[92].mxu1 %vm469_vm3, %v15436_v61 }
 0x3a0   : > { %4372 = vmatpush1.bf16.msra.mxu1 %v15433_v26  ;;  %4297 = vmatprep.mubr.bf16.mxu1 %v17036_v59  ;;  %v15462_v26 = vld [vmem:[%s16971_s7 + $0x120] ss:$8 sps:$4 sm:$0xff]  }
 0x3a1   : > { %4373 = vmatprep.subr.bf16.mxu1 %v15441_v10  ;;  %v15468_v10 = vld [vmem:[%s16971_s7 + $0x134] ss:$8 sps:$4 sm:$0xff]  }
 0x3a2   : > { %17056 = vst [vmem:[#allocation29_spill] sm:$0xff] %v15468_v10 }
 0x3a4   : > { %4374 = vmatpush1.bf16.msra.mxu1 %v15449_v35  ;;  %v15475_v35 = vld [vmem:[%s16971_s7 + $0x130] ss:$8 sps:$4 sm:$0xff]  }
 0x3a5   : > { %4375 = vmatprep.subr.bf16.mxu1 %v15456_v29  ;;  %17057 = vst [vmem:[#allocation30_spill] sm:$0xff] %v15475_v35  ;;  %v4313_v29 = vld [vmem:[#allocation3 + $0x33] sm:$0xff] }
 0x3a6   : > { %v15481_v5 = vpack.c.bf16 %v4313_v29, %v4312_v47  ;;  %v4429_v29 = vld [vmem:[#allocation3 + $0x10] sm:$0xff] }
 0x3a7   : > { %11399 = vmatmul.mubr.msk.bf16.gmra.mrb[108].mxu1 %vm469_vm3, %v4208_v28  ;;  %v4314_v28 = vld [vmem:[#allocation3 + $0x3b] sm:$0x3f] }
 0x3a8   : > { %4376 = vmatpush1.bf16.msra.mxu1 %v15462_v26  ;;  %4403 = vmatprep.mubr.bf16.mxu1 %v17036_v59 }
 0x3a9   : > { %4377 = vmatprep.subr.bf16.mxu1 %v15468_v10 }
 0x3ac   : > { %4378 = vmatpush1.bf16.msra.mxu1 %v15475_v35  ;;  %v4324_v35 = vpack.c.bf16 %v4314_v28, %v4314_v28 }
 0x3ad   : > { %4487 = vmatprep.subr.bf16.mxu1 %v14913_v60 }
 0x3af   : > { %11416 = vmatmul.mubr.msk.bf16.vlgmr.msra.gmra.mrb[92].mxu1 %vm469_vm3, %v15481_v5 }
 0x3b0   : > { %4488 = vmatpush1.bf16.msra.mxu1 %v14922_v39  ;;  %4413 = vmatprep.mubr.bf16.mxu1 %v17036_v59  ;;  %v4428_v39 = vld [vmem:[#allocation3 + $0x8] sm:$0xff] }
 0x3b1   : > { %4489 = vmatprep.subr.bf16.mxu1 %v14933_v36 }
 0x3b4   : > { %4490 = vmatpush1.bf16.msra.mxu1 %v14944_v11  ;;  %v15496_v11 = vpack.c.bf16 %v4429_v29, %v4428_v39 }
 0x3b5   : > { %4491 = vmatprep.subr.bf16.mxu1 %v14951_v18  ;;  %v4430_v18 = vld [vmem:[#allocation3 + $0x18] sm:$0x3f] }
 0x3b7   : > { %11417 = vmatmul.mubr.msk.bf16.gmra.mrb[112].mxu1 %vm469_vm3, %v4324_v35 }
 0x3b8   : > { %4492 = vmatpush1.bf16.msra.mxu1 %v14960_v50  ;;  %4519 = vmatprep.mubr.bf16.mxu1 %v17036_v59  ;;  %v4440_v50 = vpack.c.bf16 %v4430_v18, %v4430_v18 }
 0x3b9   : > { %4493 = vmatprep.subr.bf16.mxu1 %v14967_v9  ;;  %v2872_v60 = vpop.f32.mrb[56].mxu1 }
 0x3ba   : > { %v2874_v47 = vpop.f32.mrb[57].mxu1 }
 0x3bb   : > { %v2876_v36 = vpop.f32.mrb[58].mxu1 }
 0x3bc   : > { %4494 = vmatpush1.bf16.msra.mxu1 %v14976_v43  ;;  %v2877_v10 = vpop.f32.mrb[59].mxu1 }
 0x3bd   : > { %4603 = vmatprep.subr.bf16.mxu1 %v14983_v22  ;;  %v4545_v22 = vld [vmem:[#allocation3 + $0x57] sm:$0xff] }
 0x3bf   : > { %11434 = vmatmul.mubr.msk.bf16.vlgmr.msra.gmra.mrb[92].mxu1 %vm469_vm3, %v15496_v11 }
 0x3c0   : > { %4604 = vmatpush1.bf16.msra.mxu1 %v14992_v42  ;;  %4529 = vmatprep.mubr.bf16.mxu1 %v17036_v59 }
 0x3c1   : > { %4605 = vmatprep.subr.bf16.mxu1 %v15001_v32 }
 0x3c4   : > { %4606 = vmatpush1.bf16.msra.mxu1 %v15012_v37 }
 0x3c5   : > { %4607 = vmatprep.subr.bf16.mxu1 %v15019_v14 }
 0x3c7   : > { %11435 = vmatmul.mubr.msk.bf16.gmra.mrb[116].mxu1 %vm469_vm3, %v4440_v50 }
 0x3c8   : > { %4608 = vmatpush1.bf16.msra.mxu1 %v15028_v63  ;;  %4635 = vmatprep.mubr.bf16.mxu1 %v17036_v59  ;;  %v4544_v63 = vld [vmem:[#allocation3 + $0x4f] sm:$0xff] }
 0x3c9   : > { %4609 = vmatprep.subr.bf16.mxu1 %v15035_v0  ;;  %v5396_v9 = vpop.f32.mrb[124].mxu0  ;;  %v15513_v0 = vpack.c.bf16 %v4545_v22, %v4544_v63 }
 0x3ca   : > { %v2969_v43 = vpop.f32.mrb[60].mxu1  ;;  %v5407_v42 = vadd.f32 %v5396_v9, %v15379_v31  ;;  %v5398_v10 = vpop.f32.mrb[125].mxu0  ;;  %v4546_v31 = vld [vmem:[#allocation3 + $0x5f] sm:$0x3f] }
 0x3cb   : > { %v2970_v32 = vadd.f32 %v2969_v43, %v2872_v60  ;;  %v2971_v35 = vpop.f32.mrb[61].mxu1  ;;  %v5408_v37 = vadd.f32 %v5398_v10, %v15387_v34  ;;  %v5400_v28 = vpop.f32.mrb[126].mxu0  ;;  %v4661_v34 = vld [vmem:[#allocation3 + $0x7b] sm:$0xff]  ;;  %v4660_v43 = vld [vmem:[#allocation3 + $0x73] sm:$0xff] }
 0x3cc   : > { %v2972_v14 = vadd.f32 %v2971_v35, %v2874_v47  ;;  %4610 = vmatpush1.bf16.msra.mxu1 %v15044_v53  ;;  %v2973_v39 = vpop.f32.mrb[62].mxu1  ;;  %v5401_v29 = vpop.f32.mrb[127].mxu0  ;;  %v4556_v53 = vpack.c.bf16 %v4546_v31, %v4546_v31  ;;  %v15528_v10 = vpack.c.bf16 %v4661_v34, %v4660_v43 }
 0x3cd   : > { %v2974_v36 = vpop.f32.mrb[63].mxu1  ;;  %4719 = vmatprep.subr.bf16.mxu1 %v15051_v24 }
 0x3cf   : > { %11452 = vmatmul.mubr.msk.bf16.vlgmr.msra.gmra.mrb[92].mxu1 %vm469_vm3, %v15513_v0 }
 0x3d0   : > { %4720 = vmatpush1.bf16.msra.mxu1 %v15060_v52  ;;  %4645 = vmatprep.mubr.bf16.mxu1 %v17036_v59 }
 0x3d1   : > { %4721 = vmatprep.subr.bf16.mxu1 %v15067_v7 }
 0x3d4   : > { %4722 = vmatpush1.bf16.msra.mxu1 %v15077_v45 }
 0x3d5   : > { %4723 = vmatprep.subr.bf16.mxu1 %v15084_v19 }
 0x3d7   : > { %11453 = vmatmul.mubr.msk.bf16.gmra.mrb[120].mxu1 %vm469_vm3, %v4556_v53 }
 0x3d8   : > { %4724 = vmatpush1.bf16.msra.mxu1 %v15093_v8  ;;  %4751 = vmatprep.mubr.bf16.mxu1 %v17036_v59 }
 0x3d9   : > { %4725 = vmatprep.subr.bf16.mxu1 %v15100_v48  ;;  %v5512_v24 = vpop.f32.mrb[128].mxu0  ;;  %v4662_v48 = vld [vmem:[#allocation3 + $0x83] sm:$0x3f] }
 0x3da   : > { %v3080_v52 = vpop.f32.mrb[64].mxu1  ;;  %v5523_v60 = vadd.f32 %v5512_v24, %v5407_v42  ;;  %v5514_v7 = vpop.f32.mrb[129].mxu0  ;;  %v4776_v42 = vld [vmem:[#allocation3 + $0x50] sm:$0xff] }
 0x3db   : > { %v3091_v47 = vadd.f32 %v3080_v52, %v2970_v32  ;;  %v3082_v18 = vpop.f32.mrb[65].mxu1  ;;  %v5524_v50 = vadd.f32 %v5514_v7, %v5408_v37  ;;  %v5516_v19 = vpop.f32.mrb[130].mxu0  ;;  %v4777_v32 = vld [vmem:[#allocation3 + $0x58] sm:$0xff] }
 0x3dc   : > { %v3092_v45 = vadd.f32 %v3082_v18, %v2972_v14  ;;  %4726 = vmatpush1.bf16.msra.mxu1 %v15109_v54  ;;  %v3084_v9 = vpop.f32.mrb[66].mxu1  ;;  %v5517_v22 = vpop.f32.mrb[131].mxu0  ;;  %v4672_v54 = vpack.c.bf16 %v4662_v48, %v4662_v48  ;;  %v15543_v29 = vpack.c.bf16 %v4777_v32, %v4776_v42  ;;  %v17059_v48 = vld [vmem:[#allocation12_spill] sm:$0xff] }
 0x3dd   : > { %v3085_v8 = vpop.f32.mrb[67].mxu1  ;;  %4835 = vmatprep.subr.bf16.mxu1 %v15116_v56 }
 0x3de   : > { %v17058_v8 = vld [vmem:[#allocation11_spill] sm:$0xff] }
 0x3df   : > { %11470 = vmatmul.mubr.msk.bf16.vlgmr.msra.gmra.mrb[92].mxu1 %vm469_vm3, %v15528_v10 }
 0x3e0   : > { %4836 = vmatpush1.bf16.msra.mxu1 %v15125_v25  ;;  %4761 = vmatprep.mubr.bf16.mxu1 %v17036_v59 }
 0x3e1   : > { %4837 = vmatprep.subr.bf16.mxu1 %v15132_v4 }
 0x3e4   : > { %4838 = vmatpush1.bf16.msra.mxu1 %v15142_v16 }
 0x3e5   : > { %4839 = vmatprep.subr.bf16.mxu1 %v15149_v1 }
 0x3e7   : > { %11471 = vmatmul.mubr.msk.bf16.gmra.mrb[124].mxu1 %vm469_vm3, %v4672_v54 }
 0x3e8   : > { %4840 = vmatpush1.bf16.msra.mxu1 %v15158_v2  ;;  %4867 = vmatprep.mubr.bf16.mxu1 %v17036_v59 }
 0x3e9   : > { %4841 = vmatprep.subr.bf16.mxu1 %v15165_v3  ;;  %v5628_v56 = vpop.f32.mrb[132].mxu0  ;;  %v4778_v3 = vld [vmem:[#allocation3 + $0x60] sm:$0x3f] }
 0x3ea   : > { %v3197_v25 = vpop.f32.mrb[68].mxu1  ;;  %v5639_v35 = vadd.f32 %v5628_v56, %v5523_v60  ;;  %v5630_v37 = vpop.f32.mrb[133].mxu0  ;;  %v6053_v56 = vld [vmem:[#allocation3 + $0x17] sm:$0x3f] }
 0x3eb   : > { %v3208_v4 = vadd.f32 %v3197_v25, %v3091_v47  ;;  %v3199_v14 = vpop.f32.mrb[69].mxu1  ;;  %v5640_v16 = vadd.f32 %v5630_v37, %v5524_v50  ;;  %v5632_v1 = vpop.f32.mrb[134].mxu0 }
 0x3ec   : > { %v3209_v28 = vadd.f32 %v3199_v14, %v3092_v45  ;;  %4842 = vmatpush1.bf16.msra.mxu1 %v15174_v44  ;;  %v3201_v39 = vpop.f32.mrb[70].mxu1  ;;  %v5633_v63 = vpop.f32.mrb[135].mxu0  ;;  %v4788_v44 = vpack.c.bf16 %v4778_v3, %v4778_v3  ;;  %v17061_v14 = vld [vmem:[#allocation16_spill] sm:$0xff] }
 0x3ed   : > { %v3202_v2 = vpop.f32.mrb[71].mxu1  ;;  %6123 = vmatprep.subr.bf16.mxu1 %v15213_v15  ;;  %v17062_v39 = vld [vmem:[#allocation13_spill] sm:$0xff] }
 0x3ef   : > { %11488 = vmatmul.mubr.msk.bf16.vlgmr.msra.gmra.mrb[92].mxu1 %vm469_vm3, %v15543_v29 }
 0x3f0   : > { %6124 = vmatpush1.bf16.msra.mxu1 %v15219_v12  ;;  %4877 = vmatprep.mubr.bf16.mxu1 %v17036_v59 }
 0x3f1   : > { %6125 = vmatprep.subr.bf16.mxu1 %v15225_v55 }
 0x3f4   : > { %6126 = vmatpush1.bf16.msra.mxu1 %v15233_v46 }
 0x3f5   : > { %6127 = vmatprep.subr.bf16.mxu1 %v15240_v6 }
 0x3f7   : > { %11489 = vmatmul.mubr.msk.bf16.gmra.mrb[128].mxu1 %vm469_vm3, %v4788_v44 }
 0x3f8   : > { %6128 = vmatpush1.bf16.msra.mxu1 %v15246_v20  ;;  %6155 = vmatprep.mubr.bf16.mxu1 %v17036_v59  ;;  %v6066_v20 = vld [vmem:[#allocation3 + $0x3b] sm:$0x3f] }
 0x3f9   : > { %6129 = vmatprep.subr.bf16.mxu1 %v15252_v51  ;;  %v5744_v15 = vpop.f32.mrb[136].mxu0  ;;  %v3797_v51 = vlaneseq }
 0x3fa   : > { %v3314_v12 = vpop.f32.mrb[72].mxu1  ;;  %v5755_v36 = vadd.f32 %v5744_v15, %v5639_v35  ;;  %v5746_v53 = vpop.f32.mrb[137].mxu0  ;;  %v17060_v35 = vld [vmem:[#allocation15_spill] sm:$0xff]  ;;  %v17063_v15 = vld [vmem:[#allocation17_spill] sm:$0xff] }
 0x3fb   : > { %v3325_v31 = vadd.f32 %v3314_v12, %v3208_v4  ;;  %v3316_v55 = vpop.f32.mrb[73].mxu1  ;;  %v5756_v24 = vadd.f32 %v5746_v53, %v5640_v16  ;;  %v5748_v46 = vpop.f32.mrb[138].mxu0  ;;  %v3798_v47 = vshrl.u32 %v3797_v51, 7  ;;  %v6063_v16 = vpack.c.bf16 %v6053_v56, %v6053_v56  ;;  %v17065_v53 = vld [vmem:[#allocation18_spill] sm:$0xff] }
 0x3fc   : > { %v3326_v52 = vadd.f32 %v3316_v55, %v3209_v28  ;;  %6130 = vmatpush1.bf16.msra.mxu1 %v15259_v27  ;;  %v3318_v6 = vpop.f32.mrb[74].mxu1  ;;  %v5749_v34 = vpop.f32.mrb[139].mxu0  ;;  %v6076_v27 = vpack.c.bf16 %v6066_v20, %v6066_v20 }
 0x3fd   : > { %v3319_v60 = vpop.f32.mrb[75].mxu1  ;;  %6220 = vmatprep.subr.bf16.mxu1 %v15266_v40  ;;  %v15569_v50 = vsub.s32 0, %v3798_v47  ;;  %v15575_v9 = vsub.s32 1, %v3798_v47 }
 0x3ff   : > { %11660 = vmatmul.mubr.msk.bf16.vlgmr.msra.gmra.mrb[132].mxu1 %vm469_vm3, %v15481_v5 }
 0x400   : > { %6221 = vmatpush1.bf16.msra.mxu1 %v15272_v13  ;;  %6165 = vmatprep.mubr.bf16.mxu1 %v17036_v59 }
 0x401   : > { %6222 = vmatprep.subr.bf16.mxu1 %v15278_v57 }
 0x404   : > { %6223 = vmatpush1.bf16.msra.mxu1 %v15286_v30 }
 0x405   : > { %6224 = vmatprep.subr.bf16.mxu1 %v15293_v23 }
 0x407   : > { %11661 = vmatmul.mubr.msk.bf16.gmra.mrb[136].mxu1 %vm469_vm3, %v6076_v27 }
 0x408   : > { %6225 = vmatpush1.bf16.msra.mxu1 %v15299_v49  ;;  %6252 = vmatprep.mubr.bf16.mxu1 %v17036_v59  ;;  %v5989_v49 = vld [vmem:[%s16972_s8] sm:$0x3] }
 0x409   : > { %6226 = vmatprep.subr.bf16.mxu1 %v15305_v33  ;;  %v5860_v40 = vpop.f32.mrb[140].mxu0  ;;  %v5994_v22 = vrot.slane %v5989_v49, %v15569_v50 }
 0x40a   : > { %v3431_v13 = vpop.f32.mrb[76].mxu1  ;;  %v5871_v5 = vadd.f32 %v5860_v40, %v5755_v36  ;;  %v5862_v7 = vpop.f32.mrb[141].mxu0  ;;  %v17064_v36 = vld [vmem:[#allocation10_spill] sm:$0xff] }
 0x40b   : > { %v3442_v57 = vadd.f32 %v3431_v13, %v3325_v31  ;;  %v3433_v18 = vpop.f32.mrb[77].mxu1  ;;  %v5872_v30 = vadd.f32 %v5862_v7, %v5756_v24  ;;  %v5864_v19 = vpop.f32.mrb[142].mxu0  ;;  %v17066_v13 = vld [vmem:[#allocation19_spill] sm:$0xff] }
 0x40c   : > { %v3443_v23 = vadd.f32 %v3433_v18, %v3326_v52  ;;  %6227 = vmatpush1.bf16.msra.mxu1 %v15312_v17  ;;  %v3435_v45 = vpop.f32.mrb[78].mxu1  ;;  %v5865_v43 = vpop.f32.mrb[143].mxu0  ;;  %v5998_v17 = vrot.slane %v5989_v49, %v15575_v9 }
 0x40d   : > { %v3436_v33 = vpop.f32.mrb[79].mxu1  ;;  %6330 = vmatprep.subr.bf16.mxu1 %v15319_v58 }
 0x40f   : > { %11670 = vmatmul.mubr.msk.bf16.vlgmr.msra.gmra.mrb[132].mxu1 %vm469_vm3, %v15436_v61 }
 0x410   : > { %6331 = vmatpush1.bf16.msra.mxu1 %v17058_v8  ;;  %6262 = vmatprep.mubr.bf16.mxu1 %v17036_v59  ;;  %v6273_v8 = vld [vmem:[#allocation3 + $0x18] sm:$0x3f] }
 0x411   : > { %6332 = vmatprep.subr.bf16.mxu1 %v17059_v48  ;;  %v5966_v54 = vpop.f32.mrb[108].mxu0 }
 0x412   : > { %v6001_v25 = vadd.f32 %v5994_v22, %v5966_v54  ;;  %v5968_v42 = vpop.f32.mrb[109].mxu0 }
 0x413   : > { %v6002_v32 = vadd.f32 %v5998_v17, %v5968_v42  ;;  %v5970_v58 = vpop.f32.mrb[110].mxu0 }
 0x414   : > { %6333 = vmatpush1.bf16.msra.mxu1 %v17060_v35  ;;  %v6007_v4 = vmax.f32 %v6001_v25, 0.0  ;;  %v6003_v61 = vadd.f32 %v5994_v22, %v5970_v58  ;;  %v5972_v37 = vpop.f32.mrb[111].mxu0  ;;  %v17071_v35 = vld [vmem:[#allocation23_spill] sm:$0xff] }
 0x415   : > { %6334 = vmatprep.subr.bf16.mxu1 %v17061_v14  ;;  %v6008_v28 = vmax.f32 %v6002_v32, 0.0  ;;  %v6004_v1 = vadd.f32 %v5998_v17, %v5972_v37  ;;  %v17072_v14 = vld [vmem:[#allocation24_spill] sm:$0xff] }
 0x416   : > { %v6013_v63 = vmul.f32 %v6007_v4, %v17062_v39  ;;  %v6009_v2 = vmax.f32 %v6003_v61, 0.0  ;;  %v3795_v61 = vld [vmem:[%s16972_s8] sm:$0x3] }
 0x417   : > { %11671 = vmatmul.mubr.msk.bf16.gmra.mrb[140].mxu1 %vm469_vm3, %v6063_v16  ;;  %v6014_v3 = vmul.f32 %v6008_v28, %v17062_v39  ;;  %v6010_v44 = vmax.f32 %v6004_v1, 0.0  ;;  %v3800_v16 = vrot.slane %v3795_v61, %v15569_v50  ;;  %v17073_v28 = vld [vmem:[#allocation25_spill] sm:$0xff]  ;;  %v3804_v1 = vrot.slane %v3795_v61, %v15575_v9 }
 0x418   : > { %6335 = vmatpush1.bf16.msra.mxu1 %v17063_v15  ;;  %6362 = vmatprep.mubr.bf16.mxu1 %v17036_v59  ;;  %v6025_v12 = vrot.slane %v6013_v63, 1  ;;  %v6015_v31 = vmul.f32 %v6009_v2, %v17064_v36  ;;  %v17074_v63 = vld [vmem:[#allocation26_spill] sm:$0xff] }
 0x419   : > { %6336 = vmatprep.subr.bf16.mxu1 %v17065_v53  ;;  %v6026_v55 = vrot.slane %v6014_v3, 1  ;;  %v6016_v24 = vmul.f32 %v6010_v44, %v17064_v36  ;;  %v5976_v52 = vpop.f32.mrb[144].mxu0  ;;  %v6389_v3 = vld [vmem:[#allocation3 + $0x5f] sm:$0x3f] }
 0x41a   : > { %v3548_v46 = vpop.f32.mrb[80].mxu1  ;;  %6043 = vst [vmem:[#allocation4 + $0x90] sm:$0x80] %v6025_v12  ;;  %v6027_v6 = vrot.slane %v6015_v31, 1  ;;  %v5987_v34 = vadd.f32 %v5976_v52, %v5871_v5  ;;  %v5978_v20 = vpop.f32.mrb[145].mxu0  ;;  %v17075_v31 = vld [vmem:[#allocation27_spill] sm:$0xff] }
 0x41b   : > { %v3559_v60 = vadd.f32 %v3548_v46, %v3442_v57  ;;  %v3550_v51 = vpop.f32.mrb[81].mxu1  ;;  %6044 = vst.msk [vmem:[#allocation4 + $0x98] sm:$0x80] %vm3851_vm5, %v6026_v55  ;;  %v6029_v27 = vrot.slane %v6016_v24, 1  ;;  %v5988_v47 = vadd.f32 %v5978_v20, %v5872_v30  ;;  %v5980_v18 = vpop.f32.mrb[146].mxu0  ;;  %v17076_v52 = vld [vmem:[#allocation28_spill] sm:$0xff]  ;;  %v6399_v46 = vpack.c.bf16 %v6389_v3, %v6389_v3 }
 0x41c   : > { %v3560_v40 = vadd.f32 %v3550_v51, %v3443_v23  ;;  %6337 = vmatpush1.bf16.msra.mxu1 %v17066_v13  ;;  %v3552_v7 = vpop.f32.mrb[82].mxu1  ;;  %v6028_v45 = vsel %vm3831_vm6, %v6025_v12, %v6027_v6  ;;  %v6005_v19 = vadd.f32 %v5994_v22, %v5987_v34  ;;  %v5981_v33 = vpop.f32.mrb[147].mxu0  ;;  %v17067_v23 = vld [vmem:[#allocation14_spill] sm:$0xff]  ;;  %v17077_v13 = vld [vmem:[#allocation29_spill] sm:$0xff] }
 0x41d   : > { %v3553_v49 = vpop.f32.mrb[83].mxu1  ;;  %6446 = vmatprep.subr.bf16.mxu1 %v15371_v21  ;;  %6045 = vst [vmem:[#allocation4 + $0xa0] sm:$0xff] %v6028_v45  ;;  %v6030_v5 = vsel %vm3831_vm6, %v6026_v55, %v6029_v27  ;;  %v6006_v57 = vadd.f32 %v5998_v17, %v5988_v47  ;;  %v13421_v7 = vld [vmem:[%s16971_s7 + $0x144] ss:$8 sps:$4 sm:$0xff]   ;;  %v13431_v3 = vld [vmem:[%s16971_s7 + $0x180] ss:$8 sps:$4 sm:$0xff]  }
 0x41e   : > { %6046 = vst.msk [vmem:[#allocation4 + $0xa8] sm:$0xff] %vm469_vm3, %v6030_v5  ;;  %v6011_v43 = vmax.f32 %v6005_v19, 0.0 }
 0x41f   : > { %11688 = vmatmul.mubr.msk.bf16.vlgmr.msra.gmra.mrb[132].mxu1 %vm469_vm3, %v15496_v11  ;;  %v6012_v30 = vmax.f32 %v6006_v57, 0.0  ;;  %v17068_v11 = vld [vmem:[#allocation20_spill] sm:$0xff] }
 0x420   : > { %6447 = vmatpush1.bf16.msra.mxu1 %v15377_v62  ;;  %6372 = vmatprep.mubr.bf16.mxu1 %v17036_v59  ;;  %v6017_v22 = vmul.f32 %v6011_v43, %v17067_v23  ;;  %v6283_v62 = vpack.c.bf16 %v6273_v8, %v6273_v8  ;;  %v17078_v43 = vld [vmem:[#allocation30_spill] sm:$0xff] }
 0x421   : > { %6448 = vmatprep.subr.bf16.mxu1 %v15385_v41  ;;  %v6018_v21 = vmul.f32 %v6012_v30, %v17067_v23  ;;  %v17069_v41 = vld [vmem:[#allocation21_spill] sm:$0xff] }
 0x422   : > { %v6031_v48 = vrot.slane %v6017_v22, 1  ;;  %v13419_v22 = vld [vmem:[%s16971_s7 + $0x140] ss:$8 sps:$4 sm:$0xff]  }
 0x423   : > { %v6033_v17 = vrot.slane %v6018_v21, 1 }
 0x424   : > { %6449 = vmatpush1.bf16.msra.mxu1 %v15394_v38  ;;  %v6032_v54 = vsel %vm3831_vm6, %v6027_v6, %v6031_v48  ;;  %6049 = vst [vmem:[#allocation4 + $0xc0] sm:$0x1f] %v6031_v48  ;;  %v17070_v38 = vld [vmem:[#allocation22_spill] sm:$0xff] }
 0x425   : > { %6450 = vmatprep.subr.bf16.mxu1 %v17068_v11  ;;  %6047 = vst [vmem:[#allocation4 + $0xb0] sm:$0xff] %v6032_v54  ;;  %v6034_v56 = vsel %vm3831_vm6, %v6029_v27, %v6033_v17  ;;  %6050 = vst.msk [vmem:[#allocation4 + $0xc8] sm:$0x1f] %vm3858_vm7, %v6033_v17  ;;  %v13424_v17 = vld [vmem:[%s16971_s7 + $0x154] ss:$8 sps:$4 sm:$0xff]  }
 0x426   : > { %6048 = vst.msk [vmem:[#allocation4 + $0xb8] sm:$0xff] %vm469_vm3, %v6034_v56 }
 0x427   : > { %11689 = vmatmul.mubr.msk.bf16.gmra.mrb[144].mxu1 %vm469_vm3, %v6283_v62 }
 0x428   : > { %6451 = vmatpush1.bf16.msra.mxu1 %v17069_v41  ;;  %6478 = vmatprep.mubr.bf16.mxu1 %v17036_v59  ;;  %v13422_v41 = vld [vmem:[%s16971_s7 + $0x150] ss:$8 sps:$4 sm:$0xff]  }
 0x429   : > { %6452 = vmatprep.subr.bf16.mxu1 %v17070_v38 }
 0x42a   : > { %v3665_v25 = vpop.f32.mrb[84].mxu1 }
 0x42b   : > { %v3676_v42 = vadd.f32 %v3665_v25, %v3559_v60  ;;  %v3667_v32 = vpop.f32.mrb[85].mxu1  ;;  %v13427_v25 = vld [vmem:[%s16971_s7 + $0x164] ss:$8 sps:$4 sm:$0xff]  }
 0x42c   : > { %v3677_v58 = vadd.f32 %v3667_v32, %v3560_v40  ;;  %6453 = vmatpush1.bf16.msra.mxu1 %v17071_v35  ;;  %v3669_v4 = vpop.f32.mrb[86].mxu1  ;;  %v6505_v32 = vld [vmem:[#allocation3 + $0x83] sm:$0x3f] }
 0x42d   : > { %v3670_v37 = vpop.f32.mrb[87].mxu1  ;;  %6562 = vmatprep.subr.bf16.mxu1 %v17072_v14  ;;  %v13425_v35 = vld [vmem:[%s16971_s7 + $0x160] ss:$8 sps:$4 sm:$0xff]   ;;  %v6515_v61 = vpack.c.bf16 %v6505_v32, %v6505_v32 }
 0x42e   : > { %v13430_v37 = vld [vmem:[%s16971_s7 + $0x174] ss:$8 sps:$4 sm:$0xff]   ;;  %v13461_v32 = vld [vmem:[%s16971_s7 + $0x220] ss:$8 sps:$4 sm:$0xff]  }
 0x42f   : > { %11706 = vmatmul.mubr.msk.bf16.vlgmr.msra.gmra.mrb[132].mxu1 %vm469_vm3, %v15513_v0 }
 0x430   : > { %6563 = vmatpush1.bf16.msra.mxu1 %v17073_v28  ;;  %6488 = vmatprep.mubr.bf16.mxu1 %v17036_v59  ;;  %v13433_v28 = vld [vmem:[%s16971_s7 + $0x184] ss:$8 sps:$4 sm:$0xff]  }
 0x431   : > { %6564 = vmatprep.subr.bf16.mxu1 %v17074_v63 }
 0x432   : > { %v3772_v2 = vpop.f32.mrb[52].mxu1 }
 0x433   : > { %v3807_v44 = vadd.f32 %v3800_v16, %v3772_v2  ;;  %v3774_v15 = vpop.f32.mrb[53].mxu1 }
 0x434   : > { %v3808_v12 = vadd.f32 %v3804_v1, %v3774_v15  ;;  %6565 = vmatpush1.bf16.msra.mxu1 %v17075_v31  ;;  %v3776_v53 = vpop.f32.mrb[54].mxu1  ;;  %v13436_v15 = vld [vmem:[%s16971_s7 + $0x194] ss:$8 sps:$4 sm:$0xff]   ;;  %v13439_v31 = vld [vmem:[%s16971_s7 + $0x1a4] ss:$8 sps:$4 sm:$0xff]  }
 0x435   : > { %v3813_v55 = vmax.f32 %v3807_v44, 0.0  ;;  %v3809_v0 = vadd.f32 %v3800_v16, %v3776_v53  ;;  %v3778_v24 = vpop.f32.mrb[55].mxu1  ;;  %6566 = vmatprep.subr.bf16.mxu1 %v17076_v52  ;;  %v6621_v53 = vld [vmem:[#allocation3 + $0x60] sm:$0x3f] }
 0x436   : > { %v3814_v6 = vmax.f32 %v3808_v12, 0.0  ;;  %v3810_v34 = vadd.f32 %v3804_v1, %v3778_v24  ;;  %v13434_v12 = vld [vmem:[%s16971_s7 + $0x190] ss:$8 sps:$4 sm:$0xff]   ;;  %v13445_v52 = vld [vmem:[%s16971_s7 + $0x1c4] ss:$8 sps:$4 sm:$0xff]  }
 0x437   : > { %v3819_v60 = vmul.f32 %v3813_v55, %v17062_v39  ;;  %v3815_v20 = vmax.f32 %v3809_v0, 0.0  ;;  %11707 = vmatmul.mubr.msk.bf16.gmra.mrb[148].mxu1 %vm469_vm3, %v6399_v46  ;;  %v13437_v55 = vld [vmem:[%s16971_s7 + $0x1a0] ss:$8 sps:$4 sm:$0xff]   ;;  %v13442_v0 = vld [vmem:[%s16971_s7 + $0x1b4] ss:$8 sps:$4 sm:$0xff]  }
 0x438   : > { %v3820_v51 = vmul.f32 %v3814_v6, %v17062_v39  ;;  %v3816_v27 = vmax.f32 %v3810_v34, 0.0  ;;  %6567 = vmatpush1.bf16.msra.mxu1 %v15462_v26  ;;  %6594 = vmatprep.mubr.bf16.mxu1 %v17036_v59  ;;  %v13440_v24 = vld [vmem:[%s16971_s7 + $0x1b0] ss:$8 sps:$4 sm:$0xff]  }
 0x439   : > { %v3832_v47 = vrot.slane %v3819_v60, 1  ;;  %v3821_v40 = vmul.f32 %v3815_v20, %v17064_v36  ;;  %6568 = vmatprep.subr.bf16.mxu1 %v17077_v13  ;;  %v6735_v6 = vld [vmem:[#allocation3 + $0xd] sm:$0xff]  ;;  %v6736_v34 = vld [vmem:[#allocation3 + $0x15] sm:$0xff] }
 0x43a   : > { %v3833_v18 = vrot.slane %v3820_v51, 1  ;;  %v3822_v45 = vmul.f32 %v3816_v27, %v17064_v36  ;;  %v3782_v19 = vpop.f32.mrb[88].mxu1  ;;  %v6746_v13 = vpack.c.bf16 %v6736_v34, %v6735_v6 }
 0x43b   : > { %3850 = vst [vmem:[#allocation4] sm:$0x80] %v3832_v47  ;;  %v3834_v49 = vrot.slane %v3821_v40, 1  ;;  %v3793_v33 = vadd.f32 %v3782_v19, %v3676_v42  ;;  %v3784_v5 = vpop.f32.mrb[89].mxu1  ;;  %v13451_v19 = vld [vmem:[%s16971_s7 + $0x1e4] ss:$8 sps:$4 sm:$0xff]  }
 0x43c   : > { %3852 = vst.msk [vmem:[#allocation4 + $0x8] sm:$0x80] %vm3851_vm5, %v3833_v18  ;;  %v3836_v26 = vrot.slane %v3822_v45, 1  ;;  %v3794_v57 = vadd.f32 %v3784_v5, %v3677_v58  ;;  %6569 = vmatpush1.bf16.msra.mxu1 %v17078_v43  ;;  %v3786_v30 = vpop.f32.mrb[90].mxu1  ;;  %v6737_v45 = vld [vmem:[#allocation3 + $0x1d] sm:$0x3f] }
 0x43d   : > { %v3835_v21 = vsel %vm3831_vm6, %v3832_v47, %v3834_v49  ;;  %v3811_v8 = vadd.f32 %v3800_v16, %v3793_v33  ;;  %v3787_v48 = vpop.f32.mrb[91].mxu1  ;;  %6678 = vmatprep.subr.bf16.mxu1 %v13421_v7  ;;  %v13428_v16 = vld [vmem:[%s16971_s7 + $0x170] ss:$8 sps:$4 sm:$0xff]   ;;  %v13443_v47 = vld [vmem:[%s16971_s7 + $0x1c0] ss:$8 sps:$4 sm:$0xff]  }
 0x43e   : > { %3853 = vst [vmem:[#allocation4 + $0x10] sm:$0xff] %v3835_v21  ;;  %v3837_v54 = vsel %vm3831_vm6, %v3833_v18, %v3836_v26  ;;  %v3812_v11 = vadd.f32 %v3804_v1, %v3794_v57  ;;  %v13448_v7 = vld [vmem:[%s16971_s7 + $0x1d4] ss:$8 sps:$4 sm:$0xff]   ;;  %v13446_v18 = vld [vmem:[%s16971_s7 + $0x1d0] ss:$8 sps:$4 sm:$0xff]  }
 0x43f   : > { %3854 = vst.msk [vmem:[#allocation4 + $0x18] sm:$0xff] %vm469_vm3, %v3837_v54  ;;  %v3817_v62 = vmax.f32 %v3811_v8, 0.0  ;;  %11724 = vmatmul.mubr.msk.bf16.vlgmr.msra.gmra.mrb[132].mxu1 %vm469_vm3, %v15528_v10  ;;  %v13449_v33 = vld [vmem:[%s16971_s7 + $0x1e0] ss:$8 sps:$4 sm:$0xff]   ;;  %v13454_v5 = vld [vmem:[%s16971_s7 + $0x1f4] ss:$8 sps:$4 sm:$0xff]  }
 0x440   : > { %v3818_v56 = vmax.f32 %v3812_v11, 0.0  ;;  %6679 = vmatpush1.bf16.msra.mxu1 %v13419_v22  ;;  %6604 = vmatprep.mubr.bf16.mxu1 %v17036_v59  ;;  %v13457_v57 = vld [vmem:[%s16971_s7 + $0x204] ss:$8 sps:$4 sm:$0xff]   ;;  %v6851_v30 = vld [vmem:[#allocation3 + $0x31] sm:$0xff]  ;;  %v6852_v22 = vld [vmem:[#allocation3 + $0x39] sm:$0xff] }
 0x441   : > { %v3823_v38 = vmul.f32 %v3817_v62, %v17067_v23  ;;  %6680 = vmatprep.subr.bf16.mxu1 %v13424_v17  ;;  %v13455_v54 = vld [vmem:[%s16971_s7 + $0x200] ss:$8 sps:$4 sm:$0xff]   ;;  %v6862_v62 = vpack.c.bf16 %v6852_v22, %v6851_v30 }
 0x442   : > { %v3824_v42 = vmul.f32 %v3818_v56, %v17067_v23  ;;  %v13460_v56 = vld [vmem:[%s16971_s7 + $0x214] ss:$8 sps:$4 sm:$0xff]  }
 0x443   : > { %v3838_v58 = vrot.slane %v3823_v38, 1  ;;  %v6853_v38 = vld [vmem:[#allocation3 + $0x41] sm:$0x3f] }
 0x444   : > { %v3840_v10 = vrot.slane %v3824_v42, 1  ;;  %6681 = vmatpush1.bf16.msra.mxu1 %v13422_v41  ;;  %v13458_v41 = vld [vmem:[%s16971_s7 + $0x210] ss:$8 sps:$4 sm:$0xff]   ;;  %v6863_v42 = vpack.c.bf16 %v6853_v38, %v6853_v38 }
 0x445   : > { %v3839_v4 = vsel %vm3831_vm6, %v3834_v49, %v3838_v58  ;;  %3857 = vst [vmem:[#allocation4 + $0x30] sm:$0x1f] %v3838_v58  ;;  %6682 = vmatprep.subr.bf16.mxu1 %v13427_v25  ;;  %v6747_v49 = vpack.c.bf16 %v6737_v45, %v6737_v45  ;;  %v13463_v25 = vld [vmem:[%s16971_s7 + $0x224] ss:$8 sps:$4 sm:$0xff]   ;;  %v13466_v58 = vld [vmem:[%s16971_s7 + $0x234] ss:$8 sps:$4 sm:$0xff]  }
 0x446   : > { %3855 = vst [vmem:[#allocation4 + $0x20] sm:$0xff] %v3839_v4  ;;  %v3841_v14 = vsel %vm3831_vm6, %v3836_v26, %v3840_v10  ;;  %3859 = vst.msk [vmem:[#allocation4 + $0x38] sm:$0x1f] %vm3858_vm7, %v3840_v10  ;;  %v13452_v26 = vld [vmem:[%s16971_s7 + $0x1f0] ss:$8 sps:$4 sm:$0xff]  }
 0x447   : > { %3856 = vst.msk [vmem:[#allocation4 + $0x28] sm:$0xff] %vm469_vm3, %v3841_v14  ;;  %11725 = vmatmul.mubr.msk.bf16.gmra.mrb[152].mxu1 %vm469_vm3, %v6515_v61  ;;  %v13464_v10 = vld [vmem:[%s16971_s7 + $0x230] ss:$8 sps:$4 sm:$0xff]  }
 0x448   : > { %6683 = vmatpush1.bf16.msra.mxu1 %v13425_v35  ;;  %6710 = vmatprep.mubr.bf16.mxu1 %v17036_v59  ;;  %v6967_v4 = vld [vmem:[#allocation3 + $0xe] sm:$0xff]  ;;  %v6968_v61 = vld [vmem:[#allocation3 + $0x16] sm:$0xff] }
 0x449   : > { %6684 = vmatprep.subr.bf16.mxu1 %v13430_v37 }
 0x44a   : > { %v3976_v1 = vpop.f32.mrb[96].mxu1 }
 0x44b   : > { %v3978_v63 = vpop.f32.mrb[97].mxu1 }
 0x44c   : > { %6685 = vmatpush1.bf16.msra.mxu1 %v13428_v16  ;;  %v3980_v2 = vpop.f32.mrb[98].mxu1 }
 0x44d   : > { %v3981_v44 = vpop.f32.mrb[99].mxu1  ;;  %6794 = vmatprep.subr.bf16.mxu1 %v13433_v28  ;;  %v6969_v2 = vld [vmem:[#allocation3 + $0x1e] sm:$0x3f] }
 0x44f   : > { %11742 = vmatmul.mubr.msk.bf16.vlgmr.msra.gmra.mrb[132].mxu1 %vm469_vm3, %v15543_v29  ;;  %v6631_v29 = vpack.c.bf16 %v6621_v53, %v6621_v53 }
 0x450   : > { %6795 = vmatpush1.bf16.msra.mxu1 %v13431_v3  ;;  %6720 = vmatprep.mubr.bf16.mxu1 %v17036_v59  ;;  %v6979_v3 = vpack.c.bf16 %v6969_v2, %v6969_v2 }
 0x451   : > { %6796 = vmatprep.subr.bf16.mxu1 %v13436_v15 }
 0x454   : > { %6797 = vmatpush1.bf16.msra.mxu1 %v13434_v12 }
 0x455   : > { %6798 = vmatprep.subr.bf16.mxu1 %v13439_v31 }
 0x457   : > { %11743 = vmatmul.mubr.msk.bf16.gmra.mrb[156].mxu1 %vm469_vm3, %v6631_v29 }
 0x458   : > { %6799 = vmatpush1.bf16.msra.mxu1 %v13437_v55  ;;  %6826 = vmatprep.mubr.bf16.mxu1 %v17036_v59 }
 0x459   : > { %6800 = vmatprep.subr.bf16.mxu1 %v13442_v0 }
 0x45a   : > { %v4073_v46 = vpop.f32.mrb[100].mxu1 }
 0x45b   : > { %v4074_v60 = vadd.f32 %v4073_v46, %v3976_v1  ;;  %v4075_v20 = vpop.f32.mrb[101].mxu1 }
 0x45c   : > { %v4076_v51 = vadd.f32 %v4075_v20, %v3978_v63  ;;  %6801 = vmatpush1.bf16.msra.mxu1 %v13440_v24  ;;  %v4077_v27 = vpop.f32.mrb[102].mxu1  ;;  %v6978_v63 = vpack.c.bf16 %v6968_v61, %v6967_v4 }
 0x45d   : > { %v4078_v40 = vpop.f32.mrb[103].mxu1  ;;  %6910 = vmatprep.subr.bf16.mxu1 %v13445_v52 }
 0x45f   : > { %11760 = vmatmul.mubr.msk.bf16.vlgmr.msra.gmra.mrb[132].mxu1 %vm469_vm3, %v6746_v13 }
 0x460   : > { %6911 = vmatpush1.bf16.msra.mxu1 %v13443_v47  ;;  %6836 = vmatprep.mubr.bf16.mxu1 %v17036_v59 }
 0x461   : > { %6912 = vmatprep.subr.bf16.mxu1 %v13448_v7 }
 0x464   : > { %6913 = vmatpush1.bf16.msra.mxu1 %v13446_v18 }
 0x465   : > { %6914 = vmatprep.subr.bf16.mxu1 %v13451_v19  ;;  %v4892_v19 = vld [vmem:[%s16972_s8] sm:$0x3] }
 0x467   : > { %11761 = vmatmul.mubr.msk.bf16.gmra.mrb[160].mxu1 %vm469_vm3, %v6747_v49 }
 0x468   : > { %6915 = vmatpush1.bf16.msra.mxu1 %v13449_v33  ;;  %6942 = vmatprep.mubr.bf16.mxu1 %v17036_v59  ;;  %v4897_v33 = vrot.slane %v4892_v19, %v15569_v50 }
 0x469   : > { %6916 = vmatprep.subr.bf16.mxu1 %v13454_v5  ;;  %v4901_v5 = vrot.slane %v4892_v19, %v15575_v9  ;;  %v13478_v19 = vld [vmem:[%s16973_s9 + $0x34] ss:$8 sps:$4 sm:$0xff]  }
 0x46a   : > { %v4183_v43 = vpop.f32.mrb[104].mxu1 }
 0x46b   : > { %v4194_v21 = vadd.f32 %v4183_v43, %v4074_v60  ;;  %v4185_v8 = vpop.f32.mrb[105].mxu1 }
 0x46c   : > { %v4195_v48 = vadd.f32 %v4185_v8, %v4076_v51  ;;  %6917 = vmatpush1.bf16.msra.mxu1 %v13452_v26  ;;  %v4187_v17 = vpop.f32.mrb[106].mxu1 }
 0x46d   : > { %v4188_v11 = vpop.f32.mrb[107].mxu1  ;;  %7026 = vmatprep.subr.bf16.mxu1 %v13457_v57 }
 0x46f   : > { %11778 = vmatmul.mubr.msk.bf16.vlgmr.msra.gmra.mrb[132].mxu1 %vm469_vm3, %v6862_v62 }
 0x470   : > { %7027 = vmatpush1.bf16.msra.mxu1 %v13455_v54  ;;  %6952 = vmatprep.mubr.bf16.mxu1 %v17036_v59 }
 0x471   : > { %7028 = vmatprep.subr.bf16.mxu1 %v13460_v56 }
 0x474   : > { %7029 = vmatpush1.bf16.msra.mxu1 %v13458_v41 }
 0x475   : > { %7030 = vmatprep.subr.bf16.mxu1 %v13463_v25 }
 0x477   : > { %11779 = vmatmul.mubr.msk.bf16.gmra.mrb[164].mxu1 %vm469_vm3, %v6863_v42 }
 0x478   : > { %7031 = vmatpush1.bf16.msra.mxu1 %v13461_v32  ;;  %7058 = vmatprep.mubr.bf16.mxu1 %v17036_v59 }
 0x479   : > { %7032 = vmatprep.subr.bf16.mxu1 %v13466_v58 }
 0x47a   : > { %v4299_v35 = vpop.f32.mrb[108].mxu1 }
 0x47b   : > { %v4310_v37 = vadd.f32 %v4299_v35, %v4194_v21  ;;  %v4301_v14 = vpop.f32.mrb[109].mxu1 }
 0x47c   : > { %v4311_v16 = vadd.f32 %v4301_v14, %v4195_v48  ;;  %7033 = vmatpush1.bf16.msra.mxu1 %v13464_v10  ;;  %v4303_v28 = vpop.f32.mrb[110].mxu1 }
 0x47d   : > { %v4304_v1 = vpop.f32.mrb[111].mxu1  ;;  %8138 = vmatprep.subr.bf16.mxu1 %v17036_v59 }
 0x47f   : > { %11796 = vmatmul.mubr.msk.bf16.vlgmr.msra.gmra.mrb[132].mxu1 %vm469_vm3, %v6978_v63 }
 0x480   : > { %7068 = vmatprep.mubr.bf16.mxu1 %v17036_v59 }
 0x487   : > { %11797 = vmatmul.mubr.msk.bf16.gmra.mrb[168].mxu1 %vm469_vm3, %v6979_v3 }
 0x48a   : > { %v4415_v44 = vpop.f32.mrb[112].mxu1 }
 0x48b   : > { %v4426_v15 = vadd.f32 %v4415_v44, %v4310_v37  ;;  %v4417_v12 = vpop.f32.mrb[113].mxu1 }
 0x48c   : > { %v4427_v31 = vadd.f32 %v4417_v12, %v4311_v16  ;;  %v4419_v53 = vpop.f32.mrb[114].mxu1 }
 0x48d   : > { %v4420_v55 = vpop.f32.mrb[115].mxu1 }
 0x49a   : > { %v4531_v29 = vpop.f32.mrb[116].mxu1 }
 0x49b   : > { %v4542_v0 = vadd.f32 %v4531_v29, %v4426_v15  ;;  %v4533_v24 = vpop.f32.mrb[117].mxu1 }
 0x49c   : > { %v4543_v52 = vadd.f32 %v4533_v24, %v4427_v31  ;;  %v4535_v46 = vpop.f32.mrb[118].mxu1 }
 0x49d   : > { %v4536_v6 = vpop.f32.mrb[119].mxu1 }
 0x4aa   : > { %v4647_v34 = vpop.f32.mrb[120].mxu1 }
 0x4ab   : > { %v4658_v60 = vadd.f32 %v4647_v34, %v4542_v0  ;;  %v4649_v20 = vpop.f32.mrb[121].mxu1 }
 0x4ac   : > { %v4659_v51 = vadd.f32 %v4649_v20, %v4543_v52  ;;  %v4651_v27 = vpop.f32.mrb[122].mxu1 }
 0x4ad   : > { %v4652_v47 = vpop.f32.mrb[123].mxu1 }
 0x4ae   : > { %v13469_v47 = vld [vmem:[%s16973_s9 + $0x4] ss:$8 sps:$4 sm:$0xff]  }
 0x4af   : > { %7693 = vmatprep.subr.bf16.mxu0 %v13469_v47  ;;  %v13511_v47 = vld [vmem:[%s16974_s10 + $0x40] sm:$0xff]  }
 0x4ba   : > { %v4763_v40 = vpop.f32.mrb[124].mxu1 }
 0x4bb   : > { %v4774_v13 = vadd.f32 %v4763_v40, %v4658_v60  ;;  %v4765_v7 = vpop.f32.mrb[125].mxu1  ;;  %v13467_v40 = vld [vmem:[%s16973_s9] ss:$8 sps:$4 sm:$0xff]  }
 0x4bc   : > { %v4775_v18 = vadd.f32 %v4765_v7, %v4659_v51  ;;  %v4767_v45 = vpop.f32.mrb[126].mxu1  ;;  %7694 = vmatpush1.bf16.msra.mxu0 %v13467_v40  ;;  %v13470_v7 = vld [vmem:[%s16973_s9 + $0x10] ss:$8 sps:$4 sm:$0xff]   ;;  %v13512_v40 = vld [vmem:[%s16974_s10 + $0x48] sm:$0xff]  }
 0x4bd   : > { %v4768_v49 = vpop.f32.mrb[127].mxu1  ;;  %v13473_v45 = vld [vmem:[%s16973_s9 + $0x20] ss:$8 sps:$4 sm:$0xff]  }
 0x4be   : > { %v13476_v49 = vld [vmem:[%s16973_s9 + $0x30] ss:$8 sps:$4 sm:$0xff]  }
 0x4c2   : > { %v4869_v26 = vpop.f32.mrb[92].mxu1 }
 0x4c3   : > { %v4904_v57 = vadd.f32 %v4897_v33, %v4869_v26  ;;  %v4871_v43 = vpop.f32.mrb[93].mxu1  ;;  %v13491_v26 = vld [vmem:[%s16974_s10] sm:$0xff]  }
 0x4c4   : > { %v4905_v30 = vadd.f32 %v4901_v5, %v4871_v43  ;;  %v4873_v22 = vpop.f32.mrb[94].mxu1  ;;  %8139 = vmatpush1.bf16.msra.mxu1 %v13491_v26  ;;  %v13514_v26 = vld [vmem:[%s16974_s10 + $0x58] sm:$0xff]  }
 0x4c5   : > { %v4910_v21 = vmax.f32 %v4904_v57, 0.0  ;;  %v4906_v8 = vadd.f32 %v4897_v33, %v4873_v22  ;;  %v4875_v48 = vpop.f32.mrb[95].mxu1  ;;  %8140 = vmatprep.subr.bf16.mxu1 %v17036_v59 }
 0x4c6   : > { %v4911_v17 = vmax.f32 %v4905_v30, 0.0  ;;  %v4907_v54 = vadd.f32 %v4901_v5, %v4875_v48  ;;  %v13479_v48 = vld [vmem:[%s16973_s9 + $0x40] ss:$8 sps:$4 sm:$0xff]  }
 0x4c7   : > { %v4916_v11 = vmul.f32 %v4910_v21, %v17062_v39  ;;  %v4912_v62 = vmax.f32 %v4906_v8, 0.0  ;;  %v13495_v21 = vld [vmem:[%s16974_s10 + $0x8] sm:$0xff]  }
 0x4c8   : > { %v4917_v56 = vmul.f32 %v4911_v17, %v17062_v39  ;;  %v4913_v41 = vmax.f32 %v4907_v54, 0.0  ;;  %v13484_v17 = vld [vmem:[%s16973_s9 + $0x54] ss:$8 sps:$4 sm:$0xff]   ;;  %8141 = vmatpush1.bf16.msra.mxu1 %v13495_v21 }
 0x4c9   : > { %v4929_v38 = vrot.slane %v4916_v11, 5  ;;  %v4918_v25 = vmul.f32 %v4912_v62, %v17064_v36  ;;  %v13499_v54 = vld [vmem:[%s16974_s10 + $0x10] sm:$0xff]   ;;  %8142 = vmatprep.subr.bf16.mxu1 %v17036_v59  ;;  %v13487_v62 = vld [vmem:[%s16973_s9 + $0x64] ss:$8 sps:$4 sm:$0xff]  }
 0x4ca   : > { %v4930_v42 = vrot.slane %v4917_v56, 5  ;;  %v4919_v32 = vmul.f32 %v4913_v41, %v17064_v36  ;;  %v4879_v58 = vpop.f32.mrb[128].mxu1  ;;  %v13482_v11 = vld [vmem:[%s16973_s9 + $0x50] ss:$8 sps:$4 sm:$0xff]   ;;  %v13485_v41 = vld [vmem:[%s16973_s9 + $0x60] ss:$8 sps:$4 sm:$0xff]  }
 0x4cb   : > { %4947 = vst [vmem:[#allocation4 + $0x50] sm:$0xf8] %v4929_v38  ;;  %v4931_v10 = vrot.slane %v4918_v25, 5  ;;  %v4890_v35 = vadd.f32 %v4879_v58, %v4774_v13  ;;  %v4881_v4 = vpop.f32.mrb[129].mxu1  ;;  %v13472_v13 = vld [vmem:[%s16973_s9 + $0x14] ss:$8 sps:$4 sm:$0xff]  }
 0x4cc   : > { %4949 = vst.msk [vmem:[#allocation4 + $0x58] sm:$0xf8] %vm4948_vm8, %v4930_v42  ;;  %v4933_v61 = vrot.slane %v4919_v32, 5  ;;  %v4891_v37 = vadd.f32 %v4881_v4, %v4775_v18  ;;  %v4883_v14 = vpop.f32.mrb[130].mxu1  ;;  %7695 = vmatprep.subr.bf16.mxu0 %v13472_v13  ;;  %v13475_v18 = vld [vmem:[%s16973_s9 + $0x24] ss:$8 sps:$4 sm:$0xff]   ;;  %8143 = vmatpush1.bf16.msra.mxu1 %v13499_v54 }
 0x4cd   : > { %v15780_v16 = vsel %vm4928_vm9, %v4929_v38, %v4931_v10  ;;  %v4908_v28 = vadd.f32 %v4897_v33, %v4890_v35  ;;  %v4884_v1 = vpop.f32.mrb[131].mxu1  ;;  %7696 = vmatpush1.bf16.msra.mxu0 %v13470_v7  ;;  %v13503_v56 = vld [vmem:[%s16974_s10 + $0x18] sm:$0xff]   ;;  %8144 = vmatprep.subr.bf16.mxu1 %v17036_v59  ;;  %v13507_v25 = vld [vmem:[%s16974_s10 + $0x20] sm:$0xff]  }
 0x4ce   : > { %v4934_v63 = vsel %vm4928_vm9, %v4930_v42, %v4933_v61  ;;  %v4909_v2 = vadd.f32 %v4901_v5, %v4891_v37  ;;  %v7247_v29 = vrot.slane %v15780_v16, 6  ;;  %v7328_v52 = vrot.slane %v15780_v16, 7  ;;  %7697 = vmatprep.subr.bf16.mxu0 %v13475_v18  ;;  %v13481_v5 = vld [vmem:[%s16973_s9 + $0x44] ss:$8 sps:$4 sm:$0xff]   ;;  %v13490_v38 = vld [vmem:[%s16973_s9 + $0x74] ss:$8 sps:$4 sm:$0xff]  }
 0x4cf   : > { %4951 = vst.msk [vmem:[#allocation4 + $0x68] sm:$0xff] %vm469_vm3, %v4934_v63  ;;  %v4914_v3 = vmax.f32 %v4908_v28, 0.0  ;;  %v13488_v42 = vld [vmem:[%s16973_s9 + $0x70] ss:$8 sps:$4 sm:$0xff]   ;;  %v13494_v58 = vld [vmem:[%s16973_s9 + $0x84] ss:$8 sps:$4 sm:$0xff]  }
 0x4d0   : > { %v4915_v44 = vmax.f32 %v4909_v2, 0.0  ;;  %8145 = vmatpush1.bf16.msra.mxu1 %v13503_v56  ;;  %v13492_v14 = vld [vmem:[%s16973_s9 + $0x80] ss:$8 sps:$4 sm:$0xff]   ;;  %v13498_v28 = vld [vmem:[%s16973_s9 + $0x94] ss:$8 sps:$4 sm:$0xff]  }
 0x4d1   : > { %v4920_v15 = vmul.f32 %v4914_v3, %v17067_v23  ;;  %7698 = vmatpush1.bf16.msra.mxu0 %v13473_v45  ;;  %8146 = vmatprep.subr.bf16.mxu1 %v17036_v59  ;;  %v13496_v1 = vld [vmem:[%s16973_s9 + $0x90] ss:$8 sps:$4 sm:$0xff]   ;;  %v13502_v63 = vld [vmem:[%s16973_s9 + $0xa4] ss:$8 sps:$4 sm:$0xff]   ;;  %v13500_v2 = vld [vmem:[%s16973_s9 + $0xa0] ss:$8 sps:$4 sm:$0xff]  }
 0x4d2   : > { %v4921_v12 = vmul.f32 %v4915_v44, %v17067_v23  ;;  %7699 = vmatprep.subr.bf16.mxu0 %v13478_v19  ;;  %v13506_v3 = vld [vmem:[%s16973_s9 + $0xb4] ss:$8 sps:$4 sm:$0xff]   ;;  %v13504_v44 = vld [vmem:[%s16973_s9 + $0xb0] ss:$8 sps:$4 sm:$0xff]  }
 0x4d3   : > { %v4935_v31 = vrot.slane %v4920_v15, 5 }
 0x4d4   : > { %v4937_v53 = vrot.slane %v4921_v12, 5  ;;  %8147 = vmatpush1.bf16.msra.mxu1 %v13507_v25  ;;  %v15930_v25 = vrot.slane %v17062_v39, 4 }
 0x4d5   : > { %v15787_v55 = vsel %vm4928_vm9, %v4931_v10, %v4935_v31  ;;  %4954 = vst [vmem:[#allocation4 + $0x80] sm:$0x1] %v4935_v31  ;;  %7700 = vmatpush1.bf16.msra.mxu0 %v13476_v49  ;;  %8148 = vmatprep.subr.bf16.mxu1 %v17036_v59 }
 0x4d6   : > { %v4938_v0 = vsel %vm4928_vm9, %v4933_v61, %v4937_v53  ;;  %4956 = vst.msk [vmem:[#allocation4 + $0x88] sm:$0x1] %vm4955_vm10, %v4937_v53  ;;  %v17008_v24 = vrot.slane %v15787_v55, 6  ;;  %v17014_v46 = vrot.slane %v15787_v55, 7  ;;  %7701 = vmatprep.subr.bf16.mxu0 %v13481_v5  ;;  %v13508_v53 = vld [vmem:[%s16974_s10 + $0x28] sm:$0xff]   ;;  %v13642_v5 = vld [vmem:[#allocation4 + $0x40] sm:$0xff] }
 0x4d7   : > { %4953 = vst.msk [vmem:[#allocation4 + $0x78] sm:$0xff] %vm469_vm3, %v4938_v0 }
 0x4d8   : > { %v15801_v6 = vsel %vm1144_vm2, %v7247_v29, %v17008_v24  ;;  %v15808_v34 = vsel %vm1143_vm1, %v7328_v52, %v17014_v46  ;;  %8149 = vmatpush1.bf16.msra.mxu1 %v13508_v53  ;;  %534 = vst.msk [vmem:[#allocation5 + $0x48] sm:$0xf] %vm533_vm11, %v13642_v5  ;;  %539 = vst.msk [vmem:[#allocation6 + $0x20] sm:$0xf] %vm533_vm11, %v13642_v5 }
 0x4d9   : > { %7702 = vmatpush1.bf16.msra.mxu0 %v13479_v48  ;;  %8150 = vmatprep.subr.bf16.mxu1 %v17036_v59  ;;  %544 = vst.msk [vmem:[#allocation7 + $0x20] sm:$0xf] %vm533_vm11, %v13642_v5 }
 0x4da   : > { %v6167_v60 = vpop.f32.mrb[136].mxu1  ;;  %7703 = vmatprep.subr.bf16.mxu0 %v13484_v17 }
 0x4db   : > { %v6169_v20 = vpop.f32.mrb[137].mxu1 }
 0x4dc   : > { %v6171_v51 = vpop.f32.mrb[138].mxu1 }
 0x4dd   : > { %v6172_v27 = vpop.f32.mrb[139].mxu1  ;;  %7704 = vmatpush1.bf16.msra.mxu0 %v13482_v11  ;;  %v13509_v51 = vld [vmem:[%s16974_s10 + $0x30] sm:$0xff]  }
 0x4de   : > { %7705 = vmatprep.subr.bf16.mxu0 %v13487_v62  ;;  %8151 = vmatpush1.bf16.msra.mxu1 %v13509_v51  ;;  %v13510_v27 = vld [vmem:[%s16974_s10 + $0x38] sm:$0xff]   ;;  %v7146_v51 = vld [vmem:[#allocation4 + $0xd8] sm:$0xf0] }
 0x4df   : > { %8152 = vmatprep.subr.bf16.mxu1 %v17036_v59  ;;  %v16064_v24 = vld [vmem:[#allocation4 + $0x78] sm:$0xff] }
 0x4e1   : > { %7706 = vmatpush1.bf16.msra.mxu0 %v13485_v41  ;;  %v7153_v41 = vld [vmem:[#allocation4 + $0x90] sm:$0xfe] }
 0x4e2   : > { %7707 = vmatprep.subr.bf16.mxu0 %v13490_v38  ;;  %8153 = vmatpush1.bf16.msra.mxu1 %v13510_v27 }
 0x4e3   : > { %8154 = vmatprep.subr.bf16.mxu1 %v17036_v59 }
 0x4e5   : > { %7708 = vmatpush1.bf16.msra.mxu0 %v13488_v42  ;;  %v7390_v42 = vld [vmem:[#allocation4 + $0x90] sm:$0x80] }
 0x4e6   : > { %7709 = vmatprep.subr.bf16.mxu0 %v13494_v58  ;;  %8155 = vmatpush1.bf16.msra.mxu1 %v13511_v47  ;;  %v7393_v47 = vld [vmem:[#allocation4 + $0xb8] sm:$0xff] }
 0x4e7   : > { %8156 = vmatprep.subr.bf16.mxu1 %v17036_v59 }
 0x4e9   : > { %7710 = vmatpush1.bf16.msra.mxu0 %v13492_v14 }
 0x4ea   : > { %v6264_v33 = vpop.f32.mrb[140].mxu1  ;;  %7711 = vmatprep.subr.bf16.mxu0 %v13498_v28  ;;  %8157 = vmatpush1.bf16.msra.mxu1 %v13512_v40  ;;  %v7083_v28 = vld [vmem:[%s16972_s8] sm:$0x3] }
 0x4eb   : > { %v6265_v57 = vadd.f32 %v6264_v33, %v6167_v60  ;;  %v6266_v43 = vpop.f32.mrb[141].mxu1  ;;  %v13513_v33 = vld [vmem:[%s16974_s10 + $0x50] sm:$0xff]   ;;  %8158 = vmatprep.subr.bf16.mxu1 %v17036_v59 }
 0x4ec   : > { %v6267_v30 = vadd.f32 %v6266_v43, %v6169_v20  ;;  %v6268_v22 = vpop.f32.mrb[142].mxu1 }
 0x4ed   : > { %v6269_v8 = vpop.f32.mrb[143].mxu1  ;;  %7712 = vmatpush1.bf16.msra.mxu0 %v13496_v1  ;;  %v7156_v1 = vld [vmem:[#allocation4 + $0xa8] sm:$0xff] }
 0x4ee   : > { %7713 = vmatprep.subr.bf16.mxu0 %v13502_v63  ;;  %8159 = vmatpush1.bf16.msra.mxu1 %v13513_v33  ;;  %v7391_v63 = vld [vmem:[#allocation4 + $0x98] sm:$0x80]  ;;  %v7169_v27 = vrot.slane %v7156_v1, 5  ;;  %v7406_v40 = vrot.slane %v7156_v1, 3 }
 0x4ef   : > { %8160 = vmatprep.subr.bf16.mxu1 %v17036_v59  ;;  %v15933_v59 = vrot.slane %v17067_v23, 4  ;;  %v7405_v5 = vrot.slane %v7391_v63, 3 }
 0x4f1   : > { %7714 = vmatpush1.bf16.msra.mxu0 %v13500_v2  ;;  %17079 = vst [vmem:[#allocation11_spill] sm:$0xff] %v15933_v59  ;;  %v7145_v2 = vld [vmem:[#allocation4 + $0xd0] sm:$0xf0] }
 0x4f2   : > { %7715 = vmatprep.subr.bf16.mxu0 %v13506_v3  ;;  %8161 = vmatpush1.bf16.msra.mxu1 %v13514_v26 }
 0x4f5   : > { %7716 = vmatpush1.bf16.msra.mxu0 %v13504_v44  ;;  %v15943_v44 = vld [vmem:[#allocation4 + $0xb0] sm:$0x7f] }
 0x4fa   : > { %v6374_v32 = vpop.f32.mrb[144].mxu1 }
 0x4fb   : > { %v6385_v10 = vadd.f32 %v6374_v32, %v6265_v57  ;;  %v6376_v35 = vpop.f32.mrb[145].mxu1 }
 0x4fc   : > { %v6386_v4 = vadd.f32 %v6376_v35, %v6267_v30  ;;  %v6378_v61 = vpop.f32.mrb[146].mxu1  ;;  %v7155_v35 = vld [vmem:[#allocation4 + $0xa0] sm:$0xff] }
 0x4fd   : > { %v6379_v37 = vpop.f32.mrb[147].mxu1  ;;  %v17006_v61 = vrot.slane %v17064_v36, 4 }
 0x50a   : > { %v6490_v15 = vpop.f32.mrb[148].mxu1 }
 0x50b   : > { %v6501_v12 = vadd.f32 %v6490_v15, %v6385_v10  ;;  %v6492_v31 = vpop.f32.mrb[149].mxu1  ;;  %v7154_v10 = vld [vmem:[#allocation4 + $0x98] sm:$0xfe]  ;;  %v7392_v15 = vld [vmem:[#allocation4 + $0xb0] sm:$0xff] }
 0x50c   : > { %v6502_v0 = vadd.f32 %v6492_v31, %v6386_v4  ;;  %v6494_v60 = vpop.f32.mrb[150].mxu1  ;;  %v7165_v4 = vrot.slane %v7153_v41, 5  ;;  %v15947_v31 = vld [vmem:[#allocation4 + $0xb8] sm:$0x7f]  ;;  %v7166_v53 = vrot.slane %v7154_v10, 5 }
 0x50d   : > { %v6495_v20 = vpop.f32.mrb[151].mxu1  ;;  %v7403_v60 = vrot.slane %v7155_v35, 3  ;;  %v17011_v33 = vrot.slane %v15947_v31, 5 }
 0x50e   : > { %v15950_v20 = vrot.slane %v7083_v28, %v15569_v50  ;;  %v15964_v50 = vsel %vm7470_vm12, %v15930_v25, %v17006_v61  ;;  %v15966_v26 = vmax.f32 %v7145_v2, %v7165_v4  ;;  %v16006_v2 = vld [vmem:[#allocation4 + $0x30] sm:$0x1f] }
 0x50f   : > { %v16004_v63 = vsel %vm4928_vm9, %v7169_v27, %v17011_v33  ;;  %v7321_v33 = vld [vmem:[#allocation4 + $0x88] sm:$0x1] }
 0x51a   : > { %v6606_v13 = vpop.f32.mrb[152].mxu1 }
 0x51b   : > { %v6617_v7 = vadd.f32 %v6606_v13, %v6501_v12  ;;  %v6608_v18 = vpop.f32.mrb[153].mxu1  ;;  %v15945_v12 = vld [vmem:[#allocation4 + $0xc0] sm:$0x1f]  ;;  %v7402_v13 = vrot.slane %v7390_v42, 3  ;;  %v7272_v42 = vld [vmem:[#allocation4 + $0x8] sm:$0x80] }
 0x51c   : > { %v6618_v45 = vadd.f32 %v6608_v18, %v6502_v0  ;;  %v6610_v19 = vpop.f32.mrb[154].mxu1  ;;  %17080 = vst [vmem:[#allocation12_spill] sm:$0xff] %v15945_v12  ;;  %v7167_v0 = vrot.slane %v7155_v35, 5  ;;  %v17010_v18 = vrot.slane %v15943_v44, 5 }
 0x51d   : > { %v6611_v49 = vpop.f32.mrb[155].mxu1  ;;  %v7408_v19 = vrot.slane %v7392_v15, 3 }
 0x51e   : > { %v17005_v49 = vrot.slane %v15945_v12, 3  ;;  %v17081_v12 = vrot.slane %v16064_v24, 6 }
 0x51f   : > { %v15993_v10 = vsel %vm7287_vm13, %v7403_v60, %v7408_v19 }
 0x520   : > { %v15998_v35 = vsel %vm7287_vm13, %v7408_v19, %v17005_v49 }
 0x52a   : > { %v6722_v57 = vpop.f32.mrb[156].mxu1 }
 0x52b   : > { %v6733_v43 = vadd.f32 %v6722_v57, %v6617_v7  ;;  %v6724_v30 = vpop.f32.mrb[157].mxu1  ;;  %v15953_v7 = vrot.slane %v7083_v28, %v15575_v9  ;;  %v15969_v57 = vsel %vm4928_vm9, %v7165_v4, %v7167_v0  ;;  %v7271_v4 = vld [vmem:[#allocation4] sm:$0x80] }
 0x52c   : > { %v6734_v22 = vadd.f32 %v6724_v30, %v6618_v45  ;;  %v6726_v21 = vpop.f32.mrb[158].mxu1  ;;  %v15956_v45 = vld [vmem:[#allocation4 + $0xc8] sm:$0x1f]  ;;  %v7273_v30 = vld [vmem:[#allocation4 + $0x10] sm:$0xff] }
 0x52d   : > { %v6727_v8 = vpop.f32.mrb[159].mxu1  ;;  %v15974_v21 = vsel %vm7287_vm13, %v7402_v13, %v7403_v60  ;;  %v16014_v13 = vld [vmem:[#allocation4 + $0x38] sm:$0x1f] }
 0x53a   : > { %v6838_v48 = vpop.f32.mrb[160].mxu1 }
 0x53b   : > { %v6849_v17 = vadd.f32 %v6838_v48, %v6733_v43  ;;  %v6840_v54 = vpop.f32.mrb[161].mxu1  ;;  %v15971_v43 = vmax.f32 %v7146_v51, %v7166_v53 }
 0x53c   : > { %v6850_v11 = vadd.f32 %v6840_v54, %v6734_v22  ;;  %v6842_v62 = vpop.f32.mrb[162].mxu1  ;;  %v7410_v22 = vrot.slane %v7393_v47, 3  ;;  %v15980_v54 = vld [vmem:[#allocation4 + $0x18] sm:$0xff] }
 0x53d   : > { %v6843_v56 = vpop.f32.mrb[163].mxu1  ;;  %v17007_v62 = vrot.slane %v15956_v45, 3 }
 0x53e   : > { %v16011_v60 = vsel %vm7287_vm13, %v7406_v40, %v7410_v22 }
 0x54a   : > { %v6954_v38 = vpop.f32.mrb[164].mxu1 }
 0x54b   : > { %v15935_v32 = vadd.f32 %v6954_v38, %v6849_v17  ;;  %v6956_v58 = vpop.f32.mrb[165].mxu1  ;;  %v15978_v17 = vsel %vm4928_vm9, %v7166_v53, %v7169_v27  ;;  %v15990_v38 = vsel %vm4928_vm9, %v7167_v0, %v17010_v18  ;;  %v7292_v0 = vrot.slane %v15980_v54, 3 }
 0x54c   : > { %v15938_v37 = vadd.f32 %v6956_v58, %v6850_v11  ;;  %v6958_v14 = vpop.f32.mrb[166].mxu1  ;;  %v15983_v11 = vsel %vm7287_vm13, %v7405_v5, %v7406_v40  ;;  %v7275_v58 = vld [vmem:[#allocation4 + $0x20] sm:$0xff]  ;;  %v7288_v5 = vrot.slane %v7271_v4, 3  ;;  %v16021_v40 = vld [vmem:[#allocation4 + $0x50] sm:$0xfc] }
 0x54d   : > { %v6959_v3 = vpop.f32.mrb[167].mxu1  ;;  %v7294_v19 = vrot.slane %v7275_v58, 3 }
 0x54e   : > { %v7289_v3 = vrot.slane %v7273_v30, 3  ;;  %v7291_v30 = vrot.slane %v7272_v42, 3 }
 0x550   : > { %v16029_v58 = vsel %vm7287_vm13, %v7288_v5, %v7289_v3  ;;  %v16044_v5 = vld [vmem:[#allocation4 + $0x58] sm:$0xfc] }
 0x552   : > { %v7060_v9 = vpop.f32.mrb[132].mxu1 }
 0x553   : > { %v7095_v8 = vadd.f32 %v15950_v20, %v7060_v9  ;;  %v7062_v48 = vpop.f32.mrb[133].mxu1 }
 0x554   : > { %v7096_v56 = vadd.f32 %v15953_v7, %v7062_v48  ;;  %v7064_v41 = vpop.f32.mrb[134].mxu1  ;;  %v17009_v48 = vrot.slane %v16006_v2, 3 }
 0x555   : > { %v7101_v14 = vmax.f32 %v7095_v8, 0.0  ;;  %v7097_v28 = vadd.f32 %v15950_v20, %v7064_v41  ;;  %v7066_v1 = vpop.f32.mrb[135].mxu1  ;;  %v7276_v8 = vld [vmem:[#allocation4 + $0x28] sm:$0xff]  ;;  %v16026_v41 = vsel %vm7287_vm13, %v7410_v22, %v17007_v62  ;;  %v17013_v62 = vrot.slane %v16021_v40, 6 }
 0x556   : > { %v7102_v15 = vmax.f32 %v7096_v56, 0.0  ;;  %v7098_v53 = vadd.f32 %v15953_v7, %v7066_v1  ;;  %v16037_v1 = vsel %vm7287_vm13, %v7291_v30, %v7292_v0 }
 0x557   : > { %v7107_v51 = vmul.f32 %v7101_v14, %v17062_v39  ;;  %v7103_v47 = vmax.f32 %v7097_v28, 0.0  ;;  %v16034_v28 = vld [vmem:[#allocation4 + $0x68] sm:$0xff] }
 0x558   : > { %v7108_v27 = vmul.f32 %v7102_v15, %v17062_v39  ;;  %v7104_v9 = vmax.f32 %v7098_v53, 0.0  ;;  %v17012_v15 = vrot.slane %v16014_v13, 3  ;;  %v16040_v53 = vld [vmem:[#allocation4 + $0x50] sm:$0xf8]  ;;  %v7330_v18 = vrot.slane %v16034_v28, 7 }
 0x559   : > { %v7119_v56 = vrot.slane %v7107_v51, 5  ;;  %v16019_v54 = vmul.f32 %v7103_v47, %v17064_v36 }
 0x55a   : > { %v7120_v4 = vrot.slane %v7108_v27, 5  ;;  %v16032_v14 = vmul.f32 %v7104_v9, %v17064_v36  ;;  %v7070_v42 = vpop.f32.mrb[168].mxu1  ;;  %v16047_v27 = vsel %vm7287_vm13, %v7289_v3, %v7294_v19  ;;  %v7296_v9 = vrot.slane %v7276_v8, 3 }
 0x55b   : > { %7137 = vst [vmem:[#allocation4 + $0xe0] sm:$0xf8] %v7119_v56  ;;  %v7121_v22 = vrot.slane %v16019_v54, 5  ;;  %v7081_v51 = vadd.f32 %v7070_v42, %v15935_v32  ;;  %v7072_v47 = vpop.f32.mrb[169].mxu1  ;;  %v16056_v32 = vsel %vm7287_vm13, %v7294_v19, %v17009_v48  ;;  %v16058_v54 = vld [vmem:[#allocation4 + $0x58] sm:$0xf8] }
 0x55c   : > { %7138 = vst.msk [vmem:[#allocation4 + $0xe8] sm:$0xf8] %vm4948_vm8, %v7120_v4  ;;  %v7123_v30 = vrot.slane %v16032_v14, 5  ;;  %v7082_v49 = vadd.f32 %v7072_v47, %v15938_v37  ;;  %v7074_v61 = vpop.f32.mrb[170].mxu1  ;;  %v7249_v37 = vrot.slane %v16034_v28, 6  ;;  %v7246_v48 = vrot.slane %v16044_v5, 6 }
 0x55d   : > { %v16061_v3 = vsel %vm4928_vm9, %v7119_v56, %v7121_v22  ;;  %v7099_v8 = vadd.f32 %v15950_v20, %v7081_v51  ;;  %v7075_v42 = vpop.f32.mrb[171].mxu1  ;;  %v17015_v61 = vrot.slane %v16040_v53, 7  ;;  %v7320_v14 = vld [vmem:[#allocation4 + $0x80] sm:$0x1]  ;;  %v7192_v20 = vld [vmem:[#allocation4 + $0xd8] sm:$0xe0]  ;;  %v16074_v51 = vsel %vm7287_vm13, %v7292_v0, %v7296_v9 }
 0x55e   : > { %v7124_v47 = vsel %vm4928_vm9, %v7120_v4, %v7123_v30  ;;  %v7100_v19 = vadd.f32 %v15953_v7, %v7082_v49  ;;  %v16079_v42 = vsel %vm7287_vm13, %v7296_v9, %v17012_v15  ;;  %v17018_v4 = vrot.slane %v16058_v54, 7 }
 0x55f   : > { %7140 = vst.msk [vmem:[#allocation4 + $0xf8] sm:$0xff] %vm469_vm3, %v7124_v47  ;;  %v7105_v56 = vmax.f32 %v7099_v8, 0.0  ;;  %v7248_v49 = vsel %vm1144_vm2, %v17013_v62, %v7247_v29  ;;  %v7336_v5 = vrot.slane %v7320_v14, 7  ;;  %v16090_v8 = vsel %vm1144_vm2, %v7246_v48, %v7249_v37 }
 0x560   : > { %v7106_v7 = vmax.f32 %v7100_v19, 0.0  ;;  %v16097_v9 = vsel %vm1143_vm1, %v17015_v61, %v7328_v52  ;;  %v7334_v47 = vrot.slane %v16064_v24, 7  ;;  %v7206_v15 = vrot.slane %v7192_v20, 1 }
 0x561   : > { %v7111_v0 = vmul.f32 %v7105_v56, %v17067_v23  ;;  %v16104_v14 = vsel %vm1143_vm1, %v17018_v4, %v7330_v18  ;;  %v7338_v56 = vrot.slane %v7321_v33, 7  ;;  %v17019_v52 = vrot.slane %v16061_v3, 1 }
 0x562   : > { %v7112_v19 = vmul.f32 %v7106_v7, %v17067_v23  ;;  %v7147_v29 = vld [vmem:[#allocation4 + $0xe0] sm:$0xff]  ;;  %v16111_v7 = vsel %vm1144_vm2, %v7249_v37, %v17081_v12  ;;  %v17082_v4 = vrot.slane %v15787_v55, 7  ;;  %v7366_v12 = vrot.slane %v16061_v3, 6  ;;  %v7191_v37 = vld [vmem:[#allocation4 + $0xd0] sm:$0xe0] }
 0x563   : > { %v7125_v62 = vrot.slane %v7111_v0, 5  ;;  %v7148_v46 = vld [vmem:[#allocation4 + $0xe8] sm:$0xff]  ;;  %v7185_v16 = vmax.f32 %v7147_v29, %v15969_v57  ;;  %v7204_v28 = vrot.slane %v7147_v29, 1  ;;  %v16113_v20 = vld [vmem:[#allocation4 + $0xe0] sm:$0xfc]  ;;  %v16143_v36 = vsel %vm1143_vm1, %v7334_v47, %v7338_v56 }
 0x564   : > { %v7127_v61 = vrot.slane %v7112_v19, 5  ;;  %v7207_v39 = vrot.slane %v7148_v46, 1  ;;  %v16118_v33 = vsel %vm1143_vm1, %v17082_v4, %v7336_v5  ;;  %v16127_v19 = vsel %vm1143_vm1, %v7330_v18, %v7334_v47 }
 0x565   : > { %v16121_v0 = vsel %vm4928_vm9, %v7121_v22, %v7125_v62  ;;  %7143 = vst [vmem:[#allocation4 + $0x110] sm:$0x1] %v7125_v62  ;;  %v7210_v57 = vsel %vm3831_vm6, %v7204_v28, %v17019_v52  ;;  %v16137_v52 = vld [vmem:[#allocation4 + $0xe0] sm:$0xf8] }
 0x566   : > { %7141 = vst [vmem:[#allocation4 + $0x100] sm:$0xff] %v16121_v0  ;;  %v7128_v29 = vsel %vm4928_vm9, %v7123_v30, %v7127_v61  ;;  %7144 = vst.msk [vmem:[#allocation4 + $0x118] sm:$0x1] %vm4955_vm10, %v7127_v61  ;;  %v16133_v4 = vld [vmem:[#allocation4 + $0xf8] sm:$0xff]  ;;  %v7208_v62 = vsel %vm3831_vm6, %v7206_v15, %v7207_v39  ;;  %v7227_v22 = vmax.f32 %v7185_v16, %v7210_v57  ;;  %v17023_v5 = vrot.slane %v16121_v0, 6 }
 0x567   : > { %7142 = vst.msk [vmem:[#allocation4 + $0x108] sm:$0xff] %vm469_vm3, %v7128_v29  ;;  %v7211_v18 = vrot.slane %v16133_v4, 1  ;;  %v7226_v23 = vmax.f32 %v15971_v43, %v7208_v62  ;;  %v7186_v61 = vmax.f32 %v7148_v46, %v15978_v17  ;;  %v7357_v15 = vld [vmem:[#allocation4 + $0xe8] sm:$0xfc]  ;;  %v7203_v57 = vrot.slane %v7191_v37, 1 }
 0x568   : > { %v7265_v59 = vmax.f32 %v7227_v22, %v7248_v49  ;;  %v16150_v16 = vsel %vm1144_vm2, %v7366_v12, %v17023_v5  ;;  %v7187_v29 = vmax.f32 %v16061_v3, %v15990_v38  ;;  %v17025_v47 = vrot.slane %v16137_v52, 7  ;;  %v7433_v46 = vld [vmem:[#allocation4 + $0xe8] sm:$0xf8] }
 0x569   : > { %v7212_v43 = vsel %vm3831_vm6, %v7207_v39, %v7211_v18  ;;  %v7264_v62 = vmax.f32 %v7226_v23, %v7246_v48  ;;  %v7442_v17 = vrot.slane %v16061_v3, 7  ;;  %v17024_v49 = vrot.slane %v16121_v0, 7 }
 0x56a   : > { %v7228_v56 = vmax.f32 %v7186_v61, %v7212_v43  ;;  %v7312_v30 = vmax.f32 %v7265_v59, %v16047_v27  ;;  %v7188_v22 = vmax.f32 %v16133_v4, %v16004_v63  ;;  %v7365_v5 = vrot.slane %v7357_v15, 6 }
 0x56b   : > { %v7311_v37 = vmax.f32 %v7264_v62, %v16037_v1  ;;  %v17083_v38 = vrot.slane %v16113_v20, 6  ;;  %v16170_v59 = vsel %vm1143_vm1, %v7442_v17, %v17024_v49  ;;  %v7205_v27 = vsel %vm3831_vm6, %v7203_v57, %v7204_v28 }
 0x56c   : > { %v7266_v23 = vmax.f32 %v7228_v56, %v16090_v8  ;;  %v7350_v48 = vmax.f32 %v7312_v30, %v16097_v9  ;;  %v17084_v63 = vrot.slane %v16058_v54, 7  ;;  %v7368_v15 = vrot.slane %v16133_v4, 6 }
 0x56d   : > { %v7367_v39 = vsel %vm1144_vm2, %v17083_v38, %v7366_v12  ;;  %v7193_v61 = vld [vmem:[#allocation4 + $0x100] sm:$0x7]  ;;  %v7441_v43 = vrot.slane %v7433_v46, 7  ;;  %v7443_v8 = vsel %vm1143_vm1, %v17025_v47, %v7442_v17  ;;  %v7444_v28 = vrot.slane %v16133_v4, 7 }
 0x56e   : > { %v7349_v1 = vmax.f32 %v7311_v37, %v17084_v63  ;;  %v7151_v12 = vld [vmem:[#allocation4 + $0x100] sm:$0x3]  ;;  %v7152_v9 = vld [vmem:[#allocation4 + $0x108] sm:$0x3]  ;;  %v7213_v62 = vrot.slane %v7193_v61, 1  ;;  %v7313_v56 = vmax.f32 %v7266_v23, %v16074_v51  ;;  %v7384_v38 = vmax.f32 %v7350_v48, %v7367_v39 }
 0x56f   : > { %v7194_v30 = vld [vmem:[#allocation4 + $0x108] sm:$0x7]  ;;  %v17085_v57 = vrot.slane %v15947_v31, 5  ;;  %v7225_v46 = vmax.f32 %v15966_v26, %v7205_v27  ;;  %v17086_v49 = vrot.slane %v16061_v3, 1  ;;  %v17087_v51 = vrot.slane %v15943_v44, 5 }
 0x570   : > { %v7215_v37 = vrot.slane %v7194_v30, 1  ;;  %v7383_v63 = vmax.f32 %v7349_v1, %v7365_v5  ;;  %v7351_v47 = vmax.f32 %v7313_v56, %v16104_v14  ;;  %v7426_v61 = vmax.f32 %v7384_v38, %v15993_v10 }
 0x571   : > { %v7190_v54 = vmax.f32 %v7152_v9, %v17085_v57  ;;  %v7214_v17 = vsel %vm3831_vm6, %v17086_v49, %v7213_v62  ;;  %v7189_v39 = vmax.f32 %v7151_v12, %v17087_v51  ;;  %v7369_v48 = vsel %vm1144_vm2, %v7365_v5, %v7368_v15  ;;  %v7359_v9 = vld [vmem:[#allocation4 + $0x108] sm:$0xff] }
 0x572   : > { %v7216_v4 = vsel %vm3831_vm6, %v7211_v18, %v7215_v37  ;;  %v7229_v23 = vmax.f32 %v7187_v29, %v7214_v17  ;;  %v7385_v26 = vmax.f32 %v7351_v47, %v7369_v48  ;;  %v7425_v3 = vmax.f32 %v7383_v63, %v15983_v11  ;;  %v7434_v17 = vld [vmem:[#allocation4 + $0x110] sm:$0x1] }
 0x573   : > { %v7232_v31 = vmax.f32 %v7190_v54, %v7215_v37  ;;  %v7230_v1 = vmax.f32 %v7188_v22, %v7216_v4  ;;  %v7445_v49 = vsel %vm1143_vm1, %v7441_v43, %v7444_v28  ;;  %v17088_v10 = vrot.slane %v16064_v24, 6  ;;  %v7435_v22 = vld [vmem:[#allocation4 + $0x118] sm:$0x1] }
 0x574   : > { %v7267_v14 = vmax.f32 %v7229_v23, %v15801_v6  ;;  %v7464_v44 = vmax.f32 %v7426_v61, %v7443_v8  ;;  %v17089_v12 = vrot.slane %v16021_v40, 6  ;;  %v7427_v5 = vmax.f32 %v7385_v26, %v16011_v60 }
 0x575   : > { %v7270_v27 = vmax.f32 %v7232_v31, %v17088_v10  ;;  %v7268_v29 = vmax.f32 %v7230_v1, %v16111_v7  ;;  %v7463_v30 = vmax.f32 %v7425_v3, %v7441_v43  ;;  %v7231_v47 = vmax.f32 %v7189_v39, %v7213_v62 }
 0x576   : > { %v7263_v18 = vmax.f32 %v7225_v46, %v17089_v12  ;;  %v7314_v11 = vmax.f32 %v7267_v14, %v16056_v32  ;;  %v17090_v56 = vrot.slane %v16014_v13, 3  ;;  %v7372_v6 = vrot.slane %v7359_v9, 6  ;;  %v17098_v14 = vld [vmem:[#allocation10_spill] sm:$0xff]  ;;  %v17100_v12 = vld [vmem:[#allocation12_spill] sm:$0xff] }
 0x577   : > { %v7448_v57 = vrot.slane %v7359_v9, 7  ;;  %v7315_v24 = vmax.f32 %v7268_v29, %v16079_v42  ;;  %v7465_v8 = vmax.f32 %v7427_v5, %v7445_v49  ;;  %v7481_v40 = vmul.f32 %v15930_v25, %v7463_v30  ;;  %v17097_v49 = vld [vmem:[#allocation11_spill] sm:$0xff] }
 0x578   : > { %v7317_v38 = vmax.f32 %v7270_v27, %v17090_v56  ;;  %v17091_v54 = vrot.slane %v15787_v55, 6  ;;  %v7352_v60 = vmax.f32 %v7314_v11, %v15808_v34  ;;  %v7452_v62 = vrot.slane %v7435_v22, 7 }
 0x579   : > { %v7310_v32 = vmax.f32 %v7263_v18, %v16029_v58  ;;  %v7353_v13 = vmax.f32 %v7315_v24, %v16127_v19  ;;  %v7483_v37 = vmul.f32 %v15964_v50, %v7465_v8  ;;  %v7497_v63 = vrot.slane %v7481_v40, 5 }
 0x57a   : > { %v7269_v7 = vmax.f32 %v7231_v47, %v17091_v54  ;;  %v7355_v43 = vmax.f32 %v7317_v38, %v16143_v36  ;;  %v17092_v42 = vrot.slane %v16006_v2, 3  ;;  %v7373_v61 = vsel %vm1144_vm2, %v7368_v15, %v7372_v6 }
 0x57b   : > { %v7386_v55 = vmax.f32 %v7352_v60, %v16150_v16  ;;  %v17093_v34 = vrot.slane %v16040_v53, 7  ;;  %v7387_v39 = vmax.f32 %v7353_v13, %v7373_v61  ;;  %v7449_v58 = vsel %vm1143_vm1, %v7444_v28, %v7448_v57  ;;  %7519 = vst.msk [vmem:[#allocation5 + $0x8] sm:$0x80] %vm3851_vm5, %v7497_v63  ;;  %v16265_v61 = vld [vmem:[#allocation5 + $0x48] sm:$0x3] }
 0x57c   : > { %v7316_v46 = vmax.f32 %v7269_v7, %v17092_v42  ;;  %v7389_v51 = vmax.f32 %v7355_v43, %v7372_v6  ;;  %v7500_v4 = vrot.slane %v7483_v37, 5  ;;  %v17094_v23 = vrot.slane %v15956_v45, 3 }
 0x57d   : > { %v7348_v36 = vmax.f32 %v7310_v32, %v17093_v34  ;;  %v7428_v2 = vmax.f32 %v7386_v55, %v15998_v35  ;;  %v17095_v15 = vrot.slane %v16113_v20, 6  ;;  %v7450_v48 = vrot.slane %v7434_v17, 7 }
 0x57e   : > { %v7354_v19 = vmax.f32 %v7316_v46, %v16118_v33  ;;  %v7431_v31 = vmax.f32 %v7389_v51, %v17094_v23  ;;  %v7429_v53 = vmax.f32 %v7387_v39, %v16026_v41  ;;  %v7453_v1 = vsel %vm1143_vm1, %v7448_v57, %v7452_v62 }
 0x57f   : > { %v7382_v16 = vmax.f32 %v7348_v36, %v17095_v15  ;;  %v7501_v28 = vsel %vm4928_vm9, %v7497_v63, %v7500_v4  ;;  %v17096_v9 = vrot.slane %v16121_v0, 6  ;;  %v7466_v33 = vmax.f32 %v7428_v2, %v16170_v59 }
 0x580   : > { %v7469_v3 = vmax.f32 %v7431_v31, %v7453_v1  ;;  %v7482_v35 = vmul.f32 %v15964_v50, %v7464_v44  ;;  %7521 = vst.msk [vmem:[#allocation5 + $0x18] sm:$0xff] %vm469_vm3, %v7501_v28  ;;  %v7467_v20 = vmax.f32 %v7429_v53, %v7449_v58  ;;  %v17099_v41 = vrot.slane %v17098_v14, 4 }
 0x581   : > { %v7388_v26 = vmax.f32 %v7354_v19, %v17096_v9  ;;  %v7424_v45 = vmax.f32 %v7382_v16, %v15974_v21  ;;  %v7551_v27 = vpack.c.bf16 %v7483_v37, %v7481_v40  ;;  %v17101_v18 = vrot.slane %v17100_v12, 3 }
 0x582   : > { %v7475_v10 = vsel %vm7470_vm12, %v17099_v41, %v17097_v49  ;;  %v7487_v59 = vmul.f32 %v17097_v49, %v7469_v3  ;;  %v17102_v22 = vrot.slane %v16121_v0, 7  ;;  %v17103_v44 = vrot.slane %v16137_v52, 7  ;;  %v7784_v40 = vld [vmem:[#allocation5 + $0x8] sm:$0xfe] }
 0x583   : > { %v7430_v29 = vmax.f32 %v7388_v26, %v17101_v18  ;;  %v7484_v5 = vmul.f32 %v7475_v10, %v7466_v33  ;;  %v7485_v30 = vmul.f32 %v7475_v10, %v7467_v20  ;;  %v7498_v11 = vrot.slane %v7482_v35, 5  ;;  %v7816_v60 = vld [vmem:[#allocation5 + $0x8] sm:$0xfc] }
 0x584   : > { %v7451_v50 = vsel %vm1143_vm1, %v17102_v22, %v7450_v48  ;;  %v7462_v21 = vmax.f32 %v7424_v45, %v17103_v44  ;;  %v7508_v38 = vrot.slane %v7487_v59, 5  ;;  %v7562_v54 = vrot.slane %v7551_v27, 2  ;;  %v7847_v17 = vld [vmem:[#allocation5 + $0x8] sm:$0xc0] }
 0x585   : > { %v7468_v47 = vmax.f32 %v7430_v29, %v7451_v50  ;;  %v7502_v56 = vrot.slane %v7484_v5, 5  ;;  %v7504_v57 = vrot.slane %v7485_v30, 5  ;;  %v7553_v24 = vpack.c.bf16 %v7487_v59, %v7485_v30  ;;  %v7881_v39 = vld [vmem:[#allocation5 + $0x8] sm:$0x80] }
 0x586   : > { %v7480_v6 = vmul.f32 %v15930_v25, %v7462_v21  ;;  %v7796_v42 = vrot.slane %v7784_v40, 1  ;;  %v7827_v34 = vrot.slane %v7816_v60, 2  ;;  %v7778_v2 = vld [vmem:[#allocation5 + $0x8] sm:$0xff]  ;;  %v7857_v48 = vrot.slane %v7847_v17, 6 }
 0x587   : > { %v7486_v8 = vmul.f32 %v17097_v49, %v7468_v47  ;;  %v16252_v0 = vsel %vm4928_vm9, %v7498_v11, %v7502_v56  ;;  %v7505_v43 = vsel %vm4928_vm9, %v7500_v4, %v7504_v57  ;;  %v7509_v62 = vsel %vm4928_vm9, %v7504_v57, %v7508_v38  ;;  %v16257_v13 = vld [vmem:[#allocation5 + $0x18] sm:$0xff] }
 0x588   : > { %v7496_v7 = vrot.slane %v7480_v6, 5  ;;  %v7550_v52 = vpack.c.bf16 %v7482_v35, %v7480_v6  ;;  %7522 = vst [vmem:[#allocation5 + $0x20] sm:$0xff] %v16252_v0  ;;  %v7563_v25 = vrot.slane %v7553_v24, 2  ;;  %7523 = vst.msk [vmem:[#allocation5 + $0x28] sm:$0xff] %vm469_vm3, %v7505_v43  ;;  %v7797_v46 = vrot.slane %v16257_v13, 1 }
 0x589   : > { %v7506_v32 = vrot.slane %v7486_v8, 5  ;;  %7525 = vst.msk [vmem:[#allocation5 + $0x38] sm:$0x1f] %vm3858_vm7, %v7509_v62  ;;  %v7552_v63 = vpack.c.bf16 %v7486_v8, %v7484_v5  ;;  %v7828_v36 = vrot.slane %v16257_v13, 2  ;;  %v7923_v58 = vld [vmem:[#allocation5 + $0x18] sm:$0xf0] }
 0x58a   : > { %v16262_v37 = vsel %vm4928_vm9, %v7496_v7, %v7498_v11  ;;  %7518 = vst [vmem:[#allocation5] sm:$0x80] %v7496_v7  ;;  %v7564_v55 = vsel %vm7558_vm14, %v7562_v54, %v7563_v25  ;;  %v7559_v4 = vrot.slane %v7550_v52, 2  ;;  %v7798_v23 = vsel %vm3831_vm6, %v7796_v42, %v7797_v46  ;;  %v7961_v15 = vld [vmem:[#allocation5 + $0x18] sm:$0xe0] }
 0x58b   : > { %v7507_v51 = vsel %vm4928_vm9, %v7502_v56, %v7506_v32  ;;  %7520 = vst [vmem:[#allocation5 + $0x10] sm:$0xff] %v16262_v37  ;;  %11822 = vmatprep.mubr.msk.bf16.mxu0 %vm469_vm3, %v7564_v55  ;;  %v7560_v19 = vrot.slane %v7552_v63, 2  ;;  %v7858_v31 = vrot.slane %v16257_v13, 6  ;;  %v7810_v16 = vadd.f32 %v7798_v23, %v7778_v2  ;;  %v16275_v1 = vld [vmem:[#allocation5 + $0x18] sm:$0xc0] }
 0x58c   : > { %7524 = vst [vmem:[#allocation5 + $0x30] sm:$0x1f] %v7507_v51  ;;  %v7892_v53 = vrot.slane %v16257_v13, 7  ;;  %v7829_v9 = vsel %vm7558_vm14, %v7827_v34, %v7828_v36  ;;  %v7891_v26 = vrot.slane %v7881_v39, 7  ;;  %v7946_v33 = vrot.slane %v16265_v61, 4 }
 0x58d   : > { %v7561_v28 = vsel %vm7558_vm14, %v7559_v4, %v7560_v19  ;;  %v7841_v3 = vadd.f32 %v7829_v9, %v7810_v16  ;;  %v7859_v35 = vsel %vm1144_vm2, %v7857_v48, %v7858_v31  ;;  %v7937_v45 = vrot.slane %v7923_v58, 4  ;;  %v7996_v61 = vld [vmem:[#allocation5 + $0x40] sm:$0xf] }
 0x58e   : > { %7726 = vmatmul.mubr.bf16.vlgmr.msra.gmra.mrb[148].mxu0 %v7561_v28  ;;  %v7971_v20 = vrot.slane %v7961_v15, 5  ;;  %v8004_v49 = vrot.slane %v16275_v1, 6  ;;  %v7794_v10 = vrot.slane %v16262_v37, 1  ;;  %v7825_v27 = vrot.slane %v16262_v37, 2 }
 0x58f   : > { %11823 = vmatprep.mubr.msk.bf16.mxu0 %vm469_vm3, %v7563_v25  ;;  %v16283_v41 = vld [vmem:[#allocation5 + $0x20] sm:$0x7f]  ;;  %v7830_v12 = vrot.slane %v16252_v0, 2  ;;  %v16288_v18 = vld [vmem:[#allocation5 + $0x28] sm:$0x7f]  ;;  %v7875_v5 = vadd.f32 %v7859_v35, %v7841_v3  ;;  %v7893_v59 = vsel %vm1143_vm1, %v7891_v26, %v7892_v53  ;;  %v7855_v44 = vrot.slane %v16262_v37, 6 }
 0x590   : > { %v16290_v29 = vld [vmem:[#allocation5 + $0x28] sm:$0xff]  ;;  %v16293_v22 = vld [vmem:[#allocation5 + $0x38] sm:$0xff]  ;;  %v7799_v50 = vrot.slane %v16283_v41, 1  ;;  %v7801_v21 = vrot.slane %v16288_v18, 1  ;;  %v16310_v40 = vrot.slane %v16252_v0, 6  ;;  %v7889_v54 = vrot.slane %v16262_v37, 7 }
 0x591   : > { %v7832_v30 = vrot.slane %v16290_v29, 2  ;;  %v16300_v47 = vrot.slane %v16290_v29, 6  ;;  %v7896_v11 = vrot.slane %v16290_v29, 7  ;;  %v7909_v56 = vadd.f32 %v7893_v59, %v7875_v5  ;;  %v7783_v8 = vld [vmem:[#allocation5] sm:$0xfe] }
 0x592   : > { %v7938_v38 = vrot.slane %v16290_v29, 4  ;;  %v7942_v6 = vrot.slane %v16293_v22, 4  ;;  %v7972_v57 = vrot.slane %v16290_v29, 5  ;;  %v7802_v24 = vsel %vm3831_vm6, %v7797_v46, %v7801_v21  ;;  %v7815_v25 = vld [vmem:[#allocation5] sm:$0xfc] }
 0x593   : > { %v7894_v7 = vrot.slane %v16252_v0, 7  ;;  %v7812_v52 = vadd.f32 %v7802_v24, %v16257_v13  ;;  %v7833_v60 = vsel %vm7558_vm14, %v7828_v36, %v7832_v30  ;;  %v7863_v43 = vsel %vm1144_vm2, %v7858_v31, %v16300_v47  ;;  %v7846_v34 = vld [vmem:[#allocation5] sm:$0xc0] }
 0x594   : > { %v7917_v62 = vadd.f32 %v7909_v56, %v16257_v13  ;;  %v7897_v32 = vsel %vm1143_vm1, %v7892_v53, %v7896_v11  ;;  %v7939_v63 = vsel %vm7470_vm12, %v7937_v45, %v7938_v38  ;;  %v7943_v42 = vsel %vm7470_vm12, %v7938_v38, %v7942_v6  ;;  %v7880_v2 = vld [vmem:[#allocation5] sm:$0x80]  ;;  %v16344_v45 = vld [vmem:[#allocation5 + $0x30] sm:$0xff] }
 0x595   : > { %v7973_v46 = vsel %vm4928_vm9, %v7971_v20, %v7972_v57  ;;  %v7843_v17 = vadd.f32 %v7833_v60, %v7812_v52  ;;  %v7793_v51 = vrot.slane %v7783_v8, 1  ;;  %v7800_v13 = vsel %vm3831_vm6, %v7794_v10, %v7799_v50  ;;  %v7777_v15 = vld [vmem:[#allocation5] sm:$0xff]  ;;  %v7960_v8 = vld [vmem:[#allocation5 + $0x10] sm:$0xe0] }
 0x596   : > { %7736 = vmatmul.mubr.bf16.gmra.mrb[152].mxu0 %v7560_v19  ;;  %v7955_v55 = vadd.f32 %v7939_v63, %v7917_v62  ;;  %v7976_v36 = vrot.slane %v16293_v22, 5  ;;  %v8008_v39 = vrot.slane %v16293_v22, 6  ;;  %v7811_v58 = vadd.f32 %v7800_v13, %v16262_v37 }
 0x597   : > { %v7824_v4 = vrot.slane %v7815_v25, 2  ;;  %v7877_v23 = vadd.f32 %v7863_v43, %v7843_v17  ;;  %v7795_v19 = vsel %vm3831_vm6, %v7793_v51, %v7794_v10  ;;  %v7831_v16 = vsel %vm7558_vm14, %v7825_v27, %v7830_v12 }
 0x598   : > { %v7989_v31 = vadd.f32 %v7973_v46, %v7955_v55  ;;  %v8005_v48 = vsel %vm1144_vm2, %v8004_v49, %v16300_v47  ;;  %v7809_v53 = vadd.f32 %v7795_v19, %v7777_v15  ;;  %v7842_v1 = vadd.f32 %v7831_v16, %v7811_v58  ;;  %v7922_v49 = vld [vmem:[#allocation5 + $0x10] sm:$0xf0]  ;;  %v7849_v46 = vld [vmem:[#allocation5 + $0x38] sm:$0xf] }
 0x599   : > { %v7854_v28 = vrot.slane %v7846_v34, 6  ;;  %v7911_v9 = vadd.f32 %v7897_v32, %v7877_v23  ;;  %v7826_v26 = vsel %vm7558_vm14, %v7824_v4, %v7825_v27  ;;  %v7861_v3 = vsel %vm1144_vm2, %v7855_v44, %v16310_v40 }
 0x59a   : > { %v7888_v35 = vrot.slane %v7880_v2, 7  ;;  %v8021_v20 = vadd.f32 %v8005_v48, %v7989_v31  ;;  %v7840_v10 = vadd.f32 %v7826_v26, %v7809_v53  ;;  %v7876_v5 = vadd.f32 %v7861_v3, %v7842_v1  ;;  %v7782_v2 = vld [vmem:[#allocation5 + $0x28] sm:$0x3f] }
 0x59b   : > { %v7895_v59 = vsel %vm1143_vm1, %v7889_v54, %v7894_v7  ;;  %v7919_v56 = vadd.f32 %v7911_v9, %v16290_v29  ;;  %v7977_v27 = vsel %vm4928_vm9, %v7972_v57, %v7976_v36  ;;  %v8009_v38 = vsel %vm1144_vm2, %v16300_v47, %v8008_v39 }
 0x59c   : > { %v7856_v24 = vsel %vm1144_vm2, %v7854_v28, %v7855_v44  ;;  %v7910_v60 = vadd.f32 %v7895_v59, %v7876_v5  ;;  %v7935_v43 = vrot.slane %v16252_v0, 4  ;;  %v7940_v62 = vrot.slane %v16344_v45, 4  ;;  %v7883_v44 = vld [vmem:[#allocation5 + $0x38] sm:$0x1f] }
 0x59d   : > { %v7874_v52 = vadd.f32 %v7856_v24, %v7840_v10  ;;  %v7957_v25 = vadd.f32 %v7943_v42, %v7919_v56  ;;  %v7890_v32 = vsel %vm1143_vm1, %v7888_v35, %v7889_v54  ;;  %v7934_v63 = vrot.slane %v7922_v49, 4  ;;  %v7994_v54 = vld [vmem:[#allocation5 + $0x10] sm:$0xc0]  ;;  %v7882_v10 = vld [vmem:[#allocation5 + $0x30] sm:$0x1f] }
 0x59e   : > { %v7974_v57 = vrot.slane %v16344_v45, 5  ;;  %v8027_v17 = vmul.f32 0.11111111, %v8021_v20  ;;  %v7918_v51 = vadd.f32 %v7910_v60, %v16252_v0  ;;  %v7968_v13 = vrot.slane %v7960_v8, 5 }
 0x59f   : > { %v7908_v55 = vadd.f32 %v7890_v32, %v7874_v52  ;;  %v7991_v34 = vadd.f32 %v7977_v27, %v7957_v25  ;;  %v7936_v58 = vsel %vm7470_vm12, %v7934_v63, %v7935_v43  ;;  %v7941_v4 = vsel %vm7470_vm12, %v7935_v43, %v7940_v62  ;;  %v7781_v27 = vld [vmem:[#allocation5 + $0x20] sm:$0x3f]  ;;  %v7997_v25 = vld [vmem:[#allocation5 + $0x48] sm:$0xf]  ;;  %v7915_v63 = vld [vmem:[#allocation5 + $0x38] sm:$0x3f] }
 0x5a0   : > { %v7969_v42 = vrot.slane %v16252_v0, 5  ;;  %v7956_v31 = vadd.f32 %v7941_v4, %v7918_v51  ;;  %v8006_v15 = vrot.slane %v16344_v45, 6  ;;  %v7814_v19 = vadd.f32 %v7801_v21, %v7782_v2  ;;  %v7914_v2 = vld [vmem:[#allocation5 + $0x30] sm:$0x3f]  ;;  %v13517_v45 = vld [vmem:[%s16976_s12 + $0x30] sm:$0xff]  }
 0x5a1   : > { %v7916_v23 = vadd.f32 %v7908_v55, %v16262_v37  ;;  %v8023_v16 = vadd.f32 %v8009_v38, %v7991_v34  ;;  %v7866_v53 = vrot.slane %v7849_v46, 6  ;;  %v7900_v1 = vrot.slane %v7883_v44, 7  ;;  %v7848_v37 = vld [vmem:[#allocation5 + $0x30] sm:$0xf]  ;;  %v7926_v55 = vld [vmem:[#allocation5 + $0x40] sm:$0x3] }
 0x5a2   : > { %v7975_v48 = vsel %vm4928_vm9, %v7969_v42, %v7974_v57  ;;  %v8002_v26 = vrot.slane %v7994_v54, 6  ;;  %v7845_v3 = vadd.f32 %v7832_v30, %v7814_v19  ;;  %v7970_v20 = vsel %vm4928_vm9, %v7968_v13, %v7969_v42  ;;  %v7963_v30 = vld [vmem:[#allocation5 + $0x48] sm:$0x7]  ;;  %v7962_v44 = vld [vmem:[#allocation5 + $0x40] sm:$0x7] }
 0x5a3   : > { %v7954_v28 = vadd.f32 %v7936_v58, %v7916_v23  ;;  %v7990_v9 = vadd.f32 %v7975_v48, %v7956_v31  ;;  %v8029_v35 = vmul.f32 0.11111111, %v8023_v16  ;;  %v8007_v18 = vsel %vm1144_vm2, %v16310_v40, %v8006_v15 }
 0x5a4   : > { %v7867_v21 = vsel %vm1144_vm2, %v16300_v47, %v7866_v53  ;;  %v8003_v59 = vsel %vm1144_vm2, %v8002_v26, %v16310_v40  ;;  %v7901_v24 = vsel %vm1143_vm1, %v7896_v11, %v7900_v1  ;;  %v7813_v8 = vadd.f32 %v7799_v50, %v7781_v27  ;;  %v13544_v26 = vld [vmem:[%s16975_s11 + $0x20] sm:$0xff]  }
 0x5a5   : > { %v7988_v5 = vadd.f32 %v7970_v20, %v7954_v28  ;;  %v8022_v49 = vadd.f32 %v8007_v18, %v7990_v9  ;;  %v7879_v56 = vadd.f32 %v7867_v21, %v7845_v3  ;;  %v8057_v38 = vpack.c.bf16 %v8029_v35, %v8027_v17  ;;  %v16435_v9 = vld [vmem:[%s16976_s12] sm:$0xff]   ;;  %12497 = vmatprep.subr.bf16.mxu0 %v13544_v26  ;;  %v13546_v3 = vld [vmem:[%s16975_s11 + $0x28] sm:$0xff]   ;;  %v13550_v20 = vld [vmem:[%s16975_s11 + $0x38] sm:$0xff]  }
 0x5a6   : > { %v7864_v52 = vrot.slane %v7848_v37, 6  ;;  %v7898_v32 = vrot.slane %v7882_v10, 7  ;;  %v7980_v46 = vrot.slane %v7963_v30, 5  ;;  %v7844_v17 = vadd.f32 %v7830_v12, %v7813_v8  ;;  %12498 = vmatpush3.bf16.msra.mxu0 %v13544_v26  ;;  %v13548_v37 = vld [vmem:[%s16975_s11 + $0x30] sm:$0xff]   ;;  %v16459_v8 = vld [vmem:[%s16975_s11] sm:$0xff]  }
 0x5a7   : > { %v8020_v60 = vadd.f32 %v8003_v59, %v7988_v5  ;;  %v8028_v47 = vmul.f32 0.11111111, %v8022_v49  ;;  %v7913_v43 = vadd.f32 %v7901_v24, %v7879_v56  ;;  %11836 = vmatprep.mubr.msk.bf16.mxu1 %vm469_vm3, %v8057_v38  ;;  %v7947_v50 = vsel %vm7470_vm12, %v7942_v6, %v7946_v33  ;;  %12499 = vmatprep.subr.bf16.mxu0 %v13546_v3  ;;  %v17104_v59 = vld [vmem:[#allocation13_spill] sm:$0xff] }
 0x5a8   : > { %v7865_v41 = vsel %vm1144_vm2, %v16310_v40, %v7864_v52  ;;  %v8012_v11 = vrot.slane %v7997_v25, 6  ;;  %v7899_v12 = vsel %vm1143_vm1, %v7894_v7, %v7898_v32  ;;  %v7944_v4 = vrot.slane %v7926_v55, 4 }
 0x5a9   : > { %v8026_v29 = vmul.f32 0.11111111, %v8020_v60  ;;  %v7921_v51 = vadd.f32 %v7915_v63, %v7913_v43  ;;  %v7878_v13 = vadd.f32 %v7865_v41, %v7844_v17  ;;  %v7981_v40 = vsel %vm4928_vm9, %v7976_v36, %v7980_v46  ;;  %v17105_v46 = vld [vmem:[#allocation14_spill] sm:$0xff] }
 0x5aa   : > { %v7978_v33 = vrot.slane %v7962_v44, 5  ;;  %v8013_v6 = vsel %vm1144_vm2, %v8008_v39, %v8012_v11  ;;  %v7945_v0 = vsel %vm7470_vm12, %v7940_v62, %v7944_v4  ;;  %v8010_v7 = vrot.slane %v7996_v61, 6  ;;  %v13515_v62 = vld [vmem:[%s16976_s12 + $0x20] sm:$0xff]   ;;  %12500 = vmatpush3.bf16.msra.mxu0 %v13546_v3  ;;  %v1556_v41 = vld [vmem:[%s16965_s1 + $0x68] sm:$0xff]  ;;  %v13521_v61 = vld [vmem:[%s16976_s12 + $0x10] sm:$0xff]  }
 0x5ab   : > { %v8056_v34 = vpack.c.bf16 %v8028_v47, %v8026_v29  ;;  %v7959_v58 = vadd.f32 %v7947_v50, %v7921_v51  ;;  %v7912_v42 = vadd.f32 %v7899_v12, %v7878_v13  ;;  %12605 = vmatprep.subr.bf16.mxu1 %v13515_v62  ;;  %12501 = vmatprep.subr.bf16.mxu0 %v13548_v37  ;;  %v1547_v47 = vld [vmem:[%s16965_s1 + $0x20] sm:$0xff]  ;;  %v1565_v51 = vld [vmem:[%s16965_s1 + $0xb0] sm:$0xff]  ;;  %v13520_v4 = vld [vmem:[%s16976_s12 + $0x8] sm:$0xff]   ;;  %vm8204_vm1 = vcmask 1046272  }
 0x5ac   : > { %v7979_v36 = vsel %vm4928_vm9, %v7974_v57, %v7978_v33  ;;  %v8011_v22 = vsel %vm1144_vm2, %v8006_v15, %v8010_v7  ;;  %v13516_v57 = vld [vmem:[%s16976_s12 + $0x28] sm:$0xff]   ;;  %v13518_v15 = vld [vmem:[%s16976_s12 + $0x38] sm:$0xff]   ;;  %vm550_vm2 = vcmask 781312   ;;  %vm9069_vm5 = vcmask 1048064  }
 0x5ad   : > { %8171 = vmatmul.mubr.bf16.vlgmr.msra.gmra.mrb[172].mxu1 %v8056_v34  ;;  %v7993_v54 = vadd.f32 %v7981_v40, %v7959_v58  ;;  %v7920_v23 = vadd.f32 %v7914_v2, %v7912_v42  ;;  %v1574_v42 = vld [vmem:[%s16965_s1 + $0xf8] sm:$0xff]  ;;  %v13523_v2 = vld [vmem:[%s16976_s12 + $0x40] sm:$0xff]  }
 0x5ae   : > { %12606 = vmatpush3.bf16.msra.mxu1 %v13515_v62  ;;  %12502 = vmatpush3.bf16.msra.mxu0 %v13548_v37 }
 0x5af   : > { %v8025_v31 = vadd.f32 %v8013_v6, %v7993_v54  ;;  %v7958_v19 = vadd.f32 %v7945_v0, %v7920_v23  ;;  %12607 = vmatprep.subr.bf16.mxu1 %v13516_v57  ;;  %12503 = vmatprep.subr.bf16.mxu0 %v13550_v20  ;;  %v13522_v54 = vld [vmem:[%s16976_s12 + $0x18] sm:$0xff]  }
 0x5b1   : > { %v8031_v16 = vmul.f32 0.11111111, %v8025_v31  ;;  %v7992_v48 = vadd.f32 %v7979_v36, %v7958_v19 }
 0x5b2   : > { %12608 = vmatpush3.bf16.msra.mxu1 %v13516_v57  ;;  %12504 = vmatpush3.bf16.msra.mxu0 %v13550_v20  ;;  %v13528_v20 = vld [vmem:[%s16976_s12 + $0x68] sm:$0xff]  }
 0x5b3   : > { %v8059_v53 = vpack.c.bf16 %v8031_v16, %v8031_v16  ;;  %v8024_v39 = vadd.f32 %v8011_v22, %v7992_v48  ;;  %12609 = vmatprep.subr.bf16.mxu1 %v13517_v45  ;;  %12509 = vmatprep.subr.bf16.mxu0 %v16459_v8  ;;  %v13524_v16 = vld [vmem:[%s16976_s12 + $0x48] sm:$0xff]  }
 0x5b5   : > { %11837 = vmatprep.mubr.msk.bf16.mxu1 %vm469_vm3, %v8059_v53  ;;  %v8030_v1 = vmul.f32 0.11111111, %v8024_v39  ;;  %v13525_v39 = vld [vmem:[%s16976_s12 + $0x50] sm:$0xff]  }
 0x5b6   : > { %12610 = vmatpush3.bf16.msra.mxu1 %v13517_v45  ;;  %v13527_v45 = vld [vmem:[%s16976_s12 + $0x60] sm:$0xff]  }
 0x5b7   : > { %v8058_v28 = vpack.c.bf16 %v8030_v1, %v8030_v1  ;;  %12611 = vmatprep.subr.bf16.mxu1 %v13518_v15  ;;  %v13526_v1 = vld [vmem:[%s16976_s12 + $0x58] sm:$0xff]  }
 0x5b9   : > { %8179 = vmatmul.mubr.bf16.gmra.mrb[176].mxu1 %v8058_v28 }
 0x5ba   : > { %12612 = vmatpush3.bf16.msra.mxu1 %v13518_v15 }
 0x5bb   : > { %12617 = vmatprep.subr.bf16.mxu1 %v16435_v9 }
 0x661   : > { %v7727_v35 = vpop.f32.mrb[148].mxu0 }
 0x662   : > { %v7744_v18 = vmax.f32 %v7727_v35, 0.0  ;;  %v7729_v21 = vpop.f32.mrb[149].mxu0 }
 0x663   : > { %v7745_v10 = vmax.f32 %v7729_v21, 0.0  ;;  %v7731_v5 = vpop.f32.mrb[150].mxu0  ;;  %v13529_v21 = vld [vmem:[%s16976_s12 + $0x70] sm:$0xff]  }
 0x664   : > { %7750 = vst.msk [vmem:[#allocation9] sm:$0xff] %vm469_vm3, %v7744_v18  ;;  %v7753_v49 = vmul.f32 %v7744_v18, %v17104_v59  ;;  %v7746_v56 = vmax.f32 %v7731_v5, 0.0  ;;  %v7733_v30 = vpop.f32.mrb[151].mxu0  ;;  %v13531_v5 = vld [vmem:[%s16976_s12 + $0x80] sm:$0xff]  }
 0x665   : > { %v7771_v27 = vmul.f32 %v7745_v10, %v17104_v59  ;;  %v7747_v38 = vmax.f32 %v7733_v30, 0.0  ;;  %v13530_v10 = vld [vmem:[%s16976_s12 + $0x78] sm:$0xff]  }
 0x666   : > { %7751 = vst.msk [vmem:[#allocation9 + $0x10] sm:$0xff] %vm469_vm3, %v7746_v56  ;;  %v7754_v24 = vmul.f32 %v7746_v56, %v17098_v14  ;;  %7759 = vrot.lane.b32.xlu1 %v7753_v49, %s13656_s23 }
 0x667   : > { %7774 = vst.msk [vmem:[#allocation7 + $0x7] sm:$0xff] %vm469_vm3, %v7771_v27  ;;  %v7772_v52 = vmul.f32 %v7747_v38, %v17098_v14  ;;  %v13532_v38 = vld [vmem:[%s16976_s12 + $0x88] sm:$0xff]  }
 0x668   : > { %7761 = vrot.lane.b32.xlu0 %v7754_v24, %s13656_s23 }
 0x669   : > { %7775 = vst.msk [vmem:[#allocation7 + $0xf] sm:$0xff] %vm469_vm3, %v7772_v52  ;;  %v7737_v60 = vpop.f32.mrb[152].mxu0  ;;  %v13533_v52 = vld [vmem:[%s16976_s12 + $0x90] sm:$0xff]  }
 0x66a   : > { %v7748_v43 = vmax.f32 %v7737_v60, 0.0  ;;  %v7739_v25 = vpop.f32.mrb[153].mxu0  ;;  %v13534_v60 = vld [vmem:[%s16976_s12 + $0x98] sm:$0xff]  }
 0x66b   : > { %v7749_v32 = vmax.f32 %v7739_v25, 0.0  ;;  %v7741_v63 = vpop.f32.mrb[154].mxu0 }
 0x66c   : > { %7752 = vst.msk [vmem:[#allocation9 + $0x20] sm:$0x3f] %vm2288_vm4, %v7748_v43  ;;  %v7755_v17 = vmul.f32 %v7748_v43, %v17105_v46  ;;  %1637 = vperm.xlu0 %13115, %v1547_v47   ;;  %v7742_v55 = vpop.f32.mrb[155].mxu0  ;;  %v13535_v47 = vld [vmem:[%s16976_s12 + $0xa0] sm:$0xff]   ;;  %v13536_v63 = vld [vmem:[%s16976_s12 + $0xa8] sm:$0xff]  }
 0x66d   : > { %v7773_v29 = vmul.f32 %v7749_v32, %v17105_v46  ;;  %v13537_v55 = vld [vmem:[%s16976_s12 + $0xb0] sm:$0xff]  }
 0x66e   : > { %7763 = vrot.lane.b32.xlu1 %v7755_v17, %s13656_s23  ;;  %v9087_v50 = vld [vmem:[#allocation7 + $0x1] sm:$0xff] }
 0x66f   : > { %7776 = vst.msk [vmem:[#allocation7 + $0x17] sm:$0x3f] %vm2288_vm4, %v7773_v29  ;;  %v9074_v12 = vld [vmem:[#allocation7] sm:$0xff]  ;;  %v13538_v29 = vld [vmem:[%s16976_s12 + $0xb8] sm:$0xff]  }
 0x670   : > { %1727 = vperm.xlu0 %13115, %v1565_v51   ;;  %v9088_v11 = vld [vmem:[#allocation7 + $0x9] sm:$0xff]  ;;  %v9089_v13 = vld [vmem:[#allocation7 + $0x11] sm:$0x3f]  ;;  %v13539_v51 = vld [vmem:[%s16976_s12 + $0xc0] sm:$0xff]  }
 0x671   : > { %v16480_v44 = vld [vmem:[#allocation7 + $0x8] sm:$0xff]  ;;  %v9099_v34 = vpack.c.bf16 %v9088_v11, %v9087_v50  ;;  %v9100_v58 = vpack.c.bf16 %v9089_v13, %v9089_v13  ;;  %v9076_v33 = vld [vmem:[#allocation7 + $0x10] sm:$0x3f] }
 0x672   : > { %1682 = vperm.xlu1 %13116, %v1556_v41   ;;  %v9085_v40 = vpack.c.bf16 %v16480_v44, %v9074_v12  ;;  %v9258_v0 = vld [vmem:[#allocation7 + $0xa] sm:$0xff]  ;;  %v9086_v19 = vpack.c.bf16 %v9076_v33, %v9076_v33  ;;  %v9257_v53 = vld [vmem:[#allocation7 + $0x2] sm:$0xff] }
 0x673   : > { %12613 = vmatprep.mubr.msk.bf16.mxu1 %vm469_vm3, %v9099_v34  ;;  %v9269_v22 = vpack.c.bf16 %v9258_v0, %v9257_v53  ;;  %v16516_v3 = vld [vmem:[#allocation7 + $0xe] sm:$0xff]  ;;  %v9352_v35 = vld [vmem:[#allocation7 + $0x6] sm:$0xff] }
 0x674   : > { %12614 = vmatmul.mubr.msk.bf16.vlgmr.msra.gmra.mrb[180].mxu1 %vm469_vm3, %v9100_v58  ;;  %v9364_v18 = vpack.c.bf16 %v16516_v3, %v9352_v35  ;;  %v9448_v56 = vld [vmem:[#allocation7 + $0xf] sm:$0xff]  ;;  %v9447_v27 = vld [vmem:[#allocation7 + $0x7] sm:$0xff] }
 0x675   : > { %12618 = vmatpush3.bf16.msra.mxu1 %v16435_v9  ;;  %12625 = vmatprep.mubr.msk.bf16.mxu1 %vm469_vm3, %v9085_v40  ;;  %v9459_v24 = vpack.c.bf16 %v9448_v56, %v9447_v27  ;;  %v9637_v13 = vld [vmem:[#allocation7 + $0xc] sm:$0xff]  ;;  %v13553_v53 = vld [vmem:[%s16976_s12 + $0x108] sm:$0xff]   ;;  %v13559_v56 = vld [vmem:[%s16975_s11 + $0x40] sm:$0xff]  }
 0x676   : > { %1772 = vperm.xlu1 %13116, %v1574_v42   ;;  %12619 = vmatprep.subr.bf16.mxu1 %v13520_v4  ;;  %v9259_v9 = vld [vmem:[#allocation7 + $0x12] sm:$0x3f]  ;;  %v9544_v41 = vld [vmem:[#allocation7 + $0x18] sm:$0x3f]  ;;  %v13541_v58 = vld [vmem:[%s16976_s12 + $0xd0] sm:$0xff]  }
 0x677   : > { %v9270_v37 = vpack.c.bf16 %v9259_v9, %v9259_v9  ;;  %v9354_v49 = vld [vmem:[#allocation7 + $0x16] sm:$0x3f]  ;;  %v9555_v11 = vpack.c.bf16 %v9544_v41, %v9544_v41  ;;  %v9639_v40 = vld [vmem:[#allocation7 + $0x1c] sm:$0x3f] }
 0x678   : > { %v9365_v30 = vpack.c.bf16 %v9354_v49, %v9354_v49  ;;  %v9449_v43 = vld [vmem:[#allocation7 + $0x17] sm:$0x3f]  ;;  %v13554_v9 = vld [vmem:[%s16975_s11 + $0x8] sm:$0xff]  }
 0x679   : > { %12620 = vmatpush3.bf16.msra.mxu1 %v13520_v4  ;;  %v9543_v25 = vld [vmem:[#allocation7 + $0x10] sm:$0xff]  ;;  %v9460_v32 = vpack.c.bf16 %v9449_v43, %v9449_v43  ;;  %v13543_v4 = vld [vmem:[%s16976_s12 + $0xe0] sm:$0xff]  }
 0x67a   : > { %12621 = vmatprep.subr.bf16.mxu1 %v13521_v61  ;;  %v9554_v17 = vpack.c.bf16 %v9543_v25, %v16480_v44  ;;  %v9638_v50 = vld [vmem:[#allocation7 + $0x14] sm:$0xff]  ;;  %v13540_v44 = vld [vmem:[%s16976_s12 + $0xc8] sm:$0xff]  }
 0x67b   : > { %v9649_v34 = vpack.c.bf16 %v9638_v50, %v9637_v13  ;;  %v13542_v12 = vld [vmem:[%s16976_s12 + $0xd8] sm:$0xff]  }
 0x67c   : > { %v9733_v42 = vld [vmem:[#allocation7 + $0x15] sm:$0xff] }
 0x67d   : > { %12622 = vmatpush3.bf16.msra.mxu1 %v13521_v61  ;;  %v9650_v61 = vpack.c.bf16 %v9639_v40, %v9639_v40  ;;  %v13549_v0 = vld [vmem:[%s16976_s12 + $0xf8] sm:$0xff]  }
 0x67e   : > { %12623 = vmatprep.subr.bf16.mxu1 %v13522_v54  ;;  %v13557_v35 = vld [vmem:[%s16976_s12 + $0x118] sm:$0xff]  }
 0x680   : > { %v8172_v6 = vpop.f32.mrb[172].mxu1 }
 0x681   : > { %v8186_v23 = vmax.f32 %v8172_v6, 0.0  ;;  %v8174_v31 = vpop.f32.mrb[173].mxu1  ;;  %12624 = vmatpush3.bf16.msra.mxu1 %v13522_v54  ;;  %v9732_v54 = vld [vmem:[#allocation7 + $0xd] sm:$0xff] }
 0x682   : > { %v8175_v7 = vpop.f32.mrb[174].mxu1  ;;  %12629 = vmatprep.subr.bf16.mxu1 %v13523_v2  ;;  %v9744_v33 = vpack.c.bf16 %v9733_v42, %v9732_v54  ;;  %v13547_v6 = vld [vmem:[%s16976_s12 + $0xf0] sm:$0xff]  }
 0x683   : > { %v8187_v36 = vmax.f32 %v8175_v7, 0.0  ;;  %8192 = vrot.lane.b32.xlu0 %v8186_v23, %s13657_s17  ;;  %v8177_v48 = vpop.f32.mrb[175].mxu1  ;;  %v9734_v7 = vld [vmem:[#allocation7 + $0x1d] sm:$0x3f] }
 0x684   : > { %12626 = vmatmul.mubr.msk.bf16.vlgmr.msra.gmra.mrb[180].mxu1 %vm469_vm3, %v9086_v19  ;;  %v13551_v19 = vld [vmem:[%s16976_s12 + $0x100] sm:$0xff]  }
 0x685   : > { %8194 = vrot.lane.b32.xlu1 %v8187_v36, %s13657_s17  ;;  %12630 = vmatpush3.bf16.msra.mxu1 %v13523_v2  ;;  %v13545_v2 = vld [vmem:[%s16976_s12 + $0xe8] sm:$0xff]   ;;  %v9745_v36 = vpack.c.bf16 %v9734_v7, %v9734_v7  ;;  %v9828_v48 = vld [vmem:[#allocation7 + $0x16] sm:$0xff] }
 0x686   : > { %12637 = vmatprep.mubr.msk.bf16.mxu1 %vm469_vm3, %v9269_v22  ;;  %12631 = vmatprep.subr.bf16.mxu1 %v13524_v16  ;;  %v13572_v7 = vld [vmem:[%s16975_s11 + $0xa8] sm:$0xff]  }
 0x689   : > { %12632 = vmatpush3.bf16.msra.mxu1 %v13524_v16 }
 0x68a   : > { %12633 = vmatprep.subr.bf16.mxu1 %v13525_v39 }
 0x68c   : > { %v8180_v28 = vpop.f32.mrb[176].mxu1 }
 0x68d   : > { %12634 = vmatpush3.bf16.msra.mxu1 %v13525_v39  ;;  %v8188_v62 = vmax.f32 %v8180_v28, 0.0  ;;  %v8182_v57 = vpop.f32.mrb[177].mxu1  ;;  %v9839_v28 = vpack.c.bf16 %v9828_v48, %v16516_v3  ;;  %v13555_v3 = vld [vmem:[%s16976_s12 + $0x110] sm:$0xff]   ;;  %v13575_v48 = vld [vmem:[%s16975_s11 + $0xc0] sm:$0xff]  }
 0x68e   : > { %12635 = vmatprep.subr.bf16.mxu1 %v13526_v1  ;;  %v8183_v15 = vpop.f32.mrb[178].mxu1 }
 0x68f   : > { %8196 = vrot.lane.b32.xlu0 %v8188_v62, %s13657_s17  ;;  %v8184_v26 = vpop.f32.mrb[179].mxu1 }
 0x691   : > { %12636 = vmatpush3.bf16.msra.mxu1 %v13526_v1 }
 0x692   : > { %12641 = vmatprep.subr.bf16.mxu1 %v13527_v45 }
 0x694   : > { %12638 = vmatmul.mubr.msk.bf16.vlgmr.msra.gmra.mrb[180].mxu1 %vm469_vm3, %v9270_v37  ;;  %v13556_v37 = vld [vmem:[%s16975_s11 + $0x10] sm:$0xff]  }
 0x695   : > { %12642 = vmatpush3.bf16.msra.mxu1 %v13527_v45  ;;  %12649 = vmatprep.mubr.msk.bf16.mxu1 %vm469_vm3, %v9364_v18  ;;  %v9829_v18 = vld [vmem:[#allocation7 + $0x1e] sm:$0x3f] }
 0x696   : > { %12643 = vmatprep.subr.bf16.mxu1 %v13528_v20 }
 0x699   : > { %12644 = vmatpush3.bf16.msra.mxu1 %v13528_v20 }
 0x69a   : > { %12645 = vmatprep.subr.bf16.mxu1 %v13529_v21 }
 0x69d   : > { %12646 = vmatpush3.bf16.msra.mxu1 %v13529_v21  ;;  %v16621_v21 = vld [vmem:[#allocation4 + $0x40] sm:$0xff] }
 0x69e   : > { %12647 = vmatprep.subr.bf16.mxu1 %v13530_v10  ;;  %548 = vst.msk [vmem:[#allocation8 + $0x10] sm:$0xff] %vm545_vm15, %v16621_v21  ;;  %549 = vst.msk [vmem:[#allocation8 + $0x18] sm:$0xff] %vm545_vm15, %v16621_v21 }
 0x69f   : > { %546 = vst.msk [vmem:[#allocation8] sm:$0xff] %vm545_vm15, %v16621_v21  ;;  %547 = vst.msk [vmem:[#allocation8 + $0x8] sm:$0xff] %vm545_vm15, %v16621_v21 }
 0x6a0   : > { %551 = vst.msk [vmem:[#allocation8 + $0x20] sm:$0xf] %vm550_vm2, %v16621_v21  ;;  %v13591_v21 = vld [vmem:[%s16977_s13 + $0x50] sm:$0xff]  }
 0x6a1   : > { %12648 = vmatpush3.bf16.msra.mxu1 %v13530_v10 }
 0x6a2   : > { %12653 = vmatprep.subr.bf16.mxu1 %v13531_v5 }
 0x6a4   : > { %12650 = vmatmul.mubr.msk.bf16.vlgmr.msra.gmra.mrb[180].mxu1 %vm469_vm3, %v9365_v30 }
 0x6a5   : > { %12654 = vmatpush3.bf16.msra.mxu1 %v13531_v5  ;;  %12661 = vmatprep.mubr.msk.bf16.mxu1 %vm469_vm3, %v9459_v24  ;;  %v9840_v5 = vpack.c.bf16 %v9829_v18, %v9829_v18  ;;  %v13582_v18 = vld [vmem:[%s16975_s11 + $0xf8] sm:$0xff]  }
 0x6a6   : > { %12655 = vmatprep.subr.bf16.mxu1 %v13532_v38 }
 0x6a9   : > { %12656 = vmatpush3.bf16.msra.mxu1 %v13532_v38 }
 0x6aa   : > { %12657 = vmatprep.subr.bf16.mxu1 %v13533_v52 }
 0x6ad   : > { %12658 = vmatpush3.bf16.msra.mxu1 %v13533_v52 }
 0x6ae   : > { %12659 = vmatprep.subr.bf16.mxu1 %v13534_v60 }
 0x6b1   : > { %12660 = vmatpush3.bf16.msra.mxu1 %v13534_v60 }
 0x6b2   : > { %12665 = vmatprep.subr.bf16.mxu1 %v13535_v47 }
 0x6b4   : > { %12662 = vmatmul.mubr.msk.bf16.vlgmr.msra.gmra.mrb[180].mxu1 %vm469_vm3, %v9460_v32  ;;  %v13561_v32 = vld [vmem:[%s16975_s11 + $0x50] sm:$0xff]  }
 0x6b5   : > { %12666 = vmatpush3.bf16.msra.mxu1 %v13535_v47  ;;  %12673 = vmatprep.mubr.msk.bf16.mxu1 %vm469_vm3, %v9554_v17  ;;  %v13560_v47 = vld [vmem:[%s16975_s11 + $0x48] sm:$0xff]   ;;  %v13563_v17 = vld [vmem:[%s16975_s11 + $0x60] sm:$0xff]  }
 0x6b6   : > { %12667 = vmatprep.subr.bf16.mxu1 %v13536_v63 }
 0x6b9   : > { %12668 = vmatpush3.bf16.msra.mxu1 %v13536_v63  ;;  %v13562_v63 = vld [vmem:[%s16975_s11 + $0x58] sm:$0xff]  }
 0x6ba   : > { %12669 = vmatprep.subr.bf16.mxu1 %v13537_v55 }
 0x6bd   : > { %12670 = vmatpush3.bf16.msra.mxu1 %v13537_v55 }
 0x6be   : > { %12671 = vmatprep.subr.bf16.mxu1 %v13538_v29 }
 0x6c1   : > { %12672 = vmatpush3.bf16.msra.mxu1 %v13538_v29 }
 0x6c2   : > { %12677 = vmatprep.subr.bf16.mxu1 %v13539_v51 }
 0x6c4   : > { %12674 = vmatmul.mubr.msk.bf16.vlgmr.msra.gmra.mrb[180].mxu1 %vm469_vm3, %v9555_v11  ;;  %v13564_v11 = vld [vmem:[%s16975_s11 + $0x68] sm:$0xff]  }
 0x6c5   : > { %12678 = vmatpush3.bf16.msra.mxu1 %v13539_v51  ;;  %12685 = vmatprep.mubr.msk.bf16.mxu1 %vm469_vm3, %v9649_v34  ;;  %v13566_v34 = vld [vmem:[%s16975_s11 + $0x78] sm:$0xff]  }
 0x6c6   : > { %12679 = vmatprep.subr.bf16.mxu1 %v13540_v44 }
 0x6c9   : > { %12680 = vmatpush3.bf16.msra.mxu1 %v13540_v44  ;;  %v13565_v44 = vld [vmem:[%s16975_s11 + $0x70] sm:$0xff]  }
 0x6ca   : > { %12681 = vmatprep.subr.bf16.mxu1 %v13541_v58 }
 0x6cd   : > { %12682 = vmatpush3.bf16.msra.mxu1 %v13541_v58  ;;  %v13567_v58 = vld [vmem:[%s16975_s11 + $0x80] sm:$0xff]  }
 0x6ce   : > { %12683 = vmatprep.subr.bf16.mxu1 %v13542_v12 }
 0x6d1   : > { %12684 = vmatpush3.bf16.msra.mxu1 %v13542_v12 }
 0x6d2   : > { %12689 = vmatprep.subr.bf16.mxu1 %v13543_v4 }
 0x6d4   : > { %12686 = vmatmul.mubr.msk.bf16.vlgmr.msra.gmra.mrb[180].mxu1 %vm469_vm3, %v9650_v61  ;;  %v13568_v61 = vld [vmem:[%s16975_s11 + $0x88] sm:$0xff]  }
 0x6d5   : > { %12690 = vmatpush3.bf16.msra.mxu1 %v13543_v4  ;;  %12697 = vmatprep.mubr.msk.bf16.mxu1 %vm469_vm3, %v9744_v33  ;;  %v13570_v33 = vld [vmem:[%s16975_s11 + $0x98] sm:$0xff]  }
 0x6d6   : > { %12691 = vmatprep.subr.bf16.mxu1 %v13545_v2 }
 0x6d8   : > { %v7760_v23 = vpop.permute.xlu1 %7759 }
 0x6d9   : > { %7768 = vst.msk [vmem:[#allocation6 + $0x7] sm:$0xff] %vm469_vm3, %v7760_v23  ;;  %12692 = vmatpush3.bf16.msra.mxu1 %v13545_v2  ;;  %v13569_v2 = vld [vmem:[%s16975_s11 + $0x90] sm:$0xff]  }
 0x6da   : > { %v7762_v31 = vpop.permute.xlu0 %7761  ;;  %12693 = vmatprep.subr.bf16.mxu1 %v13547_v6 }
 0x6db   : > { %7769 = vst.msk [vmem:[#allocation6 + $0xf] sm:$0xff] %vm469_vm3, %v7762_v31 }
 0x6dd   : > { %12694 = vmatpush3.bf16.msra.mxu1 %v13547_v6  ;;  %v13571_v6 = vld [vmem:[%s16975_s11 + $0xa0] sm:$0xff]  }
 0x6de   : > { %12695 = vmatprep.subr.bf16.mxu1 %v13549_v0 }
 0x6e0   : > { %v7764_v16 = vpop.permute.xlu1 %7763  ;;  %v8219_v22 = vld [vmem:[#allocation6 + $0x1] sm:$0xff] }
 0x6e1   : > { %7770 = vst.msk [vmem:[#allocation6 + $0x17] sm:$0x3f] %vm2288_vm4, %v7764_v16  ;;  %12696 = vmatpush3.bf16.msra.mxu1 %v13549_v0  ;;  %v8206_v15 = vld [vmem:[#allocation6] sm:$0xff]  ;;  %v13573_v16 = vld [vmem:[%s16975_s11 + $0xb0] sm:$0xff]   ;;  %vm9072_vm4 = vcmask 1046016  }
 0x6e2   : > { %12701 = vmatprep.subr.bf16.mxu1 %v13551_v19  ;;  %v8220_v39 = vld [vmem:[#allocation6 + $0x9] sm:$0xff]  ;;  %v8221_v1 = vld [vmem:[#allocation6 + $0x11] sm:$0x3f] }
 0x6e3   : > { %v8231_v62 = vpack.c.bf16 %v8220_v39, %v8219_v22  ;;  %v8232_v57 = vpack.c.bf16 %v8221_v1, %v8221_v1  ;;  %v16597_v45 = vld [vmem:[#allocation6 + $0x8] sm:$0xff]  ;;  %v8208_v30 = vld [vmem:[#allocation6 + $0x10] sm:$0x3f] }
 0x6e4   : > { %12698 = vmatmul.mubr.msk.bf16.vlgmr.msra.gmra.mrb[180].mxu1 %vm469_vm3, %v9745_v36  ;;  %v8217_v26 = vpack.c.bf16 %v16597_v45, %v8206_v15  ;;  %v8390_v27 = vld [vmem:[#allocation6 + $0xa] sm:$0xff]  ;;  %v8218_v24 = vpack.c.bf16 %v8208_v30, %v8208_v30  ;;  %v8389_v60 = vld [vmem:[#allocation6 + $0x2] sm:$0xff]  ;;  %v13574_v36 = vld [vmem:[%s16975_s11 + $0xb8] sm:$0xff]  }
 0x6e5   : > { %12702 = vmatpush3.bf16.msra.mxu1 %v13551_v19  ;;  %12709 = vmatprep.mubr.msk.bf16.mxu1 %vm469_vm3, %v9839_v28  ;;  %v8401_v43 = vpack.c.bf16 %v8390_v27, %v8389_v60  ;;  %v16651_v51 = vld [vmem:[#allocation6 + $0xe] sm:$0xff]  ;;  %v8484_v50 = vld [vmem:[#allocation6 + $0x6] sm:$0xff] }
 0x6e6   : > { %12505 = vmatprep.mubr.msk.bf16.mxu0 %vm469_vm3, %v8231_v62  ;;  %12703 = vmatprep.subr.bf16.mxu1 %v13553_v53  ;;  %v8496_v13 = vpack.c.bf16 %v16651_v51, %v8484_v50  ;;  %v8580_v4 = vld [vmem:[#allocation6 + $0xf] sm:$0xff]  ;;  %v8579_v42 = vld [vmem:[#allocation6 + $0x7] sm:$0xff] }
 0x6e7   : > { %12506 = vmatmul.mubr.msk.bf16.vlgmr.msra.gmra.mrb[156].mxu0 %vm469_vm3, %v8232_v57  ;;  %v8591_v54 = vpack.c.bf16 %v8580_v4, %v8579_v42  ;;  %v8769_v1 = vld [vmem:[#allocation6 + $0xc] sm:$0xff]  ;;  %v13579_v15 = vld [vmem:[%s16975_s11 + $0xe0] sm:$0xff]  }
 0x6e8   : > { %12510 = vmatpush3.bf16.msra.mxu0 %v16459_v8  ;;  %12517 = vmatprep.mubr.msk.bf16.mxu0 %vm469_vm3, %v8217_v26  ;;  %v13558_v8 = vld [vmem:[%s16975_s11 + $0x18] sm:$0xff]   ;;  %v8391_v29 = vld [vmem:[#allocation6 + $0x12] sm:$0x3f]  ;;  %v13576_v28 = vld [vmem:[%s16975_s11 + $0xc8] sm:$0xff]  }
 0x6e9   : > { %12704 = vmatpush3.bf16.msra.mxu1 %v13553_v53  ;;  %12511 = vmatprep.subr.bf16.mxu0 %v13554_v9  ;;  %v8402_v41 = vpack.c.bf16 %v8391_v29, %v8391_v29  ;;  %v8486_v12 = vld [vmem:[#allocation6 + $0x16] sm:$0x3f]  ;;  %v13584_v30 = vld [vmem:[%s16975_s11 + $0x108] sm:$0xff]  }
 0x6ea   : > { %12705 = vmatprep.subr.bf16.mxu1 %v13555_v3  ;;  %v8497_v40 = vpack.c.bf16 %v8486_v12, %v8486_v12  ;;  %v8581_v23 = vld [vmem:[#allocation6 + $0x17] sm:$0x3f] }
 0x6eb   : > { %v1638_v20 = vpop.permute.xlu0 %1637  ;;  %v8675_v31 = vld [vmem:[#allocation6 + $0x10] sm:$0xff]  ;;  %v8592_v0 = vpack.c.bf16 %v8581_v23, %v8581_v23  ;;  %v8676_v53 = vld [vmem:[#allocation6 + $0x18] sm:$0x3f]  ;;  %v13598_v23 = vld [vmem:[%s16977_s13 + $0x28] sm:$0xff]  }
 0x6ec   : > { %12512 = vmatpush3.bf16.msra.mxu0 %v13554_v9  ;;  %v8686_v19 = vpack.c.bf16 %v8675_v31, %v16597_v45  ;;  %v8770_v22 = vld [vmem:[#allocation6 + $0x14] sm:$0xff]  ;;  %v8687_v39 = vpack.c.bf16 %v8676_v53, %v8676_v53  ;;  %v8771_v9 = vld [vmem:[#allocation6 + $0x1c] sm:$0x3f] }
 0x6ed   : > { %12706 = vmatpush3.bf16.msra.mxu1 %v13555_v3  ;;  %12513 = vmatprep.subr.bf16.mxu0 %v13556_v37  ;;  %v8781_v62 = vpack.c.bf16 %v8770_v22, %v8769_v1  ;;  %v13577_v57 = vld [vmem:[%s16975_s11 + $0xd0] sm:$0xff]   ;;  %v13578_v45 = vld [vmem:[%s16975_s11 + $0xd8] sm:$0xff]   ;;  %v8782_v3 = vpack.c.bf16 %v8771_v9, %v8771_v9  ;;  %v13599_v31 = vld [vmem:[%s16977_s13 + $0x60] sm:$0xff]  }
 0x6ee   : > { %12707 = vmatprep.subr.bf16.mxu1 %v13557_v35  ;;  %v8865_v26 = vld [vmem:[#allocation6 + $0x15] sm:$0xff]  ;;  %v13604_v1 = vld [vmem:[%s16977_s13 + $0x88] sm:$0xff]  }
 0x6ef   : > { %v1728_v10 = vpop.permute.xlu0 %1727  ;;  %v13587_v60 = vld [vmem:[%s16977_s13 + $0x30] sm:$0xff]   ;;  %v13602_v22 = vld [vmem:[%s16977_s13 + $0x78] sm:$0xff]  }
 0x6f0   : > { %12514 = vmatpush3.bf16.msra.mxu0 %v13556_v37  ;;  %v8864_v37 = vld [vmem:[#allocation6 + $0xd] sm:$0xff]  ;;  %v8866_v10 = vld [vmem:[#allocation6 + $0x1d] sm:$0x3f] }
 0x6f1   : > { %12708 = vmatpush3.bf16.msra.mxu1 %v13557_v35  ;;  %12515 = vmatprep.subr.bf16.mxu0 %v13558_v8  ;;  %v1683_v49 = vpop.permute.xlu1 %1682  ;;  %v13580_v35 = vld [vmem:[%s16975_s11 + $0xe8] sm:$0xff]   ;;  %v8876_v20 = vpack.c.bf16 %v8865_v26, %v8864_v37  ;;  %v13601_v53 = vld [vmem:[%s16977_s13 + $0x70] sm:$0xff]   ;;  %v13606_v9 = vld [vmem:[%s16977_s13 + $0x98] sm:$0xff]  }
 0x6f2   : > { %v8877_v49 = vpack.c.bf16 %v8866_v10, %v8866_v10  ;;  %v13608_v37 = vld [vmem:[%s16977_s13 + $0xa8] sm:$0xff]  }
 0x6f4   : > { %12516 = vmatpush3.bf16.msra.mxu0 %v13558_v8  ;;  %12710 = vmatmul.mubr.msk.bf16.vlgmr.msra.gmra.mrb[180].mxu1 %vm469_vm3, %v9840_v5  ;;  %v13581_v8 = vld [vmem:[%s16975_s11 + $0xf0] sm:$0xff]   ;;  %v13583_v5 = vld [vmem:[%s16975_s11 + $0x100] sm:$0xff]  }
 0x6f5   : > { %v8193_v38 = vpop.permute.xlu0 %8192  ;;  %12521 = vmatprep.subr.bf16.mxu0 %v13559_v56  ;;  %v1773_v52 = vpop.permute.xlu1 %1772 }
 0x6f6   : > { %8202 = vst.msk [vmem:[#allocation9 + $0x8] sm:$0xff] %vm8201_vm0, %v8193_v38  ;;  %v13585_v38 = vld [vmem:[%s16975_s11 + $0x110] sm:$0xff]   ;;  %v8961_v52 = vld [vmem:[#allocation6 + $0x1e] sm:$0x3f] }
 0x6f7   : > { %12518 = vmatmul.mubr.msk.bf16.vlgmr.msra.gmra.mrb[156].mxu0 %vm469_vm3, %v8218_v24  ;;  %v13586_v24 = vld [vmem:[%s16975_s11 + $0x118] sm:$0xff]  }
 0x6f8   : > { %12522 = vmatpush3.bf16.msra.mxu0 %v13559_v56  ;;  %12529 = vmatprep.mubr.msk.bf16.mxu0 %vm469_vm3, %v8401_v43  ;;  %v8960_v56 = vld [vmem:[#allocation6 + $0x16] sm:$0xff] }
 0x6f9   : > { %12523 = vmatprep.subr.bf16.mxu0 %v13560_v47  ;;  %v8195_v25 = vpop.permute.xlu1 %8194  ;;  %v8971_v27 = vpack.c.bf16 %v8960_v56, %v16651_v51  ;;  %v13588_v43 = vld [vmem:[%s16977_s13 + $0x38] sm:$0xff]   ;;  %v13612_v56 = vld [vmem:[%s16977_s13 + $0xc8] sm:$0xff]  }
 0x6fa   : > { %8203 = vst.msk [vmem:[#allocation9 + $0x18] sm:$0xff] %vm8201_vm0, %v8195_v25  ;;  %v13589_v25 = vld [vmem:[%s16977_s13 + $0x40] sm:$0xff]  }
 0x6fc   : > { %12524 = vmatpush3.bf16.msra.mxu0 %v13560_v47  ;;  %v8972_v47 = vpack.c.bf16 %v8961_v52, %v8961_v52  ;;  %v13616_v52 = vld [vmem:[%s16977_s13 + $0xe8] sm:$0xff]  }
 0x6fd   : > { %12525 = vmatprep.subr.bf16.mxu0 %v13561_v32 }
 0x700   : > { %12526 = vmatpush3.bf16.msra.mxu0 %v13561_v32  ;;  %v13590_v32 = vld [vmem:[%s16977_s13 + $0x48] sm:$0xff]  }
 0x701   : > { %12527 = vmatprep.subr.bf16.mxu0 %v13562_v63  ;;  %v8197_v55 = vpop.permute.xlu0 %8196 }
 0x702   : > { %8205 = vst.msk [vmem:[#allocation9 + $0x28] sm:$0x3f] %vm8204_vm1, %v8197_v55 }
 0x704   : > { %12528 = vmatpush3.bf16.msra.mxu0 %v13562_v63  ;;  %v13592_v63 = vld [vmem:[%s16977_s13 + $0x58] sm:$0xff]  }
 0x705   : > { %12533 = vmatprep.subr.bf16.mxu0 %v13563_v17 }
 0x707   : > { %12530 = vmatmul.mubr.msk.bf16.vlgmr.msra.gmra.mrb[156].mxu0 %vm469_vm3, %v8402_v41 }
 0x708   : > { %12534 = vmatpush3.bf16.msra.mxu0 %v13563_v17  ;;  %12541 = vmatprep.mubr.msk.bf16.mxu0 %vm469_vm3, %v8496_v13  ;;  %v13593_v17 = vld [vmem:[%s16977_s13] sm:$0xff]  }
 0x709   : > { %12535 = vmatprep.subr.bf16.mxu0 %v13564_v11 }
 0x70c   : > { %12536 = vmatpush3.bf16.msra.mxu0 %v13564_v11 }
 0x70d   : > { %12537 = vmatprep.subr.bf16.mxu0 %v13565_v44 }
 0x710   : > { %12538 = vmatpush3.bf16.msra.mxu0 %v13565_v44 }
 0x711   : > { %12539 = vmatprep.subr.bf16.mxu0 %v13566_v34 }
 0x714   : > { %12540 = vmatpush3.bf16.msra.mxu0 %v13566_v34 }
 0x715   : > { %12545 = vmatprep.subr.bf16.mxu0 %v13567_v58 }
 0x717   : > { %12542 = vmatmul.mubr.msk.bf16.vlgmr.msra.gmra.mrb[156].mxu0 %vm469_vm3, %v8497_v40 }
 0x718   : > { %12546 = vmatpush3.bf16.msra.mxu0 %v13567_v58  ;;  %12553 = vmatprep.mubr.msk.bf16.mxu0 %vm469_vm3, %v8591_v54 }
 0x719   : > { %12547 = vmatprep.subr.bf16.mxu0 %v13568_v61 }
 0x71c   : > { %12548 = vmatpush3.bf16.msra.mxu0 %v13568_v61 }
 0x71d   : > { %12549 = vmatprep.subr.bf16.mxu0 %v13569_v2 }
 0x720   : > { %12550 = vmatpush3.bf16.msra.mxu0 %v13569_v2 }
 0x721   : > { %12551 = vmatprep.subr.bf16.mxu0 %v13570_v33 }
 0x724   : > { %12552 = vmatpush3.bf16.msra.mxu0 %v13570_v33  ;;  %v13596_v33 = vld [vmem:[%s16977_s13 + $0x18] sm:$0xff]  }
 0x725   : > { %12557 = vmatprep.subr.bf16.mxu0 %v13571_v6 }
 0x727   : > { %12554 = vmatmul.mubr.msk.bf16.vlgmr.msra.gmra.mrb[156].mxu0 %vm469_vm3, %v8592_v0 }
 0x728   : > { %12558 = vmatpush3.bf16.msra.mxu0 %v13571_v6  ;;  %12565 = vmatprep.mubr.msk.bf16.mxu0 %vm469_vm3, %v8686_v19  ;;  %v13597_v6 = vld [vmem:[%s16977_s13 + $0x20] sm:$0xff]  }
 0x729   : > { %12559 = vmatprep.subr.bf16.mxu0 %v13572_v7 }
 0x72c   : > { %12560 = vmatpush3.bf16.msra.mxu0 %v13572_v7 }
 0x72d   : > { %12561 = vmatprep.subr.bf16.mxu0 %v13573_v16 }
 0x730   : > { %12562 = vmatpush3.bf16.msra.mxu0 %v13573_v16 }
 0x731   : > { %12563 = vmatprep.subr.bf16.mxu0 %v13574_v36 }
 0x734   : > { %12564 = vmatpush3.bf16.msra.mxu0 %v13574_v36  ;;  %v13600_v36 = vld [vmem:[%s16977_s13 + $0x68] sm:$0xff]  }
 0x735   : > { %12569 = vmatprep.subr.bf16.mxu0 %v13575_v48 }
 0x737   : > { %12566 = vmatmul.mubr.msk.bf16.vlgmr.msra.gmra.mrb[156].mxu0 %vm469_vm3, %v8687_v39  ;;  %v13603_v39 = vld [vmem:[%s16977_s13 + $0x80] sm:$0xff]  }
 0x738   : > { %12570 = vmatpush3.bf16.msra.mxu0 %v13575_v48  ;;  %12577 = vmatprep.mubr.msk.bf16.mxu0 %vm469_vm3, %v8781_v62 }
 0x739   : > { %12571 = vmatprep.subr.bf16.mxu0 %v13576_v28 }
 0x73c   : > { %12572 = vmatpush3.bf16.msra.mxu0 %v13576_v28  ;;  %v13605_v28 = vld [vmem:[%s16977_s13 + $0x90] sm:$0xff]  }
 0x73d   : > { %12573 = vmatprep.subr.bf16.mxu0 %v13577_v57 }
 0x740   : > { %12574 = vmatpush3.bf16.msra.mxu0 %v13577_v57 }
 0x741   : > { %12575 = vmatprep.subr.bf16.mxu0 %v13578_v45 }
 0x744   : > { %12576 = vmatpush3.bf16.msra.mxu0 %v13578_v45 }
 0x745   : > { %12581 = vmatprep.subr.bf16.mxu0 %v13579_v15 }
 0x747   : > { %12578 = vmatmul.mubr.msk.bf16.vlgmr.msra.gmra.mrb[156].mxu0 %vm469_vm3, %v8782_v3  ;;  %v13607_v3 = vld [vmem:[%s16977_s13 + $0xa0] sm:$0xff]  }
 0x748   : > { %12582 = vmatpush3.bf16.msra.mxu0 %v13579_v15  ;;  %12589 = vmatprep.mubr.msk.bf16.mxu0 %vm469_vm3, %v8876_v20  ;;  %v13610_v20 = vld [vmem:[%s16977_s13 + $0xb8] sm:$0xff]  }
 0x749   : > { %12583 = vmatprep.subr.bf16.mxu0 %v13580_v35 }
 0x74c   : > { %12584 = vmatpush3.bf16.msra.mxu0 %v13580_v35  ;;  %v13609_v35 = vld [vmem:[%s16977_s13 + $0xb0] sm:$0xff]  }
 0x74d   : > { %12585 = vmatprep.subr.bf16.mxu0 %v13581_v8 }
 0x750   : > { %12586 = vmatpush3.bf16.msra.mxu0 %v13581_v8  ;;  %v13611_v8 = vld [vmem:[%s16977_s13 + $0xc0] sm:$0xff]  }
 0x751   : > { %12587 = vmatprep.subr.bf16.mxu0 %v13582_v18 }
 0x754   : > { %12588 = vmatpush3.bf16.msra.mxu0 %v13582_v18 }
 0x755   : > { %12593 = vmatprep.subr.bf16.mxu0 %v13583_v5 }
 0x757   : > { %12590 = vmatmul.mubr.msk.bf16.vlgmr.msra.gmra.mrb[156].mxu0 %vm469_vm3, %v8877_v49 }
 0x758   : > { %12594 = vmatpush3.bf16.msra.mxu0 %v13583_v5  ;;  %12601 = vmatprep.mubr.msk.bf16.mxu0 %vm469_vm3, %v8971_v27  ;;  %v13613_v27 = vld [vmem:[%s16977_s13 + $0xd0] sm:$0xff]  }
 0x759   : > { %12595 = vmatprep.subr.bf16.mxu0 %v13584_v30 }
 0x75c   : > { %12596 = vmatpush3.bf16.msra.mxu0 %v13584_v30 }
 0x75d   : > { %12597 = vmatprep.subr.bf16.mxu0 %v13585_v38 }
 0x760   : > { %12598 = vmatpush3.bf16.msra.mxu0 %v13585_v38  ;;  %v13614_v38 = vld [vmem:[%s16977_s13 + $0xd8] sm:$0xff]  }
 0x761   : > { %12599 = vmatprep.subr.bf16.mxu0 %v13586_v24 }
 0x764   : > { %12600 = vmatpush3.bf16.msra.mxu0 %v13586_v24  ;;  %v13615_v24 = vld [vmem:[%s16977_s13 + $0xe0] sm:$0xff]  }
 0x765   : > { %12713 = vmatprep.subr.bf16.mxu0 %v13587_v60 }
 0x767   : > { %12602 = vmatmul.mubr.msk.bf16.vlgmr.msra.gmra.mrb[156].mxu0 %vm469_vm3, %v8972_v47  ;;  %vm9930_vm3 = vcmask 783360  }
 0x768   : > { %12714 = vmatpush3.bf16.msra.mxu0 %v13587_v60  ;;  %v13617_v60 = vld [vmem:[%s16977_s13 + $0xf0] sm:$0xff]  }
 0x769   : > { %12715 = vmatprep.subr.bf16.mxu0 %v13588_v43 }
 0x76c   : > { %12716 = vmatpush3.bf16.msra.mxu0 %v13588_v43 }
 0x76d   : > { %12717 = vmatprep.subr.bf16.mxu0 %v13589_v25 }
 0x770   : > { %12718 = vmatpush3.bf16.msra.mxu0 %v13589_v25 }
 0x771   : > { %12719 = vmatprep.subr.bf16.mxu0 %v13590_v32 }
 0x774   : > { %12720 = vmatpush3.bf16.msra.mxu0 %v13590_v32  ;;  %v13618_v32 = vld [vmem:[%s16977_s13 + $0xf8] sm:$0xff]  }
 0x775   : > { %12721 = vmatprep.subr.bf16.mxu0 %v13591_v21 }
 0x778   : > { %12722 = vmatpush3.bf16.msra.mxu0 %v13591_v21 }
 0x779   : > { %12723 = vmatprep.subr.bf16.mxu0 %v13592_v63 }
 0x77c   : > { %12724 = vmatpush3.bf16.msra.mxu0 %v13592_v63 }
 0x77d   : > { %12729 = vmatprep.subr.bf16.mxu0 %v13593_v17 }
 0x7c7   : > { %v12711_v55 = vpop.f32.mrb[180].mxu1 }
 0x7c8   : > { %v9924_v29 = vmax.f32 %v12711_v55, 0.0  ;;  %v9905_v51 = vpop.f32.mrb[181].mxu1 }
 0x7c9   : > { %v9922_v41 = vmax.f32 %v9905_v51, 0.0  ;;  %v12712_v50 = vpop.f32.mrb[182].mxu1  ;;  %v13619_v51 = vld [vmem:[%s16977_s13 + $0x100] sm:$0xff]  }
 0x7ca   : > { %v9927_v11 = vmul.f32 %v9924_v29, %v17105_v46  ;;  %v9908_v13 = vpop.f32.mrb[183].mxu1 }
 0x7cb   : > { %v9925_v44 = vmul.f32 %v9922_v41, %v17104_v59  ;;  %v9923_v34 = vmax.f32 %v9908_v13, 0.0  ;;  %v13594_v59 = vld [vmem:[%s16977_s13 + $0x8] sm:$0xff]  }
 0x7cc   : > { %9931 = vst.msk [vmem:[#allocation8 + $0x17] sm:$0x3f] %vm9930_vm3, %v9927_v11  ;;  %v13620_v13 = vld [vmem:[%s16977_s13 + $0x108] sm:$0xff]  }
 0x7cd   : > { %9928 = vst.msk [vmem:[#allocation8 + $0x7] sm:$0xff] %vm545_vm15, %v9925_v44  ;;  %v9926_v58 = vmul.f32 %v9923_v34, %v17098_v14  ;;  %v13595_v14 = vld [vmem:[%s16977_s13 + $0x10] sm:$0xff]   ;;  %v1583_v44 = vld [vmem:[%s16965_s1 + $0x140] sm:$0xff]  ;;  %v1592_v34 = vld [vmem:[%s16965_s1 + $0x188] sm:$0xff] }
 0x7cf   : > { %9929 = vst.msk [vmem:[#allocation8 + $0xf] sm:$0xff] %vm545_vm15, %v9926_v58  ;;  %v13621_v58 = vld [vmem:[%s16977_s13 + $0x110] sm:$0xff]  }
 0x7d3   : > { %v10371_v47 = vld [vmem:[#allocation8 + $0x17] sm:$0x3f] }
 0x7d4   : > { %v9949_v12 = vld [vmem:[#allocation8 + $0x1] sm:$0xff]  ;;  %v10386_v25 = vpack.c.bf16 %v10371_v47, %v10371_v47 }
 0x7d5   : > { %v9932_v46 = vld [vmem:[#allocation8] sm:$0xff] }
 0x7d6   : > { %v9950_v4 = vld [vmem:[#allocation8 + $0x9] sm:$0xff]  ;;  %v9951_v40 = vld [vmem:[#allocation8 + $0x11] sm:$0x3f] }
 0x7d7   : > { %v16766_v42 = vld [vmem:[#allocation8 + $0x8] sm:$0xff]  ;;  %v9965_v61 = vpack.c.bf16 %v9950_v4, %v9949_v12  ;;  %v9966_v54 = vpack.c.bf16 %v9951_v40, %v9951_v40  ;;  %v9934_v0 = vld [vmem:[#allocation8 + $0x10] sm:$0x3f]  ;;  %v10260_v18 = vld [vmem:[#allocation8 + $0x16] sm:$0x3f] }
 0x7d8   : > { %v9947_v2 = vpack.c.bf16 %v16766_v42, %v9932_v46  ;;  %v10148_v7 = vld [vmem:[#allocation8 + $0xa] sm:$0xff]  ;;  %v9948_v19 = vpack.c.bf16 %v9934_v0, %v9934_v0  ;;  %v10147_v16 = vld [vmem:[#allocation8 + $0x2] sm:$0xff]  ;;  %v10149_v62 = vld [vmem:[#allocation8 + $0x12] sm:$0x3f]  ;;  %v10275_v5 = vpack.c.bf16 %v10260_v18, %v10260_v18 }
 0x7d9   : > { %12725 = vmatprep.mubr.msk.bf16.mxu0 %vm545_vm15, %v9965_v61  ;;  %v10163_v48 = vpack.c.bf16 %v10148_v7, %v10147_v16  ;;  %v16810_v57 = vld [vmem:[#allocation8 + $0xe] sm:$0xff]  ;;  %v10164_v45 = vpack.c.bf16 %v10149_v62, %v10149_v62  ;;  %v10258_v15 = vld [vmem:[#allocation8 + $0x6] sm:$0xff]  ;;  %v10482_v40 = vld [vmem:[#allocation8 + $0x18] sm:$0x3f] }
 0x7da   : > { %12726 = vmatmul.mubr.msk.bf16.vlgmr.msra.gmra.mrb[160].mxu0 %vm545_vm15, %v9966_v54  ;;  %v10274_v26 = vpack.c.bf16 %v16810_v57, %v10258_v15  ;;  %v10370_v10 = vld [vmem:[#allocation8 + $0xf] sm:$0xff]  ;;  %v10369_v49 = vld [vmem:[#allocation8 + $0x7] sm:$0xff]  ;;  %v10497_v54 = vpack.c.bf16 %v10482_v40, %v10482_v40  ;;  %v13624_v46 = vld [vmem:[%s16977_s13 + $0x128] sm:$0xff]  }
 0x7db   : > { %12730 = vmatpush3.bf16.msra.mxu0 %v13593_v17  ;;  %12741 = vmatprep.mubr.msk.bf16.mxu0 %vm545_vm15, %v9947_v2  ;;  %v10385_v30 = vpack.c.bf16 %v10370_v10, %v10369_v49  ;;  %v10481_v43 = vld [vmem:[#allocation8 + $0x10] sm:$0xff]  ;;  %v13622_v12 = vld [vmem:[%s16977_s13 + $0x118] sm:$0xff]   ;;  %v13625_v2 = vld [vmem:[%s16977_s13 + $0x130] sm:$0xff]  }
 0x7dc   : > { %12731 = vmatprep.subr.bf16.mxu0 %v13594_v59  ;;  %v10496_v21 = vpack.c.bf16 %v10481_v43, %v16766_v42  ;;  %v13623_v4 = vld [vmem:[%s16977_s13 + $0x120] sm:$0xff]   ;;  %v13630_v16 = vld [vmem:[%s16977_s13 + $0x158] sm:$0xff]   ;;  %v13636_v15 = vld [vmem:[%s16977_s13 + $0x188] sm:$0xff]  }
 0x7dd   : > { %v10591_v42 = vld [vmem:[#allocation8 + $0xc] sm:$0xff]  ;;  %v10592_v61 = vld [vmem:[#allocation8 + $0x14] sm:$0xff] }
 0x7de   : > { %v10702_v0 = vld [vmem:[#allocation8 + $0xd] sm:$0xff]  ;;  %v10703_v7 = vld [vmem:[#allocation8 + $0x15] sm:$0xff] }
 0x7df   : > { %12732 = vmatpush3.bf16.msra.mxu0 %v13594_v59  ;;  %v10607_v59 = vpack.c.bf16 %v10592_v61, %v10591_v42 }
 0x7e0   : > { %12733 = vmatprep.subr.bf16.mxu0 %v13595_v14 }
 0x7e3   : > { %12734 = vmatpush3.bf16.msra.mxu0 %v13595_v14  ;;  %v13626_v14 = vld [vmem:[%s16977_s13 + $0x138] sm:$0xff]  }
 0x7e4   : > { %12735 = vmatprep.subr.bf16.mxu0 %v13596_v33 }
 0x7e7   : > { %12736 = vmatpush3.bf16.msra.mxu0 %v13596_v33  ;;  %v13627_v33 = vld [vmem:[%s16977_s13 + $0x140] sm:$0xff]  }
 0x7e8   : > { %12737 = vmatprep.subr.bf16.mxu0 %v13597_v6 }
 0x7eb   : > { %12738 = vmatpush3.bf16.msra.mxu0 %v13597_v6  ;;  %v13628_v6 = vld [vmem:[%s16977_s13 + $0x148] sm:$0xff]  }
 0x7ec   : > { %12739 = vmatprep.subr.bf16.mxu0 %v13598_v23 }
 0x7ef   : > { %12740 = vmatpush3.bf16.msra.mxu0 %v13598_v23  ;;  %v13629_v23 = vld [vmem:[%s16977_s13 + $0x150] sm:$0xff]  }
 0x7f0   : > { %12745 = vmatprep.subr.bf16.mxu0 %v13599_v31 }
 0x7f2   : > { %12742 = vmatmul.mubr.msk.bf16.vlgmr.msra.gmra.mrb[160].mxu0 %vm545_vm15, %v9948_v19 }
 0x7f3   : > { %12746 = vmatpush3.bf16.msra.mxu0 %v13599_v31  ;;  %12757 = vmatprep.mubr.msk.bf16.mxu0 %vm545_vm15, %v10163_v48  ;;  %v10593_v31 = vld [vmem:[#allocation8 + $0x1c] sm:$0x3f]  ;;  %v13631_v48 = vld [vmem:[%s16977_s13 + $0x160] sm:$0xff]  }
 0x7f4   : > { %12747 = vmatprep.subr.bf16.mxu0 %v13600_v36  ;;  %v10608_v19 = vpack.c.bf16 %v10593_v31, %v10593_v31 }
 0x7f7   : > { %12748 = vmatpush3.bf16.msra.mxu0 %v13600_v36  ;;  %v10718_v36 = vpack.c.bf16 %v10703_v7, %v10702_v0 }
 0x7f8   : > { %12749 = vmatprep.subr.bf16.mxu0 %v13601_v53 }
 0x7fb   : > { %12750 = vmatpush3.bf16.msra.mxu0 %v13601_v53  ;;  %v13632_v53 = vld [vmem:[%s16977_s13 + $0x168] sm:$0xff]  }
 0x7fc   : > { %12751 = vmatprep.subr.bf16.mxu0 %v13602_v22 }
 0x7ff   : > { %12752 = vmatpush3.bf16.msra.mxu0 %v13602_v22  ;;  %v13633_v22 = vld [vmem:[%s16977_s13 + $0x170] sm:$0xff]  }
 0x800   : > { %12753 = vmatprep.subr.bf16.mxu0 %v13603_v39 }
 0x803   : > { %12754 = vmatpush3.bf16.msra.mxu0 %v13603_v39  ;;  %v13634_v39 = vld [vmem:[%s16977_s13 + $0x178] sm:$0xff]  }
 0x804   : > { %12755 = vmatprep.subr.bf16.mxu0 %v13604_v1 }
 0x807   : > { %12756 = vmatpush3.bf16.msra.mxu0 %v13604_v1  ;;  %v10704_v1 = vld [vmem:[#allocation8 + $0x1d] sm:$0x3f] }
 0x808   : > { %12761 = vmatprep.subr.bf16.mxu0 %v13605_v28  ;;  %v10719_v62 = vpack.c.bf16 %v10704_v1, %v10704_v1 }
 0x80a   : > { %12758 = vmatmul.mubr.msk.bf16.vlgmr.msra.gmra.mrb[160].mxu0 %vm545_vm15, %v10164_v45  ;;  %v10814_v45 = vld [vmem:[#allocation8 + $0x16] sm:$0xff] }
 0x80b   : > { %12762 = vmatpush3.bf16.msra.mxu0 %v13605_v28  ;;  %12773 = vmatprep.mubr.msk.bf16.mxu0 %vm545_vm15, %v10274_v26  ;;  %v13635_v28 = vld [vmem:[%s16977_s13 + $0x180] sm:$0xff]   ;;  %v13637_v26 = vld [vmem:[%s16977_s13 + $0x190] sm:$0xff]  }
 0x80c   : > { %12763 = vmatprep.subr.bf16.mxu0 %v13606_v9 }
 0x80f   : > { %12764 = vmatpush3.bf16.msra.mxu0 %v13606_v9  ;;  %v10829_v9 = vpack.c.bf16 %v10814_v45, %v16810_v57  ;;  %v13639_v57 = vld [vmem:[%s16977_s13 + $0x1a0] sm:$0xff]  }
 0x810   : > { %12765 = vmatprep.subr.bf16.mxu0 %v13607_v3 }
 0x813   : > { %12766 = vmatpush3.bf16.msra.mxu0 %v13607_v3  ;;  %v13638_v3 = vld [vmem:[%s16977_s13 + $0x198] sm:$0xff]  }
 0x814   : > { %12767 = vmatprep.subr.bf16.mxu0 %v13608_v37 }
 0x817   : > { %12768 = vmatpush3.bf16.msra.mxu0 %v13608_v37  ;;  %v13640_v37 = vld [vmem:[%s16977_s13 + $0x1a8] sm:$0xff]  }
 0x818   : > { %12769 = vmatprep.subr.bf16.mxu0 %v13609_v35 }
 0x81b   : > { %12770 = vmatpush3.bf16.msra.mxu0 %v13609_v35  ;;  %v10815_v35 = vld [vmem:[#allocation8 + $0x1e] sm:$0x3f] }
 0x81c   : > { %12771 = vmatprep.subr.bf16.mxu0 %v13610_v20 }
 0x81f   : > { %12772 = vmatpush3.bf16.msra.mxu0 %v13610_v20  ;;  %v10830_v20 = vpack.c.bf16 %v10815_v35, %v10815_v35 }
 0x820   : > { %12777 = vmatprep.subr.bf16.mxu0 %v13611_v8 }
 0x822   : > { %12774 = vmatmul.mubr.msk.bf16.vlgmr.msra.gmra.mrb[160].mxu0 %vm545_vm15, %v10275_v5 }
 0x823   : > { %12778 = vmatpush3.bf16.msra.mxu0 %v13611_v8  ;;  %12789 = vmatprep.mubr.msk.bf16.mxu0 %vm545_vm15, %v10385_v30 }
 0x824   : > { %12779 = vmatprep.subr.bf16.mxu0 %v13612_v56 }
 0x827   : > { %12780 = vmatpush3.bf16.msra.mxu0 %v13612_v56 }
 0x828   : > { %12781 = vmatprep.subr.bf16.mxu0 %v13613_v27 }
 0x82b   : > { %12782 = vmatpush3.bf16.msra.mxu0 %v13613_v27 }
 0x82c   : > { %12783 = vmatprep.subr.bf16.mxu0 %v13614_v38 }
 0x82f   : > { %12784 = vmatpush3.bf16.msra.mxu0 %v13614_v38 }
 0x830   : > { %12785 = vmatprep.subr.bf16.mxu0 %v13615_v24 }
 0x833   : > { %12786 = vmatpush3.bf16.msra.mxu0 %v13615_v24 }
 0x834   : > { %12787 = vmatprep.subr.bf16.mxu0 %v13616_v52 }
 0x837   : > { %12788 = vmatpush3.bf16.msra.mxu0 %v13616_v52 }
 0x838   : > { %12793 = vmatprep.subr.bf16.mxu0 %v13617_v60 }
 0x83a   : > { %v12603_v63 = vpop.f32.mrb[156].mxu0  ;;  %12790 = vmatmul.mubr.msk.bf16.vlgmr.msra.gmra.mrb[160].mxu0 %vm545_vm15, %v10386_v25 }
 0x83b   : > { %v9056_v17 = vmax.f32 %v12603_v63, 0.0  ;;  %v9037_v55 = vpop.f32.mrb[157].mxu0  ;;  %12794 = vmatpush3.bf16.msra.mxu0 %v13617_v60  ;;  %12805 = vmatprep.mubr.msk.bf16.mxu0 %vm545_vm15, %v10496_v21 }
 0x83c   : > { %v12604_v29 = vpop.f32.mrb[158].mxu0  ;;  %12795 = vmatprep.subr.bf16.mxu0 %v13618_v32  ;;  %v9054_v11 = vmax.f32 %v9037_v55, 0.0 }
 0x83d   : > { %v9040_v41 = vpop.f32.mrb[159].mxu0  ;;  %9064 = vrot.lane.b32.xlu1 %v9056_v17, %s13656_s23 }
 0x83e   : > { %v9055_v50 = vmax.f32 %v9040_v41, 0.0 }
 0x83f   : > { %12796 = vmatpush3.bf16.msra.mxu0 %v13618_v32 }
 0x840   : > { %9062 = vrot.lane.b32.xlu0 %v9055_v50, %s13656_s23  ;;  %12797 = vmatprep.subr.bf16.mxu0 %v13619_v51 }
 0x841   : > { %9060 = vrot.lane.b32.xlu1 %v9054_v11, %s13656_s23 }
 0x843   : > { %12798 = vmatpush3.bf16.msra.mxu0 %v13619_v51 }
 0x844   : > { %1817 = vperm.xlu0 %13115, %v1583_v44   ;;  %12799 = vmatprep.subr.bf16.mxu0 %v13620_v13 }
 0x845   : > { %1862 = vperm.xlu1 %13116, %v1592_v34  }
 0x847   : > { %12800 = vmatpush3.bf16.msra.mxu0 %v13620_v13 }
 0x848   : > { %12801 = vmatprep.subr.bf16.mxu0 %v13621_v58 }
 0x84b   : > { %12802 = vmatpush3.bf16.msra.mxu0 %v13621_v58 }
 0x84c   : > { %12803 = vmatprep.subr.bf16.mxu0 %v13622_v12 }
 0x84f   : > { %12804 = vmatpush3.bf16.msra.mxu0 %v13622_v12 }
 0x850   : > { %12809 = vmatprep.subr.bf16.mxu0 %v13623_v4 }
 0x852   : > { %12806 = vmatmul.mubr.msk.bf16.vlgmr.msra.gmra.mrb[160].mxu0 %vm545_vm15, %v10497_v54 }
 0x853   : > { %12810 = vmatpush3.bf16.msra.mxu0 %v13623_v4  ;;  %12821 = vmatprep.mubr.msk.bf16.mxu0 %vm545_vm15, %v10607_v59 }
 0x854   : > { %12811 = vmatprep.subr.bf16.mxu0 %v13624_v46 }
 0x857   : > { %12812 = vmatpush3.bf16.msra.mxu0 %v13624_v46 }
 0x858   : > { %12813 = vmatprep.subr.bf16.mxu0 %v13625_v2 }
 0x85b   : > { %12814 = vmatpush3.bf16.msra.mxu0 %v13625_v2 }
 0x85c   : > { %12815 = vmatprep.subr.bf16.mxu0 %v13626_v14 }
 0x85f   : > { %12816 = vmatpush3.bf16.msra.mxu0 %v13626_v14 }
 0x860   : > { %12817 = vmatprep.subr.bf16.mxu0 %v13627_v33 }
 0x863   : > { %12818 = vmatpush3.bf16.msra.mxu0 %v13627_v33 }
 0x864   : > { %12819 = vmatprep.subr.bf16.mxu0 %v13628_v6 }
 0x867   : > { %12820 = vmatpush3.bf16.msra.mxu0 %v13628_v6 }
 0x868   : > { %12825 = vmatprep.subr.bf16.mxu0 %v13629_v23 }
 0x86a   : > { %12822 = vmatmul.mubr.msk.bf16.vlgmr.msra.gmra.mrb[160].mxu0 %vm545_vm15, %v10608_v19 }
 0x86b   : > { %12826 = vmatpush3.bf16.msra.mxu0 %v13629_v23  ;;  %12837 = vmatprep.mubr.msk.bf16.mxu0 %vm545_vm15, %v10718_v36 }
 0x86c   : > { %12827 = vmatprep.subr.bf16.mxu0 %v13630_v16 }
 0x86f   : > { %12828 = vmatpush3.bf16.msra.mxu0 %v13630_v16 }
 0x870   : > { %12829 = vmatprep.subr.bf16.mxu0 %v13631_v48 }
 0x873   : > { %12830 = vmatpush3.bf16.msra.mxu0 %v13631_v48 }
 0x874   : > { %12831 = vmatprep.subr.bf16.mxu0 %v13632_v53 }
 0x877   : > { %12832 = vmatpush3.bf16.msra.mxu0 %v13632_v53 }
 0x878   : > { %12833 = vmatprep.subr.bf16.mxu0 %v13633_v22 }
 0x87b   : > { %12834 = vmatpush3.bf16.msra.mxu0 %v13633_v22 }
 0x87c   : > { %12835 = vmatprep.subr.bf16.mxu0 %v13634_v39 }
 0x87f   : > { %12836 = vmatpush3.bf16.msra.mxu0 %v13634_v39 }
 0x880   : > { %12841 = vmatprep.subr.bf16.mxu0 %v13635_v28 }
 0x882   : > { %12838 = vmatmul.mubr.msk.bf16.vlgmr.msra.gmra.mrb[160].mxu0 %vm545_vm15, %v10719_v62 }
 0x883   : > { %12842 = vmatpush3.bf16.msra.mxu0 %v13635_v28  ;;  %12853 = vmatprep.mubr.msk.bf16.mxu0 %vm545_vm15, %v10829_v9 }
 0x884   : > { %12843 = vmatprep.subr.bf16.mxu0 %v13636_v15 }
 0x887   : > { %12844 = vmatpush3.bf16.msra.mxu0 %v13636_v15 }
 0x888   : > { %12845 = vmatprep.subr.bf16.mxu0 %v13637_v26 }
 0x88b   : > { %12846 = vmatpush3.bf16.msra.mxu0 %v13637_v26 }
 0x88c   : > { %12847 = vmatprep.subr.bf16.mxu0 %v13638_v3 }
 0x88f   : > { %12848 = vmatpush3.bf16.msra.mxu0 %v13638_v3 }
 0x890   : > { %12849 = vmatprep.subr.bf16.mxu0 %v13639_v57 }
 0x893   : > { %12850 = vmatpush3.bf16.msra.mxu0 %v13639_v57 }
 0x894   : > { %12851 = vmatprep.subr.bf16.mxu0 %v13640_v37 }
 0x897   : > { %12852 = vmatpush3.bf16.msra.mxu0 %v13640_v37 }
 0x89a   : > { %12854 = vmatmul.mubr.msk.bf16.vlgmr.msra.gmra.mrb[160].mxu0 %vm545_vm15, %v10830_v20 }
 0x8af   : > { %v9065_v8 = vpop.permute.xlu1 %9064 }
 0x8b0   : > { %9073 = vst.msk [vmem:[#allocation9 + $0x20] sm:$0x3f] %vm9072_vm4, %v9065_v8 }
 0x8b2   : > { %v9063_v18 = vpop.permute.xlu0 %9062 }
 0x8b3   : > { %9071 = vst.msk [vmem:[#allocation9 + $0x10] sm:$0xff] %vm9069_vm5, %v9063_v18  ;;  %v9061_v10 = vpop.permute.xlu1 %9060 }
 0x8b4   : > { %9070 = vst.msk [vmem:[#allocation9] sm:$0xff] %vm9069_vm5, %v9061_v10 }
 0x8b7   : > { %v10962_v5 = vld [vmem:[#allocation9 + $0x20] sm:$0x3c] }
 0x8b8   : > { %v10966_v49 = vrot.slane %v10962_v5, 6 }
 0x8ba   : > { %10970 = vst [vmem:[%s16946_s24 + $0x10] sm:$0xf0] %v10966_v49  ;;  %v10936_v56 = vld [vmem:[#allocation9 + $0x10] sm:$0x3]  ;;  %v10952_v30 = vld [vmem:[#allocation9 + $0x10] sm:$0xf0] }
 0x8bb   : > { %v10943_v27 = vrot.slane %v10936_v56, 2  ;;  %v10956_v38 = vrot.slane %v10952_v30, 4  ;;  %v10930_v24 = vld [vmem:[#allocation9] sm:$0xf]  ;;  %v10934_v52 = vld [vmem:[#allocation9] sm:$0xc0] }
 0x8bc   : > { %10932 = vst [vmem:[%s16946_s24] sm:$0xf] %v10930_v24  ;;  %v10942_v60 = vrot.slane %v10934_v52, 2 }
 0x8bd   : > { %10960 = vst [vmem:[%s16946_s24 + $0x10] sm:$0xf] %v10956_v38 }
 0x8be   : > { %v10944_v47 = vsel %vm7558_vm14, %v10942_v60, %v10943_v27 }
 0x8bf   : > { %10950 = vst [vmem:[%s16946_s24] sm:$0xf0] %v10944_v47 }
 0x8c3   : > { %v1818_v43 = vpop.permute.xlu0 %1817 }
 0x8c4   : > { %v1863_v25 = vpop.permute.xlu1 %1862 }
 0x96d   : > { %v12855_v32 = vpop.f32.mrb[160].mxu0 }
 0x96e   : > { %v10926_v21 = vmax.f32 %v12855_v32, 0.0  ;;  %v10907_v63 = vpop.f32.mrb[161].mxu0 }
 0x96f   : > { %v10924_v17 = vmax.f32 %v10907_v63, 0.0  ;;  %v12856_v55 = vpop.f32.mrb[162].mxu0 }
 0x970   : > { %10929 = vst.msk [vmem:[#allocation9 + $0x28] sm:$0x3f] %vm9930_vm3, %v10926_v21  ;;  %v10910_v29 = vpop.f32.mrb[163].mxu0 }
 0x971   : > { %10927 = vst.msk [vmem:[#allocation9 + $0x8] sm:$0xff] %vm545_vm15, %v10924_v17  ;;  %v10925_v51 = vmax.f32 %v10910_v29, 0.0 }
 0x973   : > { %10928 = vst.msk [vmem:[#allocation9 + $0x18] sm:$0xff] %vm545_vm15, %v10925_v51 }
 0x977   : > { %v10963_v41 = vld [vmem:[#allocation9 + $0x28] sm:$0x3c] }
 0x978   : > { %v10967_v50 = vrot.slane %v10963_v41, 6  ;;  %v10931_v11 = vld [vmem:[#allocation9 + $0x8] sm:$0xf]  ;;  %v10935_v13 = vld [vmem:[#allocation9 + $0x8] sm:$0xc0] }
 0x979   : > { %10933 = vst [vmem:[%s16946_s24 + $0x8] sm:$0xf] %v10931_v11  ;;  %v10945_v58 = vrot.slane %v10935_v13, 2 }
 0x97a   : > { %10971 = vst [vmem:[%s16946_s24 + $0x18] sm:$0xf0] %v10967_v50  ;;  %v10937_v44 = vld [vmem:[#allocation9 + $0x18] sm:$0x3]  ;;  %v10953_v34 = vld [vmem:[#allocation9 + $0x18] sm:$0xf0] }
 0x97b   : > { %v10946_v12 = vrot.slane %v10937_v44, 2  ;;  %v10957_v4 = vrot.slane %v10953_v34, 4 }
 0x97d   : > { %v10947_v40 = vsel %vm7558_vm14, %v10945_v58, %v10946_v12  ;;  %10961 = vst [vmem:[%s16946_s24 + $0x18] sm:$0xf] %v10957_v4 }
 0x97e   : > { %10951 = vst [vmem:[%s16946_s24 + $0x8] sm:$0xf0] %v10947_v40 }
 0x97f PF: > { %s24_s29 = sadd.s32 1, %s13651_s29  }
 0x980   : > { %p21_p4 = scmp.ge.s32.totalorder %s24_s29, 4  }
 0x982   :  { %23 = sbr.rel (!%p21_p4) target bundleno = 1 (0x1), region = 138 }

</bundles_post_ra>
